<compile_context>
chip_gen: v7x
topology: tpu7x:2x2x1
jax: 0.10.0
libtpu: 0.0.40
codegen_flags: <defaults>
</compile_context>

<pallas_src>
import jax
import jax.numpy as jnp
from jax.experimental import pallas as pl
from jax.experimental.pallas import tpu as pltpu

HIDDEN = 120
N_CAT = 5005
N_IDX = 100

H_PAD = 128                  # 120  -> 128
CAT_PAD = 5120               # 5004 / 5005 -> 5120 (40 * 128)
IDX_PAD = 128                # 100  -> 128
FUSED_OUT = CAT_PAD + IDX_PAD  # 5248 (41 * 128)


def _prelu(x, alpha):
    return jnp.where(x >= 0, x, alpha * x)


def _masked_softmax(x, valid):
    """Softmax over the first `valid` lanes of x; padded lanes produce 0."""
    col = jax.lax.broadcasted_iota(jnp.int32, x.shape, 1)
    xm = jnp.where(col < valid, x, -1e30)
    m = jnp.max(xm, axis=-1, keepdims=True)
    e = jnp.exp(xm - m)
    s = jnp.sum(e, axis=-1, keepdims=True)
    # Exact reciprocal: the approx EUP rcp (~1e-3 rel error) made row sums
    # deviate beyond tolerance.  One exact rcp per row is essentially free.
    return e * pl.reciprocal(s, approx=False)


def coachnet1_kernel(
    noise_ref,
    w1t_ref, b1t_ref, a1_ref,
    w1f_ref, b1c_ref, w1ib_ref, b1i_ref,
    w2ta_ref, w2tb_ref, b2t_ref, a2_ref,
    w2f_ref, b2c_ref, w2ib_ref, b2i_ref,
    o1c_ref, o1i_ref, o2c_ref, o2i_ref,
):
    f32 = jnp.float32
    bf16 = jnp.bfloat16

    noise = noise_ref[...]                 # [B, 1] f32
    alpha1 = a1_ref[0, 0]                  # SMEM scalars
    alpha2 = a2_ref[0, 0]

    # net1_trunk: Linear(1, H) -> Dropout(id) -> PReLU  (in_features=1 => scale+bias)
    trunk1 = _prelu(noise * w1t_ref[...] + b1t_ref[...], alpha1)      # [B, H_PAD] f32
    trunk1_b = trunk1.astype(bf16)

    # Fused (net1_cat | trunk-part of net1_idx): one MXU pass over shared LHS.
    fused1 = jnp.dot(trunk1_b, w1f_ref[...],
                     preferred_element_type=f32)                      # [B, 5248] f32
    net1_cat = fused1[:, :CAT_PAD] + b1c_ref[...]                     # [B, 5120]
    net1_cat_b = net1_cat.astype(bf16)
    net1_idx = (fused1[:, CAT_PAD:]
                + jnp.dot(net1_cat_b, w1ib_ref[...], preferred_element_type=f32)
                + b1i_ref[...])                                       # [B, 128]

    # net2_trunk: Linear(cat([net1_cat, net1_idx])) -> PReLU (split weights)
    trunk2 = _prelu(
        jnp.dot(net1_cat_b, w2ta_ref[...], preferred_element_type=f32)
        + jnp.dot(net1_idx.astype(bf16), w2tb_ref[...], preferred_element_type=f32)
        + b2t_ref[...],
        alpha2)                                                       # [B, H_PAD]
    trunk2_b = trunk2.astype(bf16)

    # Fused (net2_cat | trunk-part of net2_idx)
    fused2 = jnp.dot(trunk2_b, w2f_ref[...],
                     preferred_element_type=f32)                      # [B, 5248]
    net2_cat = fused2[:, :CAT_PAD] + b2c_ref[...]                     # [B, 5120]
    net2_cat_b = net2_cat.astype(bf16)
    net2_idx = (fused2[:, CAT_PAD:]
                + jnp.dot(net2_cat_b, w2ib_ref[...], preferred_element_type=f32)
                + b2i_ref[...])                                       # [B, 128]

    o1c_ref[...] = _masked_softmax(net1_cat, N_CAT - 1)
    o1i_ref[...] = _masked_softmax(net1_idx, N_IDX)
    o2c_ref[...] = _masked_softmax(net2_cat, N_CAT)
    o2i_ref[...] = _masked_softmax(net2_idx, N_IDX)


def init_params(key, hidden=HIDDEN):
    """Torch-style Linear init at true shapes, then pad to 128-multiples.

    Weights stored as [in, out]; padded rows/cols and biases are zero so padded
    activation lanes are exactly zero.  Large weights are cast to bfloat16.
    """
    def linear(k, fan_in, fan_out):
        k1, k2 = jax.random.split(k)
        bound = 1.0 / float(fan_in) ** 0.5
        w = jax.random.uniform(k1, (fan_in, fan_out), jnp.float32, -bound, bound)
        b = jax.random.uniform(k2, (1, fan_out), jnp.float32, -bound, bound)
        return w, b

    def pad(x, rows, cols):
        r, c = x.shape
        return jnp.pad(x, ((0, rows - r), (0, cols - c)))

    ks = jax.random.split(key, 6)
    w1t, b1t = linear(ks[0], 1, hidden)                          # net1_trunk
    w1c, b1c = linear(ks[1], hidden, N_CAT - 1)                  # net1_cat
    w1i, b1i = linear(ks[2], hidden + N_CAT - 1, N_IDX)          # net1_idx
    w2t, b2t = linear(ks[3], (N_CAT - 1) + N_IDX, hidden)        # net2_trunk
    w2c, b2c = linear(ks[4], hidden, N_CAT)                      # net2_cat
    w2i, b2i = linear(ks[5], hidden + N_CAT, N_IDX)              # net2_idx

    bf16 = jnp.bfloat16

    # Split concatenated-input weights along the input (row) dimension.
    w1ia, w1ib = w1i[:hidden], w1i[hidden:]                      # [trunk1 | net1_cat]
    w2ta, w2tb = w2t[:N_CAT - 1], w2t[N_CAT - 1:]                # [net1_cat | net1_idx]
    w2ia, w2ib = w2i[:hidden], w2i[hidden:]                      # [trunk2 | net2_cat]

    # Tiny trunk1 params stay f32.
    w1t_p = pad(w1t, 1, H_PAD)
    b1t_p = pad(b1t, 1, H_PAD)

    # Fused shared-LHS weights: [w_cat | w_idx_trunk_part] -> [H_PAD, 5248] bf16.
    w1f = jnp.concatenate(
        [pad(w1c, H_PAD, CAT_PAD), pad(w1ia, H_PAD, IDX_PAD)], axis=1).astype(bf16)
    w2f = jnp.concatenate(
        [pad(w2c, H_PAD, CAT_PAD), pad(w2ia, H_PAD, IDX_PAD)], axis=1).astype(bf16)

    w1ib_p = pad(w1ib, CAT_PAD, IDX_PAD).astype(bf16)            # [5120, 128]
    w2ta_p = pad(w2ta, CAT_PAD, H_PAD).astype(bf16)              # [5120, 128]
    w2tb_p = pad(w2tb, IDX_PAD, H_PAD).astype(bf16)              # [128, 128]
    w2ib_p = pad(w2ib, CAT_PAD, IDX_PAD).astype(bf16)            # [5120, 128]

    b1c_p = pad(b1c, 1, CAT_PAD)
    b1i_p = pad(b1i, 1, IDX_PAD)
    b2t_p = pad(b2t, 1, H_PAD)
    b2c_p = pad(b2c, 1, CAT_PAD)
    b2i_p = pad(b2i, 1, IDX_PAD)

    a1 = jnp.full((1, 1), 0.25, jnp.float32)                     # PReLU alphas
    a2 = jnp.full((1, 1), 0.25, jnp.float32)

    return (w1t_p, b1t_p, a1,
            w1f, b1c_p, w1ib_p, b1i_p,
            w2ta_p, w2tb_p, b2t_p, a2,
            w2f, b2c_p, w2ib_p, b2i_p)


@jax.jit
def coachnet1_forward(noise, params):
    batch = noise.shape[0]
    args = (noise,) + tuple(params)

    vmem = pl.BlockSpec(memory_space=pltpu.MemorySpace.VMEM)
    smem = pl.BlockSpec(memory_space=pltpu.MemorySpace.SMEM)
    in_specs = [vmem] * len(args)
    in_specs[3] = smem    # a1 (PReLU alpha) -> SMEM scalar
    in_specs[11] = smem   # a2 (PReLU alpha) -> SMEM scalar

    out_shapes = (
        jax.ShapeDtypeStruct((batch, CAT_PAD), jnp.float32),
        jax.ShapeDtypeStruct((batch, IDX_PAD), jnp.float32),
        jax.ShapeDtypeStruct((batch, CAT_PAD), jnp.float32),
        jax.ShapeDtypeStruct((batch, IDX_PAD), jnp.float32),
    )
    o1c, o1i, o2c, o2i = pl.pallas_call(
        coachnet1_kernel,
        out_shape=out_shapes,
        in_specs=in_specs,
        out_specs=tuple([vmem] * 4),
        compiler_params=pltpu.CompilerParams(vmem_limit_bytes=32 * 1024 * 1024),
    )(*args)

    # Slice padded lanes away outside the kernel (stores inside stay lane-dense).
    return (o1c[:, :N_CAT - 1], o1i[:, :N_IDX],
            o2c[:, :N_CAT], o2i[:, :N_IDX])


if __name__ == "__main__":
    key = jax.random.PRNGKey(0)
    k_noise, k_params = jax.random.split(key)

    batch_size = 8
    # In the torch module the "input" is just torch.rand([batch_size, 1]);
    # generate it deterministically here and feed it to the kernel.
    noise = jax.random.uniform(k_noise, (batch_size, 1), jnp.float32)
    params = init_params(k_params)

    outs = coachnet1_forward(noise, params)
    outs = jax.block_until_ready(outs)

    # Sanity checks: correct (unpadded) shapes, finite values, softmax rows sum to 1.
    expected_shapes = [(batch_size, N_CAT - 1), (batch_size, N_IDX),
                       (batch_size, N_CAT), (batch_size, N_IDX)]
    for o, s in zip(outs, expected_shapes):
        assert o.shape == s, (o.shape, s)
        assert bool(jnp.all(jnp.isfinite(o)))
        assert bool(jnp.all(o >= 0.0))
        row_sums = jnp.sum(o, axis=-1)
        assert bool(jnp.all(jnp.abs(row_sums - 1.0) < 2e-3)), row_sums

    print("KERNEL_OK")
</pallas_src>

<mosaic_0001>
module attributes {stable_mosaic.version = 11 : i64} {
  func.func @coachnet1_kernel(%arg0: memref<8x1xf32, #tpu.memory_space<vmem>>, %arg1: memref<1x128xf32, #tpu.memory_space<vmem>>, %arg2: memref<1x128xf32, #tpu.memory_space<vmem>>, %arg3: memref<1x1xf32, #tpu.memory_space<smem>>, %arg4: memref<128x5248xbf16, #tpu.memory_space<vmem>>, %arg5: memref<1x5120xf32, #tpu.memory_space<vmem>>, %arg6: memref<5120x128xbf16, #tpu.memory_space<vmem>>, %arg7: memref<1x128xf32, #tpu.memory_space<vmem>>, %arg8: memref<5120x128xbf16, #tpu.memory_space<vmem>>, %arg9: memref<128x128xbf16, #tpu.memory_space<vmem>>, %arg10: memref<1x128xf32, #tpu.memory_space<vmem>>, %arg11: memref<1x1xf32, #tpu.memory_space<smem>>, %arg12: memref<128x5248xbf16, #tpu.memory_space<vmem>>, %arg13: memref<1x5120xf32, #tpu.memory_space<vmem>>, %arg14: memref<5120x128xbf16, #tpu.memory_space<vmem>>, %arg15: memref<1x128xf32, #tpu.memory_space<vmem>>, %arg16: memref<8x5120xf32, #tpu.memory_space<vmem>>, %arg17: memref<8x128xf32, #tpu.memory_space<vmem>>, %arg18: memref<8x5120xf32, #tpu.memory_space<vmem>>, %arg19: memref<8x128xf32, #tpu.memory_space<vmem>>) attributes {dimension_semantics = [], scalar_prefetch = 0 : i64, scratch_operands = 0 : i64, tpu.core_type = #tpu.core_type<tc>} {
    %c0 = arith.constant 0 : index
    %c0_0 = arith.constant 0 : index
    %0 = vector.load %arg0[%c0, %c0_0] : memref<8x1xf32, #tpu.memory_space<vmem>>, vector<8x1xf32>
    %c0_1 = arith.constant 0 : index
    %c0_2 = arith.constant 0 : index
    %1 = memref.load %arg3[%c0_1, %c0_2] : memref<1x1xf32, #tpu.memory_space<smem>>
    %c0_3 = arith.constant 0 : index
    %c0_4 = arith.constant 0 : index
    %2 = memref.load %arg11[%c0_3, %c0_4] : memref<1x1xf32, #tpu.memory_space<smem>>
    %c0_5 = arith.constant 0 : index
    %c0_6 = arith.constant 0 : index
    %3 = vector.load %arg1[%c0_5, %c0_6] : memref<1x128xf32, #tpu.memory_space<vmem>>, vector<1x128xf32>
    %4 = vector.broadcast %0 : vector<8x1xf32> to vector<8x128xf32>
    %5 = vector.broadcast %3 : vector<1x128xf32> to vector<8x128xf32>
    %6 = arith.mulf %4, %5 : vector<8x128xf32>
    %c0_7 = arith.constant 0 : index
    %c0_8 = arith.constant 0 : index
    %7 = vector.load %arg2[%c0_7, %c0_8] : memref<1x128xf32, #tpu.memory_space<vmem>>, vector<1x128xf32>
    %8 = vector.broadcast %7 : vector<1x128xf32> to vector<8x128xf32>
    %9 = arith.addf %6, %8 : vector<8x128xf32>
    %cst = arith.constant 0.000000e+00 : f32
    %10 = vector.broadcast %cst : f32 to vector<8x128xf32>
    %11 = arith.cmpf oge, %9, %10 : vector<8x128xf32>
    %12 = vector.broadcast %1 : f32 to vector<8x128xf32>
    %13 = arith.mulf %12, %9 : vector<8x128xf32>
    %14 = arith.select %11, %9, %13 : vector<8x128xi1>, vector<8x128xf32>
    %15 = arith.truncf %14 : vector<8x128xf32> to vector<8x128xbf16>
    %c0_9 = arith.constant 0 : index
    %c0_10 = arith.constant 0 : index
    %16 = vector.load %arg4[%c0_9, %c0_10] : memref<128x5248xbf16, #tpu.memory_space<vmem>>, vector<128x5248xbf16>
    %cst_11 = arith.constant dense<0.000000e+00> : vector<8x5248xf32>
    %17 = tpu.matmul %15, %16, %cst_11 {dimension_numbers = #tpu.dot_dimension_numbers<[1], [0], [0], [1], [0, 0, 1, 1], [], []>} : vector<8x128xbf16>, vector<128x5248xbf16>, vector<8x5248xf32> -> vector<8x5248xf32>
    %18 = vector.extract_strided_slice %17 {offsets = [0, 0], sizes = [8, 5120], strides = [1, 1]} : vector<8x5248xf32> to vector<8x5120xf32>
    %c0_12 = arith.constant 0 : index
    %c0_13 = arith.constant 0 : index
    %19 = vector.load %arg5[%c0_12, %c0_13] : memref<1x5120xf32, #tpu.memory_space<vmem>>, vector<1x5120xf32>
    %20 = vector.broadcast %19 : vector<1x5120xf32> to vector<8x5120xf32>
    %21 = arith.addf %18, %20 : vector<8x5120xf32>
    %22 = arith.truncf %21 : vector<8x5120xf32> to vector<8x5120xbf16>
    %23 = vector.extract_strided_slice %17 {offsets = [0, 5120], sizes = [8, 128], strides = [1, 1]} : vector<8x5248xf32> to vector<8x128xf32>
    %c0_14 = arith.constant 0 : index
    %c0_15 = arith.constant 0 : index
    %24 = vector.load %arg6[%c0_14, %c0_15] : memref<5120x128xbf16, #tpu.memory_space<vmem>>, vector<5120x128xbf16>
    %cst_16 = arith.constant dense<0.000000e+00> : vector<8x128xf32>
    %25 = tpu.matmul %22, %24, %cst_16 {dimension_numbers = #tpu.dot_dimension_numbers<[1], [0], [0], [1], [0, 0, 1, 1], [], []>} : vector<8x5120xbf16>, vector<5120x128xbf16>, vector<8x128xf32> -> vector<8x128xf32>
    %26 = arith.addf %23, %25 : vector<8x128xf32>
    %c0_17 = arith.constant 0 : index
    %c0_18 = arith.constant 0 : index
    %27 = vector.load %arg7[%c0_17, %c0_18] : memref<1x128xf32, #tpu.memory_space<vmem>>, vector<1x128xf32>
    %28 = vector.broadcast %27 : vector<1x128xf32> to vector<8x128xf32>
    %29 = arith.addf %26, %28 : vector<8x128xf32>
    %c0_19 = arith.constant 0 : index
    %c0_20 = arith.constant 0 : index
    %30 = vector.load %arg8[%c0_19, %c0_20] : memref<5120x128xbf16, #tpu.memory_space<vmem>>, vector<5120x128xbf16>
    %cst_21 = arith.constant dense<0.000000e+00> : vector<8x128xf32>
    %31 = tpu.matmul %22, %30, %cst_21 {dimension_numbers = #tpu.dot_dimension_numbers<[1], [0], [0], [1], [0, 0, 1, 1], [], []>} : vector<8x5120xbf16>, vector<5120x128xbf16>, vector<8x128xf32> -> vector<8x128xf32>
    %32 = arith.truncf %29 : vector<8x128xf32> to vector<8x128xbf16>
    %c0_22 = arith.constant 0 : index
    %c0_23 = arith.constant 0 : index
    %33 = vector.load %arg9[%c0_22, %c0_23] : memref<128x128xbf16, #tpu.memory_space<vmem>>, vector<128x128xbf16>
    %cst_24 = arith.constant dense<0.000000e+00> : vector<8x128xf32>
    %34 = tpu.matmul %32, %33, %cst_24 {dimension_numbers = #tpu.dot_dimension_numbers<[1], [0], [0], [1], [0, 0, 1, 1], [], []>} : vector<8x128xbf16>, vector<128x128xbf16>, vector<8x128xf32> -> vector<8x128xf32>
    %35 = arith.addf %31, %34 : vector<8x128xf32>
    %c0_25 = arith.constant 0 : index
    %c0_26 = arith.constant 0 : index
    %36 = vector.load %arg10[%c0_25, %c0_26] : memref<1x128xf32, #tpu.memory_space<vmem>>, vector<1x128xf32>
    %37 = vector.broadcast %36 : vector<1x128xf32> to vector<8x128xf32>
    %38 = arith.addf %35, %37 : vector<8x128xf32>
    %cst_27 = arith.constant 0.000000e+00 : f32
    %39 = vector.broadcast %cst_27 : f32 to vector<8x128xf32>
    %40 = arith.cmpf oge, %38, %39 : vector<8x128xf32>
    %41 = vector.broadcast %2 : f32 to vector<8x128xf32>
    %42 = arith.mulf %41, %38 : vector<8x128xf32>
    %43 = arith.select %40, %38, %42 : vector<8x128xi1>, vector<8x128xf32>
    %44 = arith.truncf %43 : vector<8x128xf32> to vector<8x128xbf16>
    %c0_28 = arith.constant 0 : index
    %c0_29 = arith.constant 0 : index
    %45 = vector.load %arg12[%c0_28, %c0_29] : memref<128x5248xbf16, #tpu.memory_space<vmem>>, vector<128x5248xbf16>
    %cst_30 = arith.constant dense<0.000000e+00> : vector<8x5248xf32>
    %46 = tpu.matmul %44, %45, %cst_30 {dimension_numbers = #tpu.dot_dimension_numbers<[1], [0], [0], [1], [0, 0, 1, 1], [], []>} : vector<8x128xbf16>, vector<128x5248xbf16>, vector<8x5248xf32> -> vector<8x5248xf32>
    %47 = vector.extract_strided_slice %46 {offsets = [0, 0], sizes = [8, 5120], strides = [1, 1]} : vector<8x5248xf32> to vector<8x5120xf32>
    %c0_31 = arith.constant 0 : index
    %c0_32 = arith.constant 0 : index
    %48 = vector.load %arg13[%c0_31, %c0_32] : memref<1x5120xf32, #tpu.memory_space<vmem>>, vector<1x5120xf32>
    %49 = vector.broadcast %48 : vector<1x5120xf32> to vector<8x5120xf32>
    %50 = arith.addf %47, %49 : vector<8x5120xf32>
    %51 = arith.truncf %50 : vector<8x5120xf32> to vector<8x5120xbf16>
    %52 = vector.extract_strided_slice %46 {offsets = [0, 5120], sizes = [8, 128], strides = [1, 1]} : vector<8x5248xf32> to vector<8x128xf32>
    %c0_33 = arith.constant 0 : index
    %c0_34 = arith.constant 0 : index
    %53 = vector.load %arg14[%c0_33, %c0_34] : memref<5120x128xbf16, #tpu.memory_space<vmem>>, vector<5120x128xbf16>
    %cst_35 = arith.constant dense<0.000000e+00> : vector<8x128xf32>
    %54 = tpu.matmul %51, %53, %cst_35 {dimension_numbers = #tpu.dot_dimension_numbers<[1], [0], [0], [1], [0, 0, 1, 1], [], []>} : vector<8x5120xbf16>, vector<5120x128xbf16>, vector<8x128xf32> -> vector<8x128xf32>
    %55 = arith.addf %52, %54 : vector<8x128xf32>
    %c0_36 = arith.constant 0 : index
    %c0_37 = arith.constant 0 : index
    %56 = vector.load %arg15[%c0_36, %c0_37] : memref<1x128xf32, #tpu.memory_space<vmem>>, vector<1x128xf32>
    %57 = vector.broadcast %56 : vector<1x128xf32> to vector<8x128xf32>
    %58 = arith.addf %55, %57 : vector<8x128xf32>
    %59 = tpu.iota {dimensions = array<i32: 1>} : vector<8x5120xi32>
    %c5004_i32 = arith.constant 5004 : i32
    %60 = vector.broadcast %c5004_i32 : i32 to vector<8x5120xi32>
    %61 = arith.cmpi slt, %59, %60 : vector<8x5120xi32>
    %cst_38 = arith.constant -1.000000e+30 : f32
    %62 = vector.broadcast %cst_38 : f32 to vector<8x5120xf32>
    %63 = arith.select %61, %21, %62 : vector<8x5120xi1>, vector<8x5120xf32>
    %cst_39 = arith.constant dense<0xFF800000> : vector<8xf32>
    %64 = vector.multi_reduction <maximumf>, %63, %cst_39 [1] : vector<8x5120xf32> to vector<8xf32>
    %65 = vector.shape_cast %64 : vector<8xf32> to vector<8x1xf32>
    %66 = vector.broadcast %65 : vector<8x1xf32> to vector<8x5120xf32>
    %67 = arith.subf %63, %66 : vector<8x5120xf32>
    %68 = math.exp %67 : vector<8x5120xf32>
    %cst_40 = arith.constant dense<0.000000e+00> : vector<8xf32>
    %69 = vector.multi_reduction <add>, %68, %cst_40 [1] : vector<8x5120xf32> to vector<8xf32>
    %70 = vector.shape_cast %69 : vector<8xf32> to vector<8x1xf32>
    %71 = tpu.reciprocal %70 : vector<8x1xf32> -> vector<8x1xf32>
    %72 = vector.broadcast %71 : vector<8x1xf32> to vector<8x5120xf32>
    %73 = arith.mulf %68, %72 : vector<8x5120xf32>
    %c0_41 = arith.constant 0 : index
    %c0_42 = arith.constant 0 : index
    %74 = vector.load %arg16[%c0_41, %c0_42] : memref<8x5120xf32, #tpu.memory_space<vmem>>, vector<8x5120xf32>
    tpu.vector_store %arg16[%c0_41, %c0_42], %73 {strides = array<i32>} : memref<8x5120xf32, #tpu.memory_space<vmem>>, vector<8x5120xf32>,
    %75 = tpu.iota {dimensions = array<i32: 1>} : vector<8x128xi32>
    %c100_i32 = arith.constant 100 : i32
    %76 = vector.broadcast %c100_i32 : i32 to vector<8x128xi32>
    %77 = arith.cmpi slt, %75, %76 : vector<8x128xi32>
    %cst_43 = arith.constant -1.000000e+30 : f32
    %78 = vector.broadcast %cst_43 : f32 to vector<8x128xf32>
    %79 = arith.select %77, %29, %78 : vector<8x128xi1>, vector<8x128xf32>
    %cst_44 = arith.constant dense<0xFF800000> : vector<8xf32>
    %80 = vector.multi_reduction <maximumf>, %79, %cst_44 [1] : vector<8x128xf32> to vector<8xf32>
    %81 = vector.shape_cast %80 : vector<8xf32> to vector<8x1xf32>
    %82 = vector.broadcast %81 : vector<8x1xf32> to vector<8x128xf32>
    %83 = arith.subf %79, %82 : vector<8x128xf32>
    %84 = math.exp %83 : vector<8x128xf32>
    %cst_45 = arith.constant dense<0.000000e+00> : vector<8xf32>
    %85 = vector.multi_reduction <add>, %84, %cst_45 [1] : vector<8x128xf32> to vector<8xf32>
    %86 = vector.shape_cast %85 : vector<8xf32> to vector<8x1xf32>
    %87 = tpu.reciprocal %86 : vector<8x1xf32> -> vector<8x1xf32>
    %88 = vector.broadcast %87 : vector<8x1xf32> to vector<8x128xf32>
    %89 = arith.mulf %84, %88 : vector<8x128xf32>
    %c0_46 = arith.constant 0 : index
    %c0_47 = arith.constant 0 : index
    %90 = vector.load %arg17[%c0_46, %c0_47] : memref<8x128xf32, #tpu.memory_space<vmem>>, vector<8x128xf32>
    tpu.vector_store %arg17[%c0_46, %c0_47], %89 {strides = array<i32>} : memref<8x128xf32, #tpu.memory_space<vmem>>, vector<8x128xf32>,
    %91 = tpu.iota {dimensions = array<i32: 1>} : vector<8x5120xi32>
    %c5005_i32 = arith.constant 5005 : i32
    %92 = vector.broadcast %c5005_i32 : i32 to vector<8x5120xi32>
    %93 = arith.cmpi slt, %91, %92 : vector<8x5120xi32>
    %cst_48 = arith.constant -1.000000e+30 : f32
    %94 = vector.broadcast %cst_48 : f32 to vector<8x5120xf32>
    %95 = arith.select %93, %50, %94 : vector<8x5120xi1>, vector<8x5120xf32>
    %cst_49 = arith.constant dense<0xFF800000> : vector<8xf32>
    %96 = vector.multi_reduction <maximumf>, %95, %cst_49 [1] : vector<8x5120xf32> to vector<8xf32>
    %97 = vector.shape_cast %96 : vector<8xf32> to vector<8x1xf32>
    %98 = vector.broadcast %97 : vector<8x1xf32> to vector<8x5120xf32>
    %99 = arith.subf %95, %98 : vector<8x5120xf32>
    %100 = math.exp %99 : vector<8x5120xf32>
    %cst_50 = arith.constant dense<0.000000e+00> : vector<8xf32>
    %101 = vector.multi_reduction <add>, %100, %cst_50 [1] : vector<8x5120xf32> to vector<8xf32>
    %102 = vector.shape_cast %101 : vector<8xf32> to vector<8x1xf32>
    %103 = tpu.reciprocal %102 : vector<8x1xf32> -> vector<8x1xf32>
    %104 = vector.broadcast %103 : vector<8x1xf32> to vector<8x5120xf32>
    %105 = arith.mulf %100, %104 : vector<8x5120xf32>
    %c0_51 = arith.constant 0 : index
    %c0_52 = arith.constant 0 : index
    %106 = vector.load %arg18[%c0_51, %c0_52] : memref<8x5120xf32, #tpu.memory_space<vmem>>, vector<8x5120xf32>
    tpu.vector_store %arg18[%c0_51, %c0_52], %105 {strides = array<i32>} : memref<8x5120xf32, #tpu.memory_space<vmem>>, vector<8x5120xf32>,
    %107 = tpu.iota {dimensions = array<i32: 1>} : vector<8x128xi32>
    %c100_i32_53 = arith.constant 100 : i32
    %108 = vector.broadcast %c100_i32_53 : i32 to vector<8x128xi32>
    %109 = arith.cmpi slt, %107, %108 : vector<8x128xi32>
    %cst_54 = arith.constant -1.000000e+30 : f32
    %110 = vector.broadcast %cst_54 : f32 to vector<8x128xf32>
    %111 = arith.select %109, %58, %110 : vector<8x128xi1>, vector<8x128xf32>
    %cst_55 = arith.constant dense<0xFF800000> : vector<8xf32>
    %112 = vector.multi_reduction <maximumf>, %111, %cst_55 [1] : vector<8x128xf32> to vector<8xf32>
    %113 = vector.shape_cast %112 : vector<8xf32> to vector<8x1xf32>
    %114 = vector.broadcast %113 : vector<8x1xf32> to vector<8x128xf32>
    %115 = arith.subf %111, %114 : vector<8x128xf32>
    %116 = math.exp %115 : vector<8x128xf32>
    %cst_56 = arith.constant dense<0.000000e+00> : vector<8xf32>
    %117 = vector.multi_reduction <add>, %116, %cst_56 [1] : vector<8x128xf32> to vector<8xf32>
    %118 = vector.shape_cast %117 : vector<8xf32> to vector<8x1xf32>
    %119 = tpu.reciprocal %118 : vector<8x1xf32> -> vector<8x1xf32>
    %120 = vector.broadcast %119 : vector<8x1xf32> to vector<8x128xf32>
    %121 = arith.mulf %116, %120 : vector<8x128xf32>
    %c0_57 = arith.constant 0 : index
    %c0_58 = arith.constant 0 : index
    %122 = vector.load %arg19[%c0_57, %c0_58] : memref<8x128xf32, #tpu.memory_space<vmem>>, vector<8x128xf32>
    tpu.vector_store %arg19[%c0_57, %c0_58], %121 {strides = array<i32>} : memref<8x128xf32, #tpu.memory_space<vmem>>, vector<8x128xf32>,
    return
  }
}

</mosaic_0001>

<bundles_post_ra>
// kernel: coachnet1_forward.1
= control target key start
LH: loop header
LB: loop body
LE: loop exit
PB: predicated region body
PF: predicated region fallthrough
CT: control target
= control target key end

     0   :  { %s25289_s0 = inlined_call_operand.vmem [shape: f32[8,1], index: 0, kind: input, shape index: {}]   ;;  %s25290_s1 = inlined_call_operand.hbm [shape: f32[1,128], index: 1, kind: input, shape index: {}]   ;;  %s25291_s2 = inlined_call_operand.hbm [shape: f32[1,128], index: 2, kind: input, shape index: {}]   ;;  %s25292_s3 = inlined_call_operand.<no memory space> [shape: f32[1,1], index: 3, kind: input, shape index: {}]   ;;  %s25293_s4 = inlined_call_operand.hbm [shape: bf16[128,5248], index: 4, kind: input, shape index: {}]   ;;  %s25294_s5 = inlined_call_operand.hbm [shape: f32[1,5120], index: 5, kind: input, shape index: {}]   ;;  %s25295_s6 = inlined_call_operand.hbm [shape: bf16[5120,128], index: 6, kind: input, shape index: {}]   ;;  %s25296_s7 = inlined_call_operand.hbm [shape: f32[1,128], index: 7, kind: input, shape index: {}]   ;;  %s25297_s8 = inlined_call_operand.hbm [shape: bf16[5120,128], index: 8, kind: input, shape index: {}]   ;;  %s25298_s9 = inlined_call_operand.hbm [shape: bf16[128,128], index: 9, kind: input, shape index: {}]   ;;  %s25299_s10 = inlined_call_operand.hbm [shape: f32[1,128], index: 10, kind: input, shape index: {}]   ;;  %s25300_s11 = inlined_call_operand.<no memory space> [shape: f32[1,1], index: 11, kind: input, shape index: {}]   ;;  %s25301_s12 = inlined_call_operand.hbm [shape: bf16[128,5248], index: 12, kind: input, shape index: {}]   ;;  %s25302_s13 = inlined_call_operand.hbm [shape: f32[1,5120], index: 13, kind: input, shape index: {}]   ;;  %s25303_s14 = inlined_call_operand.hbm [shape: bf16[5120,128], index: 14, kind: input, shape index: {}]   ;;  %s25304_s15 = inlined_call_operand.hbm [shape: f32[1,128], index: 15, kind: input, shape index: {}]   ;;  %s25305_s16 = inlined_call_operand.hbm [shape: f32[8,5120], index: 16, kind: output, shape index: {0}]   ;;  %s25306_s17 = inlined_call_operand.hbm [shape: f32[8,128], index: 17, kind: output, shape index: {1}]   ;;  %s25307_s18 = inlined_call_operand.hbm [shape: f32[8,5120], index: 18, kind: output, shape index: {2}]   ;;  %s25308_s19 = inlined_call_operand.hbm [shape: f32[8,128], index: 19, kind: output, shape index: {3}]  }
   0x1   :  { %25407 = sst [smem:[#allocation92_spill]] %s25289_s0 }
   0x2   :  { %25408 = sst [smem:[#allocation93_spill]] %s25290_s1 }
   0x3   :  { %25409 = sst [smem:[#allocation94_spill]] %s25291_s2 }
   0x4   :  { %25410 = sst [smem:[#allocation95_spill]] %s25292_s3 }
   0x5   :  { %27 = vsyncpa [#allocation5], 0 }
   0x6   :  { %28 = vsyncpa [#allocation8], 0 }
   0x7   :  { %29 = vsyncpa [#allocation11], 0 }
   0x8   :  { %30 = vsyncpa [#allocation14], 0 }
   0x9   :  { %31 = vsyncpa [#allocation17], 0 }
   0xa   :  { %32 = vsyncpa [#allocation20], 0 }
   0xb   :  { %33 = vsyncpa [#allocation23], 0 }
   0xc   :  { %34 = vsyncpa [#allocation6], 0 }
   0xd   :  { %35 = vsyncpa [#allocation27], 0 }
   0xe   :  { %36 = vsyncpa [#allocation30], 0  ;;  %s23161_s0 = smov [#allocation7]   ;;  %s23162_s20 = smov [#allocation10]  }
   0xf   :  { %s55_s30 = sshll.u32 %s23161_s0, 4  ;;  %s79_s21 = sshll.u32 %s23162_s20, 4  ;;  %s56_s30 = int_to_ptr.vmem [resolvable:$true] %s55_s30  ;;  %s80_s21 = int_to_ptr.vmem [resolvable:$true] %s79_s21 }
  0x10   :  { %s25411_s2 = sld [smem:[#allocation94_spill]] }
  0x16   :  { %s22767_s23 = scalar_lea.hbm %s25411_s2, 16 }
  0x17   :  { %p22768_p0 = scmp.ne.s32.totalorder %s25411_s2, %s22767_s23  ;;  %p22771_p1 = scmp.lt.u32.totalorder %s22767_s23, %s25411_s2 }
  0x19   :  { %p22773_p2 = pnand %p22771_p1, %p22768_p0 }
  0x1b   :  { %22776 = shalt.err (!%p22773_p2)
}
  0x1c   :  { %s22777_s27 = scalar_lea.vmem %s56_s30, 16  ;;  %s22781_s28 = scalar_lea.vmem %s56_s30, 32 }
  0x1d   :  { %p22778_p3 = scmp.ne.s32.totalorder %s56_s30, %s22777_s27  ;;  %p22782_p4 = scmp.lt.s32.totalorder %s56_s30, %s56_s30 }
  0x1e   :  { %p22783_p5 = scmp.lt.s32.totalorder %s22781_s28, %s22777_s27 }
  0x20   :  { %p22784_p6 = por %p22783_p5, %p22782_p4 }
  0x22   :  { %p22785_p7 = pnand %p22784_p6, %p22778_p3 }
  0x24   :  { %22788 = shalt.err (!%p22785_p7)
}
  0x25   :  { %58 = dma.hbm_to_vmem [thread:$0]  %s25411_s2, 16, %s56_s30, [#allocation8]  }
  0x26   :  { %s22789_s22 = scalar_lea.hbm %s25294_s5, 640 }
  0x27   :  { %p22790_p8 = scmp.ne.s32.totalorder %s25294_s5, %s22789_s22  ;;  %p22793_p9 = scmp.lt.u32.totalorder %s22789_s22, %s25294_s5 }
  0x29   :  { %p22795_p10 = pnand %p22793_p9, %p22790_p8 }
  0x2b   :  { %22798 = shalt.err (!%p22795_p10)
}
  0x2c   :  { %s22799_s26 = scalar_lea.vmem %s80_s21, 640  ;;  %p22804_p12 = scmp.lt.s32.totalorder %s80_s21, %s80_s21 }
  0x2d   :  { %p22800_p11 = scmp.ne.s32.totalorder %s80_s21, %s22799_s26  ;;  %p22805_p13 = scmp.lt.s32.totalorder %s22799_s26, %s22799_s26 }
  0x2f   :  { %p22806_p0 = por %p22805_p13, %p22804_p12 }
  0x31   :  { %p22807_p1 = pnand %p22806_p0, %p22800_p11 }
  0x33   :  { %22810 = shalt.err (!%p22807_p1)
}
  0x34   :  { %82 = dma.hbm_to_vmem [thread:$0]  %s25294_s5, 640, %s80_s21, [#allocation11]  }
  0x35   :  { %s23163_s27 = smov [#allocation13]   ;;  %s22811_s20 = scalar_lea.hbm %s25296_s7, 16 }
  0x36   :  { %s101_s28 = sshll.u32 %s23163_s27, 4  ;;  %p22812_p2 = scmp.ne.s32.totalorder %s25296_s7, %s22811_s20  ;;  %s102_s28 = int_to_ptr.vmem [resolvable:$true] %s101_s28 }
  0x37   :  { %p22815_p3 = scmp.lt.u32.totalorder %s22811_s20, %s25296_s7 }
  0x39   :  { %p22817_p4 = pnand %p22815_p3, %p22812_p2 }
  0x3b   :  { %22820 = shalt.err (!%p22817_p4)
}
  0x3c   :  { %s22821_s25 = scalar_lea.vmem %s102_s28, 16  ;;  %s22825_s5 = scalar_lea.vmem %s102_s28, 32 }
  0x3d   :  { %p22822_p5 = scmp.ne.s32.totalorder %s102_s28, %s22821_s25  ;;  %p22826_p6 = scmp.lt.s32.totalorder %s102_s28, %s102_s28 }
  0x3e   :  { %p22827_p7 = scmp.lt.s32.totalorder %s22825_s5, %s22821_s25 }
  0x40   :  { %p22828_p8 = por %p22827_p7, %p22826_p6 }
  0x42   :  { %p22829_p9 = pnand %p22828_p8, %p22822_p5 }
  0x44   :  { %22832 = shalt.err (!%p22829_p9)
}
  0x45   :  { %104 = dma.hbm_to_vmem [thread:$0]  %s25296_s7, 16, %s102_s28, [#allocation14]  }
  0x46   :  { %s23164_s26 = smov [#allocation16]   ;;  %s22833_s29 = scalar_lea.hbm %s25298_s9, 1024 }
  0x47   :  { %s122_s30 = sshll.u32 %s23164_s26, 4  ;;  %p22834_p10 = scmp.ne.s32.totalorder %s25298_s9, %s22833_s29  ;;  %s123_s30 = int_to_ptr.vmem [resolvable:$true] %s122_s30 }
  0x48   :  { %p22837_p11 = scmp.lt.u32.totalorder %s22833_s29, %s25298_s9 }
  0x4a   :  { %p22839_p12 = pnand %p22837_p11, %p22834_p10 }
  0x4c   :  { %22842 = shalt.err (!%p22839_p12)
}
  0x4d   :  { %s22843_s24 = scalar_lea.vmem %s123_s30, 1024  ;;  %p22848_p0 = scmp.lt.s32.totalorder %s123_s30, %s123_s30 }
  0x4e   :  { %p22844_p13 = scmp.ne.s32.totalorder %s123_s30, %s22843_s24  ;;  %p22849_p1 = scmp.lt.s32.totalorder %s22843_s24, %s22843_s24 }
  0x50   :  { %p22850_p2 = por %p22849_p1, %p22848_p0 }
  0x52   :  { %p22851_p3 = pnand %p22850_p2, %p22844_p13 }
  0x54   :  { %22854 = shalt.err (!%p22851_p3)
}
  0x55   :  { %s23165_s7 = smov 64   ;;  %s23166_s28 = smov 4  }
  0x56   :  { %128 = dma.hbm_to_vmem [thread:$0]  %s25298_s9, 1024, %s123_s30, [#allocation17], %s23165_s7, %s23165_s7, %s23166_s28  }
  0x57   :  { %s23167_s5 = smov [#allocation19]   ;;  %s23168_s3 = smov [#allocation22]  }
  0x58   :  { %s146_s21 = sshll.u32 %s23167_s5, 4  ;;  %s168_s26 = sshll.u32 %s23168_s3, 4  ;;  %s147_s21 = int_to_ptr.vmem [resolvable:$true] %s146_s21  ;;  %s23336_s26 = int_to_ptr.vmem [resolvable:$true] %s168_s26 }
  0x59   :  { %s22855_s29 = scalar_lea.hbm %s25301_s12, 41984 }
  0x5a   :  { %p22856_p4 = scmp.ne.s32.totalorder %s25301_s12, %s22855_s29  ;;  %p22859_p5 = scmp.lt.u32.totalorder %s22855_s29, %s25301_s12 }
  0x5c   :  { %p22861_p6 = pnand %p22859_p5, %p22856_p4 }
  0x5e   :  { %22864 = shalt.err (!%p22861_p6)
}
  0x5f   :  { %s22865_s9 = scalar_lea.vmem %s147_s21, 41984  ;;  %p22870_p8 = scmp.lt.s32.totalorder %s147_s21, %s147_s21 }
  0x60   :  { %p22866_p7 = scmp.ne.s32.totalorder %s147_s21, %s22865_s9  ;;  %p22871_p9 = scmp.lt.s32.totalorder %s22865_s9, %s22865_s9 }
  0x62   :  { %p22872_p10 = por %p22871_p9, %p22870_p8 }
  0x64   :  { %p22873_p11 = pnand %p22872_p10, %p22866_p7 }
  0x66   :  { %22876 = shalt.err (!%p22873_p11)
}
  0x67   :  { %s23169_s30 = smov 2624   ;;  %s23170_s24 = smov 164  }
  0x68   :  { %152 = dma.hbm_to_vmem [thread:$0]  %s25301_s12, 41984, %s147_s21, [#allocation20], %s23169_s30, %s23169_s30, %s23170_s24  }
  0x69   :  { %s22877_s2 = scalar_lea.hbm %s25303_s14, 40960 }
  0x6a   :  { %p22878_p12 = scmp.ne.s32.totalorder %s25303_s14, %s22877_s2  ;;  %p22881_p13 = scmp.lt.u32.totalorder %s22877_s2, %s25303_s14 }
  0x6c   :  { %p22883_p0 = pnand %p22881_p13, %p22878_p12 }
  0x6e   :  { %22886 = shalt.err (!%p22883_p0)
}
  0x6f   :  { %s22887_s1 = scalar_lea.vmem %s23336_s26, 40960  ;;  %p22892_p2 = scmp.lt.s32.totalorder %s23336_s26, %s23336_s26 }
  0x70   :  { %p22888_p1 = scmp.ne.s32.totalorder %s23336_s26, %s22887_s1  ;;  %p22893_p3 = scmp.lt.s32.totalorder %s22887_s1, %s22887_s1 }
  0x72   :  { %p22894_p4 = por %p22893_p3, %p22892_p2 }
  0x74   :  { %p22895_p5 = pnand %p22894_p4, %p22888_p1 }
  0x76   :  { %22898 = shalt.err (!%p22895_p5)
}
  0x77   :  { %174 = dma.hbm_to_vmem [thread:$0]  %s25303_s14, 40960, %s23336_s26, [#allocation23], %s23165_s7, %s23165_s7, %s23166_s28  }
  0x78   :  { %s23171_s22 = smov [#allocation4]   ;;  %s23172_s23 = smov [#allocation9]  }
  0x79   :  { %s45_s9 = sshll.u32 %s23171_s22, 4  ;;  %s66_s25 = sshll.u32 %s23172_s23, 4  ;;  %s46_s9 = int_to_ptr.vmem [resolvable:$true] %s45_s9  ;;  %s23373_s25 = int_to_ptr.vmem [resolvable:$true] %s66_s25 }
  0x7a   :  { %s25412_s2 = sld [smem:[#allocation93_spill]] }
  0x80   :  { %s22899_s27 = scalar_lea.hbm %s25412_s2, 16 }
  0x81   :  { %p22900_p6 = scmp.ne.s32.totalorder %s25412_s2, %s22899_s27  ;;  %p22903_p7 = scmp.lt.u32.totalorder %s22899_s27, %s25412_s2 }
  0x83   :  { %p22905_p8 = pnand %p22903_p7, %p22900_p6 }
  0x85   :  { %22908 = shalt.err (!%p22905_p8)
}
  0x86   :  { %s22909_s14 = scalar_lea.vmem %s46_s9, 16  ;;  %s22913_s26 = scalar_lea.vmem %s46_s9, 32 }
  0x87   :  { %p22910_p9 = scmp.ne.s32.totalorder %s46_s9, %s22909_s14  ;;  %p22914_p10 = scmp.lt.s32.totalorder %s46_s9, %s46_s9 }
  0x88   :  { %p22915_p11 = scmp.lt.s32.totalorder %s22913_s26, %s22909_s14 }
  0x8a   :  { %p22916_p12 = por %p22915_p11, %p22914_p10 }
  0x8c   :  { %p22917_p13 = pnand %p22916_p12, %p22910_p9 }
  0x8e   :  { %22920 = shalt.err (!%p22917_p13)
}
  0x8f   :  { %48 = dma.hbm_to_vmem [thread:$0]  %s25412_s2, 16, %s46_s9, [#allocation5]  }
  0x90   :  { %s22921_s5 = scalar_lea.hbm %s25293_s4, 41984 }
  0x91   :  { %p22922_p0 = scmp.ne.s32.totalorder %s25293_s4, %s22921_s5  ;;  %p22925_p1 = scmp.lt.u32.totalorder %s22921_s5, %s25293_s4 }
  0x93   :  { %p22927_p2 = pnand %p22925_p1, %p22922_p0 }
  0x95   :  { %22930 = shalt.err (!%p22927_p2)
}
  0x96   :  { %s22931_s20 = scalar_lea.vmem %s23373_s25, 41984  ;;  %p22936_p4 = scmp.lt.s32.totalorder %s23373_s25, %s23373_s25 }
  0x97   :  { %p22932_p3 = scmp.ne.s32.totalorder %s23373_s25, %s22931_s20  ;;  %p22937_p5 = scmp.lt.s32.totalorder %s22931_s20, %s22931_s20 }
  0x99   :  { %p22938_p6 = por %p22937_p5, %p22936_p4 }
  0x9b   :  { %p22939_p7 = pnand %p22938_p6, %p22932_p3 }
  0x9d   :  { %22942 = shalt.err (!%p22939_p7)
}
  0x9e   :  { %72 = dma.hbm_to_vmem [thread:$0]  %s25293_s4, 41984, %s23373_s25, [#allocation8], %s23169_s30, %s23169_s30, %s23170_s24  }
  0x9f   :  { %s23173_s1 = smov [#allocation12]   ;;  %s23174_s26 = smov [#allocation15]  }
  0xa0   :  { %s88_s14 = sshll.u32 %s23173_s1, 4  ;;  %s110_s12 = sshll.u32 %s23174_s26, 4  ;;  %s89_s14 = int_to_ptr.vmem [resolvable:$true] %s88_s14  ;;  %s23407_s12 = int_to_ptr.vmem [resolvable:$true] %s110_s12 }
  0xa1   :  { %s22943_s23 = scalar_lea.hbm %s25295_s6, 40960 }
  0xa2   :  { %p22944_p8 = scmp.ne.s32.totalorder %s25295_s6, %s22943_s23  ;;  %p22947_p9 = scmp.lt.u32.totalorder %s22943_s23, %s25295_s6 }
  0xa4   :  { %p22949_p10 = pnand %p22947_p9, %p22944_p8 }
  0xa6   :  { %22952 = shalt.err (!%p22949_p10)
}
  0xa7   :  { %s22953_s4 = scalar_lea.vmem %s89_s14, 40960  ;;  %p22958_p12 = scmp.lt.s32.totalorder %s89_s14, %s89_s14 }
  0xa8   :  { %p22954_p11 = scmp.ne.s32.totalorder %s89_s14, %s22953_s4  ;;  %p22959_p13 = scmp.lt.s32.totalorder %s22953_s4, %s22953_s4 }
  0xaa   :  { %p22960_p0 = por %p22959_p13, %p22958_p12 }
  0xac   :  { %p22961_p1 = pnand %p22960_p0, %p22954_p11 }
  0xae   :  { %22964 = shalt.err (!%p22961_p1)
}
  0xaf   :  { %94 = dma.hbm_to_vmem [thread:$0]  %s25295_s6, 40960, %s89_s14, [#allocation11], %s23165_s7, %s23165_s7, %s23166_s28  }
  0xb0   :  { %s22965_s20 = scalar_lea.hbm %s25297_s8, 40960 }
  0xb1   :  { %p22966_p2 = scmp.ne.s32.totalorder %s25297_s8, %s22965_s20  ;;  %p22969_p3 = scmp.lt.u32.totalorder %s22965_s20, %s25297_s8 }
  0xb3   :  { %p22971_p4 = pnand %p22969_p3, %p22966_p2 }
  0xb5   :  { %22974 = shalt.err (!%p22971_p4)
}
  0xb6   :  { %s22975_s21 = scalar_lea.vmem %s23407_s12, 40960  ;;  %p22980_p6 = scmp.lt.s32.totalorder %s23407_s12, %s23407_s12 }
  0xb7   :  { %p22976_p5 = scmp.ne.s32.totalorder %s23407_s12, %s22975_s21  ;;  %p22981_p7 = scmp.lt.s32.totalorder %s22975_s21, %s22975_s21 }
  0xb9   :  { %p22982_p8 = por %p22981_p7, %p22980_p6 }
  0xbb   :  { %p22983_p9 = pnand %p22982_p8, %p22976_p5 }
  0xbd   :  { %22986 = shalt.err (!%p22983_p9)
}
  0xbe   :  { %116 = dma.hbm_to_vmem [thread:$0]  %s25297_s8, 40960, %s23407_s12, [#allocation14], %s23165_s7, %s23165_s7, %s23166_s28  }
  0xbf   :  { %s23175_s22 = smov [#allocation18]   ;;  %s23176_s5 = smov [#allocation21]  }
  0xc0   :  { %s135_s23 = sshll.u32 %s23175_s22, 4  ;;  %s159_s3 = sshll.u32 %s23176_s5, 4  ;;  %s136_s23 = int_to_ptr.vmem [resolvable:$true] %s135_s23  ;;  %s160_s3 = int_to_ptr.vmem [resolvable:$true] %s159_s3 }
  0xc1   :  { %s22987_s4 = scalar_lea.hbm %s25299_s10, 16 }
  0xc2   :  { %p22988_p10 = scmp.ne.s32.totalorder %s25299_s10, %s22987_s4  ;;  %p22991_p11 = scmp.lt.u32.totalorder %s22987_s4, %s25299_s10 }
  0xc4   :  { %p22993_p12 = pnand %p22991_p11, %p22988_p10 }
  0xc6   :  { %22996 = shalt.err (!%p22993_p12)
}
  0xc7   :  { %s22997_s8 = scalar_lea.vmem %s136_s23, 16  ;;  %s23001_s7 = scalar_lea.vmem %s136_s23, 32 }
  0xc8   :  { %p22998_p13 = scmp.ne.s32.totalorder %s136_s23, %s22997_s8  ;;  %p23002_p0 = scmp.lt.s32.totalorder %s136_s23, %s136_s23 }
  0xc9   :  { %p23003_p1 = scmp.lt.s32.totalorder %s23001_s7, %s22997_s8 }
  0xcb   :  { %p23004_p2 = por %p23003_p1, %p23002_p0 }
  0xcd   :  { %p23005_p3 = pnand %p23004_p2, %p22998_p13 }
  0xcf   :  { %23008 = shalt.err (!%p23005_p3)
}
  0xd0   :  { %138 = dma.hbm_to_vmem [thread:$0]  %s25299_s10, 16, %s136_s23, [#allocation17]  }
  0xd1   :  { %s23009_s2 = scalar_lea.hbm %s25302_s13, 640 }
  0xd2   :  { %p23010_p4 = scmp.ne.s32.totalorder %s25302_s13, %s23009_s2  ;;  %p23013_p5 = scmp.lt.u32.totalorder %s23009_s2, %s25302_s13 }
  0xd4   :  { %p23015_p6 = pnand %p23013_p5, %p23010_p4 }
  0xd6   :  { %23018 = shalt.err (!%p23015_p6)
}
  0xd7   :  { %s23019_s14 = scalar_lea.vmem %s160_s3, 640  ;;  %p23024_p8 = scmp.lt.s32.totalorder %s160_s3, %s160_s3 }
  0xd8   :  { %p23020_p7 = scmp.ne.s32.totalorder %s160_s3, %s23019_s14  ;;  %p23025_p9 = scmp.lt.s32.totalorder %s23019_s14, %s23019_s14 }
  0xda   :  { %p23026_p10 = por %p23025_p9, %p23024_p8 }
  0xdc   :  { %p23027_p11 = pnand %p23026_p10, %p23020_p7 }
  0xde   :  { %23030 = shalt.err (!%p23027_p11)
}
  0xdf   :  { %162 = dma.hbm_to_vmem [thread:$0]  %s25302_s13, 640, %s160_s3, [#allocation20]  }
  0xe0   :  { %s23177_s23 = smov [#allocation24]   ;;  %s23031_s4 = scalar_lea.hbm %s25304_s15, 16 }
  0xe1   :  { %s181_s5 = sshll.u32 %s23177_s23, 4  ;;  %p23032_p12 = scmp.ne.s32.totalorder %s25304_s15, %s23031_s4  ;;  %s182_s5 = int_to_ptr.vmem [resolvable:$true] %s181_s5 }
  0xe2   :  { %p23035_p13 = scmp.lt.u32.totalorder %s23031_s4, %s25304_s15 }
  0xe4   :  { %p23037_p0 = pnand %p23035_p13, %p23032_p12 }
  0xe6   :  { %23040 = shalt.err (!%p23037_p0)
}
  0xe7   :  { %s23041_s8 = scalar_lea.vmem %s182_s5, 16  ;;  %s23045_s13 = scalar_lea.vmem %s182_s5, 32 }
  0xe8   :  { %p23042_p1 = scmp.ne.s32.totalorder %s182_s5, %s23041_s8  ;;  %p23046_p2 = scmp.lt.s32.totalorder %s182_s5, %s182_s5 }
  0xe9   :  { %p23047_p3 = scmp.lt.s32.totalorder %s23045_s13, %s23041_s8 }
  0xeb   :  { %p23048_p4 = por %p23047_p3, %p23046_p2 }
  0xed   :  { %p23049_p5 = pnand %p23048_p4, %p23042_p1 }
  0xef   :  { %23052 = shalt.err (!%p23049_p5)
}
  0xf0   :  { %184 = dma.hbm_to_vmem [thread:$0]  %s25304_s15, 16, %s182_s5, [#allocation23]  }
  0xf1   :  { %23141 = dma.done.wait [#allocation5], 16  }
  0xf2   :  { %23142 = vsyncadd [#allocation5], 4294967280 }
  0xf3   :  { %23143 = dma.done.wait [#allocation8], 42000  }
  0xf4   :  { %23144 = vsyncadd [#allocation8], 4294925296 }
  0xf5   :  { %23145 = dma.done.wait [#allocation11], 41600  }
  0xf6   :  { %23146 = vsyncadd [#allocation11], 4294925696 }
  0xf7   :  { %23147 = dma.done.wait [#allocation14], 40976  }
  0xf8   :  { %23148 = vsyncadd [#allocation14], 4294926320 }
  0xf9   :  { %23149 = dma.done.wait [#allocation17], 1040  }
  0xfa   :  { %23150 = vsyncadd [#allocation17], 4294966256 }
  0xfb   :  { %23151 = dma.done.wait [#allocation20], 42624  }
  0xfc   :  { %23152 = vsyncadd [#allocation20], 4294924672 }
  0xfd   :  { %23153 = dma.done.wait [#allocation23], 40976  }
  0xfe   :  { %23154 = vsyncadd [#allocation23], 4294926320  ;;  %v25311_v0 = vmov 0   ;;  %s25413_s12 = sld [smem:[#allocation92_spill]]  ;;  %v20651_v2 = vld [vmem:[#allocation9 + $0x4] ss:$164 sps:$4 sm:$0xff]  }
  0xff   :  { %20650 = vset.pattern.permute.xlu0 %v25311_v0  ;;  %2270 = vmatprep.mubr.bf16.mxu0 %v25311_v0  ;;  %v20653_v3 = vld [vmem:[#allocation9 + $0xc] ss:$164 sps:$4 sm:$0xff]   ;;  %v20655_v4 = vld [vmem:[#allocation9] ss:$164 sps:$4 sm:$0xff]   ;;  %v20659_v7 = vld [vmem:[#allocation9 + $0x154] ss:$164 sps:$4 sm:$0xff]  }
 0x100   :  { %2311 = vmatprep.mubr.bf16.mxu1 %v25311_v0  ;;  %v20656_v5 = vld [vmem:[#allocation9 + $0x8] ss:$164 sps:$4 sm:$0xff]   ;;  %2238 = vmatprep.subr.bf16.mxu0 %v20651_v2  ;;  %v20662_v9 = vld [vmem:[#allocation9 + $0x150] ss:$164 sps:$4 sm:$0xff]   ;;  %v20665_v11 = vld [vmem:[#allocation9 + $0x29c] ss:$164 sps:$4 sm:$0xff]  }
 0x101   :  { %v20657_v6 = vld [vmem:[#allocation9 + $0x14c] ss:$164 sps:$4 sm:$0xff]   ;;  %2279 = vmatprep.subr.bf16.mxu1 %v20653_v3  ;;  %2239 = vmatpush1.bf16.msra.mxu0 %v20655_v4  ;;  %v20663_v10 = vld [vmem:[#allocation9 + $0x294] ss:$164 sps:$4 sm:$0xff]   ;;  %v20669_v14 = vld [vmem:[#allocation9 + $0x3dc] ss:$164 sps:$4 sm:$0xff]  }
 0x102   :  { %2280 = vmatpush1.bf16.msra.mxu1 %v20656_v5  ;;  %2240 = vmatprep.subr.bf16.mxu0 %v20657_v6  ;;  %v20661_v8 = vld [vmem:[#allocation9 + $0x148] ss:$164 sps:$4 sm:$0xff]   ;;  %v20667_v12 = vld [vmem:[#allocation9 + $0x290] ss:$164 sps:$4 sm:$0xff]   ;;  %v20668_v13 = vld [vmem:[#allocation9 + $0x298] ss:$164 sps:$4 sm:$0xff]  }
 0x103   :  { %2281 = vmatprep.subr.bf16.mxu1 %v20659_v7  ;;  %v20671_v15 = vld [vmem:[#allocation9 + $0x3e4] ss:$164 sps:$4 sm:$0xff]   ;;  %v20673_v16 = vld [vmem:[#allocation9 + $0x3d8] ss:$164 sps:$4 sm:$0xff]   ;;  %v20677_v19 = vld [vmem:[#allocation9 + $0x52c] ss:$164 sps:$4 sm:$0xff]  }
 0x104   :  { %v225_v1 = vld [vmem:[%s25413_s12] sm:$0xff]  ;;  %v20675_v18 = vld [vmem:[#allocation9 + $0x524] ss:$164 sps:$4 sm:$0xff]   ;;  %v20681_v22 = vld [vmem:[#allocation9 + $0x66c] ss:$164 sps:$4 sm:$0xff]   ;;  %s25414_s2 = sld [smem:[#allocation95_spill]] }
 0x105   :  { %231 = vperm.xlu0 %20650, %v225_v1   ;;  %2241 = vmatpush1.bf16.msra.mxu0 %v20661_v8  ;;  %v20674_v17 = vld [vmem:[#allocation9 + $0x3e0] ss:$164 sps:$4 sm:$0xff]   ;;  %v20680_v21 = vld [vmem:[#allocation9 + $0x528] ss:$164 sps:$4 sm:$0xff]   ;;  %v20683_v23 = vld [vmem:[#allocation9 + $0x674] ss:$164 sps:$4 sm:$0xff]  }
 0x106   :  { %2282 = vmatpush1.bf16.msra.mxu1 %v20662_v9  ;;  %2242 = vmatprep.subr.bf16.mxu0 %v20663_v10  ;;  %v20679_v20 = vld [vmem:[#allocation9 + $0x520] ss:$164 sps:$4 sm:$0xff]   ;;  %v20685_v24 = vld [vmem:[#allocation9 + $0x668] ss:$164 sps:$4 sm:$0xff]   ;;  %v20686_v25 = vld [vmem:[#allocation9 + $0x670] ss:$164 sps:$4 sm:$0xff]  }
 0x107   :  { %2283 = vmatprep.subr.bf16.mxu1 %v20665_v11  ;;  %v20687_v26 = vld [vmem:[#allocation9 + $0x7b4] ss:$164 sps:$4 sm:$0xff]   ;;  %v20689_v27 = vld [vmem:[#allocation9 + $0x7bc] ss:$164 sps:$4 sm:$0xff]   ;;  %v20695_v31 = vld [vmem:[#allocation9 + $0x904] ss:$164 sps:$4 sm:$0xff]  }
 0x108   :  { %v20691_v28 = vld [vmem:[#allocation9 + $0x7b0] ss:$164 sps:$4 sm:$0xff]   ;;  %v20692_v29 = vld [vmem:[#allocation9 + $0x7b8] ss:$164 sps:$4 sm:$0xff]   ;;  %v20698_v33 = vld [vmem:[#allocation9 + $0x900] ss:$164 sps:$4 sm:$0xff]  }
 0x109   :  { %2243 = vmatpush1.bf16.msra.mxu0 %v20667_v12  ;;  %v20693_v30 = vld [vmem:[#allocation9 + $0x8fc] ss:$164 sps:$4 sm:$0xff]   ;;  %v20701_v34 = vld [vmem:[#allocation9 + $0x14] ss:$164 sps:$4 sm:$0xff]   ;;  %v20710_v48 = vld [vmem:[#allocation9 + $0x164] ss:$164 sps:$4 sm:$0xff]  }
 0x10a   :  { %2284 = vmatpush1.bf16.msra.mxu1 %v20668_v13  ;;  %2244 = vmatprep.subr.bf16.mxu0 %v20669_v14  ;;  %v20697_v32 = vld [vmem:[#allocation9 + $0x8f8] ss:$164 sps:$4 sm:$0xff]   ;;  %v250_v40 = vstv %s25414_s2  ;;  %v20699_v43 = vld [vmem:[#allocation9 + $0x10] ss:$164 sps:$4 sm:$0xff]   ;;  %v20708_v50 = vld [vmem:[#allocation9 + $0x160] ss:$164 sps:$4 sm:$0xff]  }
 0x10b   :  { %2285 = vmatprep.subr.bf16.mxu1 %v20671_v15  ;;  %v20704_v35 = vld [vmem:[#allocation9 + $0x1c] ss:$164 sps:$4 sm:$0xff]   ;;  %v20713_v51 = vld [vmem:[#allocation9 + $0x2a4] ss:$164 sps:$4 sm:$0xff]   ;;  %v20716_v52 = vld [vmem:[#allocation9 + $0x2ac] ss:$164 sps:$4 sm:$0xff]  }
 0x10c   :  { %v17590_v36 = vld [vmem:[#allocation4] ss:$0 sm:$0xff]  ;;  %v17591_v37 = vld [vmem:[#allocation7] ss:$0 sm:$0xff]  ;;  %v20711_v53 = vld [vmem:[#allocation9 + $0x2a0] ss:$164 sps:$4 sm:$0xff]  }
 0x10d   :  { %2245 = vmatpush1.bf16.msra.mxu0 %v20673_v16  ;;  %v20702_v44 = vld [vmem:[#allocation9 + $0x18] ss:$164 sps:$4 sm:$0xff]   ;;  %v20714_v54 = vld [vmem:[#allocation9 + $0x2a8] ss:$164 sps:$4 sm:$0xff]   ;;  %v20720_v58 = vld [vmem:[#allocation9 + $0x3f0] ss:$164 sps:$4 sm:$0xff]  }
 0x10e   :  { %2286 = vmatpush1.bf16.msra.mxu1 %v20674_v17  ;;  %2246 = vmatprep.subr.bf16.mxu0 %v20675_v18  ;;  %v20707_v47 = vld [vmem:[#allocation9 + $0x15c] ss:$164 sps:$4 sm:$0xff]   ;;  %v20719_v55 = vld [vmem:[#allocation9 + $0x3ec] ss:$164 sps:$4 sm:$0xff]   ;;  %v20722_v56 = vld [vmem:[#allocation9 + $0x3f4] ss:$164 sps:$4 sm:$0xff]  }
 0x10f   :  { %2287 = vmatprep.subr.bf16.mxu1 %v20677_v19  ;;  %v20705_v49 = vld [vmem:[#allocation9 + $0x158] ss:$164 sps:$4 sm:$0xff]   ;;  %v20717_v57 = vld [vmem:[#allocation9 + $0x3e8] ss:$164 sps:$4 sm:$0xff]   ;;  %v20723_v61 = vld [vmem:[#allocation9 + $0x530] ss:$164 sps:$4 sm:$0xff]  }
 0x110   :  { %v20725_v59 = vld [vmem:[#allocation9 + $0x534] ss:$164 sps:$4 sm:$0xff]   ;;  %v20728_v60 = vld [vmem:[#allocation9 + $0x53c] ss:$164 sps:$4 sm:$0xff]   ;;  %v20734_v1 = vld [vmem:[#allocation9 + $0x684] ss:$164 sps:$4 sm:$0xff]  }
 0x111   :  { %2247 = vmatpush1.bf16.msra.mxu0 %v20679_v20  ;;  %v20726_v62 = vld [vmem:[#allocation9 + $0x538] ss:$164 sps:$4 sm:$0xff]   ;;  %v20732_v3 = vld [vmem:[#allocation9 + $0x680] ss:$164 sps:$4 sm:$0xff]   ;;  %v20740_v5 = vld [vmem:[#allocation9 + $0x7cc] ss:$164 sps:$4 sm:$0xff]  }
 0x112   :  { %2288 = vmatpush1.bf16.msra.mxu1 %v20680_v21  ;;  %2248 = vmatprep.subr.bf16.mxu0 %v20681_v22  ;;  %v20731_v63 = vld [vmem:[#allocation9 + $0x67c] ss:$164 sps:$4 sm:$0xff]   ;;  %v20737_v4 = vld [vmem:[#allocation9 + $0x7c4] ss:$164 sps:$4 sm:$0xff]   ;;  %v20743_v8 = vld [vmem:[#allocation9 + $0x90c] ss:$164 sps:$4 sm:$0xff]  }
 0x113   :  { %2289 = vmatprep.subr.bf16.mxu1 %v20683_v23  ;;  %v20729_v2 = vld [vmem:[#allocation9 + $0x678] ss:$164 sps:$4 sm:$0xff]   ;;  %v20735_v6 = vld [vmem:[#allocation9 + $0x7c0] ss:$164 sps:$4 sm:$0xff]   ;;  %v20738_v7 = vld [vmem:[#allocation9 + $0x7c8] ss:$164 sps:$4 sm:$0xff]  }
 0x114   :  { %v20746_v9 = vld [vmem:[#allocation9 + $0x914] ss:$164 sps:$4 sm:$0xff]   ;;  %v20741_v10 = vld [vmem:[#allocation9 + $0x908] ss:$164 sps:$4 sm:$0xff]   ;;  %v20747_v14 = vld [vmem:[#allocation9 + $0x20] ss:$164 sps:$4 sm:$0xff]  }
 0x115   :  { %2249 = vmatpush1.bf16.msra.mxu0 %v20685_v24  ;;  %v20744_v11 = vld [vmem:[#allocation9 + $0x910] ss:$164 sps:$4 sm:$0xff]   ;;  %v20749_v12 = vld [vmem:[#allocation9 + $0x24] ss:$164 sps:$4 sm:$0xff]   ;;  %v20764_v21 = vld [vmem:[#allocation9 + $0x2bc] ss:$164 sps:$4 sm:$0xff]  }
 0x116   :  { %2290 = vmatpush1.bf16.msra.mxu1 %v20686_v25  ;;  %2250 = vmatprep.subr.bf16.mxu0 %v20687_v26  ;;  %v20752_v13 = vld [vmem:[#allocation9 + $0x2c] ss:$164 sps:$4 sm:$0xff]   ;;  %v20758_v17 = vld [vmem:[#allocation9 + $0x174] ss:$164 sps:$4 sm:$0xff]   ;;  %v20767_v24 = vld [vmem:[#allocation9 + $0x3fc] ss:$164 sps:$4 sm:$0xff]  }
 0x117   :  { %2291 = vmatprep.subr.bf16.mxu1 %v20689_v27  ;;  %v20750_v15 = vld [vmem:[#allocation9 + $0x28] ss:$164 sps:$4 sm:$0xff]   ;;  %v20756_v19 = vld [vmem:[#allocation9 + $0x170] ss:$164 sps:$4 sm:$0xff]   ;;  %v20762_v23 = vld [vmem:[#allocation9 + $0x2b8] ss:$164 sps:$4 sm:$0xff]  }
 0x118   :  { %v20755_v16 = vld [vmem:[#allocation9 + $0x16c] ss:$164 sps:$4 sm:$0xff]   ;;  %v20761_v20 = vld [vmem:[#allocation9 + $0x2b4] ss:$164 sps:$4 sm:$0xff]   ;;  %v20770_v25 = vld [vmem:[#allocation9 + $0x404] ss:$164 sps:$4 sm:$0xff]  }
 0x119   :  { %2251 = vmatpush1.bf16.msra.mxu0 %v20691_v28  ;;  %v20753_v18 = vld [vmem:[#allocation9 + $0x168] ss:$164 sps:$4 sm:$0xff]   ;;  %v20759_v22 = vld [vmem:[#allocation9 + $0x2b0] ss:$164 sps:$4 sm:$0xff]   ;;  %v20765_v26 = vld [vmem:[#allocation9 + $0x3f8] ss:$164 sps:$4 sm:$0xff]  }
 0x11a   :  { %2292 = vmatpush1.bf16.msra.mxu1 %v20692_v29  ;;  %2252 = vmatprep.subr.bf16.mxu0 %v20693_v30  ;;  %v20768_v27 = vld [vmem:[#allocation9 + $0x400] ss:$164 sps:$4 sm:$0xff]   ;;  %v20776_v29 = vld [vmem:[#allocation9 + $0x54c] ss:$164 sps:$4 sm:$0xff]   ;;  %vm23180_vm1 = vmmov 0   ;;  %s23182_s6 = smov [#allocation25]  }
 0x11b   :  { %2293 = vmatprep.subr.bf16.mxu1 %v20695_v31  ;;  %v20773_v28 = vld [vmem:[#allocation9 + $0x544] ss:$164 sps:$4 sm:$0xff]   ;;  %s17534_s14 = sshll.u32 %s23182_s6, 4  ;;  %s25177_s14 = int_to_ptr.vmem [resolvable:$true] %s17534_s14 }
 0x11c   :  { %v20771_v30 = vld [vmem:[#allocation9 + $0x540] ss:$164 sps:$4 sm:$0xff]   ;;  %v20774_v31 = vld [vmem:[#allocation9 + $0x548] ss:$164 sps:$4 sm:$0xff]  }
 0x11d   :  { %2253 = vmatpush1.bf16.msra.mxu0 %v20697_v32  ;;  %v20779_v32 = vld [vmem:[#allocation9 + $0x68c] ss:$164 sps:$4 sm:$0xff]  }
 0x11e   :  { %2294 = vmatpush1.bf16.msra.mxu1 %v20698_v33  ;;  %2320 = vmatprep.subr.bf16.mxu0 %v20701_v34  ;;  %v20782_v33 = vld [vmem:[#allocation9 + $0x694] ss:$164 sps:$4 sm:$0xff]   ;;  %v20777_v34 = vld [vmem:[#allocation9 + $0x688] ss:$164 sps:$4 sm:$0xff]  }
 0x11f   :  { %2361 = vmatprep.subr.bf16.mxu1 %v20704_v35  ;;  %v20780_v35 = vld [vmem:[#allocation9 + $0x690] ss:$164 sps:$4 sm:$0xff]  }
 0x184   :  { %v232_v38 = vpop.permute.xlu0 %231 }
 0x185   :  { %v240_v39 = vmul.f32 %v17590_v36, %v232_v38  ;;  %v20785_v36 = vld [vmem:[#allocation9 + $0x7d4] ss:$164 sps:$4 sm:$0xff]  }
 0x186   :  { %v20783_v38 = vld [vmem:[#allocation9 + $0x7d0] ss:$164 sps:$4 sm:$0xff]  }
 0x187   :  { %v248_v41 = vadd.f32 %v17591_v37, %v240_v39  ;;  %v20788_v37 = vld [vmem:[#allocation9 + $0x7dc] ss:$164 sps:$4 sm:$0xff]  }
 0x188   :  { %v20786_v39 = vld [vmem:[#allocation9 + $0x7d8] ss:$164 sps:$4 sm:$0xff]  }
 0x189   :  { %vm249_vm0 = vcmp.ge.f32.partialorder %v248_v41, 0.0  ;;  %v251_v42 = vmul.f32 %v250_v40, %v248_v41  ;;  %v20791_v40 = vld [vmem:[#allocation9 + $0x91c] ss:$164 sps:$4 sm:$0xff]  }
 0x18b   :  { %v252_v45 = vsel %vm249_vm0, %v248_v41, %v251_v42  ;;  %v20794_v41 = vld [vmem:[#allocation9 + $0x924] ss:$164 sps:$4 sm:$0xff]   ;;  %v20789_v42 = vld [vmem:[#allocation9 + $0x918] ss:$164 sps:$4 sm:$0xff]  }
 0x18c   :  { %v23489_v46 = vpack.c.bf16 %v252_v45, %v252_v45  ;;  %v20800_v45 = vld [vmem:[#allocation9 + $0x3c] ss:$164 sps:$4 sm:$0xff]  }
 0x18e   :  { %2271 = vmatmul.mubr.bf16.vlgmr.msra.gmra.mrb[0].mxu0 %v23489_v46  ;;  %2312 = vmatmul.mubr.bf16.vlgmr.msra.gmra.mrb[0].mxu1 %v23489_v46 }
 0x18f   :  { %2321 = vmatpush1.bf16.msra.mxu0 %v20699_v43  ;;  %2362 = vmatpush1.bf16.msra.mxu1 %v20702_v44  ;;  %v20792_v43 = vld [vmem:[#allocation9 + $0x920] ss:$164 sps:$4 sm:$0xff]   ;;  %v20797_v44 = vld [vmem:[#allocation9 + $0x34] ss:$164 sps:$4 sm:$0xff]  }
 0x190   :  { %2322 = vmatprep.subr.bf16.mxu0 %v20707_v47  ;;  %2363 = vmatprep.subr.bf16.mxu1 %v20710_v48  ;;  %v20795_v47 = vld [vmem:[#allocation9 + $0x30] ss:$164 sps:$4 sm:$0xff]   ;;  %v20798_v48 = vld [vmem:[#allocation9 + $0x38] ss:$164 sps:$4 sm:$0xff]  }
 0x191   :  { %2352 = vmatprep.mubr.bf16.mxu0 %v25311_v0  ;;  %2393 = vmatprep.mubr.bf16.mxu1 %v25311_v0 }
 0x193   :  { %2323 = vmatpush1.bf16.msra.mxu0 %v20705_v49  ;;  %2364 = vmatpush1.bf16.msra.mxu1 %v20708_v50  ;;  %v20803_v49 = vld [vmem:[#allocation9 + $0x17c] ss:$164 sps:$4 sm:$0xff]   ;;  %v20806_v50 = vld [vmem:[#allocation9 + $0x184] ss:$164 sps:$4 sm:$0xff]  }
 0x194   :  { %2324 = vmatprep.subr.bf16.mxu0 %v20713_v51  ;;  %2365 = vmatprep.subr.bf16.mxu1 %v20716_v52  ;;  %v20801_v51 = vld [vmem:[#allocation9 + $0x178] ss:$164 sps:$4 sm:$0xff]   ;;  %v20804_v52 = vld [vmem:[#allocation9 + $0x180] ss:$164 sps:$4 sm:$0xff]  }
 0x197   :  { %2325 = vmatpush1.bf16.msra.mxu0 %v20711_v53  ;;  %2366 = vmatpush1.bf16.msra.mxu1 %v20714_v54  ;;  %v20809_v53 = vld [vmem:[#allocation9 + $0x2c4] ss:$164 sps:$4 sm:$0xff]   ;;  %v20812_v54 = vld [vmem:[#allocation9 + $0x2cc] ss:$164 sps:$4 sm:$0xff]  }
 0x198   :  { %2326 = vmatprep.subr.bf16.mxu0 %v20719_v55  ;;  %2367 = vmatprep.subr.bf16.mxu1 %v20722_v56  ;;  %v20807_v55 = vld [vmem:[#allocation9 + $0x2c0] ss:$164 sps:$4 sm:$0xff]   ;;  %v20810_v56 = vld [vmem:[#allocation9 + $0x2c8] ss:$164 sps:$4 sm:$0xff]  }
 0x19b   :  { %2327 = vmatpush1.bf16.msra.mxu0 %v20717_v57  ;;  %2368 = vmatpush1.bf16.msra.mxu1 %v20720_v58  ;;  %v20815_v57 = vld [vmem:[#allocation9 + $0x40c] ss:$164 sps:$4 sm:$0xff]   ;;  %v20818_v58 = vld [vmem:[#allocation9 + $0x414] ss:$164 sps:$4 sm:$0xff]  }
 0x19c   :  { %2328 = vmatprep.subr.bf16.mxu0 %v20725_v59  ;;  %2369 = vmatprep.subr.bf16.mxu1 %v20728_v60  ;;  %v20813_v59 = vld [vmem:[#allocation9 + $0x408] ss:$164 sps:$4 sm:$0xff]   ;;  %v20816_v60 = vld [vmem:[#allocation9 + $0x410] ss:$164 sps:$4 sm:$0xff]  }
 0x19f   :  { %2329 = vmatpush1.bf16.msra.mxu0 %v20723_v61  ;;  %2370 = vmatpush1.bf16.msra.mxu1 %v20726_v62  ;;  %v20821_v61 = vld [vmem:[#allocation9 + $0x554] ss:$164 sps:$4 sm:$0xff]   ;;  %v20824_v62 = vld [vmem:[#allocation9 + $0x55c] ss:$164 sps:$4 sm:$0xff]  }
 0x1a0   :  { %2330 = vmatprep.subr.bf16.mxu0 %v20731_v63  ;;  %2371 = vmatprep.subr.bf16.mxu1 %v20734_v1  ;;  %v20819_v63 = vld [vmem:[#allocation9 + $0x550] ss:$164 sps:$4 sm:$0xff]   ;;  %v20822_v1 = vld [vmem:[#allocation9 + $0x558] ss:$164 sps:$4 sm:$0xff]  }
 0x1a3   :  { %2331 = vmatpush1.bf16.msra.mxu0 %v20729_v2  ;;  %2372 = vmatpush1.bf16.msra.mxu1 %v20732_v3  ;;  %v20827_v2 = vld [vmem:[#allocation9 + $0x69c] ss:$164 sps:$4 sm:$0xff]   ;;  %v20830_v3 = vld [vmem:[#allocation9 + $0x6a4] ss:$164 sps:$4 sm:$0xff]  }
 0x1a4   :  { %2332 = vmatprep.subr.bf16.mxu0 %v20737_v4  ;;  %2373 = vmatprep.subr.bf16.mxu1 %v20740_v5  ;;  %v20825_v4 = vld [vmem:[#allocation9 + $0x698] ss:$164 sps:$4 sm:$0xff]   ;;  %v20828_v5 = vld [vmem:[#allocation9 + $0x6a0] ss:$164 sps:$4 sm:$0xff]  }
 0x1a7   :  { %2333 = vmatpush1.bf16.msra.mxu0 %v20735_v6  ;;  %2374 = vmatpush1.bf16.msra.mxu1 %v20738_v7  ;;  %v20833_v6 = vld [vmem:[#allocation9 + $0x7e4] ss:$164 sps:$4 sm:$0xff]   ;;  %v20836_v7 = vld [vmem:[#allocation9 + $0x7ec] ss:$164 sps:$4 sm:$0xff]  }
 0x1a8   :  { %2334 = vmatprep.subr.bf16.mxu0 %v20743_v8  ;;  %2375 = vmatprep.subr.bf16.mxu1 %v20746_v9  ;;  %v20831_v8 = vld [vmem:[#allocation9 + $0x7e0] ss:$164 sps:$4 sm:$0xff]   ;;  %v20834_v9 = vld [vmem:[#allocation9 + $0x7e8] ss:$164 sps:$4 sm:$0xff]  }
 0x1ab   :  { %2335 = vmatpush1.bf16.msra.mxu0 %v20741_v10  ;;  %2376 = vmatpush1.bf16.msra.mxu1 %v20744_v11  ;;  %v20839_v10 = vld [vmem:[#allocation9 + $0x92c] ss:$164 sps:$4 sm:$0xff]   ;;  %v20842_v11 = vld [vmem:[#allocation9 + $0x934] ss:$164 sps:$4 sm:$0xff]  }
 0x1ac   :  { %2402 = vmatprep.subr.bf16.mxu0 %v20749_v12  ;;  %2443 = vmatprep.subr.bf16.mxu1 %v20752_v13  ;;  %v20837_v12 = vld [vmem:[#allocation9 + $0x928] ss:$164 sps:$4 sm:$0xff]   ;;  %v20840_v13 = vld [vmem:[#allocation9 + $0x930] ss:$164 sps:$4 sm:$0xff]  }
 0x1ae   :  { %2353 = vmatmul.mubr.bf16.vlgmr.msra.gmra.mrb[4].mxu0 %v23489_v46  ;;  %2394 = vmatmul.mubr.bf16.vlgmr.msra.gmra.mrb[4].mxu1 %v23489_v46 }
 0x1af   :  { %2403 = vmatpush1.bf16.msra.mxu0 %v20747_v14  ;;  %2444 = vmatpush1.bf16.msra.mxu1 %v20750_v15  ;;  %v20845_v14 = vld [vmem:[#allocation9 + $0x44] ss:$164 sps:$4 sm:$0xff]   ;;  %v20848_v15 = vld [vmem:[#allocation9 + $0x4c] ss:$164 sps:$4 sm:$0xff]  }
 0x1b0   :  { %2404 = vmatprep.subr.bf16.mxu0 %v20755_v16  ;;  %2445 = vmatprep.subr.bf16.mxu1 %v20758_v17  ;;  %v20843_v16 = vld [vmem:[#allocation9 + $0x40] ss:$164 sps:$4 sm:$0xff]   ;;  %v20846_v17 = vld [vmem:[#allocation9 + $0x48] ss:$164 sps:$4 sm:$0xff]  }
 0x1b1   :  { %2434 = vmatprep.mubr.bf16.mxu0 %v25311_v0  ;;  %2475 = vmatprep.mubr.bf16.mxu1 %v25311_v0 }
 0x1b3   :  { %2405 = vmatpush1.bf16.msra.mxu0 %v20753_v18  ;;  %2446 = vmatpush1.bf16.msra.mxu1 %v20756_v19  ;;  %v20851_v18 = vld [vmem:[#allocation9 + $0x18c] ss:$164 sps:$4 sm:$0xff]   ;;  %v20854_v19 = vld [vmem:[#allocation9 + $0x194] ss:$164 sps:$4 sm:$0xff]  }
 0x1b4   :  { %2406 = vmatprep.subr.bf16.mxu0 %v20761_v20  ;;  %2447 = vmatprep.subr.bf16.mxu1 %v20764_v21  ;;  %v20849_v20 = vld [vmem:[#allocation9 + $0x188] ss:$164 sps:$4 sm:$0xff]   ;;  %v20852_v21 = vld [vmem:[#allocation9 + $0x190] ss:$164 sps:$4 sm:$0xff]  }
 0x1b7   :  { %2407 = vmatpush1.bf16.msra.mxu0 %v20759_v22  ;;  %2448 = vmatpush1.bf16.msra.mxu1 %v20762_v23  ;;  %v20857_v22 = vld [vmem:[#allocation9 + $0x2d4] ss:$164 sps:$4 sm:$0xff]   ;;  %v20860_v23 = vld [vmem:[#allocation9 + $0x2dc] ss:$164 sps:$4 sm:$0xff]  }
 0x1b8   :  { %2408 = vmatprep.subr.bf16.mxu0 %v20767_v24  ;;  %2449 = vmatprep.subr.bf16.mxu1 %v20770_v25  ;;  %v20855_v24 = vld [vmem:[#allocation9 + $0x2d0] ss:$164 sps:$4 sm:$0xff]   ;;  %v20858_v25 = vld [vmem:[#allocation9 + $0x2d8] ss:$164 sps:$4 sm:$0xff]  }
 0x1bb   :  { %2409 = vmatpush1.bf16.msra.mxu0 %v20765_v26  ;;  %2450 = vmatpush1.bf16.msra.mxu1 %v20768_v27  ;;  %v20863_v26 = vld [vmem:[#allocation9 + $0x41c] ss:$164 sps:$4 sm:$0xff]   ;;  %v20866_v27 = vld [vmem:[#allocation9 + $0x424] ss:$164 sps:$4 sm:$0xff]  }
 0x1bc   :  { %2410 = vmatprep.subr.bf16.mxu0 %v20773_v28  ;;  %2451 = vmatprep.subr.bf16.mxu1 %v20776_v29  ;;  %v20861_v28 = vld [vmem:[#allocation9 + $0x418] ss:$164 sps:$4 sm:$0xff]   ;;  %v20864_v29 = vld [vmem:[#allocation9 + $0x420] ss:$164 sps:$4 sm:$0xff]  }
 0x1bf   :  { %2411 = vmatpush1.bf16.msra.mxu0 %v20771_v30  ;;  %2452 = vmatpush1.bf16.msra.mxu1 %v20774_v31  ;;  %v20869_v30 = vld [vmem:[#allocation9 + $0x564] ss:$164 sps:$4 sm:$0xff]   ;;  %v20872_v31 = vld [vmem:[#allocation9 + $0x56c] ss:$164 sps:$4 sm:$0xff]  }
 0x1c0   :  { %2412 = vmatprep.subr.bf16.mxu0 %v20779_v32  ;;  %2453 = vmatprep.subr.bf16.mxu1 %v20782_v33  ;;  %v20867_v32 = vld [vmem:[#allocation9 + $0x560] ss:$164 sps:$4 sm:$0xff]   ;;  %v20870_v33 = vld [vmem:[#allocation9 + $0x568] ss:$164 sps:$4 sm:$0xff]  }
 0x1c3   :  { %2413 = vmatpush1.bf16.msra.mxu0 %v20777_v34  ;;  %2454 = vmatpush1.bf16.msra.mxu1 %v20780_v35  ;;  %v20875_v34 = vld [vmem:[#allocation9 + $0x6ac] ss:$164 sps:$4 sm:$0xff]   ;;  %v20878_v35 = vld [vmem:[#allocation9 + $0x6b4] ss:$164 sps:$4 sm:$0xff]  }
 0x1c4   :  { %2414 = vmatprep.subr.bf16.mxu0 %v20785_v36  ;;  %2455 = vmatprep.subr.bf16.mxu1 %v20788_v37  ;;  %v20873_v36 = vld [vmem:[#allocation9 + $0x6a8] ss:$164 sps:$4 sm:$0xff]   ;;  %v20876_v37 = vld [vmem:[#allocation9 + $0x6b0] ss:$164 sps:$4 sm:$0xff]  }
 0x1c7   :  { %2415 = vmatpush1.bf16.msra.mxu0 %v20783_v38  ;;  %2456 = vmatpush1.bf16.msra.mxu1 %v20786_v39  ;;  %v20881_v38 = vld [vmem:[#allocation9 + $0x7f4] ss:$164 sps:$4 sm:$0xff]   ;;  %v20884_v39 = vld [vmem:[#allocation9 + $0x7fc] ss:$164 sps:$4 sm:$0xff]  }
 0x1c8   :  { %2416 = vmatprep.subr.bf16.mxu0 %v20791_v40  ;;  %2457 = vmatprep.subr.bf16.mxu1 %v20794_v41  ;;  %v20879_v40 = vld [vmem:[#allocation9 + $0x7f0] ss:$164 sps:$4 sm:$0xff]   ;;  %v20882_v41 = vld [vmem:[#allocation9 + $0x7f8] ss:$164 sps:$4 sm:$0xff]  }
 0x1cb   :  { %2417 = vmatpush1.bf16.msra.mxu0 %v20789_v42  ;;  %2458 = vmatpush1.bf16.msra.mxu1 %v20792_v43  ;;  %v20887_v42 = vld [vmem:[#allocation9 + $0x93c] ss:$164 sps:$4 sm:$0xff]   ;;  %v20890_v43 = vld [vmem:[#allocation9 + $0x944] ss:$164 sps:$4 sm:$0xff]  }
 0x1cc   :  { %2484 = vmatprep.subr.bf16.mxu0 %v20797_v44  ;;  %2525 = vmatprep.subr.bf16.mxu1 %v20800_v45  ;;  %v20885_v44 = vld [vmem:[#allocation9 + $0x938] ss:$164 sps:$4 sm:$0xff]   ;;  %v20888_v45 = vld [vmem:[#allocation9 + $0x940] ss:$164 sps:$4 sm:$0xff]  }
 0x1ce   :  { %2435 = vmatmul.mubr.bf16.vlgmr.msra.gmra.mrb[8].mxu0 %v23489_v46  ;;  %2476 = vmatmul.mubr.bf16.vlgmr.msra.gmra.mrb[8].mxu1 %v23489_v46 }
 0x1cf   :  { %2485 = vmatpush1.bf16.msra.mxu0 %v20795_v47  ;;  %2526 = vmatpush1.bf16.msra.mxu1 %v20798_v48  ;;  %v20893_v47 = vld [vmem:[#allocation9 + $0x54] ss:$164 sps:$4 sm:$0xff]   ;;  %v20896_v48 = vld [vmem:[#allocation9 + $0x5c] ss:$164 sps:$4 sm:$0xff]  }
 0x1d0   :  { %2486 = vmatprep.subr.bf16.mxu0 %v20803_v49  ;;  %2527 = vmatprep.subr.bf16.mxu1 %v20806_v50  ;;  %v20891_v49 = vld [vmem:[#allocation9 + $0x50] ss:$164 sps:$4 sm:$0xff]   ;;  %v20894_v50 = vld [vmem:[#allocation9 + $0x58] ss:$164 sps:$4 sm:$0xff]  }
 0x1d1   :  { %2516 = vmatprep.mubr.bf16.mxu0 %v25311_v0  ;;  %2557 = vmatprep.mubr.bf16.mxu1 %v25311_v0 }
 0x1d3   :  { %2487 = vmatpush1.bf16.msra.mxu0 %v20801_v51  ;;  %2528 = vmatpush1.bf16.msra.mxu1 %v20804_v52  ;;  %v20899_v51 = vld [vmem:[#allocation9 + $0x19c] ss:$164 sps:$4 sm:$0xff]   ;;  %v20902_v52 = vld [vmem:[#allocation9 + $0x1a4] ss:$164 sps:$4 sm:$0xff]  }
 0x1d4   :  { %2488 = vmatprep.subr.bf16.mxu0 %v20809_v53  ;;  %2529 = vmatprep.subr.bf16.mxu1 %v20812_v54  ;;  %v20897_v53 = vld [vmem:[#allocation9 + $0x198] ss:$164 sps:$4 sm:$0xff]   ;;  %v20900_v54 = vld [vmem:[#allocation9 + $0x1a0] ss:$164 sps:$4 sm:$0xff]  }
 0x1d7   :  { %2489 = vmatpush1.bf16.msra.mxu0 %v20807_v55  ;;  %2530 = vmatpush1.bf16.msra.mxu1 %v20810_v56  ;;  %v20905_v55 = vld [vmem:[#allocation9 + $0x2e4] ss:$164 sps:$4 sm:$0xff]   ;;  %v20908_v56 = vld [vmem:[#allocation9 + $0x2ec] ss:$164 sps:$4 sm:$0xff]  }
 0x1d8   :  { %2490 = vmatprep.subr.bf16.mxu0 %v20815_v57  ;;  %2531 = vmatprep.subr.bf16.mxu1 %v20818_v58  ;;  %v20903_v57 = vld [vmem:[#allocation9 + $0x2e0] ss:$164 sps:$4 sm:$0xff]   ;;  %v20906_v58 = vld [vmem:[#allocation9 + $0x2e8] ss:$164 sps:$4 sm:$0xff]  }
 0x1db   :  { %2491 = vmatpush1.bf16.msra.mxu0 %v20813_v59  ;;  %2532 = vmatpush1.bf16.msra.mxu1 %v20816_v60  ;;  %v20911_v59 = vld [vmem:[#allocation9 + $0x42c] ss:$164 sps:$4 sm:$0xff]   ;;  %v20914_v60 = vld [vmem:[#allocation9 + $0x434] ss:$164 sps:$4 sm:$0xff]  }
 0x1dc   :  { %2492 = vmatprep.subr.bf16.mxu0 %v20821_v61  ;;  %2533 = vmatprep.subr.bf16.mxu1 %v20824_v62  ;;  %v20909_v61 = vld [vmem:[#allocation9 + $0x428] ss:$164 sps:$4 sm:$0xff]   ;;  %v20912_v62 = vld [vmem:[#allocation9 + $0x430] ss:$164 sps:$4 sm:$0xff]  }
 0x1df   :  { %2493 = vmatpush1.bf16.msra.mxu0 %v20819_v63  ;;  %2534 = vmatpush1.bf16.msra.mxu1 %v20822_v1  ;;  %v20917_v63 = vld [vmem:[#allocation9 + $0x574] ss:$164 sps:$4 sm:$0xff]   ;;  %v20920_v1 = vld [vmem:[#allocation9 + $0x57c] ss:$164 sps:$4 sm:$0xff]  }
 0x1e0   :  { %2494 = vmatprep.subr.bf16.mxu0 %v20827_v2  ;;  %2535 = vmatprep.subr.bf16.mxu1 %v20830_v3  ;;  %v20915_v2 = vld [vmem:[#allocation9 + $0x570] ss:$164 sps:$4 sm:$0xff]   ;;  %v20918_v3 = vld [vmem:[#allocation9 + $0x578] ss:$164 sps:$4 sm:$0xff]  }
 0x1e3   :  { %2495 = vmatpush1.bf16.msra.mxu0 %v20825_v4  ;;  %2536 = vmatpush1.bf16.msra.mxu1 %v20828_v5  ;;  %v20923_v4 = vld [vmem:[#allocation9 + $0x6bc] ss:$164 sps:$4 sm:$0xff]   ;;  %v20926_v5 = vld [vmem:[#allocation9 + $0x6c4] ss:$164 sps:$4 sm:$0xff]  }
 0x1e4   :  { %2496 = vmatprep.subr.bf16.mxu0 %v20833_v6  ;;  %2537 = vmatprep.subr.bf16.mxu1 %v20836_v7  ;;  %v20921_v6 = vld [vmem:[#allocation9 + $0x6b8] ss:$164 sps:$4 sm:$0xff]   ;;  %v20924_v7 = vld [vmem:[#allocation9 + $0x6c0] ss:$164 sps:$4 sm:$0xff]  }
 0x1e7   :  { %2497 = vmatpush1.bf16.msra.mxu0 %v20831_v8  ;;  %2538 = vmatpush1.bf16.msra.mxu1 %v20834_v9  ;;  %v20929_v8 = vld [vmem:[#allocation9 + $0x804] ss:$164 sps:$4 sm:$0xff]   ;;  %v20932_v9 = vld [vmem:[#allocation9 + $0x80c] ss:$164 sps:$4 sm:$0xff]  }
 0x1e8   :  { %2498 = vmatprep.subr.bf16.mxu0 %v20839_v10  ;;  %2539 = vmatprep.subr.bf16.mxu1 %v20842_v11  ;;  %v20927_v10 = vld [vmem:[#allocation9 + $0x800] ss:$164 sps:$4 sm:$0xff]   ;;  %v20930_v11 = vld [vmem:[#allocation9 + $0x808] ss:$164 sps:$4 sm:$0xff]  }
 0x1eb   :  { %2499 = vmatpush1.bf16.msra.mxu0 %v20837_v12  ;;  %2540 = vmatpush1.bf16.msra.mxu1 %v20840_v13  ;;  %v20935_v12 = vld [vmem:[#allocation9 + $0x94c] ss:$164 sps:$4 sm:$0xff]   ;;  %v20938_v13 = vld [vmem:[#allocation9 + $0x954] ss:$164 sps:$4 sm:$0xff]  }
 0x1ec   :  { %2566 = vmatprep.subr.bf16.mxu0 %v20845_v14  ;;  %2607 = vmatprep.subr.bf16.mxu1 %v20848_v15  ;;  %v20933_v14 = vld [vmem:[#allocation9 + $0x948] ss:$164 sps:$4 sm:$0xff]   ;;  %v20936_v15 = vld [vmem:[#allocation9 + $0x950] ss:$164 sps:$4 sm:$0xff]  }
 0x1ee   :  { %2517 = vmatmul.mubr.bf16.vlgmr.msra.gmra.mrb[12].mxu0 %v23489_v46  ;;  %2558 = vmatmul.mubr.bf16.vlgmr.msra.gmra.mrb[12].mxu1 %v23489_v46 }
 0x1ef   :  { %2567 = vmatpush1.bf16.msra.mxu0 %v20843_v16  ;;  %2608 = vmatpush1.bf16.msra.mxu1 %v20846_v17  ;;  %v20941_v16 = vld [vmem:[#allocation9 + $0x64] ss:$164 sps:$4 sm:$0xff]   ;;  %v20944_v17 = vld [vmem:[#allocation9 + $0x6c] ss:$164 sps:$4 sm:$0xff]  }
 0x1f0   :  { %2568 = vmatprep.subr.bf16.mxu0 %v20851_v18  ;;  %2609 = vmatprep.subr.bf16.mxu1 %v20854_v19  ;;  %v20939_v18 = vld [vmem:[#allocation9 + $0x60] ss:$164 sps:$4 sm:$0xff]   ;;  %v20942_v19 = vld [vmem:[#allocation9 + $0x68] ss:$164 sps:$4 sm:$0xff]  }
 0x1f1   :  { %2598 = vmatprep.mubr.bf16.mxu0 %v25311_v0  ;;  %2639 = vmatprep.mubr.bf16.mxu1 %v25311_v0 }
 0x1f3   :  { %2569 = vmatpush1.bf16.msra.mxu0 %v20849_v20  ;;  %2610 = vmatpush1.bf16.msra.mxu1 %v20852_v21  ;;  %v20947_v20 = vld [vmem:[#allocation9 + $0x1ac] ss:$164 sps:$4 sm:$0xff]   ;;  %v20950_v21 = vld [vmem:[#allocation9 + $0x1b4] ss:$164 sps:$4 sm:$0xff]  }
 0x1f4   :  { %2570 = vmatprep.subr.bf16.mxu0 %v20857_v22  ;;  %2611 = vmatprep.subr.bf16.mxu1 %v20860_v23  ;;  %v20945_v22 = vld [vmem:[#allocation9 + $0x1a8] ss:$164 sps:$4 sm:$0xff]   ;;  %v20948_v23 = vld [vmem:[#allocation9 + $0x1b0] ss:$164 sps:$4 sm:$0xff]  }
 0x1f7   :  { %2571 = vmatpush1.bf16.msra.mxu0 %v20855_v24  ;;  %2612 = vmatpush1.bf16.msra.mxu1 %v20858_v25  ;;  %v20953_v24 = vld [vmem:[#allocation9 + $0x2f4] ss:$164 sps:$4 sm:$0xff]   ;;  %v20956_v25 = vld [vmem:[#allocation9 + $0x2fc] ss:$164 sps:$4 sm:$0xff]  }
 0x1f8   :  { %2572 = vmatprep.subr.bf16.mxu0 %v20863_v26  ;;  %2613 = vmatprep.subr.bf16.mxu1 %v20866_v27  ;;  %v20951_v26 = vld [vmem:[#allocation9 + $0x2f0] ss:$164 sps:$4 sm:$0xff]   ;;  %v20954_v27 = vld [vmem:[#allocation9 + $0x2f8] ss:$164 sps:$4 sm:$0xff]  }
 0x1fb   :  { %2573 = vmatpush1.bf16.msra.mxu0 %v20861_v28  ;;  %2614 = vmatpush1.bf16.msra.mxu1 %v20864_v29  ;;  %v20959_v28 = vld [vmem:[#allocation9 + $0x43c] ss:$164 sps:$4 sm:$0xff]   ;;  %v20962_v29 = vld [vmem:[#allocation9 + $0x444] ss:$164 sps:$4 sm:$0xff]  }
 0x1fc   :  { %2574 = vmatprep.subr.bf16.mxu0 %v20869_v30  ;;  %2615 = vmatprep.subr.bf16.mxu1 %v20872_v31  ;;  %v20957_v30 = vld [vmem:[#allocation9 + $0x438] ss:$164 sps:$4 sm:$0xff]   ;;  %v20960_v31 = vld [vmem:[#allocation9 + $0x440] ss:$164 sps:$4 sm:$0xff]  }
 0x1ff   :  { %2575 = vmatpush1.bf16.msra.mxu0 %v20867_v32  ;;  %2616 = vmatpush1.bf16.msra.mxu1 %v20870_v33  ;;  %v20965_v32 = vld [vmem:[#allocation9 + $0x584] ss:$164 sps:$4 sm:$0xff]   ;;  %v20968_v33 = vld [vmem:[#allocation9 + $0x58c] ss:$164 sps:$4 sm:$0xff]  }
 0x200   :  { %2576 = vmatprep.subr.bf16.mxu0 %v20875_v34  ;;  %2617 = vmatprep.subr.bf16.mxu1 %v20878_v35  ;;  %v20963_v34 = vld [vmem:[#allocation9 + $0x580] ss:$164 sps:$4 sm:$0xff]   ;;  %v20966_v35 = vld [vmem:[#allocation9 + $0x588] ss:$164 sps:$4 sm:$0xff]  }
 0x203   :  { %2577 = vmatpush1.bf16.msra.mxu0 %v20873_v36  ;;  %2618 = vmatpush1.bf16.msra.mxu1 %v20876_v37  ;;  %v20971_v36 = vld [vmem:[#allocation9 + $0x6cc] ss:$164 sps:$4 sm:$0xff]   ;;  %v20974_v37 = vld [vmem:[#allocation9 + $0x6d4] ss:$164 sps:$4 sm:$0xff]  }
 0x204   :  { %2578 = vmatprep.subr.bf16.mxu0 %v20881_v38  ;;  %2619 = vmatprep.subr.bf16.mxu1 %v20884_v39  ;;  %v20969_v38 = vld [vmem:[#allocation9 + $0x6c8] ss:$164 sps:$4 sm:$0xff]   ;;  %v20972_v39 = vld [vmem:[#allocation9 + $0x6d0] ss:$164 sps:$4 sm:$0xff]  }
 0x207   :  { %2579 = vmatpush1.bf16.msra.mxu0 %v20879_v40  ;;  %2620 = vmatpush1.bf16.msra.mxu1 %v20882_v41  ;;  %v20977_v40 = vld [vmem:[#allocation9 + $0x814] ss:$164 sps:$4 sm:$0xff]   ;;  %v20980_v41 = vld [vmem:[#allocation9 + $0x81c] ss:$164 sps:$4 sm:$0xff]  }
 0x208   :  { %2580 = vmatprep.subr.bf16.mxu0 %v20887_v42  ;;  %2621 = vmatprep.subr.bf16.mxu1 %v20890_v43  ;;  %v20975_v42 = vld [vmem:[#allocation9 + $0x810] ss:$164 sps:$4 sm:$0xff]   ;;  %v20978_v43 = vld [vmem:[#allocation9 + $0x818] ss:$164 sps:$4 sm:$0xff]  }
 0x20b   :  { %2581 = vmatpush1.bf16.msra.mxu0 %v20885_v44  ;;  %2622 = vmatpush1.bf16.msra.mxu1 %v20888_v45  ;;  %v20983_v44 = vld [vmem:[#allocation9 + $0x95c] ss:$164 sps:$4 sm:$0xff]   ;;  %v20986_v45 = vld [vmem:[#allocation9 + $0x964] ss:$164 sps:$4 sm:$0xff]  }
 0x20c   :  { %2648 = vmatprep.subr.bf16.mxu0 %v20893_v47  ;;  %2689 = vmatprep.subr.bf16.mxu1 %v20896_v48  ;;  %v20981_v47 = vld [vmem:[#allocation9 + $0x958] ss:$164 sps:$4 sm:$0xff]   ;;  %v20984_v48 = vld [vmem:[#allocation9 + $0x960] ss:$164 sps:$4 sm:$0xff]  }
 0x20e   :  { %2599 = vmatmul.mubr.bf16.vlgmr.msra.gmra.mrb[16].mxu0 %v23489_v46  ;;  %2640 = vmatmul.mubr.bf16.vlgmr.msra.gmra.mrb[16].mxu1 %v23489_v46 }
 0x20f   :  { %2649 = vmatpush1.bf16.msra.mxu0 %v20891_v49  ;;  %2690 = vmatpush1.bf16.msra.mxu1 %v20894_v50  ;;  %v20989_v49 = vld [vmem:[#allocation9 + $0x74] ss:$164 sps:$4 sm:$0xff]   ;;  %v20992_v50 = vld [vmem:[#allocation9 + $0x7c] ss:$164 sps:$4 sm:$0xff]  }
 0x210   :  { %2650 = vmatprep.subr.bf16.mxu0 %v20899_v51  ;;  %2691 = vmatprep.subr.bf16.mxu1 %v20902_v52  ;;  %v20987_v51 = vld [vmem:[#allocation9 + $0x70] ss:$164 sps:$4 sm:$0xff]   ;;  %v20990_v52 = vld [vmem:[#allocation9 + $0x78] ss:$164 sps:$4 sm:$0xff]  }
 0x211   :  { %2680 = vmatprep.mubr.bf16.mxu0 %v25311_v0  ;;  %2721 = vmatprep.mubr.bf16.mxu1 %v25311_v0 }
 0x213   :  { %2651 = vmatpush1.bf16.msra.mxu0 %v20897_v53  ;;  %2692 = vmatpush1.bf16.msra.mxu1 %v20900_v54  ;;  %v20995_v53 = vld [vmem:[#allocation9 + $0x1bc] ss:$164 sps:$4 sm:$0xff]   ;;  %v20998_v54 = vld [vmem:[#allocation9 + $0x1c4] ss:$164 sps:$4 sm:$0xff]  }
 0x214   :  { %2652 = vmatprep.subr.bf16.mxu0 %v20905_v55  ;;  %2693 = vmatprep.subr.bf16.mxu1 %v20908_v56  ;;  %v20993_v55 = vld [vmem:[#allocation9 + $0x1b8] ss:$164 sps:$4 sm:$0xff]   ;;  %v20996_v56 = vld [vmem:[#allocation9 + $0x1c0] ss:$164 sps:$4 sm:$0xff]  }
 0x217   :  { %2653 = vmatpush1.bf16.msra.mxu0 %v20903_v57  ;;  %2694 = vmatpush1.bf16.msra.mxu1 %v20906_v58  ;;  %v21001_v57 = vld [vmem:[#allocation9 + $0x304] ss:$164 sps:$4 sm:$0xff]   ;;  %v21004_v58 = vld [vmem:[#allocation9 + $0x30c] ss:$164 sps:$4 sm:$0xff]  }
 0x218   :  { %2654 = vmatprep.subr.bf16.mxu0 %v20911_v59  ;;  %2695 = vmatprep.subr.bf16.mxu1 %v20914_v60  ;;  %v20999_v59 = vld [vmem:[#allocation9 + $0x300] ss:$164 sps:$4 sm:$0xff]   ;;  %v21002_v60 = vld [vmem:[#allocation9 + $0x308] ss:$164 sps:$4 sm:$0xff]  }
 0x21b   :  { %2655 = vmatpush1.bf16.msra.mxu0 %v20909_v61  ;;  %2696 = vmatpush1.bf16.msra.mxu1 %v20912_v62  ;;  %v21007_v61 = vld [vmem:[#allocation9 + $0x44c] ss:$164 sps:$4 sm:$0xff]   ;;  %v21010_v62 = vld [vmem:[#allocation9 + $0x454] ss:$164 sps:$4 sm:$0xff]  }
 0x21c   :  { %2656 = vmatprep.subr.bf16.mxu0 %v20917_v63  ;;  %2697 = vmatprep.subr.bf16.mxu1 %v20920_v1  ;;  %v21005_v63 = vld [vmem:[#allocation9 + $0x448] ss:$164 sps:$4 sm:$0xff]   ;;  %v21008_v1 = vld [vmem:[#allocation9 + $0x450] ss:$164 sps:$4 sm:$0xff]  }
 0x21f   :  { %2657 = vmatpush1.bf16.msra.mxu0 %v20915_v2  ;;  %2698 = vmatpush1.bf16.msra.mxu1 %v20918_v3  ;;  %v21013_v2 = vld [vmem:[#allocation9 + $0x594] ss:$164 sps:$4 sm:$0xff]   ;;  %v21016_v3 = vld [vmem:[#allocation9 + $0x59c] ss:$164 sps:$4 sm:$0xff]  }
 0x220   :  { %2658 = vmatprep.subr.bf16.mxu0 %v20923_v4  ;;  %2699 = vmatprep.subr.bf16.mxu1 %v20926_v5  ;;  %v21011_v4 = vld [vmem:[#allocation9 + $0x590] ss:$164 sps:$4 sm:$0xff]   ;;  %v21014_v5 = vld [vmem:[#allocation9 + $0x598] ss:$164 sps:$4 sm:$0xff]  }
 0x223   :  { %2659 = vmatpush1.bf16.msra.mxu0 %v20921_v6  ;;  %2700 = vmatpush1.bf16.msra.mxu1 %v20924_v7  ;;  %v21019_v6 = vld [vmem:[#allocation9 + $0x6dc] ss:$164 sps:$4 sm:$0xff]   ;;  %v21022_v7 = vld [vmem:[#allocation9 + $0x6e4] ss:$164 sps:$4 sm:$0xff]  }
 0x224   :  { %2660 = vmatprep.subr.bf16.mxu0 %v20929_v8  ;;  %2701 = vmatprep.subr.bf16.mxu1 %v20932_v9  ;;  %v21017_v8 = vld [vmem:[#allocation9 + $0x6d8] ss:$164 sps:$4 sm:$0xff]   ;;  %v21020_v9 = vld [vmem:[#allocation9 + $0x6e0] ss:$164 sps:$4 sm:$0xff]  }
 0x227   :  { %2661 = vmatpush1.bf16.msra.mxu0 %v20927_v10  ;;  %2702 = vmatpush1.bf16.msra.mxu1 %v20930_v11  ;;  %v21025_v10 = vld [vmem:[#allocation9 + $0x824] ss:$164 sps:$4 sm:$0xff]   ;;  %v21028_v11 = vld [vmem:[#allocation9 + $0x82c] ss:$164 sps:$4 sm:$0xff]  }
 0x228   :  { %2662 = vmatprep.subr.bf16.mxu0 %v20935_v12  ;;  %2703 = vmatprep.subr.bf16.mxu1 %v20938_v13 }
 0x22b   :  { %2663 = vmatpush1.bf16.msra.mxu0 %v20933_v14  ;;  %2704 = vmatpush1.bf16.msra.mxu1 %v20936_v15  ;;  %v21023_v14 = vld [vmem:[#allocation9 + $0x820] ss:$164 sps:$4 sm:$0xff]   ;;  %v21026_v15 = vld [vmem:[#allocation9 + $0x828] ss:$164 sps:$4 sm:$0xff]  }
 0x22c   :  { %2730 = vmatprep.subr.bf16.mxu0 %v20941_v16  ;;  %2771 = vmatprep.subr.bf16.mxu1 %v20944_v17 }
 0x22e   :  { %2681 = vmatmul.mubr.bf16.vlgmr.msra.gmra.mrb[20].mxu0 %v23489_v46  ;;  %2722 = vmatmul.mubr.bf16.vlgmr.msra.gmra.mrb[20].mxu1 %v23489_v46 }
 0x22f   :  { %2731 = vmatpush1.bf16.msra.mxu0 %v20939_v18  ;;  %2772 = vmatpush1.bf16.msra.mxu1 %v20942_v19  ;;  %v21031_v18 = vld [vmem:[#allocation9 + $0x96c] ss:$164 sps:$4 sm:$0xff]   ;;  %v21034_v19 = vld [vmem:[#allocation9 + $0x974] ss:$164 sps:$4 sm:$0xff]  }
 0x230   :  { %2732 = vmatprep.subr.bf16.mxu0 %v20947_v20  ;;  %2773 = vmatprep.subr.bf16.mxu1 %v20950_v21 }
 0x231   :  { %2762 = vmatprep.mubr.bf16.mxu0 %v25311_v0  ;;  %2803 = vmatprep.mubr.bf16.mxu1 %v25311_v0 }
 0x233   :  { %2733 = vmatpush1.bf16.msra.mxu0 %v20945_v22  ;;  %2774 = vmatpush1.bf16.msra.mxu1 %v20948_v23 }
 0x234   :  { %2734 = vmatprep.subr.bf16.mxu0 %v20953_v24  ;;  %2775 = vmatprep.subr.bf16.mxu1 %v20956_v25  ;;  %v21029_v24 = vld [vmem:[#allocation9 + $0x968] ss:$164 sps:$4 sm:$0xff]   ;;  %v21032_v25 = vld [vmem:[#allocation9 + $0x970] ss:$164 sps:$4 sm:$0xff]  }
 0x237   :  { %2735 = vmatpush1.bf16.msra.mxu0 %v20951_v26  ;;  %2776 = vmatpush1.bf16.msra.mxu1 %v20954_v27  ;;  %v21037_v26 = vld [vmem:[#allocation9 + $0x84] ss:$164 sps:$4 sm:$0xff]   ;;  %v21040_v27 = vld [vmem:[#allocation9 + $0x8c] ss:$164 sps:$4 sm:$0xff]  }
 0x238   :  { %2736 = vmatprep.subr.bf16.mxu0 %v20959_v28  ;;  %2777 = vmatprep.subr.bf16.mxu1 %v20962_v29  ;;  %v21035_v28 = vld [vmem:[#allocation9 + $0x80] ss:$164 sps:$4 sm:$0xff]   ;;  %v21038_v29 = vld [vmem:[#allocation9 + $0x88] ss:$164 sps:$4 sm:$0xff]  }
 0x23b   :  { %2737 = vmatpush1.bf16.msra.mxu0 %v20957_v30  ;;  %2778 = vmatpush1.bf16.msra.mxu1 %v20960_v31  ;;  %v21043_v30 = vld [vmem:[#allocation9 + $0x1cc] ss:$164 sps:$4 sm:$0xff]   ;;  %v21046_v31 = vld [vmem:[#allocation9 + $0x1d4] ss:$164 sps:$4 sm:$0xff]  }
 0x23c   :  { %2738 = vmatprep.subr.bf16.mxu0 %v20965_v32  ;;  %2779 = vmatprep.subr.bf16.mxu1 %v20968_v33  ;;  %v25315_v32 = vlaneseq  ;;  %v21041_v33 = vld [vmem:[#allocation9 + $0x1c8] ss:$164 sps:$4 sm:$0xff]  }
 0x23f   :  { %2739 = vmatpush1.bf16.msra.mxu0 %v20963_v34  ;;  %2780 = vmatpush1.bf16.msra.mxu1 %v20966_v35  ;;  %v21044_v34 = vld [vmem:[#allocation9 + $0x1d0] ss:$164 sps:$4 sm:$0xff]  }
 0x240   :  { %2740 = vmatprep.subr.bf16.mxu0 %v20971_v36  ;;  %2781 = vmatprep.subr.bf16.mxu1 %v20974_v37  ;;  %v21049_v35 = vld [vmem:[#allocation9 + $0x314] ss:$164 sps:$4 sm:$0xff]   ;;  %v21052_v36 = vld [vmem:[#allocation9 + $0x31c] ss:$164 sps:$4 sm:$0xff]   ;;  %v23530_v37 = vshrl.u32 %v25315_v32, 7 }
 0x241   :  { %v21246_v32 = vld [vmem:[#allocation12 + $0x330] sm:$0xff]  }
 0x243   :  { %2741 = vmatpush1.bf16.msra.mxu0 %v20969_v38  ;;  %2782 = vmatpush1.bf16.msra.mxu1 %v20972_v39  ;;  %v21047_v38 = vld [vmem:[#allocation9 + $0x310] ss:$164 sps:$4 sm:$0xff]   ;;  %v21050_v39 = vld [vmem:[#allocation9 + $0x318] ss:$164 sps:$4 sm:$0xff]  }
 0x244   :  { %2742 = vmatprep.subr.bf16.mxu0 %v20977_v40  ;;  %2783 = vmatprep.subr.bf16.mxu1 %v20980_v41  ;;  %v21055_v40 = vld [vmem:[#allocation9 + $0x45c] ss:$164 sps:$4 sm:$0xff]   ;;  %v21058_v41 = vld [vmem:[#allocation9 + $0x464] ss:$164 sps:$4 sm:$0xff]  }
 0x247   :  { %2743 = vmatpush1.bf16.msra.mxu0 %v20975_v42  ;;  %2784 = vmatpush1.bf16.msra.mxu1 %v20978_v43  ;;  %v21053_v42 = vld [vmem:[#allocation9 + $0x458] ss:$164 sps:$4 sm:$0xff]   ;;  %v21056_v43 = vld [vmem:[#allocation9 + $0x460] ss:$164 sps:$4 sm:$0xff]  }
 0x248   :  { %2744 = vmatprep.subr.bf16.mxu0 %v20983_v44  ;;  %2785 = vmatprep.subr.bf16.mxu1 %v20986_v45  ;;  %v21061_v44 = vld [vmem:[#allocation9 + $0x5a4] ss:$164 sps:$4 sm:$0xff]   ;;  %v21064_v45 = vld [vmem:[#allocation9 + $0x5ac] ss:$164 sps:$4 sm:$0xff]  }
 0x24b   :  { %2745 = vmatpush1.bf16.msra.mxu0 %v20981_v47  ;;  %2786 = vmatpush1.bf16.msra.mxu1 %v20984_v48  ;;  %v21059_v47 = vld [vmem:[#allocation9 + $0x5a0] ss:$164 sps:$4 sm:$0xff]   ;;  %v21062_v48 = vld [vmem:[#allocation9 + $0x5a8] ss:$164 sps:$4 sm:$0xff]  }
 0x24c   :  { %2812 = vmatprep.subr.bf16.mxu0 %v20989_v49  ;;  %2853 = vmatprep.subr.bf16.mxu1 %v20992_v50  ;;  %v23535_v49 = vsub.s32 6, %v23530_v37  ;;  %v23537_v50 = vld [vmem:[#allocation10] sm:$0xff] }
 0x24e   :  { %2763 = vmatmul.mubr.bf16.vlgmr.msra.gmra.mrb[24].mxu0 %v23489_v46  ;;  %2804 = vmatmul.mubr.bf16.vlgmr.msra.gmra.mrb[24].mxu1 %v23489_v46  ;;  %25415 = vst [vmem:[#allocation41_spill] sm:$0xff] %v23535_v49 }
 0x24f   :  { %2813 = vmatpush1.bf16.msra.mxu0 %v20987_v51  ;;  %2854 = vmatpush1.bf16.msra.mxu1 %v20990_v52  ;;  %v23540_v51 = vsub.s32 7, %v23530_v37  ;;  %v21067_v52 = vld [vmem:[#allocation9 + $0x6ec] ss:$164 sps:$4 sm:$0xff]  }
 0x250   :  { %2814 = vmatprep.subr.bf16.mxu0 %v20995_v53  ;;  %2855 = vmatprep.subr.bf16.mxu1 %v20998_v54  ;;  %v21070_v53 = vld [vmem:[#allocation9 + $0x6f4] ss:$164 sps:$4 sm:$0xff]   ;;  %v21065_v54 = vld [vmem:[#allocation9 + $0x6e8] ss:$164 sps:$4 sm:$0xff]  }
 0x251   :  { %2844 = vmatprep.mubr.bf16.mxu0 %v25311_v0  ;;  %2885 = vmatprep.mubr.bf16.mxu1 %v25311_v0  ;;  %25416 = vst [vmem:[#allocation42_spill] sm:$0xff] %v23540_v51 }
 0x253   :  { %2815 = vmatpush1.bf16.msra.mxu0 %v20993_v55  ;;  %2856 = vmatpush1.bf16.msra.mxu1 %v20996_v56  ;;  %v21068_v55 = vld [vmem:[#allocation9 + $0x6f0] ss:$164 sps:$4 sm:$0xff]   ;;  %v3135_v56 = vrot.slane %v23537_v50, %v23535_v49 }
 0x254   :  { %2816 = vmatprep.subr.bf16.mxu0 %v21001_v57  ;;  %2857 = vmatprep.subr.bf16.mxu1 %v21004_v58  ;;  %v21073_v57 = vld [vmem:[#allocation9 + $0x834] ss:$164 sps:$4 sm:$0xff]   ;;  %v3139_v58 = vrot.slane %v23537_v50, %v23540_v51 }
 0x257   :  { %2817 = vmatpush1.bf16.msra.mxu0 %v20999_v59  ;;  %2858 = vmatpush1.bf16.msra.mxu1 %v21002_v60  ;;  %v21076_v59 = vld [vmem:[#allocation9 + $0x83c] ss:$164 sps:$4 sm:$0xff]  }
 0x258   :  { %2818 = vmatprep.subr.bf16.mxu0 %v21007_v61  ;;  %2859 = vmatprep.subr.bf16.mxu1 %v21010_v62  ;;  %v21071_v62 = vld [vmem:[#allocation9 + $0x830] ss:$164 sps:$4 sm:$0xff]  }
 0x25b   :  { %2819 = vmatpush1.bf16.msra.mxu0 %v21005_v63  ;;  %2860 = vmatpush1.bf16.msra.mxu1 %v21008_v1  ;;  %v21074_v63 = vld [vmem:[#allocation9 + $0x838] ss:$164 sps:$4 sm:$0xff]  }
 0x25c   :  { %2820 = vmatprep.subr.bf16.mxu0 %v21013_v2  ;;  %2861 = vmatprep.subr.bf16.mxu1 %v21016_v3 }
 0x25f   :  { %2821 = vmatpush1.bf16.msra.mxu0 %v21011_v4  ;;  %2862 = vmatpush1.bf16.msra.mxu1 %v21014_v5  ;;  %v21079_v4 = vld [vmem:[#allocation9 + $0x97c] ss:$164 sps:$4 sm:$0xff]  }
 0x260   :  { %2822 = vmatprep.subr.bf16.mxu0 %v21019_v6  ;;  %2863 = vmatprep.subr.bf16.mxu1 %v21022_v7 }
 0x261   :  { %v23519_v12 = vpop.f32.mrb[0].mxu0  ;;  %v23521_v13 = vpop.f32.mrb[0].mxu1 }
 0x262   :  { %v23523_v16 = vpop.f32.mrb[1].mxu0  ;;  %v23525_v17 = vpop.f32.mrb[1].mxu1 }
 0x263   :  { %2823 = vmatpush1.bf16.msra.mxu0 %v21017_v8  ;;  %2864 = vmatpush1.bf16.msra.mxu1 %v21020_v9  ;;  %v2276_v20 = vpop.f32.mrb[2].mxu0  ;;  %v2317_v21 = vpop.f32.mrb[2].mxu1  ;;  %v21082_v8 = vld [vmem:[#allocation9 + $0x984] ss:$164 sps:$4 sm:$0xff]  }
 0x264   :  { %v2277_v22 = vpop.f32.mrb[3].mxu0  ;;  %v2318_v23 = vpop.f32.mrb[3].mxu1  ;;  %2824 = vmatprep.subr.bf16.mxu0 %v21025_v10  ;;  %2865 = vmatprep.subr.bf16.mxu1 %v21028_v11  ;;  %v21077_v11 = vld [vmem:[#allocation9 + $0x978] ss:$164 sps:$4 sm:$0xff]  }
 0x265   :  { %v21086_v20 = vld [vmem:[#allocation9 + $0x98] ss:$164 sps:$4 sm:$0xff]   ;;  %v21094_v22 = vld [vmem:[#allocation9 + $0x1e4] ss:$164 sps:$4 sm:$0xff]  }
 0x266   :  { %v21091_v21 = vld [vmem:[#allocation9 + $0x1dc] ss:$164 sps:$4 sm:$0xff]  }
 0x267   :  { %2825 = vmatpush1.bf16.msra.mxu0 %v21023_v14  ;;  %2866 = vmatpush1.bf16.msra.mxu1 %v21026_v15  ;;  %v21080_v14 = vld [vmem:[#allocation9 + $0x980] ss:$164 sps:$4 sm:$0xff]   ;;  %v21085_v15 = vld [vmem:[#allocation9 + $0x94] ss:$164 sps:$4 sm:$0xff]  }
 0x268   :  { %2826 = vmatprep.subr.bf16.mxu0 %v21031_v18  ;;  %2867 = vmatprep.subr.bf16.mxu1 %v21034_v19  ;;  %v21088_v18 = vld [vmem:[#allocation9 + $0x9c] ss:$164 sps:$4 sm:$0xff]   ;;  %v21083_v19 = vld [vmem:[#allocation9 + $0x90] ss:$164 sps:$4 sm:$0xff]  }
 0x269   :  { %v21089_v23 = vld [vmem:[#allocation9 + $0x1d8] ss:$164 sps:$4 sm:$0xff]  }
 0x26b   :  { %2827 = vmatpush1.bf16.msra.mxu0 %v21029_v24  ;;  %2868 = vmatpush1.bf16.msra.mxu1 %v21032_v25  ;;  %v21092_v24 = vld [vmem:[#allocation9 + $0x1e0] ss:$164 sps:$4 sm:$0xff]  }
 0x26c   :  { %2894 = vmatprep.subr.bf16.mxu0 %v21037_v26  ;;  %2935 = vmatprep.subr.bf16.mxu1 %v21040_v27  ;;  %v21097_v25 = vld [vmem:[#allocation9 + $0x324] ss:$164 sps:$4 sm:$0xff]   ;;  %v21100_v26 = vld [vmem:[#allocation9 + $0x32c] ss:$164 sps:$4 sm:$0xff]  }
 0x26d   :  { %v21095_v27 = vld [vmem:[#allocation9 + $0x320] ss:$164 sps:$4 sm:$0xff]  }
 0x26e   :  { %2845 = vmatmul.mubr.bf16.vlgmr.msra.gmra.mrb[28].mxu0 %v23489_v46  ;;  %2886 = vmatmul.mubr.bf16.vlgmr.msra.gmra.mrb[28].mxu1 %v23489_v46 }
 0x26f   :  { %2895 = vmatpush1.bf16.msra.mxu0 %v21035_v28  ;;  %2936 = vmatpush1.bf16.msra.mxu1 %v21038_v29  ;;  %v21098_v28 = vld [vmem:[#allocation9 + $0x328] ss:$164 sps:$4 sm:$0xff]  }
 0x270   :  { %2896 = vmatprep.subr.bf16.mxu0 %v21043_v30  ;;  %2937 = vmatprep.subr.bf16.mxu1 %v21046_v31  ;;  %v21103_v29 = vld [vmem:[#allocation9 + $0x46c] ss:$164 sps:$4 sm:$0xff]   ;;  %v21106_v30 = vld [vmem:[#allocation9 + $0x474] ss:$164 sps:$4 sm:$0xff]  }
 0x271   :  { %2926 = vmatprep.mubr.bf16.mxu0 %v25311_v0  ;;  %2967 = vmatprep.mubr.bf16.mxu1 %v25311_v0  ;;  %v21101_v31 = vld [vmem:[#allocation9 + $0x468] ss:$164 sps:$4 sm:$0xff]  }
 0x273   :  { %2897 = vmatpush1.bf16.msra.mxu0 %v21041_v33  ;;  %2938 = vmatpush1.bf16.msra.mxu1 %v21044_v34  ;;  %v21104_v33 = vld [vmem:[#allocation9 + $0x470] ss:$164 sps:$4 sm:$0xff]  }
 0x274   :  { %2898 = vmatprep.subr.bf16.mxu0 %v21049_v35  ;;  %2939 = vmatprep.subr.bf16.mxu1 %v21052_v36  ;;  %v21109_v34 = vld [vmem:[#allocation9 + $0x5b4] ss:$164 sps:$4 sm:$0xff]   ;;  %v21112_v35 = vld [vmem:[#allocation9 + $0x5bc] ss:$164 sps:$4 sm:$0xff]  }
 0x275   :  { %v21107_v36 = vld [vmem:[#allocation9 + $0x5b0] ss:$164 sps:$4 sm:$0xff]  }
 0x277   :  { %2899 = vmatpush1.bf16.msra.mxu0 %v21047_v38  ;;  %2940 = vmatpush1.bf16.msra.mxu1 %v21050_v39  ;;  %v21110_v38 = vld [vmem:[#allocation9 + $0x5b8] ss:$164 sps:$4 sm:$0xff]  }
 0x278   :  { %2900 = vmatprep.subr.bf16.mxu0 %v21055_v40  ;;  %2941 = vmatprep.subr.bf16.mxu1 %v21058_v41  ;;  %v21115_v39 = vld [vmem:[#allocation9 + $0x6fc] ss:$164 sps:$4 sm:$0xff]   ;;  %v21118_v40 = vld [vmem:[#allocation9 + $0x704] ss:$164 sps:$4 sm:$0xff]  }
 0x279   :  { %v21113_v41 = vld [vmem:[#allocation9 + $0x6f8] ss:$164 sps:$4 sm:$0xff]  }
 0x27b   :  { %2901 = vmatpush1.bf16.msra.mxu0 %v21053_v42  ;;  %2942 = vmatpush1.bf16.msra.mxu1 %v21056_v43  ;;  %v21116_v42 = vld [vmem:[#allocation9 + $0x700] ss:$164 sps:$4 sm:$0xff]  }
 0x27c   :  { %2902 = vmatprep.subr.bf16.mxu0 %v21061_v44  ;;  %2943 = vmatprep.subr.bf16.mxu1 %v21064_v45  ;;  %v21121_v43 = vld [vmem:[#allocation9 + $0x844] ss:$164 sps:$4 sm:$0xff]   ;;  %v21124_v44 = vld [vmem:[#allocation9 + $0x84c] ss:$164 sps:$4 sm:$0xff]   ;;  %v23559_v45 = vsub.s32 1, %v23530_v37 }
 0x27e   :  { %25419 = vst [vmem:[#allocation45_spill] sm:$0xff] %v23559_v45 }
 0x27f   :  { %2903 = vmatpush1.bf16.msra.mxu0 %v21059_v47  ;;  %2944 = vmatpush1.bf16.msra.mxu1 %v21062_v48 }
 0x280   :  { %2904 = vmatprep.subr.bf16.mxu0 %v21067_v52  ;;  %2945 = vmatprep.subr.bf16.mxu1 %v21070_v53  ;;  %v21119_v52 = vld [vmem:[#allocation9 + $0x840] ss:$164 sps:$4 sm:$0xff]   ;;  %v21122_v53 = vld [vmem:[#allocation9 + $0x848] ss:$164 sps:$4 sm:$0xff]  }
 0x281   :  { %v23546_v60 = vpop.f32.mrb[4].mxu0  ;;  %v2395_v61 = vpop.f32.mrb[4].mxu1 }
 0x282   :  { %v23548_v1 = vadd.f32 %v3135_v56, %v2395_v61  ;;  %v23550_v2 = vpop.f32.mrb[5].mxu0  ;;  %v2397_v3 = vpop.f32.mrb[5].mxu1  ;;  %v21127_v56 = vld [vmem:[#allocation9 + $0x98c] ss:$164 sps:$4 sm:$0xff]  }
 0x283   :  { %v23552_v5 = vadd.f32 %v3139_v58, %v2397_v3  ;;  %v2358_v6 = vpop.f32.mrb[6].mxu0  ;;  %v2399_v7 = vpop.f32.mrb[6].mxu1  ;;  %2905 = vmatpush1.bf16.msra.mxu0 %v21065_v54  ;;  %2946 = vmatpush1.bf16.msra.mxu1 %v21068_v55  ;;  %v21125_v3 = vld [vmem:[#allocation9 + $0x988] ss:$164 sps:$4 sm:$0xff]  }
 0x284   :  { %25417 = vst [vmem:[#allocation43_spill] sm:$0xff] %v23548_v1  ;;  %v2359_v9 = vpop.f32.mrb[7].mxu0  ;;  %v2400_v10 = vpop.f32.mrb[7].mxu1  ;;  %2906 = vmatprep.subr.bf16.mxu0 %v21073_v57  ;;  %2947 = vmatprep.subr.bf16.mxu1 %v21076_v59  ;;  %v21130_v59 = vld [vmem:[#allocation9 + $0x994] ss:$164 sps:$4 sm:$0xff]   ;;  %v21131_v6 = vld [vmem:[#allocation12 + $0x40] sm:$0xff]  }
 0x285   :  { %25418 = vst [vmem:[#allocation44_spill] sm:$0xff] %v23552_v5  ;;  %v21133_v9 = vld [vmem:[#allocation12] sm:$0xff]   ;;  %v21134_v10 = vld [vmem:[#allocation12 + $0x48] sm:$0xff]  }
 0x287   :  { %2907 = vmatpush1.bf16.msra.mxu0 %v21071_v62  ;;  %2948 = vmatpush1.bf16.msra.mxu1 %v21074_v63  ;;  %v3115_v63 = vrot.slane %v23537_v50, %v23559_v45 }
 0x288   :  { %2908 = vmatprep.subr.bf16.mxu0 %v21079_v4  ;;  %2949 = vmatprep.subr.bf16.mxu1 %v21082_v8  ;;  %v21128_v4 = vld [vmem:[#allocation9 + $0x990] ss:$164 sps:$4 sm:$0xff]   ;;  %v21132_v8 = vld [vmem:[#allocation9 + $0xa0] ss:$164 sps:$4 sm:$0xff]  }
 0x289   :  { %v23572_v7 = vadd.f32 %v3115_v63, %v23523_v16  ;;  %v21136_v16 = vld [vmem:[#allocation12 + $0x8] sm:$0xff]   ;;  %v21153_v63 = vld [vmem:[#allocation9 + $0x998] ss:$164 sps:$4 sm:$0xff]  }
 0x28b   :  { %2909 = vmatpush1.bf16.msra.mxu0 %v21077_v11  ;;  %2950 = vmatpush1.bf16.msra.mxu1 %v21080_v14  ;;  %25420 = vst [vmem:[#allocation46_spill] sm:$0xff] %v23572_v7  ;;  %v25313_v11 = vmov 0.0   ;;  %v23579_v14 = vpack.c.bf16 %v23572_v7, %v23572_v7 }
 0x28c   :  { %2976 = vmatprep.subr.bf16.mxu0 %v21085_v15  ;;  %3017 = vmatprep.subr.bf16.mxu1 %v21088_v18  ;;  %v21135_v15 = vld [vmem:[#allocation9 + $0x1e8] ss:$164 sps:$4 sm:$0xff]   ;;  %v21137_v18 = vld [vmem:[#allocation12 + $0x50] sm:$0xff]  }
 0x28e   :  { %2927 = vmatmul.mubr.bf16.vlgmr.msra.gmra.mrb[32].mxu0 %v23489_v46  ;;  %2968 = vmatmul.mubr.bf16.vlgmr.msra.gmra.mrb[32].mxu1 %v23489_v46 }
 0x28f   :  { %2977 = vmatpush1.bf16.msra.mxu0 %v21083_v19  ;;  %3018 = vmatpush1.bf16.msra.mxu1 %v21086_v20  ;;  %v21138_v19 = vld [vmem:[#allocation9 + $0x330] ss:$164 sps:$4 sm:$0xff]   ;;  %v21139_v20 = vld [vmem:[#allocation12 + $0x10] sm:$0xff]  }
 0x290   :  { %2978 = vmatprep.subr.bf16.mxu0 %v21091_v21  ;;  %3019 = vmatprep.subr.bf16.mxu1 %v21094_v22  ;;  %v21140_v21 = vld [vmem:[#allocation12 + $0x58] sm:$0xff]   ;;  %v21141_v22 = vld [vmem:[#allocation9 + $0x478] ss:$164 sps:$4 sm:$0xff]  }
 0x291   :  { %3008 = vmatprep.mubr.bf16.mxu0 %v25311_v0  ;;  %3049 = vmatprep.mubr.bf16.mxu1 %v25311_v0  ;;  %v21243_v0 = vld [vmem:[#allocation12 + $0x2f0] sm:$0xff]  }
 0x293   :  { %2979 = vmatpush1.bf16.msra.mxu0 %v21089_v23  ;;  %3020 = vmatpush1.bf16.msra.mxu1 %v21092_v24  ;;  %v21142_v23 = vld [vmem:[#allocation12 + $0x18] sm:$0xff]   ;;  %v21143_v24 = vld [vmem:[#allocation12 + $0x60] sm:$0xff]  }
 0x294   :  { %2980 = vmatprep.subr.bf16.mxu0 %v21097_v25  ;;  %3021 = vmatprep.subr.bf16.mxu1 %v21100_v26  ;;  %v21144_v25 = vld [vmem:[#allocation9 + $0x5c0] ss:$164 sps:$4 sm:$0xff]   ;;  %v21145_v26 = vld [vmem:[#allocation12 + $0x20] sm:$0xff]  }
 0x297   :  { %2981 = vmatpush1.bf16.msra.mxu0 %v21095_v27  ;;  %3022 = vmatpush1.bf16.msra.mxu1 %v21098_v28  ;;  %v23588_v27 = vsub.s32 0, %v23530_v37  ;;  %v23590_v28 = vld [vmem:[#allocation10 + $0x8] sm:$0xff] }
 0x298   :  { %2982 = vmatprep.subr.bf16.mxu0 %v21103_v29  ;;  %3023 = vmatprep.subr.bf16.mxu1 %v21106_v30  ;;  %v21146_v29 = vld [vmem:[#allocation12 + $0x68] sm:$0xff]   ;;  %v23594_v30 = vsub.s32 3, %v23530_v37 }
 0x299   :  { %25421 = vst [vmem:[#allocation47_spill] sm:$0xff] %v23588_v27 }
 0x29a   :  { %25422 = vst [vmem:[#allocation48_spill] sm:$0xff] %v23594_v30 }
 0x29b   :  { %2983 = vmatpush1.bf16.msra.mxu0 %v21101_v31  ;;  %3024 = vmatpush1.bf16.msra.mxu1 %v21104_v33  ;;  %v21147_v31 = vld [vmem:[#allocation9 + $0x708] ss:$164 sps:$4 sm:$0xff]   ;;  %v21148_v33 = vld [vmem:[#allocation12 + $0x28] sm:$0xff]  }
 0x29c   :  { %2984 = vmatprep.subr.bf16.mxu0 %v21109_v34  ;;  %3025 = vmatprep.subr.bf16.mxu1 %v21112_v35  ;;  %v3167_v34 = vrot.slane %v23590_v28, %v23535_v49  ;;  %v23599_v35 = vsub.s32 5, %v23530_v37 }
 0x29e   :  { %25423 = vst [vmem:[#allocation49_spill] sm:$0xff] %v23599_v35 }
 0x29f   :  { %2985 = vmatpush1.bf16.msra.mxu0 %v21107_v36  ;;  %3026 = vmatpush1.bf16.msra.mxu1 %v21110_v38  ;;  %v21149_v36 = vld [vmem:[#allocation12 + $0x70] sm:$0xff]  }
 0x2a0   :  { %2986 = vmatprep.subr.bf16.mxu0 %v21115_v39  ;;  %3027 = vmatprep.subr.bf16.mxu1 %v21118_v40 }
 0x2a1   :  { %v23561_v47 = vpop.f32.mrb[8].mxu0  ;;  %v23563_v48 = vpop.f32.mrb[8].mxu1 }
 0x2a2   :  { %v23565_v54 = vpop.f32.mrb[9].mxu0  ;;  %v23567_v55 = vpop.f32.mrb[9].mxu1 }
 0x2a3   :  { %v2440_v57 = vpop.f32.mrb[10].mxu0  ;;  %v2481_v58 = vpop.f32.mrb[10].mxu1  ;;  %2987 = vmatpush1.bf16.msra.mxu0 %v21113_v41  ;;  %3028 = vmatpush1.bf16.msra.mxu1 %v21116_v42 }
 0x2a4   :  { %v2441_v61 = vpop.f32.mrb[11].mxu0  ;;  %v2482_v62 = vpop.f32.mrb[11].mxu1  ;;  %2988 = vmatprep.subr.bf16.mxu0 %v21121_v43  ;;  %3029 = vmatprep.subr.bf16.mxu1 %v21124_v44  ;;  %v21150_v43 = vld [vmem:[#allocation9 + $0x850] ss:$164 sps:$4 sm:$0xff]   ;;  %v3111_v57 = vrot.slane %v23537_v50, %v23588_v27 }
 0x2a5   :  { %v3123_v61 = vrot.slane %v23537_v50, %v23594_v30  ;;  %v3131_v62 = vrot.slane %v23537_v50, %v23599_v35 }
 0x2a7   :  { %2989 = vmatpush1.bf16.msra.mxu0 %v21119_v52  ;;  %3030 = vmatpush1.bf16.msra.mxu1 %v21122_v53  ;;  %v21151_v53 = vld [vmem:[#allocation12 + $0x30] sm:$0xff]  }
 0x2a8   :  { %2990 = vmatprep.subr.bf16.mxu0 %v21127_v56  ;;  %3031 = vmatprep.subr.bf16.mxu1 %v21130_v59  ;;  %v21152_v56 = vld [vmem:[#allocation12 + $0x78] sm:$0xff]  }
 0x2ab   :  { %2991 = vmatpush1.bf16.msra.mxu0 %v21125_v3  ;;  %3032 = vmatpush1.bf16.msra.mxu1 %v21128_v4  ;;  %v21154_v3 = vld [vmem:[#allocation12 + $0x38] sm:$0xff]   ;;  %v21155_v4 = vld [vmem:[#allocation12 + $0xc0] sm:$0xff]  }
 0x2ac   :  { %20566 = vmatprep.subr.bf16.mxu0 %v25313_v11  ;;  %19228 = vmatprep.subr.bf16.mxu1 %v21131_v6  ;;  %v21156_v6 = vld [vmem:[#allocation12 + $0x140] sm:$0xff]  }
 0x2ae   :  { %3009 = vmatmul.mubr.bf16.vlgmr.msra.gmra.mrb[36].mxu0 %v23489_v46  ;;  %3050 = vmatmul.mubr.bf16.vlgmr.msra.gmra.mrb[36].mxu1 %v23489_v46 }
 0x2af   :  { %20567 = vmatpush3.bf16.msra.mxu0 %v21132_v8  ;;  %19229 = vmatpush3.bf16.msra.mxu1 %v21133_v9  ;;  %v23618_v8 = vadd.f32 %v3111_v57, %v23519_v12  ;;  %v23622_v9 = vadd.f32 %v3123_v61, %v23525_v17  ;;  %v23647_v57 = vsub.s32 4, %v23530_v37 }
 0x2b0   :  { %5980 = vmatprep.mubr.bf16.mxu1 %v23579_v14  ;;  %20568 = vmatprep.subr.bf16.mxu0 %v25313_v11 }
 0x2b1   :  { %19230 = vmatprep.subr.bf16.mxu1 %v21134_v10  ;;  %20582 = vmatprep.mubr.msk.bf16.mxu0 %vm23180_vm1, %v25313_v11  ;;  %25425 = vst [vmem:[#allocation51_spill] sm:$0xff] %v23618_v8  ;;  %25426 = vst [vmem:[#allocation52_spill] sm:$0xff] %v23622_v9  ;;  %v23625_v10 = vadd.f32 %v3131_v62, %v23550_v2  ;;  %v23633_v12 = vpack.c.bf16 %v23622_v9, %v23622_v9  ;;  %v21161_v2 = vld [vmem:[#allocation12 + $0x88] sm:$0xff]   ;;  %v21180_v62 = vld [vmem:[#allocation12 + $0x170] sm:$0xff]  }
 0x2b2   :  { %25429 = vst [vmem:[#allocation55_spill] sm:$0xff] %v23647_v57 }
 0x2b3   :  { %20569 = vmatpush3.bf16.msra.mxu0 %v21135_v15  ;;  %19231 = vmatpush3.bf16.msra.mxu1 %v21136_v16  ;;  %25427 = vst [vmem:[#allocation53_spill] sm:$0xff] %v23625_v10  ;;  %v21157_v15 = vld [vmem:[#allocation12 + $0x80] sm:$0xff]   ;;  %v23639_v17 = vpack.c.bf16 %v23625_v10, %v23625_v10 }
 0x2b4   :  { %20570 = vmatprep.subr.bf16.mxu0 %v25313_v11  ;;  %19232 = vmatprep.subr.bf16.mxu1 %v21137_v18  ;;  %v21158_v16 = vld [vmem:[#allocation12 + $0x100] sm:$0xff]   ;;  %v21159_v18 = vld [vmem:[#allocation12 + $0xc8] sm:$0xff]  }
 0x2b7   :  { %20571 = vmatpush3.bf16.msra.mxu0 %v21138_v19  ;;  %19233 = vmatpush3.bf16.msra.mxu1 %v21139_v20  ;;  %v21160_v19 = vld [vmem:[#allocation12 + $0x148] sm:$0xff]   ;;  %v23629_v20 = vpack.c.bf16 %v23618_v8, %v23618_v8 }
 0x2b8   :  { %20572 = vmatprep.subr.bf16.mxu0 %v25313_v11  ;;  %19234 = vmatprep.subr.bf16.mxu1 %v21140_v21  ;;  %v21162_v21 = vld [vmem:[#allocation12 + $0x108] sm:$0xff]  }
 0x2bb   :  { %20573 = vmatpush3.bf16.msra.mxu0 %v21141_v22  ;;  %19235 = vmatpush3.bf16.msra.mxu1 %v21142_v23  ;;  %v21163_v22 = vld [vmem:[#allocation12 + $0xd0] sm:$0xff]  }
 0x2bc   :  { %20574 = vmatprep.subr.bf16.mxu0 %v25313_v11  ;;  %19236 = vmatprep.subr.bf16.mxu1 %v21143_v24  ;;  %v21164_v23 = vld [vmem:[#allocation12 + $0x150] sm:$0xff]  }
 0x2bd   :  { %v21165_v24 = vld [vmem:[#allocation12 + $0x90] sm:$0xff]  }
 0x2bf   :  { %20575 = vmatpush3.bf16.msra.mxu0 %v21144_v25  ;;  %19237 = vmatpush3.bf16.msra.mxu1 %v21145_v26  ;;  %v21167_v25 = vld [vmem:[#allocation12 + $0xd8] sm:$0xff]  }
 0x2c0   :  { %20576 = vmatprep.subr.bf16.mxu0 %v25313_v11  ;;  %19238 = vmatprep.subr.bf16.mxu1 %v21146_v29  ;;  %v21168_v26 = vld [vmem:[#allocation12 + $0x158] sm:$0xff]  }
 0x2c1   :  { %v23602_v38 = vpop.f32.mrb[12].mxu0  ;;  %v2559_v39 = vpop.f32.mrb[12].mxu1  ;;  %v21169_v29 = vld [vmem:[#allocation12 + $0x98] sm:$0xff]  }
 0x2c2   :  { %v23604_v40 = vadd.f32 %v3167_v34, %v2559_v39  ;;  %v23606_v41 = vpop.f32.mrb[13].mxu0  ;;  %v23608_v42 = vpop.f32.mrb[13].mxu1  ;;  %v21172_v34 = vld [vmem:[#allocation12 + $0x160] sm:$0xff]  }
 0x2c3   :  { %v2522_v44 = vpop.f32.mrb[14].mxu0  ;;  %v2563_v52 = vpop.f32.mrb[14].mxu1  ;;  %20577 = vmatpush3.bf16.msra.mxu0 %v21147_v31  ;;  %19239 = vmatpush3.bf16.msra.mxu1 %v21148_v33  ;;  %v21170_v31 = vld [vmem:[#allocation12 + $0x118] sm:$0xff]   ;;  %v21171_v33 = vld [vmem:[#allocation12 + $0xe0] sm:$0xff]  }
 0x2c4   :  { %25424 = vst [vmem:[#allocation50_spill] sm:$0xff] %v23604_v40  ;;  %v2523_v58 = vpop.f32.mrb[15].mxu0  ;;  %v2564_v59 = vpop.f32.mrb[15].mxu1  ;;  %20578 = vmatprep.subr.bf16.mxu0 %v25313_v11  ;;  %19240 = vmatprep.subr.bf16.mxu1 %v21149_v36  ;;  %v21173_v36 = vld [vmem:[#allocation12 + $0xa0] sm:$0xff]   ;;  %v21176_v44 = vld [vmem:[#allocation12 + $0x168] sm:$0xff]   ;;  %v23644_v52 = vsub.s32 2, %v23530_v37 }
 0x2c5   :  { %v21174_v39 = vld [vmem:[#allocation12 + $0x120] sm:$0xff]   ;;  %v21179_v58 = vld [vmem:[#allocation12 + $0xf0] sm:$0xff]   ;;  %v21183_v37 = vld [vmem:[#allocation12 + $0xf8] sm:$0xff]  }
 0x2c6   :  { %25428 = vst [vmem:[#allocation54_spill] sm:$0xff] %v23644_v52 }
 0x2c7   :  { %20579 = vmatpush3.bf16.msra.mxu0 %v21150_v43  ;;  %19241 = vmatpush3.bf16.msra.mxu1 %v21151_v53  ;;  %v21175_v43 = vld [vmem:[#allocation12 + $0xe8] sm:$0xff]  }
 0x2c8   :  { %20580 = vmatprep.subr.bf16.mxu0 %v25313_v11  ;;  %19242 = vmatprep.subr.bf16.mxu1 %v21152_v56  ;;  %v21177_v53 = vld [vmem:[#allocation12 + $0xa8] sm:$0xff]   ;;  %v21245_v11 = vld [vmem:[#allocation12 + $0x2b0] sm:$0xff]  }
 0x2c9   :  { %v21178_v56 = vld [vmem:[#allocation12 + $0x128] sm:$0xff]  }
 0x2cb   :  { %20581 = vmatpush3.bf16.msra.mxu0 %v21153_v63  ;;  %19243 = vmatpush3.bf16.msra.mxu1 %v21154_v3 }
 0x2cc   :  { %19250 = vmatprep.subr.bf16.mxu0 %v21155_v4  ;;  %19272 = vmatprep.subr.bf16.mxu1 %v21156_v6  ;;  %v21181_v4 = vld [vmem:[#allocation12 + $0xb0] sm:$0xff]  }
 0x2cd   :  { %v21182_v6 = vld [vmem:[#allocation12 + $0x130] sm:$0xff]  }
 0x2ce   :  { %20583 = vmatmul.mubr.bf16.vlgmr.msra.gmra.mrb[40].mxu0 %v23489_v46  ;;  %5981 = vmatmul.mubr.bf16.vlgmr.msra.gmra.mrb[40].mxu1 %v23629_v20  ;;  %v21166_v46 = vld [vmem:[#allocation12 + $0x110] sm:$0xff]  }
 0x2cf   :  { %19251 = vmatpush3.bf16.msra.mxu0 %v21157_v15  ;;  %6020 = vmatprep.mubr.bf16.mxu0 %v23633_v12 }
 0x2d0   :  { %19273 = vmatpush3.bf16.msra.mxu1 %v21158_v16  ;;  %6060 = vmatprep.mubr.bf16.mxu1 %v23639_v17 }
 0x2d1   :  { %19252 = vmatprep.subr.bf16.mxu0 %v21159_v18  ;;  %19274 = vmatprep.subr.bf16.mxu1 %v21160_v19  ;;  %v21184_v18 = vld [vmem:[#allocation12 + $0x178] sm:$0xff]   ;;  %v3119_v19 = vrot.slane %v23537_v50, %v23644_v52 }
 0x2d3   :  { %19253 = vmatpush3.bf16.msra.mxu0 %v21161_v2 }
 0x2d4   :  { %19275 = vmatpush3.bf16.msra.mxu1 %v21162_v21  ;;  %19254 = vmatprep.subr.bf16.mxu0 %v21163_v22  ;;  %v3127_v22 = vrot.slane %v23537_v50, %v23647_v57  ;;  %v21190_v50 = vld [vmem:[#allocation12 + $0x200] sm:$0xff]  }
 0x2d5   :  { %19276 = vmatprep.subr.bf16.mxu1 %v21164_v23  ;;  %v21185_v23 = vld [vmem:[#allocation12 + $0xb8] sm:$0xff]  }
 0x2d7   :  { %19255 = vmatpush3.bf16.msra.mxu0 %v21165_v24  ;;  %v21186_v24 = vld [vmem:[#allocation12 + $0x138] sm:$0xff]  }
 0x2d8   :  { %19277 = vmatpush3.bf16.msra.mxu1 %v21166_v46  ;;  %19256 = vmatprep.subr.bf16.mxu0 %v21167_v25  ;;  %v3147_v46 = vrot.slane %v23590_v28, %v23559_v45  ;;  %v21187_v25 = vld [vmem:[#allocation12 + $0x1c0] sm:$0xff]  }
 0x2d9   :  { %19278 = vmatprep.subr.bf16.mxu1 %v21168_v26  ;;  %v21188_v26 = vld [vmem:[#allocation12 + $0x240] sm:$0xff]  }
 0x2db   :  { %19257 = vmatpush3.bf16.msra.mxu0 %v21169_v29  ;;  %v23664_v29 = vadd.f32 %v3119_v19, %v23521_v13  ;;  %v21204_v19 = vld [vmem:[#allocation12 + $0x260] sm:$0xff]  }
 0x2dc   :  { %19279 = vmatpush3.bf16.msra.mxu1 %v21170_v31  ;;  %19258 = vmatprep.subr.bf16.mxu0 %v21171_v33  ;;  %v23667_v31 = vadd.f32 %v3127_v22, %v23546_v60  ;;  %v21189_v33 = vld [vmem:[#allocation12 + $0x180] sm:$0xff]   ;;  %v23683_v60 = vpack.c.bf16 %v23552_v5, %v23552_v5  ;;  %v21207_v22 = vld [vmem:[#allocation12 + $0x1e8] sm:$0xff]  }
 0x2dd   :  { %19280 = vmatprep.subr.bf16.mxu1 %v21172_v34  ;;  %25430 = vst [vmem:[#allocation56_spill] sm:$0xff] %v23664_v29  ;;  %v23670_v34 = vadd.f32 %v3147_v46, %v23565_v54  ;;  %v21192_v54 = vld [vmem:[#allocation12 + $0x248] sm:$0xff]  }
 0x2de   :  { %25431 = vst [vmem:[#allocation57_spill] sm:$0xff] %v23667_v31  ;;  %v23678_v13 = vpack.c.bf16 %v23667_v31, %v23667_v31  ;;  %v21210_v46 = vld [vmem:[#allocation12 + $0x228] sm:$0xff]  }
 0x2df   :  { %19259 = vmatpush3.bf16.msra.mxu0 %v21173_v36  ;;  %25432 = vst [vmem:[#allocation58_spill] sm:$0xff] %v23670_v34  ;;  %v21191_v36 = vld [vmem:[#allocation12 + $0x1c8] sm:$0xff]  }
 0x2e0   :  { %19281 = vmatpush3.bf16.msra.mxu1 %v21174_v39  ;;  %19260 = vmatprep.subr.bf16.mxu0 %v21175_v43  ;;  %v23674_v39 = vpack.c.bf16 %v23664_v29, %v23664_v29  ;;  %v21193_v43 = vld [vmem:[#allocation12 + $0x188] sm:$0xff]  }
 0x2e1   :  { %v23649_v59 = vpop.f32.mrb[16].mxu0  ;;  %v23651_v61 = vpop.f32.mrb[16].mxu1  ;;  %19282 = vmatprep.subr.bf16.mxu1 %v21176_v44  ;;  %v23688_v44 = vpack.c.bf16 %v23670_v34, %v23670_v34 }
 0x2e2   :  { %v23653_v63 = vpop.f32.mrb[17].mxu0  ;;  %v23655_v3 = vpop.f32.mrb[17].mxu1 }
 0x2e3   :  { %v2604_v15 = vpop.f32.mrb[18].mxu0  ;;  %v2645_v16 = vpop.f32.mrb[18].mxu1  ;;  %19261 = vmatpush3.bf16.msra.mxu0 %v21177_v53  ;;  %v21194_v53 = vld [vmem:[#allocation12 + $0x208] sm:$0xff]  }
 0x2e4   :  { %19283 = vmatpush3.bf16.msra.mxu1 %v21178_v56  ;;  %v2605_v2 = vpop.f32.mrb[19].mxu0  ;;  %v2646_v21 = vpop.f32.mrb[19].mxu1  ;;  %19262 = vmatprep.subr.bf16.mxu0 %v21179_v58  ;;  %v21195_v56 = vld [vmem:[#allocation12 + $0x1d0] sm:$0xff]   ;;  %v21200_v15 = vld [vmem:[#allocation12 + $0x258] sm:$0xff]  }
 0x2e5   :  { %19284 = vmatprep.subr.bf16.mxu1 %v21180_v62  ;;  %v21196_v58 = vld [vmem:[#allocation12 + $0x250] sm:$0xff]   ;;  %v21201_v16 = vld [vmem:[#allocation12 + $0x198] sm:$0xff]   ;;  %v21205_v2 = vld [vmem:[#allocation12 + $0x1a0] sm:$0xff]  }
 0x2e6   :  { %v21197_v62 = vld [vmem:[#allocation12 + $0x190] sm:$0xff]   ;;  %v21206_v21 = vld [vmem:[#allocation12 + $0x220] sm:$0xff]  }
 0x2e7   :  { %19263 = vmatpush3.bf16.msra.mxu0 %v21181_v4  ;;  %v21198_v4 = vld [vmem:[#allocation12 + $0x210] sm:$0xff]  }
 0x2e8   :  { %19285 = vmatpush3.bf16.msra.mxu1 %v21182_v6  ;;  %19264 = vmatprep.subr.bf16.mxu0 %v21183_v37  ;;  %v21199_v6 = vld [vmem:[#allocation12 + $0x1d8] sm:$0xff]  }
 0x2e9   :  { %19286 = vmatprep.subr.bf16.mxu1 %v21184_v18  ;;  %v21202_v37 = vld [vmem:[#allocation12 + $0x218] sm:$0xff]   ;;  %v21203_v18 = vld [vmem:[#allocation12 + $0x1e0] sm:$0xff]  }
 0x2eb   :  { %19265 = vmatpush3.bf16.msra.mxu0 %v21185_v23  ;;  %v21208_v23 = vld [vmem:[#allocation12 + $0x268] sm:$0xff]  }
 0x2ec   :  { %19287 = vmatpush3.bf16.msra.mxu1 %v21186_v24  ;;  %19294 = vmatprep.subr.bf16.mxu0 %v21187_v25  ;;  %v21209_v24 = vld [vmem:[#allocation12 + $0x1a8] sm:$0xff]   ;;  %v21211_v25 = vld [vmem:[#allocation12 + $0x1f0] sm:$0xff]  }
 0x2ed   :  { %19316 = vmatprep.subr.bf16.mxu1 %v21188_v26  ;;  %v21212_v26 = vld [vmem:[#allocation12 + $0x270] sm:$0xff]  }
 0x2ee   :  { %6021 = vmatmul.mubr.bf16.vlgmr.msra.gmra.mrb[44].mxu0 %v23674_v39 }
 0x2ef   :  { %6061 = vmatmul.mubr.bf16.vlgmr.msra.gmra.mrb[44].mxu1 %v23678_v13  ;;  %19295 = vmatpush3.bf16.msra.mxu0 %v21189_v33 }
 0x2f0   :  { %6100 = vmatprep.mubr.bf16.mxu0 %v23683_v60  ;;  %19317 = vmatpush3.bf16.msra.mxu1 %v21190_v50 }
 0x2f1   :  { %6140 = vmatprep.mubr.bf16.mxu1 %v23688_v44  ;;  %19296 = vmatprep.subr.bf16.mxu0 %v21191_v36 }
 0x2f2   :  { %19318 = vmatprep.subr.bf16.mxu1 %v21192_v54 }
 0x2f3   :  { %19297 = vmatpush3.bf16.msra.mxu0 %v21193_v43  ;;  %v21213_v43 = vld [vmem:[#allocation12 + $0x1b0] sm:$0xff]  }
 0x2f4   :  { %19319 = vmatpush3.bf16.msra.mxu1 %v21194_v53  ;;  %19298 = vmatprep.subr.bf16.mxu0 %v21195_v56 }
 0x2f5   :  { %19320 = vmatprep.subr.bf16.mxu1 %v21196_v58  ;;  %v21214_v58 = vld [vmem:[#allocation12 + $0x230] sm:$0xff]  }
 0x2f7   :  { %19299 = vmatpush3.bf16.msra.mxu0 %v21197_v62  ;;  %v21215_v62 = vld [vmem:[#allocation12 + $0x1f8] sm:$0xff]  }
 0x2f8   :  { %19321 = vmatpush3.bf16.msra.mxu1 %v21198_v4  ;;  %19300 = vmatprep.subr.bf16.mxu0 %v21199_v6 }
 0x2f9   :  { %19322 = vmatprep.subr.bf16.mxu1 %v21200_v15  ;;  %v21216_v15 = vld [vmem:[#allocation12 + $0x278] sm:$0xff]  }
 0x2fb   :  { %19301 = vmatpush3.bf16.msra.mxu0 %v21201_v16  ;;  %v3143_v16 = vrot.slane %v23590_v28, %v23588_v27 }
 0x2fc   :  { %19323 = vmatpush3.bf16.msra.mxu1 %v21202_v37  ;;  %19302 = vmatprep.subr.bf16.mxu0 %v21203_v18  ;;  %v3155_v37 = vrot.slane %v23590_v28, %v23594_v30  ;;  %v21217_v18 = vld [vmem:[#allocation12 + $0x1b8] sm:$0xff]  }
 0x2fd   :  { %19324 = vmatprep.subr.bf16.mxu1 %v21204_v19  ;;  %v21218_v19 = vld [vmem:[#allocation12 + $0x238] sm:$0xff]  }
 0x2ff   :  { %19303 = vmatpush3.bf16.msra.mxu0 %v21205_v2  ;;  %v3163_v2 = vrot.slane %v23590_v28, %v23599_v35 }
 0x300   :  { %19325 = vmatpush3.bf16.msra.mxu1 %v21206_v21  ;;  %19304 = vmatprep.subr.bf16.mxu0 %v21207_v22  ;;  %v21219_v21 = vld [vmem:[#allocation12 + $0x2c0] sm:$0xff]  }
 0x301   :  { %v23692_v33 = vpop.f32.mrb[20].mxu0  ;;  %v23694_v50 = vpop.f32.mrb[20].mxu1  ;;  %19326 = vmatprep.subr.bf16.mxu1 %v21208_v23  ;;  %v21220_v22 = vld [vmem:[#allocation12 + $0x340] sm:$0xff]   ;;  %v23707_v23 = vadd.f32 %v3143_v16, %v23561_v47  ;;  %v21228_v16 = vld [vmem:[#allocation12 + $0x350] sm:$0xff]  }
 0x302   :  { %v23696_v36 = vpop.f32.mrb[21].mxu0  ;;  %v23698_v54 = vpop.f32.mrb[21].mxu1 }
 0x303   :  { %v2686_v53 = vpop.f32.mrb[22].mxu0  ;;  %v2727_v56 = vpop.f32.mrb[22].mxu1  ;;  %19305 = vmatpush3.bf16.msra.mxu0 %v21209_v24  ;;  %25433 = vst [vmem:[#allocation59_spill] sm:$0xff] %v23707_v23  ;;  %v16859_v24 = vmax.f32 %v23618_v8, %v23664_v29  ;;  %v23723_v47 = vpack.c.bf16 %v23707_v23, %v23707_v23  ;;  %v21312_v29 = vld [vmem:[#allocation12 + $0x578] sm:$0xff]  }
 0x304   :  { %19327 = vmatpush3.bf16.msra.mxu1 %v21210_v46  ;;  %v2687_v4 = vpop.f32.mrb[23].mxu0  ;;  %v2728_v6 = vpop.f32.mrb[23].mxu1  ;;  %19306 = vmatprep.subr.bf16.mxu0 %v21211_v25  ;;  %v23712_v46 = vadd.f32 %v3155_v37, %v23567_v55  ;;  %v21221_v25 = vld [vmem:[#allocation12 + $0x280] sm:$0xff]   ;;  %v23715_v53 = vadd.f32 %v3163_v2, %v23606_v41  ;;  %v23719_v56 = vpack.c.bf16 %v23548_v1, %v23548_v1 }
 0x305   :  { %19328 = vmatprep.subr.bf16.mxu1 %v21212_v26  ;;  %v21222_v26 = vld [vmem:[#allocation12 + $0x300] sm:$0xff]   ;;  %v16861_v55 = vmax.f32 %v23572_v7, %v16859_v24  ;;  %v21226_v6 = vld [vmem:[#allocation12 + $0x308] sm:$0xff]   ;;  %v21233_v24 = vld [vmem:[#allocation12 + $0x298] sm:$0xff]  }
 0x306   :  { %25434 = vst [vmem:[#allocation60_spill] sm:$0xff] %v23712_v46  ;;  %25435 = vst [vmem:[#allocation61_spill] sm:$0xff] %v23715_v53  ;;  %v23729_v41 = vpack.c.bf16 %v23712_v46, %v23712_v46  ;;  %v23734_v4 = vpack.c.bf16 %v23715_v53, %v23715_v53 }
 0x307   :  { %19307 = vmatpush3.bf16.msra.mxu0 %v21213_v43  ;;  %v21223_v43 = vld [vmem:[#allocation12 + $0x2c8] sm:$0xff]   ;;  %v16860_v37 = vmax.f32 %v23622_v9, %v16861_v55  ;;  %v21236_v55 = vld [vmem:[#allocation12 + $0x360] sm:$0xff]   ;;  %v21311_v9 = vld [vmem:[#allocation12 + $0x4f8] sm:$0xff]  }
 0x308   :  { %19329 = vmatpush3.bf16.msra.mxu1 %v21214_v58  ;;  %19308 = vmatprep.subr.bf16.mxu0 %v21215_v62  ;;  %v21224_v58 = vld [vmem:[#allocation12 + $0x348] sm:$0xff]  }
 0x309   :  { %19330 = vmatprep.subr.bf16.mxu1 %v21216_v15  ;;  %v21225_v62 = vld [vmem:[#allocation12 + $0x288] sm:$0xff]   ;;  %v21227_v15 = vld [vmem:[#allocation12 + $0x2d0] sm:$0xff]   ;;  %v16862_v2 = vmax.f32 %v23667_v31, %v16860_v37 }
 0x30b   :  { %19309 = vmatpush3.bf16.msra.mxu0 %v21217_v18  ;;  %v21229_v18 = vld [vmem:[#allocation12 + $0x290] sm:$0xff]  }
 0x30c   :  { %19331 = vmatpush3.bf16.msra.mxu1 %v21218_v19  ;;  %19338 = vmatprep.subr.bf16.mxu0 %v21219_v21  ;;  %v21230_v19 = vld [vmem:[#allocation12 + $0x310] sm:$0xff]   ;;  %v21231_v21 = vld [vmem:[#allocation12 + $0x2d8] sm:$0xff]  }
 0x30d   :  { %19360 = vmatprep.subr.bf16.mxu1 %v21220_v22  ;;  %v21232_v22 = vld [vmem:[#allocation12 + $0x358] sm:$0xff]  }
 0x30e   :  { %6101 = vmatmul.mubr.bf16.vlgmr.msra.gmra.mrb[48].mxu0 %v23719_v56 }
 0x30f   :  { %6141 = vmatmul.mubr.bf16.vlgmr.msra.gmra.mrb[48].mxu1 %v23723_v47  ;;  %19339 = vmatpush3.bf16.msra.mxu0 %v21221_v25  ;;  %v21234_v25 = vld [vmem:[#allocation12 + $0x318] sm:$0xff]  }
 0x310   :  { %6180 = vmatprep.mubr.bf16.mxu0 %v23729_v41  ;;  %19361 = vmatpush3.bf16.msra.mxu1 %v21222_v26  ;;  %v16863_v26 = vmax.f32 %v23548_v1, %v16862_v2  ;;  %v21244_v2 = vld [vmem:[#allocation12 + $0x370] sm:$0xff]   ;;  %v21249_v1 = vld [vmem:[#allocation12 + $0x2b8] sm:$0xff]  }
 0x311   :  { %6220 = vmatprep.mubr.bf16.mxu1 %v23734_v4  ;;  %19340 = vmatprep.subr.bf16.mxu0 %v21223_v43  ;;  %v21235_v43 = vld [vmem:[#allocation12 + $0x2e0] sm:$0xff]  }
 0x312   :  { %19362 = vmatprep.subr.bf16.mxu1 %v21224_v58  ;;  %v21237_v58 = vld [vmem:[#allocation12 + $0x2a0] sm:$0xff]   ;;  %v16865_v37 = vmax.f32 %v23625_v10, %v16863_v26  ;;  %v23750_v26 = vld [vmem:[#allocation10 + $0x10] sm:$0xff] }
 0x313   :  { %19341 = vmatpush3.bf16.msra.mxu0 %v21225_v62  ;;  %v21238_v62 = vld [vmem:[#allocation12 + $0x320] sm:$0xff]  }
 0x314   :  { %19363 = vmatpush3.bf16.msra.mxu1 %v21226_v6  ;;  %19342 = vmatprep.subr.bf16.mxu0 %v21227_v15  ;;  %v21239_v6 = vld [vmem:[#allocation12 + $0x2e8] sm:$0xff]  }
 0x315   :  { %19364 = vmatprep.subr.bf16.mxu1 %v21228_v16  ;;  %v21240_v15 = vld [vmem:[#allocation12 + $0x368] sm:$0xff]  }
 0x316   :  { %v21241_v16 = vld [vmem:[#allocation12 + $0x2a8] sm:$0xff]  }
 0x317   :  { %19343 = vmatpush3.bf16.msra.mxu0 %v21229_v18  ;;  %v21242_v18 = vld [vmem:[#allocation12 + $0x328] sm:$0xff]  }
 0x318   :  { %19365 = vmatpush3.bf16.msra.mxu1 %v21230_v19  ;;  %19344 = vmatprep.subr.bf16.mxu0 %v21231_v21  ;;  %v16864_v19 = vmax.f32 %v23552_v5, %v16865_v37  ;;  %v3151_v21 = vrot.slane %v23590_v28, %v23644_v52 }
 0x319   :  { %19366 = vmatprep.subr.bf16.mxu1 %v21232_v22 }
 0x31b   :  { %19345 = vmatpush3.bf16.msra.mxu0 %v21233_v24 }
 0x31c   :  { %19367 = vmatpush3.bf16.msra.mxu1 %v21234_v25  ;;  %19346 = vmatprep.subr.bf16.mxu0 %v21235_v43  ;;  %v16866_v25 = vmax.f32 %v23707_v23, %v16864_v19  ;;  %v21248_v19 = vld [vmem:[#allocation12 + $0x378] sm:$0xff]   ;;  %v3159_v23 = vrot.slane %v23590_v28, %v23647_v57 }
 0x31d   :  { %19368 = vmatprep.subr.bf16.mxu1 %v21236_v55 }
 0x31f   :  { %19347 = vmatpush3.bf16.msra.mxu0 %v21237_v58 }
 0x320   :  { %19369 = vmatpush3.bf16.msra.mxu1 %v21238_v62  ;;  %19348 = vmatprep.subr.bf16.mxu0 %v21239_v6  ;;  %v23757_v62 = vadd.f32 %v3151_v21, %v23563_v48  ;;  %v3179_v48 = vrot.slane %v23750_v26, %v23559_v45  ;;  %v23767_v21 = vadd.f32 %v3159_v23, %v23602_v38  ;;  %v21257_v23 = vld [vmem:[#allocation12 + $0x388] sm:$0xff]  }
 0x321   :  { %v23745_v22 = vpop.f32.mrb[24].mxu0  ;;  %v23747_v24 = vpop.f32.mrb[24].mxu1  ;;  %19370 = vmatprep.subr.bf16.mxu1 %v21240_v15  ;;  %v21247_v15 = vld [vmem:[#allocation12 + $0x2f8] sm:$0xff]  }
 0x322   :  { %v23752_v43 = vpop.f32.mrb[25].mxu0  ;;  %v23754_v55 = vpop.f32.mrb[25].mxu1  ;;  %25436 = vst [vmem:[#allocation62_spill] sm:$0xff] %v23757_v62  ;;  %25437 = vst [vmem:[#allocation63_spill] sm:$0xff] %v23767_v21  ;;  %v23782_v38 = vpack.c.bf16 %v23767_v21, %v23767_v21 }
 0x323   :  { %v2768_v58 = vpop.f32.mrb[26].mxu0  ;;  %v2809_v37 = vpop.f32.mrb[26].mxu1  ;;  %19349 = vmatpush3.bf16.msra.mxu0 %v21241_v16  ;;  %v3171_v16 = vrot.slane %v23590_v28, %v23540_v51  ;;  %v21254_v28 = vld [vmem:[#allocation12 + $0x400] sm:$0xff]  }
 0x324   :  { %19371 = vmatpush3.bf16.msra.mxu1 %v21242_v18  ;;  %v2769_v6 = vpop.f32.mrb[27].mxu0  ;;  %v2810_v5 = vpop.f32.mrb[27].mxu1  ;;  %19350 = vmatprep.subr.bf16.mxu0 %v21243_v0  ;;  %v16867_v58 = vmax.f32 %v23757_v62, %v16866_v25  ;;  %v21250_v18 = vld [vmem:[#allocation12 + $0x338] sm:$0xff]   ;;  %v21251_v0 = vld [vmem:[#allocation12 + $0x3c0] sm:$0xff]  }
 0x325   :  { %19372 = vmatprep.subr.bf16.mxu1 %v21244_v2  ;;  %v21252_v5 = vld [vmem:[#allocation12 + $0x440] sm:$0xff]   ;;  %v23771_v25 = vadd.f32 %v3171_v16, %v23608_v42  ;;  %v23774_v6 = vadd.f32 %v3179_v48, %v23653_v63  ;;  %v21260_v48 = vld [vmem:[#allocation12 + $0x450] sm:$0xff]  }
 0x326   :  { %v21253_v2 = vld [vmem:[#allocation12 + $0x380] sm:$0xff]   ;;  %v16869_v37 = vmax.f32 %v23670_v34, %v16867_v58  ;;  %v21259_v58 = vld [vmem:[#allocation12 + $0x3d0] sm:$0xff]  }
 0x327   :  { %19351 = vmatpush3.bf16.msra.mxu0 %v21245_v11  ;;  %25438 = vst [vmem:[#allocation64_spill] sm:$0xff] %v23771_v25  ;;  %25439 = vst [vmem:[#allocation65_spill] sm:$0xff] %v23774_v6  ;;  %v21255_v11 = vld [vmem:[#allocation12 + $0x3c8] sm:$0xff]   ;;  %v23788_v63 = vpack.c.bf16 %v23771_v25, %v23771_v25 }
 0x328   :  { %19373 = vmatpush3.bf16.msra.mxu1 %v21246_v32  ;;  %19352 = vmatprep.subr.bf16.mxu0 %v21247_v15  ;;  %v23778_v32 = vpack.c.bf16 %v23757_v62, %v23757_v62  ;;  %v16868_v42 = vmax.f32 %v23712_v46, %v16869_v37  ;;  %v23793_v15 = vpack.c.bf16 %v23774_v6, %v23774_v6  ;;  %v21264_v37 = vld [vmem:[#allocation12 + $0x458] sm:$0xff]  }
 0x329   :  { %19374 = vmatprep.subr.bf16.mxu1 %v21248_v19  ;;  %v21258_v19 = vld [vmem:[#allocation12 + $0x408] sm:$0xff]   ;;  %v21265_v46 = vld [vmem:[#allocation12 + $0x398] sm:$0xff]  }
 0x32a   :  { %v16870_v16 = vmax.f32 %v23767_v21, %v16868_v42  ;;  %v3175_v42 = vrot.slane %v23750_v26, %v23588_v27  ;;  %v21269_v21 = vld [vmem:[#allocation12 + $0x3a0] sm:$0xff]  }
 0x32b   :  { %19353 = vmatpush3.bf16.msra.mxu0 %v21249_v1  ;;  %v21256_v1 = vld [vmem:[#allocation12 + $0x448] sm:$0xff]  }
 0x32c   :  { %19375 = vmatpush3.bf16.msra.mxu1 %v21250_v18  ;;  %19382 = vmatprep.subr.bf16.mxu0 %v21251_v0  ;;  %v21261_v18 = vld [vmem:[#allocation12 + $0x390] sm:$0xff]  }
 0x32d   :  { %19404 = vmatprep.subr.bf16.mxu1 %v21252_v5  ;;  %v21262_v0 = vld [vmem:[#allocation12 + $0x410] sm:$0xff]   ;;  %v16871_v5 = vmax.f32 %v23604_v40, %v16870_v16 }
 0x32e   :  { %6181 = vmatmul.mubr.bf16.vlgmr.msra.gmra.mrb[52].mxu0 %v23778_v32 }
 0x32f   :  { %6221 = vmatmul.mubr.bf16.vlgmr.msra.gmra.mrb[52].mxu1 %v23782_v38  ;;  %19383 = vmatpush3.bf16.msra.mxu0 %v21253_v2  ;;  %v21263_v2 = vld [vmem:[#allocation12 + $0x3d8] sm:$0xff]  }
 0x330   :  { %6260 = vmatprep.mubr.bf16.mxu0 %v23788_v63  ;;  %19405 = vmatpush3.bf16.msra.mxu1 %v21254_v28  ;;  %v21266_v28 = vld [vmem:[#allocation12 + $0x418] sm:$0xff]  }
 0x331   :  { %6300 = vmatprep.mubr.bf16.mxu1 %v23793_v15  ;;  %19384 = vmatprep.subr.bf16.mxu0 %v21255_v11  ;;  %v16873_v11 = vmax.f32 %v23715_v53, %v16871_v5  ;;  %v21272_v5 = vld [vmem:[#allocation12 + $0x468] sm:$0xff]   ;;  %v21275_v53 = vld [vmem:[#allocation12 + $0x3f0] sm:$0xff]  }
 0x332   :  { %19406 = vmatprep.subr.bf16.mxu1 %v21256_v1  ;;  %v21267_v1 = vld [vmem:[#allocation12 + $0x3e0] sm:$0xff]  }
 0x333   :  { %19385 = vmatpush3.bf16.msra.mxu0 %v21257_v23  ;;  %v21268_v23 = vld [vmem:[#allocation12 + $0x460] sm:$0xff]   ;;  %v16872_v16 = vmax.f32 %v23771_v25, %v16873_v11  ;;  %v21278_v25 = vld [vmem:[#allocation12 + $0x430] sm:$0xff]  }
 0x334   :  { %19407 = vmatpush3.bf16.msra.mxu1 %v21258_v19  ;;  %19386 = vmatprep.subr.bf16.mxu0 %v21259_v58  ;;  %v23803_v19 = vadd.f32 %v3175_v42, %v23649_v59  ;;  %v21270_v58 = vld [vmem:[#allocation12 + $0x420] sm:$0xff]   ;;  %v21276_v59 = vld [vmem:[#allocation12 + $0x470] sm:$0xff]  }
 0x335   :  { %19408 = vmatprep.subr.bf16.mxu1 %v21260_v48  ;;  %v3183_v48 = vrot.slane %v23750_v26, %v23644_v52 }
 0x336   :  { %25440 = vst [vmem:[#allocation66_spill] sm:$0xff] %v23803_v19 }
 0x337   :  { %19387 = vmatpush3.bf16.msra.mxu0 %v21261_v18  ;;  %v21271_v18 = vld [vmem:[#allocation12 + $0x3e8] sm:$0xff]  }
 0x338   :  { %19409 = vmatpush3.bf16.msra.mxu1 %v21262_v0  ;;  %19388 = vmatprep.subr.bf16.mxu0 %v21263_v2  ;;  %v21273_v0 = vld [vmem:[#allocation12 + $0x3a8] sm:$0xff]   ;;  %v16874_v2 = vmax.f32 %v23803_v19, %v16872_v16  ;;  %v21277_v16 = vld [vmem:[#allocation12 + $0x3b0] sm:$0xff]  }
 0x339   :  { %19410 = vmatprep.subr.bf16.mxu1 %v21264_v37  ;;  %v21274_v37 = vld [vmem:[#allocation12 + $0x428] sm:$0xff]  }
 0x33b   :  { %19389 = vmatpush3.bf16.msra.mxu0 %v21265_v46  ;;  %v23810_v46 = vadd.f32 %v3183_v48, %v23651_v61  ;;  %v21279_v61 = vld [vmem:[#allocation12 + $0x3f8] sm:$0xff]  }
 0x33c   :  { %19411 = vmatpush3.bf16.msra.mxu1 %v21266_v28  ;;  %19390 = vmatprep.subr.bf16.mxu0 %v21267_v1  ;;  %v21280_v48 = vld [vmem:[#allocation12 + $0x478] sm:$0xff]  }
 0x33d   :  { %19412 = vmatprep.subr.bf16.mxu1 %v21268_v23  ;;  %25441 = vst [vmem:[#allocation67_spill] sm:$0xff] %v23810_v46  ;;  %v16875_v28 = vmax.f32 %v23810_v46, %v16874_v2 }
 0x33f   :  { %19391 = vmatpush3.bf16.msra.mxu0 %v21269_v21  ;;  %v16877_v34 = vmax.f32 %v23774_v6, %v16875_v28  ;;  %v3199_v28 = vrot.slane %v23750_v26, %v23535_v49  ;;  %v21297_v6 = vld [vmem:[#allocation12 + $0x498] sm:$0xff]  }
 0x340   :  { %19413 = vmatpush3.bf16.msra.mxu1 %v21270_v58  ;;  %19392 = vmatprep.subr.bf16.mxu0 %v21271_v18  ;;  %v3187_v58 = vrot.slane %v23750_v26, %v23594_v30  ;;  %v3191_v18 = vrot.slane %v23750_v26, %v23647_v57 }
 0x341   :  { %v23812_v42 = vpop.f32.mrb[28].mxu0  ;;  %v23814_v11 = vpop.f32.mrb[28].mxu1  ;;  %19414 = vmatprep.subr.bf16.mxu1 %v21272_v5 }
 0x342   :  { %v23817_v1 = vpop.f32.mrb[29].mxu0  ;;  %v23819_v23 = vpop.f32.mrb[29].mxu1  ;;  %v23829_v10 = vadd.f32 %v3187_v58, %v23655_v3  ;;  %v23832_v31 = vadd.f32 %v3191_v18, %v23692_v33  ;;  %v21287_v3 = vld [vmem:[#allocation12 + $0x4c8] sm:$0xff]   ;;  %v23842_v33 = vpack.c.bf16 %v23604_v40, %v23604_v40 }
 0x343   :  { %v2850_v21 = vpop.f32.mrb[30].mxu0  ;;  %v2891_v62 = vpop.f32.mrb[30].mxu1  ;;  %19393 = vmatpush3.bf16.msra.mxu0 %v21273_v0  ;;  %v21282_v0 = vld [vmem:[#allocation12 + $0x438] sm:$0xff]   ;;  %v21288_v58 = vld [vmem:[#allocation12 + $0x548] sm:$0xff]  }
 0x344   :  { %19415 = vmatpush3.bf16.msra.mxu1 %v21274_v37  ;;  %v2851_v5 = vpop.f32.mrb[31].mxu0  ;;  %v2892_v2 = vpop.f32.mrb[31].mxu1  ;;  %19394 = vmatprep.subr.bf16.mxu0 %v21275_v53  ;;  %v3195_v21 = vrot.slane %v23750_v26, %v23599_v35  ;;  %v21281_v62 = vld [vmem:[#allocation12 + $0x3b8] sm:$0xff]   ;;  %25442 = vst [vmem:[#allocation68_spill] sm:$0xff] %v23829_v10  ;;  %25443 = vst [vmem:[#allocation69_spill] sm:$0xff] %v23832_v31  ;;  %v21283_v37 = vld [vmem:[#allocation12 + $0x4c0] sm:$0xff]  }
 0x345   :  { %19416 = vmatprep.subr.bf16.mxu1 %v21276_v59  ;;  %v21284_v5 = vld [vmem:[#allocation12 + $0x540] sm:$0xff]   ;;  %v16876_v59 = vmax.f32 %v23829_v10, %v16877_v34  ;;  %v23847_v34 = vpack.c.bf16 %v23803_v19, %v23803_v19  ;;  %v21289_v18 = vld [vmem:[#allocation12 + $0x488] sm:$0xff]   ;;  %v21298_v19 = vld [vmem:[#allocation12 + $0x518] sm:$0xff]  }
 0x346   :  { %v21285_v53 = vld [vmem:[#allocation12 + $0x480] sm:$0xff]   ;;  %v23838_v2 = vadd.f32 %v3195_v21, %v23696_v36  ;;  %v23852_v36 = vadd.f32 %v3199_v28, %v23694_v50  ;;  %v21294_v28 = vld [vmem:[#allocation12 + $0x510] sm:$0xff]  }
 0x347   :  { %19395 = vmatpush3.bf16.msra.mxu0 %v21277_v16  ;;  %v21286_v16 = vld [vmem:[#allocation12 + $0x500] sm:$0xff]  }
 0x348   :  { %19417 = vmatpush3.bf16.msra.mxu1 %v21278_v25  ;;  %19396 = vmatprep.subr.bf16.mxu0 %v21279_v61  ;;  %25444 = vst [vmem:[#allocation70_spill] sm:$0xff] %v23838_v2  ;;  %v16878_v25 = vmax.f32 %v23832_v31, %v16876_v59  ;;  %v23849_v61 = vld [vmem:[#allocation10 + $0x18] sm:$0xff]  ;;  %25445 = vst [vmem:[#allocation71_spill] sm:$0xff] %v23852_v36  ;;  %v23862_v21 = vpack.c.bf16 %v23838_v2, %v23838_v2 }
 0x349   :  { %19418 = vmatprep.subr.bf16.mxu1 %v21280_v48  ;;  %v23857_v48 = vpack.c.bf16 %v23829_v10, %v23829_v10  ;;  %v21293_v59 = vld [vmem:[#allocation12 + $0x490] sm:$0xff]  }
 0x34a   :  { %v16879_v50 = vmax.f32 %v23852_v36, %v16878_v25  ;;  %v21295_v25 = vld [vmem:[#allocation12 + $0x4d8] sm:$0xff]  }
 0x34b   :  { %19397 = vmatpush3.bf16.msra.mxu0 %v21281_v62  ;;  %v21290_v62 = vld [vmem:[#allocation12 + $0x508] sm:$0xff]  }
 0x34c   :  { %19419 = vmatpush3.bf16.msra.mxu1 %v21282_v0  ;;  %19426 = vmatprep.subr.bf16.mxu0 %v21283_v37  ;;  %v21291_v0 = vld [vmem:[#allocation12 + $0x4d0] sm:$0xff]   ;;  %v16881_v10 = vmax.f32 %v23838_v2, %v16879_v50  ;;  %v21301_v50 = vld [vmem:[#allocation12 + $0x4a0] sm:$0xff]  }
 0x34d   :  { %19448 = vmatprep.subr.bf16.mxu1 %v21284_v5  ;;  %v21292_v37 = vld [vmem:[#allocation12 + $0x550] sm:$0xff]   ;;  %v3203_v5 = vrot.slane %v23750_v26, %v23540_v51 }
 0x34e   :  { %6261 = vmatmul.mubr.bf16.vlgmr.msra.gmra.mrb[56].mxu0 %v23842_v33 }
 0x34f   :  { %6301 = vmatmul.mubr.bf16.vlgmr.msra.gmra.mrb[56].mxu1 %v23847_v34  ;;  %19427 = vmatpush3.bf16.msra.mxu0 %v21285_v53  ;;  %v3207_v53 = vrot.slane %v23849_v61, %v23588_v27 }
 0x350   :  { %6340 = vmatprep.mubr.bf16.mxu0 %v23857_v48  ;;  %19449 = vmatpush3.bf16.msra.mxu1 %v21286_v16  ;;  %v21296_v16 = vld [vmem:[#allocation12 + $0x558] sm:$0xff]  }
 0x351   :  { %6380 = vmatprep.mubr.bf16.mxu1 %v23862_v21  ;;  %19428 = vmatprep.subr.bf16.mxu0 %v21287_v3  ;;  %v23873_v3 = vadd.f32 %v3203_v5, %v23698_v54  ;;  %v23876_v26 = vadd.f32 %v3207_v53, %v23745_v22  ;;  %v21302_v54 = vld [vmem:[#allocation12 + $0x520] sm:$0xff]   ;;  %v3211_v5 = vrot.slane %v23849_v61, %v23559_v45  ;;  %v21304_v53 = vld [vmem:[#allocation12 + $0x568] sm:$0xff]  }
 0x352   :  { %19450 = vmatprep.subr.bf16.mxu1 %v21288_v58 }
 0x353   :  { %19429 = vmatpush3.bf16.msra.mxu0 %v21289_v18  ;;  %25446 = vst [vmem:[#allocation72_spill] sm:$0xff] %v23873_v3  ;;  %25447 = vst [vmem:[#allocation73_spill] sm:$0xff] %v23876_v26  ;;  %v16880_v58 = vmax.f32 %v23873_v3, %v16881_v10  ;;  %v3215_v18 = vrot.slane %v23849_v61, %v23644_v52  ;;  %v21303_v10 = vld [vmem:[#allocation12 + $0x4e8] sm:$0xff]  }
 0x354   :  { %19451 = vmatpush3.bf16.msra.mxu1 %v21290_v62  ;;  %19430 = vmatprep.subr.bf16.mxu0 %v21291_v0  ;;  %v21299_v62 = vld [vmem:[#allocation12 + $0x4e0] sm:$0xff]  }
 0x355   :  { %19452 = vmatprep.subr.bf16.mxu1 %v21292_v37  ;;  %v21300_v0 = vld [vmem:[#allocation12 + $0x560] sm:$0xff]   ;;  %v16882_v37 = vmax.f32 %v23876_v26, %v16880_v58  ;;  %v23883_v22 = vadd.f32 %v3215_v18, %v23747_v24  ;;  %v21308_v58 = vld [vmem:[#allocation12 + $0x570] sm:$0xff]   ;;  %v3219_v24 = vrot.slane %v23849_v61, %v23594_v30 }
 0x357   :  { %19431 = vmatpush3.bf16.msra.mxu0 %v21293_v59  ;;  %25448 = vst [vmem:[#allocation74_spill] sm:$0xff] %v23883_v22  ;;  %v21305_v59 = vld [vmem:[#allocation12 + $0x4a8] sm:$0xff]  }
 0x358   :  { %19453 = vmatpush3.bf16.msra.mxu1 %v21294_v28  ;;  %19432 = vmatprep.subr.bf16.mxu0 %v21295_v25  ;;  %v16883_v28 = vmax.f32 %v23883_v22, %v16882_v37  ;;  %v21306_v25 = vld [vmem:[#allocation12 + $0x528] sm:$0xff]  }
 0x359   :  { %19454 = vmatprep.subr.bf16.mxu1 %v21296_v16  ;;  %v21307_v16 = vld [vmem:[#allocation12 + $0x4f0] sm:$0xff]  }
 0x35b   :  { %19433 = vmatpush3.bf16.msra.mxu0 %v21297_v6  ;;  %v23889_v6 = vadd.f32 %v3211_v5, %v23752_v43  ;;  %v21309_v43 = vld [vmem:[#allocation12 + $0x4b0] sm:$0xff]  }
 0x35c   :  { %19455 = vmatpush3.bf16.msra.mxu1 %v21298_v19  ;;  %19434 = vmatprep.subr.bf16.mxu0 %v21299_v62  ;;  %v3223_v19 = vrot.slane %v23849_v61, %v23647_v57  ;;  %v21310_v5 = vld [vmem:[#allocation12 + $0x530] sm:$0xff]  }
 0x35d   :  { %19456 = vmatprep.subr.bf16.mxu1 %v21300_v0  ;;  %25449 = vst [vmem:[#allocation75_spill] sm:$0xff] %v23889_v6  ;;  %v16885_v0 = vmax.f32 %v23889_v6, %v16883_v28 }
 0x35f   :  { %19435 = vmatpush3.bf16.msra.mxu0 %v21301_v50 }
 0x360   :  { %19457 = vmatpush3.bf16.msra.mxu1 %v21302_v54  ;;  %19436 = vmatprep.subr.bf16.mxu0 %v21303_v10  ;;  %v23905_v54 = vadd.f32 %v3219_v24, %v23754_v55  ;;  %v23908_v10 = vadd.f32 %v3223_v19, %v23812_v42  ;;  %v21315_v55 = vld [vmem:[#allocation12 + $0x5c0] sm:$0xff]   ;;  %v23914_v24 = vld [vmem:[#allocation10 + $0x20] sm:$0xff] }
 0x361   :  { %v23895_v18 = vpop.f32.mrb[32].mxu0  ;;  %v23897_v62 = vpop.f32.mrb[32].mxu1  ;;  %19458 = vmatprep.subr.bf16.mxu1 %v21304_v53  ;;  %v21316_v42 = vld [vmem:[#allocation12 + $0x640] sm:$0xff]  }
 0x362   :  { %v23900_v50 = vpop.f32.mrb[33].mxu0  ;;  %v23902_v37 = vpop.f32.mrb[33].mxu1  ;;  %25450 = vst [vmem:[#allocation76_spill] sm:$0xff] %v23905_v54  ;;  %25451 = vst [vmem:[#allocation77_spill] sm:$0xff] %v23908_v10  ;;  %v16884_v7 = vmax.f32 %v23905_v54, %v16885_v0  ;;  %v21318_v19 = vld [vmem:[#allocation12 + $0x600] sm:$0xff]   ;;  %v21319_v0 = vld [vmem:[#allocation12 + $0x5c8] sm:$0xff]  }
 0x363   :  { %v2932_v2 = vpop.f32.mrb[34].mxu0  ;;  %v2973_v40 = vpop.f32.mrb[34].mxu1  ;;  %19437 = vmatpush3.bf16.msra.mxu0 %v21305_v59  ;;  %v21314_v59 = vld [vmem:[#allocation12 + $0x538] sm:$0xff]  }
 0x364   :  { %19459 = vmatpush3.bf16.msra.mxu1 %v21306_v25  ;;  %v2933_v53 = vpop.f32.mrb[35].mxu0  ;;  %v2974_v28 = vpop.f32.mrb[35].mxu1  ;;  %19438 = vmatprep.subr.bf16.mxu0 %v21307_v16  ;;  %v3231_v2 = vrot.slane %v23849_v61, %v23535_v49  ;;  %v21313_v40 = vld [vmem:[#allocation12 + $0x4b8] sm:$0xff]   ;;  %v16886_v8 = vmax.f32 %v23908_v10, %v16884_v7  ;;  %v21317_v25 = vld [vmem:[#allocation12 + $0x580] sm:$0xff]   ;;  %v23923_v7 = vpack.c.bf16 %v23810_v46, %v23810_v46  ;;  %v21341_v46 = vld [vmem:[#allocation12 + $0x5b0] sm:$0xff]  }
 0x365   :  { %19460 = vmatprep.subr.bf16.mxu1 %v21308_v58  ;;  %v3227_v58 = vrot.slane %v23849_v61, %v23599_v35  ;;  %v3239_v53 = vrot.slane %v23914_v24, %v23588_v27  ;;  %v21321_v28 = vld [vmem:[#allocation12 + $0x588] sm:$0xff]  }
 0x366   :  { %v23917_v16 = vadd.f32 %v3231_v2, %v23814_v11  ;;  %v21322_v2 = vld [vmem:[#allocation12 + $0x608] sm:$0xff]  }
 0x367   :  { %19439 = vmatpush3.bf16.msra.mxu0 %v21309_v43  ;;  %v21320_v43 = vld [vmem:[#allocation12 + $0x648] sm:$0xff]   ;;  %v23931_v11 = vadd.f32 %v3227_v58, %v23817_v1  ;;  %v23945_v1 = vpack.c.bf16 %v23889_v6, %v23889_v6  ;;  %v21326_v58 = vld [vmem:[#allocation12 + $0x610] sm:$0xff]   ;;  %v21327_v6 = vld [vmem:[#allocation12 + $0x5d8] sm:$0xff]  }
 0x368   :  { %19461 = vmatpush3.bf16.msra.mxu1 %v21310_v5  ;;  %19440 = vmatprep.subr.bf16.mxu0 %v21311_v9  ;;  %25452 = vst [vmem:[#allocation78_spill] sm:$0xff] %v23917_v16  ;;  %v16887_v9 = vmax.f32 %v23917_v16, %v16886_v8  ;;  %v3235_v5 = vrot.slane %v23849_v61, %v23540_v51 }
 0x369   :  { %19462 = vmatprep.subr.bf16.mxu1 %v21312_v29  ;;  %v23928_v29 = vpack.c.bf16 %v23832_v31, %v23832_v31  ;;  %25453 = vst [vmem:[#allocation79_spill] sm:$0xff] %v23931_v11  ;;  %v23940_v8 = vpack.c.bf16 %v23873_v3, %v23873_v3  ;;  %v21328_v3 = vld [vmem:[#allocation12 + $0x658] sm:$0xff]  }
 0x36a   :  { %v16889_v61 = vmax.f32 %v23931_v11, %v16887_v9 }
 0x36b   :  { %19441 = vmatpush3.bf16.msra.mxu0 %v21313_v40  ;;  %v21323_v40 = vld [vmem:[#allocation12 + $0x5d0] sm:$0xff]  }
 0x36c   :  { %19463 = vmatpush3.bf16.msra.mxu1 %v21314_v59  ;;  %19470 = vmatprep.subr.bf16.mxu0 %v21315_v55  ;;  %v21324_v59 = vld [vmem:[#allocation12 + $0x650] sm:$0xff]  }
 0x36d   :  { %19492 = vmatprep.subr.bf16.mxu1 %v21316_v42  ;;  %v21325_v55 = vld [vmem:[#allocation12 + $0x590] sm:$0xff]   ;;  %v23951_v42 = vadd.f32 %v3235_v5, %v23819_v23  ;;  %v21330_v5 = vld [vmem:[#allocation12 + $0x618] sm:$0xff]  }
 0x36e   :  { %6341 = vmatmul.mubr.bf16.vlgmr.msra.gmra.mrb[60].mxu0 %v23923_v7 }
 0x36f   :  { %6381 = vmatmul.mubr.bf16.vlgmr.msra.gmra.mrb[60].mxu1 %v23928_v29  ;;  %19471 = vmatpush3.bf16.msra.mxu0 %v21317_v25  ;;  %25454 = vst [vmem:[#allocation80_spill] sm:$0xff] %v23951_v42  ;;  %v23954_v25 = vadd.f32 %v3239_v53, %v23895_v18  ;;  %v16888_v9 = vmax.f32 %v23951_v42, %v16889_v61  ;;  %v21331_v18 = vld [vmem:[#allocation12 + $0x5e0] sm:$0xff]   ;;  %v25457_v61 = vlaneseq }
 0x370   :  { %6420 = vmatprep.mubr.bf16.mxu0 %v23940_v8  ;;  %19493 = vmatpush3.bf16.msra.mxu1 %v21318_v19  ;;  %v3247_v19 = vrot.slane %v23914_v24, %v23644_v52  ;;  %v3243_v53 = vrot.slane %v23914_v24, %v23559_v45  ;;  %v21343_v52 = vld [vmem:[#allocation12 + $0x5f8] sm:$0xff]  }
 0x371   :  { %6460 = vmatprep.mubr.bf16.mxu1 %v23945_v1  ;;  %19472 = vmatprep.subr.bf16.mxu0 %v21319_v0  ;;  %25455 = vst [vmem:[#allocation81_spill] sm:$0xff] %v23954_v25  ;;  %v21329_v0 = vld [vmem:[#allocation12 + $0x598] sm:$0xff]   ;;  %v16890_v23 = vmax.f32 %v23954_v25, %v16888_v9  ;;  %v21334_v9 = vld [vmem:[#allocation12 + $0x620] sm:$0xff]  }
 0x372   :  { %19494 = vmatprep.subr.bf16.mxu1 %v21320_v43  ;;  %v23961_v43 = vadd.f32 %v3247_v19, %v23897_v62  ;;  %v23970_v31 = vadd.f32 %v3243_v53, %v23900_v50  ;;  %v3251_v62 = vrot.slane %v23914_v24, %v23594_v30  ;;  %v21340_v50 = vld [vmem:[#allocation12 + $0x670] sm:$0xff]   ;;  %v21344_v45 = vld [vmem:[#allocation12 + $0x678] sm:$0xff]  }
 0x373   :  { %19473 = vmatpush3.bf16.msra.mxu0 %v21321_v28  ;;  %v21332_v28 = vld [vmem:[#allocation12 + $0x660] sm:$0xff]  }
 0x374   :  { %19495 = vmatpush3.bf16.msra.mxu1 %v21322_v2  ;;  %19474 = vmatprep.subr.bf16.mxu0 %v21323_v40  ;;  %25456 = vst [vmem:[#allocation82_spill] sm:$0xff] %v23961_v43  ;;  %v23966_v2 = vand.u32 127, %v25457_v61  ;;  %v21333_v40 = vld [vmem:[#allocation12 + $0x5a0] sm:$0xff]   ;;  %25459 = vst [vmem:[#allocation84_spill] sm:$0xff] %v23970_v31  ;;  %v21339_v61 = vld [vmem:[#allocation12 + $0x5f0] sm:$0xff]   ;;  %v23981_v53 = vadd.f32 %v3251_v62, %v23902_v37  ;;  %v3259_v37 = vrot.slane %v23914_v24, %v23599_v35 }
 0x375   :  { %19496 = vmatprep.subr.bf16.mxu1 %v21324_v59  ;;  %v16891_v59 = vmax.f32 %v23961_v43, %v16890_v23  ;;  %v21338_v23 = vld [vmem:[#allocation12 + $0x628] sm:$0xff]   ;;  %v21342_v62 = vld [vmem:[#allocation12 + $0x630] sm:$0xff]  }
 0x376   :  { %25458 = vst [vmem:[#allocation83_spill] sm:$0xff] %v23966_v2  ;;  %25461 = vst [vmem:[#allocation86_spill] sm:$0xff] %v23981_v53 }
 0x377   :  { %19475 = vmatpush3.bf16.msra.mxu0 %v21325_v55  ;;  %v21335_v55 = vld [vmem:[#allocation12 + $0x5e8] sm:$0xff]   ;;  %v16893_v19 = vmax.f32 %v23970_v31, %v16891_v59 }
 0x378   :  { %19497 = vmatpush3.bf16.msra.mxu1 %v21326_v58  ;;  %19476 = vmatprep.subr.bf16.mxu0 %v21327_v6  ;;  %v23975_v6 = vadd.s32 4992, %v23966_v2  ;;  %v21336_v58 = vld [vmem:[#allocation12 + $0x668] sm:$0xff]  }
 0x379   :  { %19498 = vmatprep.subr.bf16.mxu1 %v21328_v3  ;;  %v21337_v3 = vld [vmem:[#allocation12 + $0x5a8] sm:$0xff]   ;;  %v16892_v2 = vmax.f32 %v23981_v53, %v16893_v19 }
 0x37a   :  { %25460 = vst [vmem:[#allocation85_spill] sm:$0xff] %v23975_v6  ;;  %vm16818_vm2 = vcmp.lt.s32.totalorder %v23975_v6, 5004 }
 0x37b   :  { %19477 = vmatpush3.bf16.msra.mxu0 %v21329_v0  ;;  %v3255_v0 = vrot.slane %v23914_v24, %v23647_v57 }
 0x37c   :  { %19499 = vmatpush3.bf16.msra.mxu1 %v21330_v5  ;;  %19478 = vmatprep.subr.bf16.mxu0 %v21331_v18  ;;  %v3263_v5 = vrot.slane %v23914_v24, %v23535_v49  ;;  %v3267_v18 = vrot.slane %v23914_v24, %v23540_v51  ;;  %v21345_v24 = vld [vmem:[#allocation12 + $0x5b8] sm:$0xff]  }
 0x37d   :  { %19500 = vmatprep.subr.bf16.mxu1 %v21332_v28  ;;  %v21410_v49 = vld [vmem:[#allocation12 + $0x838] sm:$0xff]  }
 0x37f   :  { %19479 = vmatpush3.bf16.msra.mxu0 %v21333_v40 }
 0x380   :  { %19501 = vmatpush3.bf16.msra.mxu1 %v21334_v9  ;;  %19480 = vmatprep.subr.bf16.mxu0 %v21335_v55 }
 0x381   :  { %v3010_v28 = vpop.f32.mrb[36].mxu0  ;;  %v3051_v59 = vpop.f32.mrb[36].mxu1  ;;  %19502 = vmatprep.subr.bf16.mxu1 %v21336_v58 }
 0x382   :  { %v23988_v57 = vadd.f32 %v3255_v0, %v3010_v28  ;;  %v3012_v40 = vpop.f32.mrb[37].mxu0  ;;  %v3053_v9 = vpop.f32.mrb[37].mxu1  ;;  %v23993_v51 = vadd.f32 %v3263_v5, %v3051_v59  ;;  %v21351_v59 = vld [vmem:[#allocation12 + $0x6c8] sm:$0xff]  }
 0x383   :  { %v3014_v30 = vpop.f32.mrb[38].mxu0  ;;  %v3055_v27 = vpop.f32.mrb[38].mxu1  ;;  %19481 = vmatpush3.bf16.msra.mxu0 %v21337_v3  ;;  %v23995_v58 = vadd.f32 %v3267_v18, %v3053_v9  ;;  %v21347_v3 = vld [vmem:[#allocation12 + $0x6c0] sm:$0xff]   ;;  %v21354_v9 = vld [vmem:[#allocation12 + $0x708] sm:$0xff]  }
 0x384   :  { %25462 = vst [vmem:[#allocation87_spill] sm:$0xff] %v23988_v57  ;;  %v16894_v55 = vmax.f32 %v23988_v57, %v16892_v2  ;;  %25463 = vst [vmem:[#allocation88_spill] sm:$0xff] %v23993_v51  ;;  %19503 = vmatpush3.bf16.msra.mxu1 %v21338_v23  ;;  %v3015_v19 = vpop.f32.mrb[39].mxu0  ;;  %v3056_v0 = vpop.f32.mrb[39].mxu1  ;;  %19482 = vmatprep.subr.bf16.mxu0 %v21339_v61  ;;  %v23999_v30 = vadd.f32 %v3259_v37, %v3012_v40  ;;  %v21346_v27 = vld [vmem:[#allocation12 + $0x638] sm:$0xff]   ;;  %v21348_v2 = vld [vmem:[#allocation12 + $0x740] sm:$0xff]  }
 0x385   :  { %19504 = vmatprep.subr.bf16.mxu1 %v21340_v50  ;;  %v24003_v18 = vsel %vm16818_vm2, %v23995_v58, -1e+30  ;;  %v21349_v23 = vld [vmem:[#allocation12 + $0x680] sm:$0xff]   ;;  %v24008_v40 = vpack.c.bf16 %v23852_v36, %v23852_v36  ;;  %v24012_v37 = vpack.c.bf16 %v23876_v26, %v23876_v26  ;;  %v21356_v19 = vld [vmem:[#allocation12 + $0x750] sm:$0xff]  }
 0x386   :  { %v16895_v28 = vmax.f32 %v23993_v51, %v16894_v55  ;;  %25464 = vst [vmem:[#allocation89_spill] sm:$0xff] %v23999_v30  ;;  %25465 = vst [vmem:[#allocation90_spill] sm:$0xff] %v24003_v18  ;;  %v21350_v50 = vld [vmem:[#allocation12 + $0x700] sm:$0xff]   ;;  %v21355_v55 = vld [vmem:[#allocation12 + $0x6d0] sm:$0xff]  }
 0x387   :  { %19483 = vmatpush3.bf16.msra.mxu0 %v21341_v46  ;;  %v21352_v46 = vld [vmem:[#allocation12 + $0x748] sm:$0xff]   ;;  %v21357_v0 = vld [vmem:[#allocation12 + $0x690] sm:$0xff]   ;;  %v21381_v36 = vld [vmem:[#allocation12 + $0x780] sm:$0xff]  }
 0x388   :  { %v16896_v5 = vmax.f32 %v23999_v30, %v16895_v28  ;;  %19505 = vmatpush3.bf16.msra.mxu1 %v21342_v62  ;;  %19484 = vmatprep.subr.bf16.mxu0 %v21343_v52  ;;  %v21353_v52 = vld [vmem:[#allocation12 + $0x688] sm:$0xff]   ;;  %v24022_v62 = vpack.c.bf16 %v23931_v11, %v23931_v11  ;;  %v21359_v28 = vld [vmem:[#allocation12 + $0x6d8] sm:$0xff]  }
 0x389   :  { %19506 = vmatprep.subr.bf16.mxu1 %v21344_v45  ;;  %v24017_v45 = vpack.c.bf16 %v23905_v54, %v23905_v54  ;;  %v21375_v11 = vld [vmem:[#allocation12 + $0x6f8] sm:$0xff]  }
 0x38a   :  { %v16897_v61 = vmax.f32 %v24003_v18, %v16896_v5  ;;  %v21363_v5 = vld [vmem:[#allocation12 + $0x6e0] sm:$0xff]   ;;  %v21376_v54 = vld [vmem:[#allocation12 + $0x778] sm:$0xff]  }
 0x38b   :  { %19485 = vmatpush3.bf16.msra.mxu0 %v21345_v24  ;;  %v21358_v24 = vld [vmem:[#allocation12 + $0x710] sm:$0xff]  }
 0x38c   :  { %19507 = vmatpush3.bf16.msra.mxu1 %v21346_v27  ;;  %16898 = vmax.xlane.f32.xlu0 %v16897_v61  ;;  %v21360_v27 = vld [vmem:[#allocation12 + $0x758] sm:$0xff]   ;;  %v21365_v61 = vld [vmem:[#allocation12 + $0x6a0] sm:$0xff]  }
 0x38d   :  { %19514 = vmatprep.subr.bf16.mxu0 %v21347_v3  ;;  %19536 = vmatprep.subr.bf16.mxu1 %v21348_v2  ;;  %v21361_v3 = vld [vmem:[#allocation12 + $0x698] sm:$0xff]  }
 0x38e   :  { %6421 = vmatmul.mubr.bf16.vlgmr.msra.gmra.mrb[64].mxu0 %v24008_v40  ;;  %v21362_v2 = vld [vmem:[#allocation12 + $0x718] sm:$0xff]  }
 0x38f   :  { %6461 = vmatmul.mubr.bf16.vlgmr.msra.gmra.mrb[64].mxu1 %v24012_v37  ;;  %19515 = vmatpush3.bf16.msra.mxu0 %v21349_v23  ;;  %v21364_v23 = vld [vmem:[#allocation12 + $0x760] sm:$0xff]  }
 0x390   :  { %6500 = vmatprep.mubr.bf16.mxu0 %v24017_v45  ;;  %19537 = vmatpush3.bf16.msra.mxu1 %v21350_v50  ;;  %v21366_v50 = vld [vmem:[#allocation12 + $0x720] sm:$0xff]  }
 0x391   :  { %6540 = vmatprep.mubr.bf16.mxu1 %v24022_v62  ;;  %19516 = vmatprep.subr.bf16.mxu0 %v21351_v59  ;;  %v21367_v59 = vld [vmem:[#allocation12 + $0x6e8] sm:$0xff]  }
 0x392   :  { %19538 = vmatprep.subr.bf16.mxu1 %v21352_v46  ;;  %v21368_v46 = vld [vmem:[#allocation12 + $0x768] sm:$0xff]  }
 0x393   :  { %19517 = vmatpush3.bf16.msra.mxu0 %v21353_v52  ;;  %v21369_v52 = vld [vmem:[#allocation12 + $0x6a8] sm:$0xff]  }
 0x394   :  { %19539 = vmatpush3.bf16.msra.mxu1 %v21354_v9  ;;  %19518 = vmatprep.subr.bf16.mxu0 %v21355_v55  ;;  %v21370_v9 = vld [vmem:[#allocation12 + $0x728] sm:$0xff]   ;;  %v21371_v55 = vld [vmem:[#allocation12 + $0x6f0] sm:$0xff]  }
 0x395   :  { %19540 = vmatprep.subr.bf16.mxu1 %v21356_v19  ;;  %v21372_v19 = vld [vmem:[#allocation12 + $0x770] sm:$0xff]  }
 0x397   :  { %19519 = vmatpush3.bf16.msra.mxu0 %v21357_v0 }
 0x398   :  { %19541 = vmatpush3.bf16.msra.mxu1 %v21358_v24  ;;  %19520 = vmatprep.subr.bf16.mxu0 %v21359_v28  ;;  %v21373_v28 = vld [vmem:[#allocation12 + $0x6b0] sm:$0xff]  }
 0x399   :  { %19542 = vmatprep.subr.bf16.mxu1 %v21360_v27 }
 0x39b   :  { %19521 = vmatpush3.bf16.msra.mxu0 %v21361_v3  ;;  %v21374_v3 = vld [vmem:[#allocation12 + $0x730] sm:$0xff]  }
 0x39c   :  { %19543 = vmatpush3.bf16.msra.mxu1 %v21362_v2  ;;  %19522 = vmatprep.subr.bf16.mxu0 %v21363_v5 }
 0x39d   :  { %19544 = vmatprep.subr.bf16.mxu1 %v21364_v23 }
 0x39f   :  { %19523 = vmatpush3.bf16.msra.mxu0 %v21365_v61 }
 0x3a0   :  { %19545 = vmatpush3.bf16.msra.mxu1 %v21366_v50  ;;  %19524 = vmatprep.subr.bf16.mxu0 %v21367_v59  ;;  %v21377_v50 = vld [vmem:[#allocation12 + $0x6b8] sm:$0xff]  }
 0x3a1   :  { %v24026_v0 = vpop.f32.mrb[40].mxu0  ;;  %v19244_v24 = vpop.f32.mrb[40].mxu1  ;;  %19546 = vmatprep.subr.bf16.mxu1 %v21368_v46  ;;  %v21378_v59 = vld [vmem:[#allocation12 + $0x738] sm:$0xff]   ;;  %v21379_v46 = vld [vmem:[#allocation12 + $0x7c0] sm:$0xff]  }
 0x3a2   :  { %v20584_v27 = vpop.f32.mrb[41].mxu0  ;;  %v19245_v18 = vpop.f32.mrb[41].mxu1 }
 0x3a3   :  { %v24028_v2 = vadd.f32 %v19245_v18, %v19244_v24  ;;  %v3095_v5 = vpop.f32.mrb[42].mxu0  ;;  %v19247_v23 = vpop.f32.mrb[42].mxu1  ;;  %19525 = vmatpush3.bf16.msra.mxu0 %v21369_v52  ;;  %v21380_v27 = vld [vmem:[#allocation12 + $0x840] sm:$0xff]   ;;  %v21383_v24 = vld [vmem:[#allocation12 + $0x7c8] sm:$0xff]   ;;  %v24032_v52 = vpack.c.bf16 %v23883_v22, %v23883_v22 }
 0x3a4   :  { %19547 = vmatpush3.bf16.msra.mxu1 %v21370_v9  ;;  %v20585_v61 = vpop.f32.mrb[43].mxu0  ;;  %v19248_v26 = vpop.f32.mrb[43].mxu1  ;;  %19526 = vmatprep.subr.bf16.mxu0 %v21371_v55  ;;  %v21382_v18 = vld [vmem:[#allocation12 + $0x800] sm:$0xff]   ;;  %v24036_v9 = vpack.c.bf16 %v23908_v10, %v23908_v10  ;;  %v21386_v55 = vld [vmem:[#allocation12 + $0x808] sm:$0xff]   ;;  %v21389_v5 = vld [vmem:[#allocation12 + $0x790] sm:$0xff]  }
 0x3a5   :  { %19548 = vmatprep.subr.bf16.mxu1 %v21372_v19  ;;  %v21384_v26 = vld [vmem:[#allocation12 + $0x848] sm:$0xff]   ;;  %v24046_v19 = vpack.c.bf16 %v23970_v31, %v23970_v31  ;;  %v21390_v23 = vld [vmem:[#allocation12 + $0x810] sm:$0xff]   ;;  %v21391_v61 = vld [vmem:[#allocation12 + $0x7d8] sm:$0xff]  }
 0x3a6   :  { %v21398_v31 = vld [vmem:[#allocation12 + $0x820] sm:$0xff]   ;;  %v21407_v10 = vld [vmem:[#allocation12 + $0x7f8] sm:$0xff]  }
 0x3a7   :  { %19527 = vmatpush3.bf16.msra.mxu0 %v21373_v28  ;;  %v21387_v28 = vld [vmem:[#allocation12 + $0x7d0] sm:$0xff]  }
 0x3a8   :  { %19549 = vmatpush3.bf16.msra.mxu1 %v21374_v3  ;;  %19528 = vmatprep.subr.bf16.mxu0 %v21375_v11  ;;  %v21385_v11 = vld [vmem:[#allocation12 + $0x788] sm:$0xff]   ;;  %v21388_v3 = vld [vmem:[#allocation12 + $0x850] sm:$0xff]  }
 0x3a9   :  { %19550 = vmatprep.subr.bf16.mxu1 %v21376_v54  ;;  %v24041_v54 = vpack.c.bf16 %v23951_v42, %v23951_v42  ;;  %v21406_v42 = vld [vmem:[#allocation12 + $0x830] sm:$0xff]  }
 0x3ab   :  { %19529 = vmatpush3.bf16.msra.mxu0 %v21377_v50  ;;  %25466 = vst [vmem:[#allocation91_spill] sm:$0xff] %v24041_v54  ;;  %v21393_v50 = vld [vmem:[#allocation12 + $0x798] sm:$0xff]  }
 0x3ac   :  { %19551 = vmatpush3.bf16.msra.mxu1 %v21378_v59  ;;  %19558 = vmatprep.subr.bf16.mxu0 %v21379_v46  ;;  %v21394_v59 = vld [vmem:[#allocation12 + $0x818] sm:$0xff]   ;;  %v21395_v46 = vld [vmem:[#allocation12 + $0x7e0] sm:$0xff]  }
 0x3ad   :  { %19580 = vmatprep.subr.bf16.mxu1 %v21380_v27  ;;  %v21396_v27 = vld [vmem:[#allocation12 + $0x860] sm:$0xff]  }
 0x3ae   :  { %6501 = vmatmul.mubr.bf16.vlgmr.msra.gmra.mrb[68].mxu0 %v24032_v52 }
 0x3af   :  { %6541 = vmatmul.mubr.bf16.vlgmr.msra.gmra.mrb[68].mxu1 %v24036_v9  ;;  %19559 = vmatpush3.bf16.msra.mxu0 %v21381_v36  ;;  %v21392_v36 = vld [vmem:[#allocation12 + $0x858] sm:$0xff]  }
 0x3b0   :  { %6580 = vmatprep.mubr.bf16.mxu0 %v24041_v54  ;;  %19581 = vmatpush3.bf16.msra.mxu1 %v21382_v18  ;;  %v21397_v18 = vld [vmem:[#allocation12 + $0x7a0] sm:$0xff]  }
 0x3b1   :  { %6620 = vmatprep.mubr.bf16.mxu1 %v24046_v19  ;;  %19560 = vmatprep.subr.bf16.mxu0 %v21383_v24  ;;  %v21399_v24 = vld [vmem:[#allocation12 + $0x7e8] sm:$0xff]   ;;  %v21411_v54 = vld [vmem:[#allocation12 + $0x8c0] sm:$0xff]  }
 0x3b2   :  { %19582 = vmatprep.subr.bf16.mxu1 %v21384_v26  ;;  %v21400_v26 = vld [vmem:[#allocation12 + $0x868] sm:$0xff]  }
 0x3b3   :  { %19561 = vmatpush3.bf16.msra.mxu0 %v21385_v11  ;;  %v21401_v11 = vld [vmem:[#allocation12 + $0x7a8] sm:$0xff]  }
 0x3b4   :  { %19583 = vmatpush3.bf16.msra.mxu1 %v21386_v55  ;;  %19562 = vmatprep.subr.bf16.mxu0 %v21387_v28  ;;  %v21402_v55 = vld [vmem:[#allocation12 + $0x828] sm:$0xff]   ;;  %v21403_v28 = vld [vmem:[#allocation12 + $0x7f0] sm:$0xff]  }
 0x3b5   :  { %19584 = vmatprep.subr.bf16.mxu1 %v21388_v3  ;;  %v21404_v3 = vld [vmem:[#allocation12 + $0x870] sm:$0xff]  }
 0x3b7   :  { %19563 = vmatpush3.bf16.msra.mxu0 %v21389_v5 }
 0x3b8   :  { %19585 = vmatpush3.bf16.msra.mxu1 %v21390_v23  ;;  %19564 = vmatprep.subr.bf16.mxu0 %v21391_v61  ;;  %v21405_v23 = vld [vmem:[#allocation12 + $0x7b0] sm:$0xff]  }
 0x3b9   :  { %19586 = vmatprep.subr.bf16.mxu1 %v21392_v36 }
 0x3bb   :  { %19565 = vmatpush3.bf16.msra.mxu0 %v21393_v50 }
 0x3bc   :  { %19587 = vmatpush3.bf16.msra.mxu1 %v21394_v59  ;;  %19566 = vmatprep.subr.bf16.mxu0 %v21395_v46  ;;  %v21408_v46 = vld [vmem:[#allocation12 + $0x878] sm:$0xff]  }
 0x3bd   :  { %19588 = vmatprep.subr.bf16.mxu1 %v21396_v27 }
 0x3bf   :  { %19567 = vmatpush3.bf16.msra.mxu0 %v21397_v18 }
 0x3c0   :  { %19589 = vmatpush3.bf16.msra.mxu1 %v21398_v31  ;;  %19568 = vmatprep.subr.bf16.mxu0 %v21399_v24  ;;  %v21409_v24 = vld [vmem:[#allocation12 + $0x7b8] sm:$0xff]  }
 0x3c1   :  { %v19266_v5 = vpop.f32.mrb[44].mxu0  ;;  %19590 = vmatprep.subr.bf16.mxu1 %v21400_v26 }
 0x3c2   :  { %v19288_v61 = vpop.f32.mrb[44].mxu1  ;;  %v19267_v36 = vpop.f32.mrb[45].mxu0 }
 0x3c3   :  { %v19268_v50 = vadd.f32 %v19267_v36, %v19266_v5  ;;  %v19289_v22 = vpop.f32.mrb[45].mxu1  ;;  %v19269_v59 = vpop.f32.mrb[46].mxu0  ;;  %19569 = vmatpush3.bf16.msra.mxu0 %v21401_v11  ;;  %v21412_v5 = vld [vmem:[#allocation12 + $0x940] sm:$0xff]   ;;  %v21423_v36 = vld [vmem:[#allocation12 + $0x8d8] sm:$0xff]  }
 0x3c4   :  { %v19290_v27 = vadd.f32 %v19289_v22, %v19288_v61  ;;  %v19291_v6 = vpop.f32.mrb[46].mxu1  ;;  %19591 = vmatpush3.bf16.msra.mxu1 %v21402_v55  ;;  %v19270_v35 = vpop.f32.mrb[47].mxu0  ;;  %19570 = vmatprep.subr.bf16.mxu0 %v21403_v28  ;;  %v21413_v11 = vld [vmem:[#allocation12 + $0x880] sm:$0xff]   ;;  %v24059_v55 = vpack.c.bf16 %v23954_v25, %v23954_v25  ;;  %v21418_v28 = vld [vmem:[#allocation12 + $0x908] sm:$0xff]   ;;  %v21422_v61 = vld [vmem:[#allocation12 + $0x910] sm:$0xff]  }
 0x3c5   :  { %v6023_v31 = vadd.f32 %v19268_v50, %v24028_v2  ;;  %v19292_v18 = vpop.f32.mrb[47].mxu1  ;;  %19592 = vmatprep.subr.bf16.mxu1 %v21404_v3  ;;  %v21414_v22 = vld [vmem:[#allocation12 + $0x900] sm:$0xff]   ;;  %v21415_v6 = vld [vmem:[#allocation12 + $0x8c8] sm:$0xff]   ;;  %v24055_v35 = vpack.c.bf16 %v23917_v16, %v23917_v16  ;;  %v21420_v3 = vld [vmem:[#allocation12 + $0x950] sm:$0xff]  }
 0x3c6   :  { %v21416_v2 = vld [vmem:[#allocation12 + $0x948] sm:$0xff]   ;;  %v21424_v50 = vld [vmem:[#allocation12 + $0x958] sm:$0xff]   ;;  %v21429_v18 = vld [vmem:[#allocation12 + $0x8a0] sm:$0xff]  }
 0x3c7   :  { %v24051_v26 = vadd.f32 %v19290_v27, %v6023_v31  ;;  %19571 = vmatpush3.bf16.msra.mxu0 %v21405_v23  ;;  %v21421_v23 = vld [vmem:[#allocation12 + $0x890] sm:$0xff]   ;;  %v21425_v59 = vld [vmem:[#allocation12 + $0x898] sm:$0xff]   ;;  %v21427_v27 = vld [vmem:[#allocation12 + $0x8e0] sm:$0xff]  }
 0x3c8   :  { %19593 = vmatpush3.bf16.msra.mxu1 %v21406_v42  ;;  %19572 = vmatprep.subr.bf16.mxu0 %v21407_v10  ;;  %v24064_v10 = vpack.c.bf16 %v23981_v53, %v23981_v53  ;;  %v21417_v42 = vld [vmem:[#allocation12 + $0x888] sm:$0xff]   ;;  %v21428_v31 = vld [vmem:[#allocation12 + $0x960] sm:$0xff]   ;;  %v21442_v25 = vld [vmem:[#allocation12 + $0x938] sm:$0xff]  }
 0x3c9   :  { %19594 = vmatprep.subr.bf16.mxu1 %v21408_v46  ;;  %v21426_v46 = vld [vmem:[#allocation12 + $0x918] sm:$0xff]  }
 0x3cb   :  { %19573 = vmatpush3.bf16.msra.mxu0 %v21409_v24  ;;  %v21430_v24 = vld [vmem:[#allocation12 + $0x920] sm:$0xff]  }
 0x3cc   :  { %19595 = vmatpush3.bf16.msra.mxu1 %v21410_v49  ;;  %19602 = vmatprep.subr.bf16.mxu0 %v21411_v54  ;;  %v24069_v49 = vpack.c.bf16 %v23999_v30, %v23999_v30  ;;  %v21419_v54 = vld [vmem:[#allocation12 + $0x8d0] sm:$0xff]  }
 0x3cd   :  { %19624 = vmatprep.subr.bf16.mxu1 %v21412_v5  ;;  %v21431_v5 = vld [vmem:[#allocation12 + $0x8e8] sm:$0xff]  }
 0x3ce   :  { %6581 = vmatmul.mubr.bf16.vlgmr.msra.gmra.mrb[72].mxu0 %v24055_v35 }
 0x3cf   :  { %6621 = vmatmul.mubr.bf16.vlgmr.msra.gmra.mrb[72].mxu1 %v24059_v55  ;;  %19603 = vmatpush3.bf16.msra.mxu0 %v21413_v11  ;;  %v21432_v11 = vld [vmem:[#allocation12 + $0x968] sm:$0xff]  }
 0x3d0   :  { %6660 = vmatprep.mubr.bf16.mxu0 %v24064_v10  ;;  %19625 = vmatpush3.bf16.msra.mxu1 %v21414_v22  ;;  %v21433_v22 = vld [vmem:[#allocation12 + $0x8a8] sm:$0xff]  }
 0x3d1   :  { %6700 = vmatprep.mubr.bf16.mxu1 %v24069_v49  ;;  %19604 = vmatprep.subr.bf16.mxu0 %v21415_v6  ;;  %v21434_v6 = vld [vmem:[#allocation12 + $0x928] sm:$0xff]  }
 0x3d2   :  { %19626 = vmatprep.subr.bf16.mxu1 %v21416_v2  ;;  %v21435_v2 = vld [vmem:[#allocation12 + $0x8f0] sm:$0xff]  }
 0x3d3   :  { %19605 = vmatpush3.bf16.msra.mxu0 %v21417_v42  ;;  %v21436_v42 = vld [vmem:[#allocation12 + $0x970] sm:$0xff]  }
 0x3d4   :  { %19627 = vmatpush3.bf16.msra.mxu1 %v21418_v28  ;;  %19606 = vmatprep.subr.bf16.mxu0 %v21419_v54  ;;  %v21437_v54 = vld [vmem:[#allocation12 + $0x8b0] sm:$0xff]  }
 0x3d5   :  { %19628 = vmatprep.subr.bf16.mxu1 %v21420_v3 }
 0x3d7   :  { %19607 = vmatpush3.bf16.msra.mxu0 %v21421_v23 }
 0x3d8   :  { %19629 = vmatpush3.bf16.msra.mxu1 %v21422_v61  ;;  %19608 = vmatprep.subr.bf16.mxu0 %v21423_v36  ;;  %v21438_v61 = vld [vmem:[#allocation12 + $0x930] sm:$0xff]   ;;  %v21439_v36 = vld [vmem:[#allocation12 + $0x8f8] sm:$0xff]  }
 0x3d9   :  { %19630 = vmatprep.subr.bf16.mxu1 %v21424_v50 }
 0x3db   :  { %19609 = vmatpush3.bf16.msra.mxu0 %v21425_v59 }
 0x3dc   :  { %19631 = vmatpush3.bf16.msra.mxu1 %v21426_v46  ;;  %19610 = vmatprep.subr.bf16.mxu0 %v21427_v27  ;;  %v21440_v27 = vld [vmem:[#allocation12 + $0x978] sm:$0xff]  }
 0x3dd   :  { %19632 = vmatprep.subr.bf16.mxu1 %v21428_v31 }
 0x3df   :  { %19611 = vmatpush3.bf16.msra.mxu0 %v21429_v18 }
 0x3e0   :  { %19633 = vmatpush3.bf16.msra.mxu1 %v21430_v24  ;;  %19612 = vmatprep.subr.bf16.mxu0 %v21431_v5 }
 0x3e1   :  { %v19310_v28 = vpop.f32.mrb[48].mxu0  ;;  %19634 = vmatprep.subr.bf16.mxu1 %v21432_v11  ;;  %v21441_v11 = vld [vmem:[#allocation12 + $0x8b8] sm:$0xff]  }
 0x3e2   :  { %v19332_v3 = vpop.f32.mrb[48].mxu1  ;;  %v19311_v23 = vpop.f32.mrb[49].mxu0 }
 0x3e3   :  { %v19312_v50 = vadd.f32 %v19311_v23, %v19310_v28  ;;  %v19333_v59 = vpop.f32.mrb[49].mxu1  ;;  %v19313_v46 = vpop.f32.mrb[50].mxu0  ;;  %19613 = vmatpush3.bf16.msra.mxu0 %v21433_v22  ;;  %v21443_v28 = vld [vmem:[#allocation12 + $0x9c0] sm:$0xff]   ;;  %v21445_v22 = vld [vmem:[#allocation12 + $0x9c8] sm:$0xff]  }
 0x3e4   :  { %v19334_v31 = vadd.f32 %v19333_v59, %v19332_v3  ;;  %v19335_v30 = vpop.f32.mrb[50].mxu1  ;;  %19635 = vmatpush3.bf16.msra.mxu1 %v21434_v6  ;;  %v19314_v53 = vpop.f32.mrb[51].mxu0  ;;  %19614 = vmatprep.subr.bf16.mxu0 %v21435_v2  ;;  %v21444_v23 = vld [vmem:[#allocation12 + $0x980] sm:$0xff]   ;;  %v24085_v6 = vpack.c.bf16 %v23995_v58, %v23995_v58  ;;  %v21446_v2 = vld [vmem:[#allocation12 + $0x988] sm:$0xff]   ;;  %v21450_v58 = vld [vmem:[#allocation12 + $0x998] sm:$0xff]  }
 0x3e5   :  { %v6103_v18 = vadd.f32 %v19312_v50, %v24051_v26  ;;  %v19336_v24 = vpop.f32.mrb[51].mxu1  ;;  %19636 = vmatprep.subr.bf16.mxu1 %v21436_v42  ;;  %v24076_v30 = vpack.c.bf16 %v23961_v43, %v23961_v43  ;;  %v24080_v53 = vpack.c.bf16 %v23988_v57, %v23988_v57  ;;  %v25467_v26 = vmov 0.0   ;;  %v21448_v42 = vld [vmem:[#allocation12 + $0x990] sm:$0xff]   ;;  %v21451_v3 = vld [vmem:[#allocation12 + $0x9e0] sm:$0xff]   ;;  %v21454_v50 = vld [vmem:[#allocation12 + $0x9a8] sm:$0xff]  }
 0x3e6   :  { %v21455_v59 = vld [vmem:[#allocation12 + $0x9f0] sm:$0xff]   ;;  %v22448_v43 = vld [vmem:[#allocation22 + $0x578] sm:$0xff]  }
 0x3e7   :  { %v6143_v5 = vadd.f32 %v19334_v31, %v6103_v18  ;;  %19615 = vmatpush3.bf16.msra.mxu0 %v21437_v54  ;;  %v21449_v54 = vld [vmem:[#allocation12 + $0x9d8] sm:$0xff]   ;;  %v21456_v18 = vld [vmem:[#allocation12 + $0x9b0] sm:$0xff]  }
 0x3e8   :  { %19637 = vmatpush3.bf16.msra.mxu1 %v21438_v61  ;;  %19616 = vmatprep.subr.bf16.mxu0 %v21439_v36  ;;  %v21452_v61 = vld [vmem:[#allocation12 + $0x9a0] sm:$0xff]   ;;  %v21453_v36 = vld [vmem:[#allocation12 + $0x9e8] sm:$0xff]  }
 0x3e9   :  { %19638 = vmatprep.subr.bf16.mxu1 %v21440_v27  ;;  %v21461_v57 = vld [vmem:[#allocation15 + $0x48] sm:$0xff]  }
 0x3eb   :  { %19617 = vmatpush3.bf16.msra.mxu0 %v21441_v11 }
 0x3ec   :  { %19639 = vmatpush3.bf16.msra.mxu1 %v21442_v25  ;;  %19646 = vmatprep.subr.bf16.mxu0 %v21443_v28  ;;  %v21447_v25 = vld [vmem:[#allocation12 + $0x9d0] sm:$0xff]  }
 0x3ed   :  { %20586 = vmatprep.subr.bf16.mxu1 %v25467_v26 }
 0x3ee   :  { %6661 = vmatmul.mubr.bf16.vlgmr.msra.gmra.mrb[76].mxu0 %v24076_v30 }
 0x3ef   :  { %6701 = vmatmul.mubr.bf16.vlgmr.msra.gmra.mrb[76].mxu1 %v24080_v53  ;;  %19647 = vmatpush3.bf16.msra.mxu0 %v21444_v23  ;;  %v21457_v23 = vld [vmem:[#allocation12 + $0x9f8] sm:$0xff]  }
 0x3f0   :  { %6740 = vmatprep.mubr.bf16.mxu0 %v24085_v6  ;;  %19648 = vmatprep.subr.bf16.mxu0 %v21445_v22 }
 0x3f1   :  { %20602 = vmatprep.mubr.msk.bf16.mxu1 %vm23180_vm1, %v25467_v26 }
 0x3f3   :  { %19649 = vmatpush3.bf16.msra.mxu0 %v21446_v2 }
 0x3f4   :  { %19650 = vmatprep.subr.bf16.mxu0 %v21447_v25 }
 0x3f7   :  { %19651 = vmatpush3.bf16.msra.mxu0 %v21448_v42 }
 0x3f8   :  { %19652 = vmatprep.subr.bf16.mxu0 %v21449_v54 }
 0x3fb   :  { %19653 = vmatpush3.bf16.msra.mxu0 %v21450_v58 }
 0x3fc   :  { %19654 = vmatprep.subr.bf16.mxu0 %v21451_v3  ;;  %v21458_v3 = vld [vmem:[#allocation12 + $0x9b8] sm:$0xff]  }
 0x3ff   :  { %19655 = vmatpush3.bf16.msra.mxu0 %v21452_v61  ;;  %v21459_v61 = vld [vmem:[#allocation15 + $0x40] sm:$0xff]  }
 0x400   :  { %19656 = vmatprep.subr.bf16.mxu0 %v21453_v36  ;;  %v21460_v36 = vld [vmem:[#allocation15] sm:$0xff]  }
 0x401   :  { %v19354_v46 = vpop.f32.mrb[52].mxu0 }
 0x402   :  { %v19376_v27 = vpop.f32.mrb[52].mxu1  ;;  %v19355_v31 = vpop.f32.mrb[53].mxu0 }
 0x403   :  { %v19356_v24 = vadd.f32 %v19355_v31, %v19354_v46  ;;  %v19377_v11 = vpop.f32.mrb[53].mxu1  ;;  %v19357_v28 = vpop.f32.mrb[54].mxu0  ;;  %19657 = vmatpush3.bf16.msra.mxu0 %v21454_v50  ;;  %v24094_v46 = vpack.c.bf16 %v23993_v51, %v23993_v51  ;;  %v21463_v50 = vld [vmem:[#allocation15 + $0x50] sm:$0xff]   ;;  %v21466_v31 = vld [vmem:[#allocation15 + $0x18] sm:$0xff]  }
 0x404   :  { %v19378_v22 = vadd.f32 %v19377_v11, %v19376_v27  ;;  %v19379_v2 = vpop.f32.mrb[54].mxu1  ;;  %v19358_v25 = vpop.f32.mrb[55].mxu0  ;;  %19658 = vmatprep.subr.bf16.mxu0 %v21455_v59  ;;  %v21464_v59 = vld [vmem:[#allocation15 + $0x10] sm:$0xff]   ;;  %v21465_v27 = vld [vmem:[#allocation15 + $0x58] sm:$0xff]   ;;  %v21469_v11 = vld [vmem:[#allocation15 + $0x68] sm:$0xff]  }
 0x405   :  { %v6183_v42 = vadd.f32 %v19356_v24, %v6143_v5  ;;  %v19380_v54 = vpop.f32.mrb[55].mxu1  ;;  %v21462_v5 = vld [vmem:[#allocation15 + $0x8] sm:$0xff]   ;;  %v21468_v24 = vld [vmem:[#allocation15 + $0x20] sm:$0xff]   ;;  %v21472_v2 = vld [vmem:[#allocation15 + $0x30] sm:$0xff]  }
 0x406   :  { %v21470_v28 = vld [vmem:[#allocation15 + $0x28] sm:$0xff]   ;;  %v22446_v51 = vld [vmem:[#allocation22 + $0x530] sm:$0xff]  }
 0x407   :  { %v6223_v58 = vadd.f32 %v19378_v22, %v6183_v42  ;;  %19659 = vmatpush3.bf16.msra.mxu0 %v21456_v18  ;;  %v21467_v18 = vld [vmem:[#allocation15 + $0x60] sm:$0xff]  }
 0x408   :  { %19660 = vmatprep.subr.bf16.mxu0 %v21457_v23  ;;  %v21471_v23 = vld [vmem:[#allocation15 + $0x70] sm:$0xff]  }
 0x40b   :  { %19661 = vmatpush3.bf16.msra.mxu0 %v21458_v3  ;;  %v21473_v3 = vld [vmem:[#allocation15 + $0x78] sm:$0xff]  }
 0x40c   :  { %19677 = vmatprep.subr.bf16.mxu0 %v21459_v61 }
 0x40e   :  { %6741 = vmatmul.mubr.bf16.vlgmr.msra.gmra.mrb[80].mxu0 %v24094_v46 }
 0x40f   :  { %19678 = vmatpush3.bf16.msra.mxu0 %v21460_v36  ;;  %9454 = vmatprep.mubr.bf16.mxu0 %v23579_v14 }
 0x410   :  { %19679 = vmatprep.subr.bf16.mxu0 %v21461_v57 }
 0x413   :  { %19680 = vmatpush3.bf16.msra.mxu0 %v21462_v5 }
 0x414   :  { %19681 = vmatprep.subr.bf16.mxu0 %v21463_v50 }
 0x417   :  { %19682 = vmatpush3.bf16.msra.mxu0 %v21464_v59 }
 0x418   :  { %19683 = vmatprep.subr.bf16.mxu0 %v21465_v27 }
 0x41b   :  { %19684 = vmatpush3.bf16.msra.mxu0 %v21466_v31  ;;  %v21474_v31 = vld [vmem:[#allocation15 + $0x38] sm:$0xff]  }
 0x41c   :  { %19685 = vmatprep.subr.bf16.mxu0 %v21467_v18  ;;  %v21475_v18 = vld [vmem:[#allocation15 + $0x140] sm:$0xff]  }
 0x41f   :  { %19686 = vmatpush3.bf16.msra.mxu0 %v21468_v24  ;;  %v21476_v24 = vld [vmem:[#allocation15 + $0x100] sm:$0xff]  }
 0x420   :  { %19687 = vmatprep.subr.bf16.mxu0 %v21469_v11  ;;  %v21477_v11 = vld [vmem:[#allocation15 + $0x148] sm:$0xff]  }
 0x421   :  { %v19398_v14 = vpop.f32.mrb[56].mxu0 }
 0x422   :  { %v19420_v22 = vpop.f32.mrb[56].mxu1  ;;  %v19399_v57 = vpop.f32.mrb[57].mxu0 }
 0x423   :  { %v19400_v25 = vadd.f32 %v19399_v57, %v19398_v14  ;;  %v19421_v42 = vpop.f32.mrb[57].mxu1  ;;  %v19401_v54 = vpop.f32.mrb[58].mxu0  ;;  %19688 = vmatpush3.bf16.msra.mxu0 %v21470_v28  ;;  %v21478_v28 = vld [vmem:[#allocation15 + $0x108] sm:$0xff]   ;;  %v21479_v14 = vld [vmem:[#allocation15 + $0x150] sm:$0xff]   ;;  %v21483_v57 = vld [vmem:[#allocation15 + $0x160] sm:$0xff]  }
 0x424   :  { %v19422_v61 = vadd.f32 %v19421_v42, %v19420_v22  ;;  %v19423_v36 = vpop.f32.mrb[58].mxu1  ;;  %v19402_v5 = vpop.f32.mrb[59].mxu0  ;;  %19689 = vmatprep.subr.bf16.mxu0 %v21471_v23  ;;  %v21481_v23 = vld [vmem:[#allocation15 + $0x158] sm:$0xff]   ;;  %v21486_v42 = vld [vmem:[#allocation15 + $0x128] sm:$0xff]  }
 0x425   :  { %v6263_v50 = vadd.f32 %v19400_v25, %v6223_v58  ;;  %v19424_v59 = vpop.f32.mrb[59].mxu1  ;;  %v21480_v58 = vld [vmem:[#allocation15 + $0x110] sm:$0xff]   ;;  %v21482_v22 = vld [vmem:[#allocation15 + $0x118] sm:$0xff]   ;;  %v21485_v25 = vld [vmem:[#allocation15 + $0x168] sm:$0xff]  }
 0x426   :  { %v21489_v59 = vld [vmem:[#allocation15 + $0x178] sm:$0xff]  }
 0x427   :  { %v6303_v27 = vadd.f32 %v19422_v61, %v6263_v50  ;;  %19690 = vmatpush3.bf16.msra.mxu0 %v21472_v2  ;;  %v21484_v2 = vld [vmem:[#allocation15 + $0x120] sm:$0xff]   ;;  %v21488_v61 = vld [vmem:[#allocation15 + $0x130] sm:$0xff]  }
 0x428   :  { %19691 = vmatprep.subr.bf16.mxu0 %v21473_v3 }
 0x42b   :  { %19692 = vmatpush3.bf16.msra.mxu0 %v21474_v31 }
 0x42c   :  { %19721 = vmatprep.subr.bf16.mxu0 %v21475_v18 }
 0x42e   :  { %9455 = vmatmul.mubr.bf16.vlgmr.msra.gmra.mrb[84].mxu0 %v23629_v20  ;;  %v21487_v20 = vld [vmem:[#allocation15 + $0x170] sm:$0xff]  }
 0x42f   :  { %19722 = vmatpush3.bf16.msra.mxu0 %v21476_v24  ;;  %9534 = vmatprep.mubr.bf16.mxu0 %v23639_v17 }
 0x430   :  { %19723 = vmatprep.subr.bf16.mxu0 %v21477_v11 }
 0x433   :  { %19724 = vmatpush3.bf16.msra.mxu0 %v21478_v28 }
 0x434   :  { %19725 = vmatprep.subr.bf16.mxu0 %v21479_v14 }
 0x437   :  { %19726 = vmatpush3.bf16.msra.mxu0 %v21480_v58  ;;  %v21490_v58 = vld [vmem:[#allocation15 + $0x138] sm:$0xff]  }
 0x438   :  { %19727 = vmatprep.subr.bf16.mxu0 %v21481_v23  ;;  %v21491_v23 = vld [vmem:[#allocation15 + $0x240] sm:$0xff]  }
 0x43b   :  { %19728 = vmatpush3.bf16.msra.mxu0 %v21482_v22  ;;  %v21492_v22 = vld [vmem:[#allocation15 + $0x200] sm:$0xff]  }
 0x43c   :  { %19729 = vmatprep.subr.bf16.mxu0 %v21483_v57  ;;  %v21493_v57 = vld [vmem:[#allocation15 + $0x248] sm:$0xff]  }
 0x43f   :  { %19730 = vmatpush3.bf16.msra.mxu0 %v21484_v2  ;;  %v21555_v2 = vld [vmem:[#allocation16] sm:$0xff]  }
 0x440   :  { %19731 = vmatprep.subr.bf16.mxu0 %v21485_v25  ;;  %20587 = vmatpush3.bf16.msra.mxu1 %v21555_v2  ;;  %v21558_v25 = vld [vmem:[#allocation16 + $0x8] sm:$0xff]  }
 0x441   :  { %v19442_v17 = vpop.f32.mrb[60].mxu0  ;;  %20588 = vmatprep.subr.bf16.mxu1 %v25467_v26 }
 0x442   :  { %v19464_v54 = vpop.f32.mrb[60].mxu1  ;;  %v19443_v3 = vpop.f32.mrb[61].mxu0 }
 0x443   :  { %v19444_v36 = vadd.f32 %v19443_v3, %v19442_v17  ;;  %v19465_v5 = vpop.f32.mrb[61].mxu1  ;;  %v19445_v50 = vpop.f32.mrb[62].mxu0  ;;  %19732 = vmatpush3.bf16.msra.mxu0 %v21486_v42  ;;  %v21495_v42 = vld [vmem:[#allocation15 + $0x250] sm:$0xff]   ;;  %v21564_v3 = vld [vmem:[#allocation16 + $0x18] sm:$0xff]  }
 0x444   :  { %v19466_v31 = vadd.f32 %v19465_v5, %v19464_v54  ;;  %v19467_v18 = vpop.f32.mrb[62].mxu1  ;;  %v19446_v24 = vpop.f32.mrb[63].mxu0  ;;  %19733 = vmatprep.subr.bf16.mxu0 %v21487_v20  ;;  %20589 = vmatpush3.bf16.msra.mxu1 %v21558_v25  ;;  %v21496_v20 = vld [vmem:[#allocation15 + $0x210] sm:$0xff]   ;;  %v21497_v54 = vld [vmem:[#allocation15 + $0x258] sm:$0xff]   ;;  %v21501_v5 = vld [vmem:[#allocation15 + $0x268] sm:$0xff]  }
 0x445   :  { %v6343_v11 = vadd.f32 %v19444_v36, %v6303_v27  ;;  %v19468_v28 = vpop.f32.mrb[63].mxu1  ;;  %v21494_v27 = vld [vmem:[#allocation15 + $0x208] sm:$0xff]   ;;  %20590 = vmatprep.subr.bf16.mxu1 %v25467_v26  ;;  %v21561_v17 = vld [vmem:[#allocation16 + $0x10] sm:$0xff]   ;;  %v21567_v36 = vld [vmem:[#allocation16 + $0x20] sm:$0xff]  }
 0x446   :  { %v21502_v50 = vld [vmem:[#allocation15 + $0x228] sm:$0xff]   ;;  %v21504_v28 = vld [vmem:[#allocation15 + $0x230] sm:$0xff]  }
 0x447   :  { %v6383_v14 = vadd.f32 %v19466_v31, %v6343_v11  ;;  %19734 = vmatpush3.bf16.msra.mxu0 %v21488_v61  ;;  %v21500_v61 = vld [vmem:[#allocation15 + $0x220] sm:$0xff]   ;;  %v21570_v18 = vld [vmem:[#allocation16 + $0x28] sm:$0xff]  }
 0x448   :  { %19735 = vmatprep.subr.bf16.mxu0 %v21489_v59  ;;  %20591 = vmatpush3.bf16.msra.mxu1 %v21561_v17  ;;  %v21503_v59 = vld [vmem:[#allocation15 + $0x270] sm:$0xff]  }
 0x449   :  { %20592 = vmatprep.subr.bf16.mxu1 %v25467_v26  ;;  %v21573_v17 = vld [vmem:[#allocation16 + $0x30] sm:$0xff]  }
 0x44b   :  { %19736 = vmatpush3.bf16.msra.mxu0 %v21490_v58 }
 0x44c   :  { %19765 = vmatprep.subr.bf16.mxu0 %v21491_v23  ;;  %20593 = vmatpush3.bf16.msra.mxu1 %v21564_v3  ;;  %v21507_v3 = vld [vmem:[#allocation15 + $0x340] sm:$0xff]  }
 0x44d   :  { %20594 = vmatprep.subr.bf16.mxu1 %v25467_v26 }
 0x44e   :  { %9535 = vmatmul.mubr.bf16.vlgmr.msra.gmra.mrb[88].mxu0 %v23678_v13  ;;  %v21498_v13 = vld [vmem:[#allocation15 + $0x218] sm:$0xff]  }
 0x44f   :  { %19766 = vmatpush3.bf16.msra.mxu0 %v21492_v22  ;;  %9614 = vmatprep.mubr.bf16.mxu0 %v23688_v44  ;;  %v21499_v44 = vld [vmem:[#allocation15 + $0x260] sm:$0xff]  }
 0x450   :  { %19767 = vmatprep.subr.bf16.mxu0 %v21493_v57  ;;  %20595 = vmatpush3.bf16.msra.mxu1 %v21567_v36  ;;  %v21505_v57 = vld [vmem:[#allocation15 + $0x278] sm:$0xff]   ;;  %v21509_v36 = vld [vmem:[#allocation15 + $0x348] sm:$0xff]  }
 0x451   :  { %20596 = vmatprep.subr.bf16.mxu1 %v25467_v26 }
 0x453   :  { %19768 = vmatpush3.bf16.msra.mxu0 %v21494_v27 }
 0x454   :  { %19769 = vmatprep.subr.bf16.mxu0 %v21495_v42  ;;  %20597 = vmatpush3.bf16.msra.mxu1 %v21570_v18  ;;  %v21514_v18 = vld [vmem:[#allocation15 + $0x318] sm:$0xff]  }
 0x455   :  { %20598 = vmatprep.subr.bf16.mxu1 %v25467_v26 }
 0x457   :  { %19770 = vmatpush3.bf16.msra.mxu0 %v21496_v20 }
 0x458   :  { %19771 = vmatprep.subr.bf16.mxu0 %v21497_v54  ;;  %20599 = vmatpush3.bf16.msra.mxu1 %v21573_v17 }
 0x459   :  { %20600 = vmatprep.subr.bf16.mxu1 %v25467_v26 }
 0x45b   :  { %19772 = vmatpush3.bf16.msra.mxu0 %v21498_v13  ;;  %v21506_v13 = vld [vmem:[#allocation15 + $0x238] sm:$0xff]  }
 0x45c   :  { %19773 = vmatprep.subr.bf16.mxu0 %v21499_v44  ;;  %v21508_v44 = vld [vmem:[#allocation15 + $0x300] sm:$0xff]  }
 0x45f   :  { %19774 = vmatpush3.bf16.msra.mxu0 %v21500_v61  ;;  %v21576_v61 = vld [vmem:[#allocation16 + $0x38] sm:$0xff]  }
 0x460   :  { %19775 = vmatprep.subr.bf16.mxu0 %v21501_v5  ;;  %20601 = vmatpush3.bf16.msra.mxu1 %v21576_v61  ;;  %v21579_v5 = vld [vmem:[#allocation15 + $0xc0] sm:$0xff]   ;;  %v21522_v61 = vld [vmem:[#allocation15 + $0x338] sm:$0xff]  }
 0x461   :  { %v19486_v31 = vpop.f32.mrb[64].mxu0  ;;  %19699 = vmatprep.subr.bf16.mxu1 %v21579_v5  ;;  %v21523_v5 = vld [vmem:[#allocation15 + $0x440] sm:$0xff]  }
 0x462   :  { %v19508_v24 = vpop.f32.mrb[64].mxu1  ;;  %v19487_v11 = vpop.f32.mrb[65].mxu0 }
 0x463   :  { %v19488_v58 = vadd.f32 %v19487_v11, %v19486_v31  ;;  %v19509_v23 = vpop.f32.mrb[65].mxu1  ;;  %v19489_v22 = vpop.f32.mrb[66].mxu0  ;;  %19776 = vmatpush3.bf16.msra.mxu0 %v21502_v50  ;;  %v21511_v50 = vld [vmem:[#allocation15 + $0x350] sm:$0xff]   ;;  %v21513_v31 = vld [vmem:[#allocation15 + $0x358] sm:$0xff]   ;;  %v21516_v11 = vld [vmem:[#allocation15 + $0x320] sm:$0xff]  }
 0x464   :  { %v19510_v2 = vadd.f32 %v19509_v23, %v19508_v24  ;;  %v19511_v27 = vpop.f32.mrb[66].mxu1  ;;  %v19490_v25 = vpop.f32.mrb[67].mxu0  ;;  %19777 = vmatprep.subr.bf16.mxu0 %v21503_v59  ;;  %v21512_v59 = vld [vmem:[#allocation15 + $0x310] sm:$0xff]   ;;  %v21515_v24 = vld [vmem:[#allocation15 + $0x360] sm:$0xff]  }
 0x465   :  { %v6423_v42 = vadd.f32 %v19488_v58, %v6383_v14  ;;  %v19512_v20 = vpop.f32.mrb[67].mxu1  ;;  %v21510_v14 = vld [vmem:[#allocation15 + $0x308] sm:$0xff]   ;;  %v21520_v25 = vld [vmem:[#allocation15 + $0x330] sm:$0xff]  }
 0x466   :  { %v21518_v58 = vld [vmem:[#allocation15 + $0x328] sm:$0xff]  }
 0x467   :  { %v6463_v54 = vadd.f32 %v19510_v2, %v6423_v42  ;;  %19778 = vmatpush3.bf16.msra.mxu0 %v21504_v28  ;;  %v21517_v28 = vld [vmem:[#allocation15 + $0x368] sm:$0xff]  }
 0x468   :  { %19779 = vmatprep.subr.bf16.mxu0 %v21505_v57 }
 0x46b   :  { %19780 = vmatpush3.bf16.msra.mxu0 %v21506_v13  ;;  %v21521_v13 = vld [vmem:[#allocation15 + $0x378] sm:$0xff]  }
 0x46c   :  { %19809 = vmatprep.subr.bf16.mxu0 %v21507_v3 }
 0x46e   :  { %9615 = vmatmul.mubr.bf16.vlgmr.msra.gmra.mrb[92].mxu0 %v23723_v47  ;;  %v21519_v47 = vld [vmem:[#allocation15 + $0x370] sm:$0xff]  }
 0x46f   :  { %19810 = vmatpush3.bf16.msra.mxu0 %v21508_v44  ;;  %9694 = vmatprep.mubr.bf16.mxu0 %v23734_v4 }
 0x470   :  { %19811 = vmatprep.subr.bf16.mxu0 %v21509_v36 }
 0x473   :  { %19812 = vmatpush3.bf16.msra.mxu0 %v21510_v14  ;;  %v21524_v14 = vld [vmem:[#allocation15 + $0x400] sm:$0xff]  }
 0x474   :  { %19813 = vmatprep.subr.bf16.mxu0 %v21511_v50  ;;  %v21525_v50 = vld [vmem:[#allocation15 + $0x448] sm:$0xff]  }
 0x477   :  { %19814 = vmatpush3.bf16.msra.mxu0 %v21512_v59  ;;  %v21526_v59 = vld [vmem:[#allocation15 + $0x408] sm:$0xff]  }
 0x478   :  { %19815 = vmatprep.subr.bf16.mxu0 %v21513_v31  ;;  %v21527_v31 = vld [vmem:[#allocation15 + $0x450] sm:$0xff]  }
 0x47b   :  { %19816 = vmatpush3.bf16.msra.mxu0 %v21514_v18  ;;  %v21528_v18 = vld [vmem:[#allocation15 + $0x410] sm:$0xff]  }
 0x47c   :  { %19817 = vmatprep.subr.bf16.mxu0 %v21515_v24  ;;  %v21530_v24 = vld [vmem:[#allocation15 + $0x418] sm:$0xff]  }
 0x47f   :  { %19818 = vmatpush3.bf16.msra.mxu0 %v21516_v11  ;;  %v21531_v11 = vld [vmem:[#allocation15 + $0x460] sm:$0xff]  }
 0x480   :  { %19819 = vmatprep.subr.bf16.mxu0 %v21517_v28  ;;  %v21532_v28 = vld [vmem:[#allocation15 + $0x420] sm:$0xff]  }
 0x481   :  { %v19530_v4 = vpop.f32.mrb[68].mxu0 }
 0x482   :  { %v19552_v23 = vpop.f32.mrb[68].mxu1  ;;  %v19531_v22 = vpop.f32.mrb[69].mxu0 }
 0x483   :  { %v19532_v57 = vadd.f32 %v19531_v22, %v19530_v4  ;;  %v19553_v2 = vpop.f32.mrb[69].mxu1  ;;  %v19533_v27 = vpop.f32.mrb[70].mxu0  ;;  %19820 = vmatpush3.bf16.msra.mxu0 %v21518_v58  ;;  %v21533_v58 = vld [vmem:[#allocation15 + $0x468] sm:$0xff]  }
 0x484   :  { %v19554_v42 = vadd.f32 %v19553_v2, %v19552_v23  ;;  %v19555_v20 = vpop.f32.mrb[70].mxu1  ;;  %v19534_v17 = vpop.f32.mrb[71].mxu0  ;;  %19821 = vmatprep.subr.bf16.mxu0 %v21519_v47  ;;  %v21534_v47 = vld [vmem:[#allocation15 + $0x428] sm:$0xff]   ;;  %v21536_v27 = vld [vmem:[#allocation15 + $0x430] sm:$0xff]  }
 0x485   :  { %v6503_v3 = vadd.f32 %v19532_v57, %v6463_v54  ;;  %v19556_v44 = vpop.f32.mrb[71].mxu1  ;;  %v21529_v54 = vld [vmem:[#allocation15 + $0x458] sm:$0xff]  }
 0x486   :  { %v21537_v17 = vld [vmem:[#allocation15 + $0x478] sm:$0xff]  }
 0x487   :  { %v6543_v36 = vadd.f32 %v19554_v42, %v6503_v3  ;;  %19822 = vmatpush3.bf16.msra.mxu0 %v21520_v25  ;;  %v21538_v44 = vld [vmem:[#allocation15 + $0x438] sm:$0xff]  }
 0x488   :  { %19823 = vmatprep.subr.bf16.mxu0 %v21521_v13 }
 0x48b   :  { %19824 = vmatpush3.bf16.msra.mxu0 %v21522_v61 }
 0x48c   :  { %19853 = vmatprep.subr.bf16.mxu0 %v21523_v5  ;;  %v21539_v5 = vld [vmem:[#allocation15 + $0x540] sm:$0xff]  }
 0x48e   :  { %9695 = vmatmul.mubr.bf16.vlgmr.msra.gmra.mrb[96].mxu0 %v23782_v38  ;;  %v21535_v38 = vld [vmem:[#allocation15 + $0x470] sm:$0xff]  }
 0x48f   :  { %19854 = vmatpush3.bf16.msra.mxu0 %v21524_v14  ;;  %9774 = vmatprep.mubr.bf16.mxu0 %v23793_v15  ;;  %v21540_v14 = vld [vmem:[#allocation15 + $0x500] sm:$0xff]  }
 0x490   :  { %19855 = vmatprep.subr.bf16.mxu0 %v21525_v50  ;;  %v21541_v50 = vld [vmem:[#allocation15 + $0x548] sm:$0xff]  }
 0x493   :  { %19856 = vmatpush3.bf16.msra.mxu0 %v21526_v59  ;;  %v21542_v59 = vld [vmem:[#allocation15 + $0x508] sm:$0xff]  }
 0x494   :  { %19857 = vmatprep.subr.bf16.mxu0 %v21527_v31  ;;  %v21543_v31 = vld [vmem:[#allocation15 + $0x550] sm:$0xff]  }
 0x497   :  { %19858 = vmatpush3.bf16.msra.mxu0 %v21528_v18  ;;  %v21544_v18 = vld [vmem:[#allocation15 + $0x510] sm:$0xff]  }
 0x498   :  { %19859 = vmatprep.subr.bf16.mxu0 %v21529_v54  ;;  %v21546_v54 = vld [vmem:[#allocation15 + $0x518] sm:$0xff]  }
 0x49b   :  { %19860 = vmatpush3.bf16.msra.mxu0 %v21530_v24  ;;  %v21547_v24 = vld [vmem:[#allocation15 + $0x560] sm:$0xff]  }
 0x49c   :  { %19861 = vmatprep.subr.bf16.mxu0 %v21531_v11  ;;  %v21548_v11 = vld [vmem:[#allocation15 + $0x520] sm:$0xff]  }
 0x49f   :  { %19862 = vmatpush3.bf16.msra.mxu0 %v21532_v28  ;;  %v21549_v28 = vld [vmem:[#allocation15 + $0x568] sm:$0xff]  }
 0x4a0   :  { %19863 = vmatprep.subr.bf16.mxu0 %v21533_v58  ;;  %v21550_v58 = vld [vmem:[#allocation15 + $0x528] sm:$0xff]  }
 0x4a1   :  { %v19574_v15 = vpop.f32.mrb[72].mxu0 }
 0x4a2   :  { %v19596_v4 = vpop.f32.mrb[72].mxu1  ;;  %v19575_v23 = vpop.f32.mrb[73].mxu0 }
 0x4a3   :  { %v19576_v22 = vadd.f32 %v19575_v23, %v19574_v15  ;;  %v19597_v57 = vpop.f32.mrb[73].mxu1  ;;  %v19577_v2 = vpop.f32.mrb[74].mxu0  ;;  %19864 = vmatpush3.bf16.msra.mxu0 %v21534_v47 }
 0x4a4   :  { %v19598_v25 = vadd.f32 %v19597_v57, %v19596_v4  ;;  %v19599_v42 = vpop.f32.mrb[74].mxu1  ;;  %v19578_v20 = vpop.f32.mrb[75].mxu0  ;;  %19865 = vmatprep.subr.bf16.mxu0 %v21535_v38 }
 0x4a5   :  { %v6583_v13 = vadd.f32 %v19576_v22, %v6543_v36  ;;  %v19600_v3 = vpop.f32.mrb[75].mxu1  ;;  %v21545_v36 = vld [vmem:[#allocation15 + $0x558] sm:$0xff]   ;;  %v21552_v22 = vld [vmem:[#allocation15 + $0x530] sm:$0xff]  }
 0x4a6   :  { %v21556_v3 = vld [vmem:[#allocation15 + $0x640] sm:$0xff]  }
 0x4a7   :  { %v6623_v61 = vadd.f32 %v19598_v25, %v6583_v13  ;;  %19866 = vmatpush3.bf16.msra.mxu0 %v21536_v27  ;;  %v21553_v25 = vld [vmem:[#allocation15 + $0x578] sm:$0xff]  }
 0x4a8   :  { %19867 = vmatprep.subr.bf16.mxu0 %v21537_v17  ;;  %v21554_v17 = vld [vmem:[#allocation15 + $0x538] sm:$0xff]  }
 0x4ab   :  { %19868 = vmatpush3.bf16.msra.mxu0 %v21538_v44  ;;  %v21557_v44 = vld [vmem:[#allocation15 + $0x600] sm:$0xff]  }
 0x4ac   :  { %19897 = vmatprep.subr.bf16.mxu0 %v21539_v5  ;;  %v21559_v5 = vld [vmem:[#allocation15 + $0x648] sm:$0xff]  }
 0x4ae   :  { %9775 = vmatmul.mubr.bf16.vlgmr.msra.gmra.mrb[100].mxu0 %v23847_v34  ;;  %v21551_v34 = vld [vmem:[#allocation15 + $0x570] sm:$0xff]  }
 0x4af   :  { %19898 = vmatpush3.bf16.msra.mxu0 %v21540_v14  ;;  %9854 = vmatprep.mubr.bf16.mxu0 %v23862_v21  ;;  %v21560_v14 = vld [vmem:[#allocation15 + $0x608] sm:$0xff]  }
 0x4b0   :  { %19899 = vmatprep.subr.bf16.mxu0 %v21541_v50  ;;  %v21562_v50 = vld [vmem:[#allocation15 + $0x650] sm:$0xff]  }
 0x4b3   :  { %19900 = vmatpush3.bf16.msra.mxu0 %v21542_v59  ;;  %v21563_v59 = vld [vmem:[#allocation15 + $0x610] sm:$0xff]  }
 0x4b4   :  { %19901 = vmatprep.subr.bf16.mxu0 %v21543_v31  ;;  %v21566_v31 = vld [vmem:[#allocation15 + $0x618] sm:$0xff]  }
 0x4b7   :  { %19902 = vmatpush3.bf16.msra.mxu0 %v21544_v18  ;;  %v21568_v18 = vld [vmem:[#allocation15 + $0x660] sm:$0xff]  }
 0x4b8   :  { %19903 = vmatprep.subr.bf16.mxu0 %v21545_v36  ;;  %v21569_v36 = vld [vmem:[#allocation15 + $0x620] sm:$0xff]  }
 0x4bb   :  { %19904 = vmatpush3.bf16.msra.mxu0 %v21546_v54  ;;  %v21571_v54 = vld [vmem:[#allocation15 + $0x668] sm:$0xff]  }
 0x4bc   :  { %19905 = vmatprep.subr.bf16.mxu0 %v21547_v24  ;;  %v21572_v24 = vld [vmem:[#allocation15 + $0x628] sm:$0xff]  }
 0x4bf   :  { %19906 = vmatpush3.bf16.msra.mxu0 %v21548_v11 }
 0x4c0   :  { %19907 = vmatprep.subr.bf16.mxu0 %v21549_v28 }
 0x4c1   :  { %v19618_v21 = vpop.f32.mrb[76].mxu0 }
 0x4c2   :  { %v19640_v47 = vpop.f32.mrb[76].mxu1  ;;  %v19619_v38 = vpop.f32.mrb[77].mxu0 }
 0x4c3   :  { %v19620_v15 = vadd.f32 %v19619_v38, %v19618_v21  ;;  %v19641_v4 = vpop.f32.mrb[77].mxu1  ;;  %v19621_v23 = vpop.f32.mrb[78].mxu0  ;;  %19908 = vmatpush3.bf16.msra.mxu0 %v21550_v58  ;;  %v18240_v21 = vld [vmem:[#allocation13] ss:$0 sm:$0xff] }
 0x4c4   :  { %v19642_v57 = vadd.f32 %v19641_v4, %v19640_v47  ;;  %v19643_v2 = vpop.f32.mrb[78].mxu1  ;;  %v19622_v27 = vpop.f32.mrb[79].mxu0  ;;  %19909 = vmatprep.subr.bf16.mxu0 %v21551_v34  ;;  %v21575_v34 = vld [vmem:[#allocation15 + $0x630] sm:$0xff]   ;;  %v21577_v38 = vld [vmem:[#allocation15 + $0x678] sm:$0xff]  }
 0x4c5   :  { %v6663_v42 = vadd.f32 %v19620_v15, %v6623_v61  ;;  %v19644_v20 = vpop.f32.mrb[79].mxu1  ;;  %v21565_v61 = vld [vmem:[#allocation15 + $0x658] sm:$0xff]   ;;  %v21583_v27 = vld [vmem:[#allocation15 + $0xc8] sm:$0xff]  }
 0x4c6   :  { %v21578_v4 = vld [vmem:[#allocation15 + $0x638] sm:$0xff]   ;;  %v21584_v20 = vld [vmem:[#allocation15 + $0x88] sm:$0xff]  }
 0x4c7   :  { %v6703_v13 = vadd.f32 %v19642_v57, %v6663_v42  ;;  %19910 = vmatpush3.bf16.msra.mxu0 %v21552_v22  ;;  %v21581_v22 = vld [vmem:[#allocation15 + $0x740] sm:$0xff]  }
 0x4c8   :  { %19911 = vmatprep.subr.bf16.mxu0 %v21553_v25  ;;  %v21580_v57 = vld [vmem:[#allocation15 + $0x80] sm:$0xff]  }
 0x4c9   :  { %v21582_v25 = vld [vmem:[#allocation15 + $0x700] sm:$0xff]  }
 0x4cb   :  { %19912 = vmatpush3.bf16.msra.mxu0 %v21554_v17  ;;  %v21585_v17 = vld [vmem:[#allocation15 + $0x748] sm:$0xff]  }
 0x4cc   :  { %19941 = vmatprep.subr.bf16.mxu0 %v21556_v3  ;;  %v21589_v3 = vld [vmem:[#allocation15 + $0x750] sm:$0xff]  }
 0x4ce   :  { %9855 = vmatmul.mubr.bf16.vlgmr.msra.gmra.mrb[104].mxu0 %v23928_v29  ;;  %v21574_v29 = vld [vmem:[#allocation15 + $0x670] sm:$0xff]  }
 0x4cf   :  { %19942 = vmatpush3.bf16.msra.mxu0 %v21557_v44  ;;  %9934 = vmatprep.mubr.bf16.mxu0 %v23945_v1  ;;  %v21588_v44 = vld [vmem:[#allocation15 + $0x90] sm:$0xff]  }
 0x4d0   :  { %19943 = vmatprep.subr.bf16.mxu0 %v21559_v5  ;;  %v21590_v5 = vld [vmem:[#allocation15 + $0x710] sm:$0xff]  }
 0x4d3   :  { %19944 = vmatpush3.bf16.msra.mxu0 %v21560_v14  ;;  %v21591_v14 = vld [vmem:[#allocation15 + $0xd8] sm:$0xff]  }
 0x4d4   :  { %19945 = vmatprep.subr.bf16.mxu0 %v21562_v50  ;;  %v21593_v50 = vld [vmem:[#allocation15 + $0x758] sm:$0xff]  }
 0x4d7   :  { %19946 = vmatpush3.bf16.msra.mxu0 %v21563_v59  ;;  %v21592_v59 = vld [vmem:[#allocation15 + $0x98] sm:$0xff]  }
 0x4d8   :  { %19947 = vmatprep.subr.bf16.mxu0 %v21565_v61  ;;  %v21595_v61 = vld [vmem:[#allocation15 + $0xe0] sm:$0xff]  }
 0x4db   :  { %19948 = vmatpush3.bf16.msra.mxu0 %v21566_v31  ;;  %v21596_v31 = vld [vmem:[#allocation15 + $0xa0] sm:$0xff]  }
 0x4dc   :  { %19949 = vmatprep.subr.bf16.mxu0 %v21568_v18  ;;  %v21599_v18 = vld [vmem:[#allocation15 + $0xe8] sm:$0xff]  }
 0x4df   :  { %19950 = vmatpush3.bf16.msra.mxu0 %v21569_v36  ;;  %v21601_v36 = vld [vmem:[#allocation15 + $0x768] sm:$0xff]  }
 0x4e0   :  { %19951 = vmatprep.subr.bf16.mxu0 %v21571_v54  ;;  %v21600_v54 = vld [vmem:[#allocation15 + $0xa8] sm:$0xff]  }
 0x4e1   :  { %v19662_v1 = vpop.f32.mrb[80].mxu0 }
 0x4e2   :  { %v19663_v11 = vpop.f32.mrb[81].mxu0 }
 0x4e3   :  { %v19664_v28 = vadd.f32 %v19663_v11, %v19662_v1  ;;  %v19665_v58 = vpop.f32.mrb[82].mxu0  ;;  %19952 = vmatpush3.bf16.msra.mxu0 %v21572_v24  ;;  %v21602_v24 = vld [vmem:[#allocation15 + $0x728] sm:$0xff]   ;;  %v21604_v1 = vld [vmem:[#allocation15 + $0xb0] sm:$0xff]  }
 0x4e4   :  { %v19666_v47 = vpop.f32.mrb[83].mxu0  ;;  %19953 = vmatprep.subr.bf16.mxu0 %v21574_v29  ;;  %v21603_v29 = vld [vmem:[#allocation15 + $0xf0] sm:$0xff]  }
 0x4e5   :  { %v6743_v15 = vadd.f32 %v19664_v28, %v6703_v13  ;;  %v21587_v13 = vld [vmem:[#allocation15 + $0xd0] sm:$0xff]  }
 0x4e6   :  { %v21605_v28 = vld [vmem:[#allocation15 + $0x770] sm:$0xff]  }
 0x4e7   :  { %v6748_v23 = vadd.f32 %v6743_v15, %v24026_v0  ;;  %19954 = vmatpush3.bf16.msra.mxu0 %v21575_v34  ;;  %v21586_v0 = vld [vmem:[#allocation15 + $0x708] sm:$0xff]   ;;  %v21606_v34 = vld [vmem:[#allocation15 + $0x730] sm:$0xff]  }
 0x4e8   :  { %19955 = vmatprep.subr.bf16.mxu0 %v21577_v38  ;;  %v21607_v38 = vld [vmem:[#allocation15 + $0xf8] sm:$0xff]  }
 0x4e9   :  { %v24118_v2 = vadd.f32 %v18240_v21, %v6748_v23  ;;  %v21609_v23 = vld [vmem:[#allocation15 + $0x778] sm:$0xff]  }
 0x4eb   :  { %19956 = vmatpush3.bf16.msra.mxu0 %v21578_v4  ;;  %v7397_v42 = vpack.c.bf16 %v24118_v2, %v24118_v2  ;;  %v21608_v4 = vld [vmem:[#allocation15 + $0xb8] sm:$0xff]  }
 0x4ec   :  { %19985 = vmatprep.subr.bf16.mxu0 %v21581_v22  ;;  %v21610_v22 = vld [vmem:[#allocation15 + $0x738] sm:$0xff]  }
 0x4ed   :  { %20603 = vmatmul.mubr.bf16.vlgmr.msra.gmra.mrb[80].mxu1 %v7397_v42  ;;  %v21615_v42 = vld [vmem:[#allocation15 + $0x1c8] sm:$0xff]  }
 0x4ee   :  { %19700 = vmatpush3.bf16.msra.mxu1 %v21580_v57  ;;  %9494 = vmatprep.mubr.bf16.mxu1 %v23633_v12  ;;  %v21594_v12 = vld [vmem:[#allocation15 + $0x718] sm:$0xff]   ;;  %v21611_v57 = vld [vmem:[#allocation15 + $0x1c0] sm:$0xff]  }
 0x4ef   :  { %9935 = vmatmul.mubr.bf16.vlgmr.msra.gmra.mrb[108].mxu0 %v24012_v37  ;;  %19701 = vmatprep.subr.bf16.mxu1 %v21583_v27  ;;  %v21597_v37 = vld [vmem:[#allocation15 + $0x760] sm:$0xff]  }
 0x4f0   :  { %19986 = vmatpush3.bf16.msra.mxu0 %v21582_v25  ;;  %10014 = vmatprep.mubr.bf16.mxu0 %v24022_v62  ;;  %v21598_v62 = vld [vmem:[#allocation15 + $0x720] sm:$0xff]  }
 0x4f1   :  { %19987 = vmatprep.subr.bf16.mxu0 %v21585_v17  ;;  %v21613_v27 = vld [vmem:[#allocation15 + $0x840] sm:$0xff]   ;;  %v21616_v17 = vld [vmem:[#allocation15 + $0x188] sm:$0xff]  }
 0x4f2   :  { %19702 = vmatpush3.bf16.msra.mxu1 %v21584_v20  ;;  %v21612_v25 = vld [vmem:[#allocation15 + $0x180] sm:$0xff]  }
 0x4f3   :  { %19703 = vmatprep.subr.bf16.mxu1 %v21587_v13  ;;  %v21614_v20 = vld [vmem:[#allocation15 + $0x800] sm:$0xff]   ;;  %v21618_v13 = vld [vmem:[#allocation15 + $0x808] sm:$0xff]  }
 0x4f4   :  { %19988 = vmatpush3.bf16.msra.mxu0 %v21586_v0  ;;  %v21617_v0 = vld [vmem:[#allocation15 + $0x848] sm:$0xff]  }
 0x4f5   :  { %19989 = vmatprep.subr.bf16.mxu0 %v21589_v3  ;;  %v21619_v3 = vld [vmem:[#allocation15 + $0x1d0] sm:$0xff]  }
 0x4f6   :  { %19704 = vmatpush3.bf16.msra.mxu1 %v21588_v44  ;;  %v21621_v44 = vld [vmem:[#allocation15 + $0x850] sm:$0xff]  }
 0x4f7   :  { %19705 = vmatprep.subr.bf16.mxu1 %v21591_v14  ;;  %v21622_v14 = vld [vmem:[#allocation15 + $0x810] sm:$0xff]  }
 0x4f8   :  { %19990 = vmatpush3.bf16.msra.mxu0 %v21590_v5  ;;  %v21620_v5 = vld [vmem:[#allocation15 + $0x190] sm:$0xff]  }
 0x4f9   :  { %19991 = vmatprep.subr.bf16.mxu0 %v21593_v50  ;;  %v21623_v50 = vld [vmem:[#allocation15 + $0x1d8] sm:$0xff]  }
 0x4fa   :  { %19706 = vmatpush3.bf16.msra.mxu1 %v21592_v59  ;;  %v21624_v59 = vld [vmem:[#allocation15 + $0x198] sm:$0xff]  }
 0x4fb   :  { %19707 = vmatprep.subr.bf16.mxu1 %v21595_v61  ;;  %v21628_v61 = vld [vmem:[#allocation15 + $0x1a0] sm:$0xff]  }
 0x4fc   :  { %19992 = vmatpush3.bf16.msra.mxu0 %v21594_v12  ;;  %v21627_v12 = vld [vmem:[#allocation15 + $0x1e0] sm:$0xff]  }
 0x4fd   :  { %19993 = vmatprep.subr.bf16.mxu0 %v21597_v37  ;;  %v21631_v37 = vld [vmem:[#allocation15 + $0x1e8] sm:$0xff]  }
 0x4fe   :  { %19708 = vmatpush3.bf16.msra.mxu1 %v21596_v31  ;;  %v21633_v31 = vld [vmem:[#allocation15 + $0x868] sm:$0xff]  }
 0x4ff   :  { %19709 = vmatprep.subr.bf16.mxu1 %v21599_v18  ;;  %v21634_v18 = vld [vmem:[#allocation15 + $0x828] sm:$0xff]  }
 0x500   :  { %19994 = vmatpush3.bf16.msra.mxu0 %v21598_v62  ;;  %v21632_v62 = vld [vmem:[#allocation15 + $0x1a8] sm:$0xff]  }
 0x501   :  { %v19693_v11 = vpop.f32.mrb[84].mxu0  ;;  %19995 = vmatprep.subr.bf16.mxu0 %v21601_v36  ;;  %v21635_v36 = vld [vmem:[#allocation15 + $0x1f0] sm:$0xff]  }
 0x502   :  { %19710 = vmatpush3.bf16.msra.mxu1 %v21600_v54  ;;  %v19694_v58 = vpop.f32.mrb[85].mxu0  ;;  %v21636_v54 = vld [vmem:[#allocation15 + $0x1b0] sm:$0xff]  }
 0x503   :  { %v24125_v21 = vadd.f32 %v19694_v58, %v19693_v11  ;;  %v19696_v47 = vpop.f32.mrb[86].mxu0  ;;  %19711 = vmatprep.subr.bf16.mxu1 %v21603_v29  ;;  %v21637_v29 = vld [vmem:[#allocation15 + $0x870] sm:$0xff]  }
 0x504   :  { %19996 = vmatpush3.bf16.msra.mxu0 %v21602_v24  ;;  %v19697_v15 = vpop.f32.mrb[87].mxu0  ;;  %v21638_v11 = vld [vmem:[#allocation15 + $0x830] sm:$0xff]  }
 0x505   :  { %19997 = vmatprep.subr.bf16.mxu0 %v21605_v28  ;;  %v21641_v15 = vld [vmem:[#allocation15 + $0x878] sm:$0xff]  }
 0x506   :  { %19712 = vmatpush3.bf16.msra.mxu1 %v21604_v1 }
 0x507   :  { %19713 = vmatprep.subr.bf16.mxu1 %v21607_v38  ;;  %v21640_v38 = vld [vmem:[#allocation15 + $0x1b8] sm:$0xff]  }
 0x508   :  { %19998 = vmatpush3.bf16.msra.mxu0 %v21606_v34  ;;  %v21639_v34 = vld [vmem:[#allocation15 + $0x1f8] sm:$0xff]  }
 0x509   :  { %19999 = vmatprep.subr.bf16.mxu0 %v21609_v23  ;;  %v21643_v23 = vld [vmem:[#allocation15 + $0x2c0] sm:$0xff]  }
 0x50a   :  { %19714 = vmatpush3.bf16.msra.mxu1 %v21608_v4  ;;  %v21642_v4 = vld [vmem:[#allocation15 + $0x838] sm:$0xff]  }
 0x50b   :  { %19743 = vmatprep.subr.bf16.mxu1 %v21611_v57  ;;  %v21644_v57 = vld [vmem:[#allocation15 + $0x280] sm:$0xff]  }
 0x50c   :  { %20000 = vmatpush3.bf16.msra.mxu0 %v21610_v22  ;;  %v21645_v22 = vld [vmem:[#allocation15 + $0x940] sm:$0xff]  }
 0x50d   :  { %9495 = vmatmul.mubr.bf16.vlgmr.msra.gmra.mrb[84].mxu1 %v23674_v39  ;;  %20029 = vmatprep.subr.bf16.mxu0 %v21613_v27  ;;  %v21625_v39 = vld [vmem:[#allocation15 + $0x858] sm:$0xff]   ;;  %v21647_v27 = vld [vmem:[#allocation15 + $0x2c8] sm:$0xff]  }
 0x50e   :  { %19744 = vmatpush3.bf16.msra.mxu1 %v21612_v25  ;;  %9574 = vmatprep.mubr.bf16.mxu1 %v23683_v60  ;;  %v21626_v60 = vld [vmem:[#allocation15 + $0x818] sm:$0xff]   ;;  %v21646_v25 = vld [vmem:[#allocation15 + $0x900] sm:$0xff]  }
 0x50f   :  { %10015 = vmatmul.mubr.bf16.vlgmr.msra.gmra.mrb[112].mxu0 %v24036_v9  ;;  %19745 = vmatprep.subr.bf16.mxu1 %v21615_v42  ;;  %v21629_v9 = vld [vmem:[#allocation15 + $0x860] sm:$0xff]   ;;  %v21648_v42 = vld [vmem:[#allocation15 + $0x288] sm:$0xff]  }
 0x510   :  { %20030 = vmatpush3.bf16.msra.mxu0 %v21614_v20  ;;  %10094 = vmatprep.mubr.bf16.mxu0 %v24046_v19  ;;  %v21630_v19 = vld [vmem:[#allocation15 + $0x820] sm:$0xff]   ;;  %v21649_v20 = vld [vmem:[#allocation15 + $0x948] sm:$0xff]  }
 0x511   :  { %20031 = vmatprep.subr.bf16.mxu0 %v21617_v0  ;;  %v21651_v0 = vld [vmem:[#allocation15 + $0x2d0] sm:$0xff]  }
 0x512   :  { %19746 = vmatpush3.bf16.msra.mxu1 %v21616_v17  ;;  %v21650_v17 = vld [vmem:[#allocation15 + $0x908] sm:$0xff]  }
 0x513   :  { %19747 = vmatprep.subr.bf16.mxu1 %v21619_v3  ;;  %v21652_v3 = vld [vmem:[#allocation15 + $0x290] sm:$0xff]  }
 0x514   :  { %20032 = vmatpush3.bf16.msra.mxu0 %v21618_v13  ;;  %v21653_v13 = vld [vmem:[#allocation15 + $0x950] sm:$0xff]  }
 0x515   :  { %20033 = vmatprep.subr.bf16.mxu0 %v21621_v44  ;;  %v21654_v44 = vld [vmem:[#allocation15 + $0x910] sm:$0xff]  }
 0x516   :  { %19748 = vmatpush3.bf16.msra.mxu1 %v21620_v5  ;;  %v21655_v5 = vld [vmem:[#allocation15 + $0x2d8] sm:$0xff]  }
 0x517   :  { %19749 = vmatprep.subr.bf16.mxu1 %v21623_v50  ;;  %v21659_v50 = vld [vmem:[#allocation15 + $0x2e0] sm:$0xff]  }
 0x518   :  { %20034 = vmatpush3.bf16.msra.mxu0 %v21622_v14  ;;  %v21656_v14 = vld [vmem:[#allocation15 + $0x298] sm:$0xff]  }
 0x519   :  { %20035 = vmatprep.subr.bf16.mxu0 %v21625_v39  ;;  %v21660_v39 = vld [vmem:[#allocation15 + $0x2a0] sm:$0xff]  }
 0x51a   :  { %19750 = vmatpush3.bf16.msra.mxu1 %v21624_v59  ;;  %v21663_v59 = vld [vmem:[#allocation15 + $0x2e8] sm:$0xff]  }
 0x51b   :  { %19751 = vmatprep.subr.bf16.mxu1 %v21627_v12  ;;  %v21664_v12 = vld [vmem:[#allocation15 + $0x2a8] sm:$0xff]  }
 0x51c   :  { %20036 = vmatpush3.bf16.msra.mxu0 %v21626_v60  ;;  %v21665_v60 = vld [vmem:[#allocation15 + $0x968] sm:$0xff]  }
 0x51d   :  { %20037 = vmatprep.subr.bf16.mxu0 %v21629_v9  ;;  %v21667_v9 = vld [vmem:[#allocation15 + $0x2f0] sm:$0xff]  }
 0x51e   :  { %19752 = vmatpush3.bf16.msra.mxu1 %v21628_v61  ;;  %v21666_v61 = vld [vmem:[#allocation15 + $0x928] sm:$0xff]  }
 0x51f   :  { %19753 = vmatprep.subr.bf16.mxu1 %v21631_v37 }
 0x520   :  { %20038 = vmatpush3.bf16.msra.mxu0 %v21630_v19  ;;  %v21668_v19 = vld [vmem:[#allocation15 + $0x2b0] sm:$0xff]  }
 0x521   :  { %v19737_v24 = vpop.f32.mrb[88].mxu0  ;;  %20039 = vmatprep.subr.bf16.mxu0 %v21633_v31  ;;  %v21669_v31 = vld [vmem:[#allocation15 + $0x970] sm:$0xff]  }
 0x522   :  { %19754 = vmatpush3.bf16.msra.mxu1 %v21632_v62  ;;  %v19738_v1 = vpop.f32.mrb[89].mxu0 }
 0x523   :  { %v24131_v28 = vadd.f32 %v19738_v1, %v19737_v24  ;;  %v19740_v58 = vpop.f32.mrb[90].mxu0  ;;  %19755 = vmatprep.subr.bf16.mxu1 %v21635_v36  ;;  %v21671_v24 = vld [vmem:[#allocation15 + $0x2f8] sm:$0xff]  }
 0x524   :  { %20040 = vmatpush3.bf16.msra.mxu0 %v21634_v18  ;;  %v19741_v47 = vpop.f32.mrb[91].mxu0  ;;  %v21670_v18 = vld [vmem:[#allocation15 + $0x930] sm:$0xff]   ;;  %v21672_v1 = vld [vmem:[#allocation15 + $0x2b8] sm:$0xff]  }
 0x525   :  { %20041 = vmatprep.subr.bf16.mxu0 %v21637_v29  ;;  %v21674_v58 = vld [vmem:[#allocation15 + $0x938] sm:$0xff]   ;;  %v21676_v47 = vld [vmem:[#allocation15 + $0x380] sm:$0xff]  }
 0x526   :  { %19756 = vmatpush3.bf16.msra.mxu1 %v21636_v54 }
 0x527   :  { %19757 = vmatprep.subr.bf16.mxu1 %v21639_v34  ;;  %v21675_v34 = vld [vmem:[#allocation15 + $0x3c0] sm:$0xff]  }
 0x528   :  { %20042 = vmatpush3.bf16.msra.mxu0 %v21638_v11  ;;  %v21673_v11 = vld [vmem:[#allocation15 + $0x978] sm:$0xff]  }
 0x529   :  { %20043 = vmatprep.subr.bf16.mxu0 %v21641_v15  ;;  %v21678_v15 = vld [vmem:[#allocation15 + $0x388] sm:$0xff]  }
 0x52a   :  { %19758 = vmatpush3.bf16.msra.mxu1 %v21640_v38  ;;  %v21677_v38 = vld [vmem:[#allocation15 + $0x3c8] sm:$0xff]  }
 0x52b   :  { %19787 = vmatprep.subr.bf16.mxu1 %v21643_v23  ;;  %v25468_v23 = vmov 0  }
 0x52c   :  { %20044 = vmatpush3.bf16.msra.mxu0 %v21642_v4  ;;  %v21679_v4 = vld [vmem:[#allocation15 + $0x3d0] sm:$0xff]  }
 0x52d   :  { %9575 = vmatmul.mubr.bf16.vlgmr.msra.gmra.mrb[88].mxu1 %v23719_v56  ;;  %20073 = vmatprep.subr.bf16.mxu0 %v21645_v22  ;;  %v21657_v56 = vld [vmem:[#allocation15 + $0x958] sm:$0xff]   ;;  %v21680_v22 = vld [vmem:[#allocation15 + $0x390] sm:$0xff]  }
 0x52e   :  { %19788 = vmatpush3.bf16.msra.mxu1 %v21644_v57  ;;  %9654 = vmatprep.mubr.bf16.mxu1 %v23729_v41  ;;  %v21658_v41 = vld [vmem:[#allocation15 + $0x918] sm:$0xff]  }
 0x52f   :  { %10095 = vmatmul.mubr.bf16.vlgmr.msra.gmra.mrb[116].mxu0 %v24059_v55  ;;  %19789 = vmatprep.subr.bf16.mxu1 %v21647_v27  ;;  %v21661_v55 = vld [vmem:[#allocation15 + $0x960] sm:$0xff]   ;;  %v21681_v57 = vld [vmem:[#allocation15 + $0x3d8] sm:$0xff]  }
 0x530   :  { %20074 = vmatpush3.bf16.msra.mxu0 %v21646_v25  ;;  %10174 = vmatprep.mubr.bf16.mxu0 %v24069_v49  ;;  %v21662_v49 = vld [vmem:[#allocation15 + $0x920] sm:$0xff]   ;;  %v21682_v27 = vld [vmem:[#allocation15 + $0x398] sm:$0xff]  }
 0x531   :  { %20075 = vmatprep.subr.bf16.mxu0 %v21649_v20  ;;  %v21683_v25 = vld [vmem:[#allocation15 + $0x3e0] sm:$0xff]   ;;  %v21687_v20 = vld [vmem:[#allocation15 + $0x3f0] sm:$0xff]  }
 0x532   :  { %19790 = vmatpush3.bf16.msra.mxu1 %v21648_v42  ;;  %v21685_v42 = vld [vmem:[#allocation15 + $0x3e8] sm:$0xff]  }
 0x533   :  { %19791 = vmatprep.subr.bf16.mxu1 %v21651_v0  ;;  %v21688_v0 = vld [vmem:[#allocation15 + $0x3b0] sm:$0xff]  }
 0x534   :  { %20076 = vmatpush3.bf16.msra.mxu0 %v21650_v17 }
 0x535   :  { %20077 = vmatprep.subr.bf16.mxu0 %v21653_v13 }
 0x536   :  { %19792 = vmatpush3.bf16.msra.mxu1 %v21652_v3 }
 0x537   :  { %19793 = vmatprep.subr.bf16.mxu1 %v21655_v5 }
 0x538   :  { %20078 = vmatpush3.bf16.msra.mxu0 %v21654_v44  ;;  %v21689_v44 = vld [vmem:[#allocation15 + $0x3f8] sm:$0xff]  }
 0x539   :  { %20079 = vmatprep.subr.bf16.mxu0 %v21657_v56  ;;  %v21690_v56 = vld [vmem:[#allocation15 + $0x3b8] sm:$0xff]  }
 0x53a   :  { %19794 = vmatpush3.bf16.msra.mxu1 %v21656_v14  ;;  %v21691_v14 = vld [vmem:[#allocation15 + $0x4c0] sm:$0xff]  }
 0x53b   :  { %19795 = vmatprep.subr.bf16.mxu1 %v21659_v50  ;;  %v21693_v50 = vld [vmem:[#allocation15 + $0x4c8] sm:$0xff]  }
 0x53c   :  { %20080 = vmatpush3.bf16.msra.mxu0 %v21658_v41  ;;  %v21692_v41 = vld [vmem:[#allocation15 + $0x480] sm:$0xff]  }
 0x53d   :  { %20081 = vmatprep.subr.bf16.mxu0 %v21661_v55  ;;  %v21694_v55 = vld [vmem:[#allocation15 + $0x488] sm:$0xff]  }
 0x53e   :  { %19796 = vmatpush3.bf16.msra.mxu1 %v21660_v39  ;;  %v21695_v39 = vld [vmem:[#allocation15 + $0x4d0] sm:$0xff]  }
 0x53f   :  { %19797 = vmatprep.subr.bf16.mxu1 %v21663_v59  ;;  %v21697_v59 = vld [vmem:[#allocation15 + $0x4d8] sm:$0xff]  }
 0x540   :  { %20082 = vmatpush3.bf16.msra.mxu0 %v21662_v49  ;;  %v21696_v49 = vld [vmem:[#allocation15 + $0x490] sm:$0xff]  }
 0x541   :  { %v19781_v37 = vpop.f32.mrb[92].mxu0  ;;  %20083 = vmatprep.subr.bf16.mxu0 %v21665_v60  ;;  %v21698_v60 = vld [vmem:[#allocation15 + $0x498] sm:$0xff]  }
 0x542   :  { %19798 = vmatpush3.bf16.msra.mxu1 %v21664_v12  ;;  %v19782_v62 = vpop.f32.mrb[93].mxu0  ;;  %v21699_v12 = vld [vmem:[#allocation15 + $0x4e0] sm:$0xff]  }
 0x543   :  { %v24137_v36 = vadd.f32 %v19782_v62, %v19781_v37  ;;  %v19784_v54 = vpop.f32.mrb[94].mxu0  ;;  %19799 = vmatprep.subr.bf16.mxu1 %v21667_v9  ;;  %v21700_v9 = vld [vmem:[#allocation15 + $0x4a0] sm:$0xff]  }
 0x544   :  { %20084 = vmatpush3.bf16.msra.mxu0 %v21666_v61  ;;  %v19785_v29 = vpop.f32.mrb[95].mxu0  ;;  %v21701_v61 = vld [vmem:[#allocation15 + $0x4e8] sm:$0xff]   ;;  %v21705_v54 = vld [vmem:[#allocation15 + $0x4f8] sm:$0xff]  }
 0x545   :  { %20085 = vmatprep.subr.bf16.mxu0 %v21669_v31  ;;  %v21704_v31 = vld [vmem:[#allocation15 + $0x4b0] sm:$0xff]   ;;  %v21706_v29 = vld [vmem:[#allocation15 + $0x4b8] sm:$0xff]  }
 0x546   :  { %19800 = vmatpush3.bf16.msra.mxu1 %v21668_v19  ;;  %v21702_v19 = vld [vmem:[#allocation15 + $0x4a8] sm:$0xff]  }
 0x547   :  { %19801 = vmatprep.subr.bf16.mxu1 %v21671_v24 }
 0x548   :  { %20086 = vmatpush3.bf16.msra.mxu0 %v21670_v18 }
 0x549   :  { %20087 = vmatprep.subr.bf16.mxu0 %v21673_v11  ;;  %v21708_v11 = vld [vmem:[#allocation15 + $0x580] sm:$0xff]  }
 0x54a   :  { %19802 = vmatpush3.bf16.msra.mxu1 %v21672_v1  ;;  %v21707_v1 = vld [vmem:[#allocation15 + $0x5c0] sm:$0xff]  }
 0x54b   :  { %19831 = vmatprep.subr.bf16.mxu1 %v21675_v34  ;;  %v21710_v34 = vld [vmem:[#allocation15 + $0x588] sm:$0xff]  }
 0x54c   :  { %20088 = vmatpush3.bf16.msra.mxu0 %v21674_v58  ;;  %v21709_v58 = vld [vmem:[#allocation15 + $0x5c8] sm:$0xff]  }
 0x54d   :  { %9655 = vmatmul.mubr.bf16.vlgmr.msra.gmra.mrb[92].mxu1 %v23778_v32  ;;  %v21684_v32 = vld [vmem:[#allocation15 + $0x3a0] sm:$0xff]  }
 0x54e   :  { %19832 = vmatpush3.bf16.msra.mxu1 %v21676_v47  ;;  %9734 = vmatprep.mubr.bf16.mxu1 %v23788_v63  ;;  %v21686_v63 = vld [vmem:[#allocation15 + $0x3a8] sm:$0xff]   ;;  %v21711_v47 = vld [vmem:[#allocation15 + $0x5d0] sm:$0xff]  }
 0x54f   :  { %10175 = vmatmul.mubr.bf16.vlgmr.msra.gmra.mrb[120].mxu0 %v24080_v53  ;;  %19833 = vmatprep.subr.bf16.mxu1 %v21677_v38  ;;  %v21712_v38 = vld [vmem:[#allocation15 + $0x590] sm:$0xff]  }
 0x550   :  { %12251 = vmatprep.mubr.bf16.mxu0 %v25468_v23 }
 0x552   :  { %19834 = vmatpush3.bf16.msra.mxu1 %v21678_v15  ;;  %v21713_v15 = vld [vmem:[#allocation15 + $0x5d8] sm:$0xff]  }
 0x553   :  { %19835 = vmatprep.subr.bf16.mxu1 %v21679_v4  ;;  %v21714_v4 = vld [vmem:[#allocation15 + $0x598] sm:$0xff]  }
 0x556   :  { %19836 = vmatpush3.bf16.msra.mxu1 %v21680_v22  ;;  %v21715_v22 = vld [vmem:[#allocation15 + $0x5e0] sm:$0xff]  }
 0x557   :  { %19837 = vmatprep.subr.bf16.mxu1 %v21681_v57  ;;  %v21716_v57 = vld [vmem:[#allocation15 + $0x5a0] sm:$0xff]  }
 0x55a   :  { %19838 = vmatpush3.bf16.msra.mxu1 %v21682_v27  ;;  %v21717_v27 = vld [vmem:[#allocation15 + $0x5e8] sm:$0xff]  }
 0x55b   :  { %19839 = vmatprep.subr.bf16.mxu1 %v21683_v25  ;;  %v21718_v25 = vld [vmem:[#allocation15 + $0x5a8] sm:$0xff]  }
 0x55e   :  { %19840 = vmatpush3.bf16.msra.mxu1 %v21684_v32 }
 0x55f   :  { %19841 = vmatprep.subr.bf16.mxu1 %v21685_v42  ;;  %v21720_v42 = vld [vmem:[#allocation15 + $0x5b0] sm:$0xff]  }
 0x561   :  { %v19825_v53 = vpop.f32.mrb[96].mxu0 }
 0x562   :  { %19842 = vmatpush3.bf16.msra.mxu1 %v21686_v63  ;;  %v19826_v17 = vpop.f32.mrb[97].mxu0 }
 0x563   :  { %v24143_v13 = vadd.f32 %v19826_v17, %v19825_v53  ;;  %v19828_v3 = vpop.f32.mrb[98].mxu0  ;;  %19843 = vmatprep.subr.bf16.mxu1 %v21687_v20  ;;  %v21721_v53 = vld [vmem:[#allocation15 + $0x5f8] sm:$0xff]  }
 0x564   :  { %v19829_v5 = vpop.f32.mrb[99].mxu0  ;;  %v21723_v3 = vld [vmem:[#allocation15 + $0x6c0] sm:$0xff]  }
 0x565   :  { %v21725_v5 = vld [vmem:[#allocation15 + $0x6c8] sm:$0xff]  }
 0x566   :  { %19844 = vmatpush3.bf16.msra.mxu1 %v21688_v0  ;;  %v21722_v0 = vld [vmem:[#allocation15 + $0x5b8] sm:$0xff]  }
 0x567   :  { %19845 = vmatprep.subr.bf16.mxu1 %v21689_v44  ;;  %v21724_v44 = vld [vmem:[#allocation15 + $0x680] sm:$0xff]  }
 0x56a   :  { %19846 = vmatpush3.bf16.msra.mxu1 %v21690_v56  ;;  %v21726_v56 = vld [vmem:[#allocation15 + $0x688] sm:$0xff]  }
 0x56b   :  { %19875 = vmatprep.subr.bf16.mxu1 %v21691_v14  ;;  %v21727_v14 = vld [vmem:[#allocation15 + $0x6d0] sm:$0xff]  }
 0x56d   :  { %9735 = vmatmul.mubr.bf16.vlgmr.msra.gmra.mrb[96].mxu1 %v23842_v33  ;;  %v21703_v33 = vld [vmem:[#allocation15 + $0x4f0] sm:$0xff]  }
 0x56e   :  { %19876 = vmatpush3.bf16.msra.mxu1 %v21692_v41  ;;  %9814 = vmatprep.mubr.bf16.mxu1 %v23857_v48  ;;  %v21728_v41 = vld [vmem:[#allocation15 + $0x690] sm:$0xff]  }
 0x56f   :  { %19877 = vmatprep.subr.bf16.mxu1 %v21693_v50  ;;  %v21729_v50 = vld [vmem:[#allocation15 + $0x6d8] sm:$0xff]  }
 0x572   :  { %19878 = vmatpush3.bf16.msra.mxu1 %v21694_v55  ;;  %v21730_v55 = vld [vmem:[#allocation15 + $0x698] sm:$0xff]  }
 0x573   :  { %19879 = vmatprep.subr.bf16.mxu1 %v21695_v39  ;;  %v21731_v39 = vld [vmem:[#allocation15 + $0x6e0] sm:$0xff]  }
 0x576   :  { %19880 = vmatpush3.bf16.msra.mxu1 %v21696_v49  ;;  %v21732_v49 = vld [vmem:[#allocation15 + $0x6a0] sm:$0xff]  }
 0x577   :  { %19881 = vmatprep.subr.bf16.mxu1 %v21697_v59  ;;  %v21733_v59 = vld [vmem:[#allocation15 + $0x6e8] sm:$0xff]  }
 0x57a   :  { %19882 = vmatpush3.bf16.msra.mxu1 %v21698_v60  ;;  %v21734_v60 = vld [vmem:[#allocation15 + $0x6a8] sm:$0xff]  }
 0x57b   :  { %19883 = vmatprep.subr.bf16.mxu1 %v21699_v12  ;;  %v21735_v12 = vld [vmem:[#allocation15 + $0x6f0] sm:$0xff]  }
 0x57e   :  { %19884 = vmatpush3.bf16.msra.mxu1 %v21700_v9 }
 0x57f   :  { %19885 = vmatprep.subr.bf16.mxu1 %v21701_v61 }
 0x581   :  { %v19869_v48 = vpop.f32.mrb[100].mxu0 }
 0x582   :  { %19886 = vmatpush3.bf16.msra.mxu1 %v21702_v19  ;;  %v19870_v37 = vpop.f32.mrb[101].mxu0 }
 0x583   :  { %v24147_v62 = vadd.f32 %v19870_v37, %v19869_v48  ;;  %v19872_v18 = vpop.f32.mrb[102].mxu0  ;;  %19887 = vmatprep.subr.bf16.mxu1 %v21703_v33  ;;  %v21736_v33 = vld [vmem:[#allocation15 + $0x6b0] sm:$0xff]  }
 0x584   :  { %v19873_v24 = vpop.f32.mrb[103].mxu0 }
 0x586   :  { %19888 = vmatpush3.bf16.msra.mxu1 %v21704_v31  ;;  %v21737_v31 = vld [vmem:[#allocation15 + $0x6f8] sm:$0xff]  }
 0x587   :  { %19889 = vmatprep.subr.bf16.mxu1 %v21705_v54 }
 0x58a   :  { %19890 = vmatpush3.bf16.msra.mxu1 %v21706_v29  ;;  %v21738_v29 = vld [vmem:[#allocation15 + $0x6b8] sm:$0xff]  }
 0x58b   :  { %19919 = vmatprep.subr.bf16.mxu1 %v21707_v1  ;;  %v21739_v1 = vld [vmem:[#allocation15 + $0x7c0] sm:$0xff]  }
 0x58d   :  { %9815 = vmatmul.mubr.bf16.vlgmr.msra.gmra.mrb[100].mxu1 %v23923_v7  ;;  %v21719_v7 = vld [vmem:[#allocation15 + $0x5f0] sm:$0xff]  }
 0x58e   :  { %19920 = vmatpush3.bf16.msra.mxu1 %v21708_v11  ;;  %9894 = vmatprep.mubr.bf16.mxu1 %v23940_v8  ;;  %v21740_v11 = vld [vmem:[#allocation15 + $0x780] sm:$0xff]  }
 0x58f   :  { %19921 = vmatprep.subr.bf16.mxu1 %v21709_v58  ;;  %v25469_v58 = vld [vmem:[#allocation91_spill] sm:$0xff] }
 0x592   :  { %19922 = vmatpush3.bf16.msra.mxu1 %v21710_v34  ;;  %v21742_v34 = vld [vmem:[#allocation15 + $0x788] sm:$0xff]  }
 0x593   :  { %19923 = vmatprep.subr.bf16.mxu1 %v21711_v47  ;;  %v21743_v47 = vld [vmem:[#allocation15 + $0x7d0] sm:$0xff]  }
 0x596   :  { %19924 = vmatpush3.bf16.msra.mxu1 %v21712_v38  ;;  %v21744_v38 = vld [vmem:[#allocation15 + $0x790] sm:$0xff]  }
 0x597   :  { %19925 = vmatprep.subr.bf16.mxu1 %v21713_v15  ;;  %v21745_v15 = vld [vmem:[#allocation15 + $0x7d8] sm:$0xff]  }
 0x59a   :  { %19926 = vmatpush3.bf16.msra.mxu1 %v21714_v4  ;;  %v21746_v4 = vld [vmem:[#allocation15 + $0x798] sm:$0xff]  }
 0x59b   :  { %19927 = vmatprep.subr.bf16.mxu1 %v21715_v22  ;;  %v21747_v22 = vld [vmem:[#allocation15 + $0x7e0] sm:$0xff]  }
 0x59e   :  { %19928 = vmatpush3.bf16.msra.mxu1 %v21716_v57  ;;  %v21748_v57 = vld [vmem:[#allocation15 + $0x7a0] sm:$0xff]  }
 0x59f   :  { %19929 = vmatprep.subr.bf16.mxu1 %v21717_v27  ;;  %v21749_v27 = vld [vmem:[#allocation15 + $0x7e8] sm:$0xff]  }
 0x5a1   :  { %v19913_v8 = vpop.f32.mrb[104].mxu0 }
 0x5a2   :  { %19930 = vmatpush3.bf16.msra.mxu1 %v21718_v25  ;;  %v19914_v32 = vpop.f32.mrb[105].mxu0  ;;  %v21751_v25 = vld [vmem:[#allocation15 + $0x7f0] sm:$0xff]  }
 0x5a3   :  { %v24151_v63 = vadd.f32 %v19914_v32, %v19913_v8  ;;  %v19916_v20 = vpop.f32.mrb[106].mxu0  ;;  %19931 = vmatprep.subr.bf16.mxu1 %v21719_v7 }
 0x5a4   :  { %v19917_v17 = vpop.f32.mrb[107].mxu0 }
 0x5a6   :  { %19932 = vmatpush3.bf16.msra.mxu1 %v21720_v42 }
 0x5a7   :  { %19933 = vmatprep.subr.bf16.mxu1 %v21721_v53  ;;  %v21752_v53 = vld [vmem:[#allocation15 + $0x7b0] sm:$0xff]  }
 0x5aa   :  { %19934 = vmatpush3.bf16.msra.mxu1 %v21722_v0 }
 0x5ab   :  { %19963 = vmatprep.subr.bf16.mxu1 %v21723_v3  ;;  %v21753_v3 = vld [vmem:[#allocation15 + $0x7f8] sm:$0xff]  }
 0x5ad   :  { %9895 = vmatmul.mubr.bf16.vlgmr.msra.gmra.mrb[104].mxu1 %v24008_v40 }
 0x5ae   :  { %19964 = vmatpush3.bf16.msra.mxu1 %v21724_v44  ;;  %9974 = vmatprep.mubr.bf16.mxu1 %v24017_v45 }
 0x5af   :  { %19965 = vmatprep.subr.bf16.mxu1 %v21725_v5 }
 0x5b2   :  { %19966 = vmatpush3.bf16.msra.mxu1 %v21726_v56 }
 0x5b3   :  { %19967 = vmatprep.subr.bf16.mxu1 %v21727_v14 }
 0x5b6   :  { %19968 = vmatpush3.bf16.msra.mxu1 %v21728_v41  ;;  %v21754_v41 = vld [vmem:[#allocation15 + $0x7b8] sm:$0xff]  }
 0x5b7   :  { %19969 = vmatprep.subr.bf16.mxu1 %v21729_v50 }
 0x5ba   :  { %19970 = vmatpush3.bf16.msra.mxu1 %v21730_v55  ;;  %v21755_v55 = vld [vmem:[#allocation15 + $0x8c0] sm:$0xff]  }
 0x5bb   :  { %19971 = vmatprep.subr.bf16.mxu1 %v21731_v39  ;;  %v21756_v39 = vld [vmem:[#allocation15 + $0x880] sm:$0xff]  }
 0x5be   :  { %19972 = vmatpush3.bf16.msra.mxu1 %v21732_v49  ;;  %v21757_v49 = vld [vmem:[#allocation15 + $0x8c8] sm:$0xff]  }
 0x5bf   :  { %19973 = vmatprep.subr.bf16.mxu1 %v21733_v59  ;;  %v21758_v59 = vld [vmem:[#allocation15 + $0x888] sm:$0xff]  }
 0x5c0   :  { %v7496_v40 = vpop.f32.mrb[80].mxu1 }
 0x5c1   :  { %v9457_v45 = vadd.f32 %v24125_v21, %v7496_v40  ;;  %v20604_v9 = vpop.f32.mrb[81].mxu1  ;;  %v21741_v21 = vld [vmem:[#allocation15 + $0x7c8] sm:$0xff]   ;;  %v21761_v40 = vld [vmem:[#allocation15 + $0x8d8] sm:$0xff]  }
 0x5c2   :  { %v19957_v61 = vpop.f32.mrb[108].mxu0  ;;  %19974 = vmatpush3.bf16.msra.mxu1 %v21734_v60  ;;  %v7499_v19 = vpop.f32.mrb[82].mxu1  ;;  %v21759_v60 = vld [vmem:[#allocation15 + $0x8d0] sm:$0xff]   ;;  %v21764_v9 = vld [vmem:[#allocation15 + $0x8a0] sm:$0xff]  }
 0x5c3   :  { %v19958_v48 = vpop.f32.mrb[109].mxu0  ;;  %v20605_v37 = vpop.f32.mrb[83].mxu1  ;;  %19975 = vmatprep.subr.bf16.mxu1 %v21735_v12  ;;  %v21760_v12 = vld [vmem:[#allocation15 + $0x890] sm:$0xff]  }
 0x5c4   :  { %v24156_v18 = vadd.f32 %v19958_v48, %v19957_v61  ;;  %v19960_v54 = vpop.f32.mrb[110].mxu0  ;;  %v21765_v61 = vld [vmem:[#allocation15 + $0x8e8] sm:$0xff]   ;;  %v21767_v19 = vld [vmem:[#allocation15 + $0x8f0] sm:$0xff]  }
 0x5c5   :  { %v19961_v24 = vpop.f32.mrb[111].mxu0  ;;  %v21768_v54 = vld [vmem:[#allocation15 + $0x8b0] sm:$0xff]  }
 0x5c6   :  { %19976 = vmatpush3.bf16.msra.mxu1 %v21736_v33 }
 0x5c7   :  { %19977 = vmatprep.subr.bf16.mxu1 %v21737_v31 }
 0x5ca   :  { %19978 = vmatpush3.bf16.msra.mxu1 %v21738_v29 }
 0x5cb   :  { %20007 = vmatprep.subr.bf16.mxu1 %v21739_v1  ;;  %v21769_v1 = vld [vmem:[#allocation15 + $0x8f8] sm:$0xff]  }
 0x5cd   :  { %9975 = vmatmul.mubr.bf16.vlgmr.msra.gmra.mrb[108].mxu1 %v24032_v52  ;;  %v21750_v52 = vld [vmem:[#allocation15 + $0x7a8] sm:$0xff]  }
 0x5ce   :  { %20008 = vmatpush3.bf16.msra.mxu1 %v21740_v11  ;;  %10054 = vmatprep.mubr.bf16.mxu1 %v25469_v58 }
 0x5cf   :  { %20009 = vmatprep.subr.bf16.mxu1 %v21741_v21 }
 0x5d2   :  { %20010 = vmatpush3.bf16.msra.mxu1 %v21742_v34 }
 0x5d3   :  { %20011 = vmatprep.subr.bf16.mxu1 %v21743_v47  ;;  %v21770_v47 = vld [vmem:[#allocation15 + $0x8b8] sm:$0xff]  }
 0x5d6   :  { %20012 = vmatpush3.bf16.msra.mxu1 %v21744_v38 }
 0x5d7   :  { %20013 = vmatprep.subr.bf16.mxu1 %v21745_v15  ;;  %v21771_v15 = vld [vmem:[#allocation15 + $0x9c0] sm:$0xff]  }
 0x5da   :  { %20014 = vmatpush3.bf16.msra.mxu1 %v21746_v4  ;;  %v21772_v4 = vld [vmem:[#allocation15 + $0x980] sm:$0xff]  }
 0x5db   :  { %20015 = vmatprep.subr.bf16.mxu1 %v21747_v22  ;;  %v21773_v22 = vld [vmem:[#allocation15 + $0x9c8] sm:$0xff]  }
 0x5de   :  { %20016 = vmatpush3.bf16.msra.mxu1 %v21748_v57  ;;  %v21774_v57 = vld [vmem:[#allocation15 + $0x988] sm:$0xff]  }
 0x5df   :  { %20017 = vmatprep.subr.bf16.mxu1 %v21749_v27  ;;  %v21775_v27 = vld [vmem:[#allocation15 + $0x9d0] sm:$0xff]  }
 0x5e0   :  { %v19715_v7 = vpop.f32.mrb[84].mxu1 }
 0x5e1   :  { %v19716_v8 = vpop.f32.mrb[85].mxu1 }
 0x5e2   :  { %v19717_v32 = vadd.f32 %v19716_v8, %v19715_v7  ;;  %v19718_v42 = vpop.f32.mrb[86].mxu1  ;;  %v20001_v20 = vpop.f32.mrb[112].mxu0  ;;  %20018 = vmatpush3.bf16.msra.mxu1 %v21750_v52  ;;  %v21776_v52 = vld [vmem:[#allocation15 + $0x990] sm:$0xff]   ;;  %v21779_v7 = vld [vmem:[#allocation15 + $0x9e0] sm:$0xff]  }
 0x5e3   :  { %v19719_v17 = vpop.f32.mrb[87].mxu1  ;;  %v20002_v0 = vpop.f32.mrb[113].mxu0  ;;  %20019 = vmatprep.subr.bf16.mxu1 %v21751_v25  ;;  %v21777_v25 = vld [vmem:[#allocation15 + $0x9d8] sm:$0xff]   ;;  %v21780_v8 = vld [vmem:[#allocation15 + $0x9a0] sm:$0xff]   ;;  %v21783_v42 = vld [vmem:[#allocation15 + $0x9f0] sm:$0xff]  }
 0x5e4   :  { %v9497_v44 = vadd.f32 %v19717_v32, %v9457_v45  ;;  %v24160_v5 = vadd.f32 %v20002_v0, %v20001_v20  ;;  %v20004_v56 = vpop.f32.mrb[114].mxu0  ;;  %v21763_v45 = vld [vmem:[#allocation15 + $0x8e0] sm:$0xff]   ;;  %v21781_v32 = vld [vmem:[#allocation15 + $0x9e8] sm:$0xff]  }
 0x5e5   :  { %v20005_v14 = vpop.f32.mrb[115].mxu0 }
 0x5e6   :  { %20020 = vmatpush3.bf16.msra.mxu1 %v21752_v53  ;;  %v9537_v50 = vadd.f32 %v24131_v28, %v9497_v44  ;;  %v21762_v28 = vld [vmem:[#allocation15 + $0x898] sm:$0xff]  }
 0x5e7   :  { %20021 = vmatprep.subr.bf16.mxu1 %v21753_v3  ;;  %v21784_v3 = vld [vmem:[#allocation15 + $0x9b0] sm:$0xff]   ;;  %v21785_v14 = vld [vmem:[#allocation15 + $0x9f8] sm:$0xff]  }
 0x5ea   :  { %20022 = vmatpush3.bf16.msra.mxu1 %v21754_v41 }
 0x5eb   :  { %20051 = vmatprep.subr.bf16.mxu1 %v21755_v55 }
 0x5ed   :  { %10055 = vmatmul.mubr.bf16.vlgmr.msra.gmra.mrb[112].mxu1 %v24055_v35  ;;  %v21766_v35 = vld [vmem:[#allocation15 + $0x8a8] sm:$0xff]  }
 0x5ee   :  { %20052 = vmatpush3.bf16.msra.mxu1 %v21756_v39  ;;  %10134 = vmatprep.mubr.bf16.mxu1 %v24064_v10 }
 0x5ef   :  { %20053 = vmatprep.subr.bf16.mxu1 %v21757_v49  ;;  %v21786_v49 = vld [vmem:[#allocation15 + $0x9b8] sm:$0xff]  }
 0x5f2   :  { %20054 = vmatpush3.bf16.msra.mxu1 %v21758_v59 }
 0x5f3   :  { %20055 = vmatprep.subr.bf16.mxu1 %v21759_v60 }
 0x5f6   :  { %20056 = vmatpush3.bf16.msra.mxu1 %v21760_v12 }
 0x5f7   :  { %20057 = vmatprep.subr.bf16.mxu1 %v21761_v40 }
 0x5fa   :  { %20058 = vmatpush3.bf16.msra.mxu1 %v21762_v28 }
 0x5fb   :  { %20059 = vmatprep.subr.bf16.mxu1 %v21763_v45 }
 0x5fe   :  { %20060 = vmatpush3.bf16.msra.mxu1 %v21764_v9 }
 0x5ff   :  { %20061 = vmatprep.subr.bf16.mxu1 %v21765_v61 }
 0x600   :  { %v19759_v10 = vpop.f32.mrb[88].mxu1 }
 0x601   :  { %v19760_v33 = vpop.f32.mrb[89].mxu1 }
 0x602   :  { %v19761_v48 = vadd.f32 %v19760_v33, %v19759_v10  ;;  %v19762_v37 = vpop.f32.mrb[90].mxu1  ;;  %v20045_v31 = vpop.f32.mrb[116].mxu0  ;;  %20062 = vmatpush3.bf16.msra.mxu1 %v21766_v35 }
 0x603   :  { %v19763_v24 = vpop.f32.mrb[91].mxu1  ;;  %v20046_v29 = vpop.f32.mrb[117].mxu0  ;;  %20063 = vmatprep.subr.bf16.mxu1 %v21767_v19  ;;  %v21787_v37 = vld [vmem:[#allocation19] ss:$164 sps:$4 sm:$0xff]  }
 0x604   :  { %v9577_v11 = vadd.f32 %v19761_v48, %v9537_v50  ;;  %v24165_v21 = vadd.f32 %v20046_v29, %v20045_v31  ;;  %v20048_v58 = vpop.f32.mrb[118].mxu0  ;;  %v21789_v31 = vld [vmem:[#allocation19 + $0x4] ss:$164 sps:$4 sm:$0xff]   ;;  %v21795_v24 = vld [vmem:[#allocation19 + $0x14c] ss:$164 sps:$4 sm:$0xff]  }
 0x605   :  { %v20049_v34 = vpop.f32.mrb[119].mxu0  ;;  %12219 = vmatprep.subr.bf16.mxu0 %v21789_v31  ;;  %v21801_v58 = vld [vmem:[#allocation19 + $0x294] ss:$164 sps:$4 sm:$0xff]  }
 0x606   :  { %20064 = vmatpush3.bf16.msra.mxu1 %v21768_v54  ;;  %v9617_v38 = vadd.f32 %v24137_v36, %v9577_v11  ;;  %v21778_v36 = vld [vmem:[#allocation15 + $0x998] sm:$0xff]   ;;  %v21790_v54 = vld [vmem:[#allocation19 + $0x8] ss:$164 sps:$4 sm:$0xff]   ;;  %12220 = vmatpush1.bf16.msra.mxu0 %v21787_v37 }
 0x607   :  { %20065 = vmatprep.subr.bf16.mxu1 %v21769_v1  ;;  %v21798_v1 = vld [vmem:[#allocation19 + $0x154] ss:$164 sps:$4 sm:$0xff]   ;;  %v21793_v11 = vld [vmem:[#allocation19 + $0x148] ss:$164 sps:$4 sm:$0xff]   ;;  %12221 = vmatprep.subr.bf16.mxu0 %v21795_v24  ;;  %v21804_v34 = vld [vmem:[#allocation19 + $0x29c] ss:$164 sps:$4 sm:$0xff]  }
 0x60a   :  { %20066 = vmatpush3.bf16.msra.mxu1 %v21770_v47  ;;  %12222 = vmatpush1.bf16.msra.mxu0 %v21793_v11  ;;  %v21799_v47 = vld [vmem:[#allocation19 + $0x290] ss:$164 sps:$4 sm:$0xff]  }
 0x60b   :  { %20095 = vmatprep.subr.bf16.mxu1 %v21771_v15  ;;  %12223 = vmatprep.subr.bf16.mxu0 %v21801_v58  ;;  %v21807_v15 = vld [vmem:[#allocation19 + $0x3dc] ss:$164 sps:$4 sm:$0xff]  }
 0x60d   :  { %10135 = vmatmul.mubr.bf16.vlgmr.msra.gmra.mrb[116].mxu1 %v24076_v30  ;;  %v21782_v30 = vld [vmem:[#allocation15 + $0x9a8] sm:$0xff]  }
 0x60e   :  { %20096 = vmatpush3.bf16.msra.mxu1 %v21772_v4  ;;  %10214 = vmatprep.mubr.bf16.mxu1 %v24085_v6  ;;  %v21810_v4 = vld [vmem:[#allocation19 + $0x3e4] ss:$164 sps:$4 sm:$0xff]  }
 0x60f   :  { %20097 = vmatprep.subr.bf16.mxu1 %v21773_v22  ;;  %12224 = vmatpush1.bf16.msra.mxu0 %v21799_v47  ;;  %v21808_v22 = vld [vmem:[#allocation19 + $0x3e0] ss:$164 sps:$4 sm:$0xff]   ;;  %v18569_v47 = vld [vmem:[#allocation18] ss:$0 sm:$0xff] }
 0x610   :  { %12225 = vmatprep.subr.bf16.mxu0 %v21807_v15 }
 0x612   :  { %20098 = vmatpush3.bf16.msra.mxu1 %v21774_v57  ;;  %v21813_v57 = vld [vmem:[#allocation19 + $0x524] ss:$164 sps:$4 sm:$0xff]  }
 0x613   :  { %20099 = vmatprep.subr.bf16.mxu1 %v21775_v27  ;;  %v21816_v27 = vld [vmem:[#allocation19 + $0x52c] ss:$164 sps:$4 sm:$0xff]  }
 0x616   :  { %20100 = vmatpush3.bf16.msra.mxu1 %v21776_v52  ;;  %v21811_v52 = vld [vmem:[#allocation19 + $0x520] ss:$164 sps:$4 sm:$0xff]  }
 0x617   :  { %20101 = vmatprep.subr.bf16.mxu1 %v21777_v25  ;;  %v21814_v25 = vld [vmem:[#allocation19 + $0x528] ss:$164 sps:$4 sm:$0xff]  }
 0x61a   :  { %20102 = vmatpush3.bf16.msra.mxu1 %v21778_v36  ;;  %v21819_v36 = vld [vmem:[#allocation19 + $0x66c] ss:$164 sps:$4 sm:$0xff]  }
 0x61b   :  { %20103 = vmatprep.subr.bf16.mxu1 %v21779_v7  ;;  %v21822_v7 = vld [vmem:[#allocation19 + $0x674] ss:$164 sps:$4 sm:$0xff]  }
 0x61e   :  { %20104 = vmatpush3.bf16.msra.mxu1 %v21780_v8 }
 0x61f   :  { %20105 = vmatprep.subr.bf16.mxu1 %v21781_v32  ;;  %v21817_v32 = vld [vmem:[#allocation19 + $0x668] ss:$164 sps:$4 sm:$0xff]  }
 0x620   :  { %v19803_v6 = vpop.f32.mrb[92].mxu1 }
 0x621   :  { %v19804_v20 = vpop.f32.mrb[93].mxu1 }
 0x622   :  { %v19805_v53 = vadd.f32 %v19804_v20, %v19803_v6  ;;  %v19806_v17 = vpop.f32.mrb[94].mxu1  ;;  %v20089_v0 = vpop.f32.mrb[120].mxu0  ;;  %20106 = vmatpush3.bf16.msra.mxu1 %v21782_v30  ;;  %v21820_v30 = vld [vmem:[#allocation19 + $0x670] ss:$164 sps:$4 sm:$0xff]  }
 0x623   :  { %v19807_v44 = vpop.f32.mrb[95].mxu1  ;;  %v20090_v56 = vpop.f32.mrb[121].mxu0  ;;  %20107 = vmatprep.subr.bf16.mxu1 %v21783_v42  ;;  %v21825_v17 = vld [vmem:[#allocation19 + $0x7b4] ss:$164 sps:$4 sm:$0xff]  }
 0x624   :  { %v9657_v41 = vadd.f32 %v19805_v53, %v9617_v38  ;;  %v24170_v50 = vadd.f32 %v20090_v56, %v20089_v0  ;;  %v20092_v55 = vpop.f32.mrb[122].mxu0  ;;  %v21802_v38 = vld [vmem:[#allocation19 + $0x298] ss:$164 sps:$4 sm:$0xff]   ;;  %v21823_v44 = vld [vmem:[#allocation19 + $0x7b0] ss:$164 sps:$4 sm:$0xff]  }
 0x625   :  { %v20093_v39 = vpop.f32.mrb[123].mxu0  ;;  %v21828_v0 = vld [vmem:[#allocation19 + $0x7bc] ss:$164 sps:$4 sm:$0xff]   ;;  %v21834_v55 = vld [vmem:[#allocation19 + $0x904] ss:$164 sps:$4 sm:$0xff]  }
 0x626   :  { %20108 = vmatpush3.bf16.msra.mxu1 %v21784_v3  ;;  %v9697_v59 = vadd.f32 %v24143_v13, %v9657_v41  ;;  %v21826_v56 = vld [vmem:[#allocation19 + $0x7b8] ss:$164 sps:$4 sm:$0xff]  }
 0x627   :  { %20109 = vmatprep.subr.bf16.mxu1 %v21785_v14  ;;  %v21831_v41 = vld [vmem:[#allocation19 + $0x8fc] ss:$164 sps:$4 sm:$0xff]  }
 0x628   :  { %v21829_v39 = vld [vmem:[#allocation19 + $0x8f8] ss:$164 sps:$4 sm:$0xff]  }
 0x62a   :  { %20110 = vmatpush3.bf16.msra.mxu1 %v21786_v49  ;;  %v21832_v49 = vld [vmem:[#allocation19 + $0x900] ss:$164 sps:$4 sm:$0xff]  }
 0x62d   :  { %10215 = vmatmul.mubr.bf16.vlgmr.msra.gmra.mrb[120].mxu1 %v24094_v46  ;;  %v21792_v46 = vld [vmem:[#allocation19 + $0xc] ss:$164 sps:$4 sm:$0xff]  }
 0x62e   :  { %12292 = vmatprep.mubr.bf16.mxu1 %v25468_v23  ;;  %12260 = vmatprep.subr.bf16.mxu1 %v21792_v46 }
 0x62f   :  { %12261 = vmatpush1.bf16.msra.mxu1 %v21790_v54 }
 0x630   :  { %12262 = vmatprep.subr.bf16.mxu1 %v21798_v1 }
 0x640   :  { %v19847_v60 = vpop.f32.mrb[96].mxu1 }
 0x641   :  { %v19848_v12 = vpop.f32.mrb[97].mxu1 }
 0x642   :  { %v19849_v40 = vadd.f32 %v19848_v12, %v19847_v60  ;;  %v19850_v28 = vpop.f32.mrb[98].mxu1  ;;  %v21840_v60 = vld [vmem:[#allocation19 + $0x1c] ss:$164 sps:$4 sm:$0xff]  }
 0x643   :  { %v19851_v45 = vpop.f32.mrb[99].mxu1 }
 0x644   :  { %v9737_v9 = vadd.f32 %v19849_v40, %v9697_v59  ;;  %v21837_v59 = vld [vmem:[#allocation19 + $0x14] ss:$164 sps:$4 sm:$0xff]  }
 0x646   :  { %v9777_v61 = vadd.f32 %v24147_v62, %v9737_v9  ;;  %v21796_v62 = vld [vmem:[#allocation19 + $0x150] ss:$164 sps:$4 sm:$0xff]  }
 0x647   :  { %12263 = vmatpush1.bf16.msra.mxu1 %v21796_v62 }
 0x648   :  { %12264 = vmatprep.subr.bf16.mxu1 %v21804_v34 }
 0x64b   :  { %12265 = vmatpush1.bf16.msra.mxu1 %v21802_v38 }
 0x64c   :  { %12266 = vmatprep.subr.bf16.mxu1 %v21810_v4  ;;  %v10231_v4 = vstv %s25300_s11  ;;  %s23181_s11 = smov [#allocation26]  }
 0x64d   :  { %s17544_s21 = sshll.u32 %s23181_s11, 4  ;;  %s17545_s21 = int_to_ptr.vmem [resolvable:$true] %s17544_s21 }
 0x64e   :  { %s23053_s10 = scalar_lea.vmem %s17545_s21, 128  ;;  %p23058_p7 = scmp.lt.s32.totalorder %s17545_s21, %s17545_s21 }
 0x64f   :  { %12267 = vmatpush1.bf16.msra.mxu1 %v21808_v22  ;;  %p23054_p6 = scmp.ne.s32.totalorder %s17545_s21, %s23053_s10  ;;  %p23059_p8 = scmp.lt.s32.totalorder %s23053_s10, %s23053_s10 }
 0x650   :  { %12268 = vmatprep.subr.bf16.mxu1 %v21816_v27  ;;  %v21838_v27 = vld [vmem:[#allocation19 + $0x18] ss:$164 sps:$4 sm:$0xff]  }
 0x651   :  { %p23060_p9 = por %p23059_p8, %p23058_p7 }
 0x653   :  { %12269 = vmatpush1.bf16.msra.mxu1 %v21814_v25  ;;  %v21846_v25 = vld [vmem:[#allocation19 + $0x164] ss:$164 sps:$4 sm:$0xff]   ;;  %p23061_p10 = pnand %p23060_p9, %p23054_p6 }
 0x654   :  { %12270 = vmatprep.subr.bf16.mxu1 %v21822_v7  ;;  %v21844_v7 = vld [vmem:[#allocation19 + $0x160] ss:$164 sps:$4 sm:$0xff]  }
 0x657   :  { %12271 = vmatpush1.bf16.msra.mxu1 %v21820_v30  ;;  %v21847_v30 = vld [vmem:[#allocation19 + $0x2a0] ss:$164 sps:$4 sm:$0xff]  }
 0x658   :  { %12272 = vmatprep.subr.bf16.mxu1 %v21828_v0  ;;  %v21861_v0 = vld [vmem:[#allocation19 + $0x534] ss:$164 sps:$4 sm:$0xff]  }
 0x65b   :  { %12273 = vmatpush1.bf16.msra.mxu1 %v21826_v56  ;;  %v21862_v56 = vld [vmem:[#allocation19 + $0x538] ss:$164 sps:$4 sm:$0xff]  }
 0x65c   :  { %12274 = vmatprep.subr.bf16.mxu1 %v21834_v55  ;;  %v21865_v55 = vld [vmem:[#allocation19 + $0x678] ss:$164 sps:$4 sm:$0xff]  }
 0x65f   :  { %12275 = vmatpush1.bf16.msra.mxu1 %v21832_v49  ;;  %v21873_v49 = vld [vmem:[#allocation19 + $0x7c4] ss:$164 sps:$4 sm:$0xff]  }
 0x660   :  { %v19891_v35 = vpop.f32.mrb[100].mxu1  ;;  %12342 = vmatprep.subr.bf16.mxu1 %v21840_v60  ;;  %v21871_v60 = vld [vmem:[#allocation19 + $0x7c0] ss:$164 sps:$4 sm:$0xff]  }
 0x661   :  { %v19892_v19 = vpop.f32.mrb[101].mxu1 }
 0x662   :  { %v19893_v10 = vadd.f32 %v19892_v19, %v19891_v35  ;;  %v19894_v33 = vpop.f32.mrb[102].mxu1 }
 0x663   :  { %v19895_v48 = vpop.f32.mrb[103].mxu1 }
 0x664   :  { %v9817_v13 = vadd.f32 %v19893_v10, %v9777_v61 }
 0x666   :  { %v9857_v29 = vadd.f32 %v24151_v63, %v9817_v13  ;;  %v21805_v63 = vld [vmem:[#allocation19 + $0x3d8] ss:$164 sps:$4 sm:$0xff]  }
 0x667   :  { %12226 = vmatpush1.bf16.msra.mxu0 %v21805_v63 }
 0x668   :  { %12227 = vmatprep.subr.bf16.mxu0 %v21813_v57  ;;  %v21835_v57 = vld [vmem:[#allocation19 + $0x10] ss:$164 sps:$4 sm:$0xff]  }
 0x66b   :  { %12228 = vmatpush1.bf16.msra.mxu0 %v21811_v52 }
 0x66c   :  { %12229 = vmatprep.subr.bf16.mxu0 %v21819_v36  ;;  %v21841_v36 = vld [vmem:[#allocation19 + $0x158] ss:$164 sps:$4 sm:$0xff]  }
 0x66f   :  { %12230 = vmatpush1.bf16.msra.mxu0 %v21817_v32  ;;  %v21852_v32 = vld [vmem:[#allocation19 + $0x2ac] ss:$164 sps:$4 sm:$0xff]  }
 0x670   :  { %12231 = vmatprep.subr.bf16.mxu0 %v21825_v17  ;;  %v21856_v17 = vld [vmem:[#allocation19 + $0x3f0] ss:$164 sps:$4 sm:$0xff]  }
 0x673   :  { %12232 = vmatpush1.bf16.msra.mxu0 %v21823_v44  ;;  %v21859_v44 = vld [vmem:[#allocation19 + $0x530] ss:$164 sps:$4 sm:$0xff]  }
 0x674   :  { %12233 = vmatprep.subr.bf16.mxu0 %v21831_v41  ;;  %v21870_v41 = vld [vmem:[#allocation19 + $0x684] ss:$164 sps:$4 sm:$0xff]  }
 0x677   :  { %12234 = vmatpush1.bf16.msra.mxu0 %v21829_v39  ;;  %v21868_v39 = vld [vmem:[#allocation19 + $0x680] ss:$164 sps:$4 sm:$0xff]  }
 0x678   :  { %12301 = vmatprep.subr.bf16.mxu0 %v21837_v59  ;;  %v21876_v59 = vld [vmem:[#allocation19 + $0x7cc] ss:$164 sps:$4 sm:$0xff]  }
 0x680   :  { %v19935_v8 = vpop.f32.mrb[104].mxu1 }
 0x681   :  { %v19936_v42 = vpop.f32.mrb[105].mxu1 }
 0x682   :  { %v19937_v6 = vadd.f32 %v19936_v42, %v19935_v8  ;;  %v19938_v20 = vpop.f32.mrb[106].mxu1  ;;  %v21849_v8 = vld [vmem:[#allocation19 + $0x2a4] ss:$164 sps:$4 sm:$0xff]  }
 0x683   :  { %v19939_v53 = vpop.f32.mrb[107].mxu1  ;;  %v21850_v42 = vld [vmem:[#allocation19 + $0x2a8] ss:$164 sps:$4 sm:$0xff]   ;;  %v21858_v20 = vld [vmem:[#allocation19 + $0x3f4] ss:$164 sps:$4 sm:$0xff]  }
 0x684   :  { %v9897_v3 = vadd.f32 %v19937_v6, %v9857_v29  ;;  %v21855_v6 = vld [vmem:[#allocation19 + $0x3ec] ss:$164 sps:$4 sm:$0xff]  }
 0x685   :  { %v21853_v53 = vld [vmem:[#allocation19 + $0x3e8] ss:$164 sps:$4 sm:$0xff]  }
 0x686   :  { %v9937_v14 = vadd.f32 %v24156_v18, %v9897_v3  ;;  %v21864_v3 = vld [vmem:[#allocation19 + $0x53c] ss:$164 sps:$4 sm:$0xff]  }
 0x6a0   :  { %v19979_v12 = vpop.f32.mrb[108].mxu1 }
 0x6a1   :  { %v19980_v40 = vpop.f32.mrb[109].mxu1 }
 0x6a2   :  { %v19981_v28 = vadd.f32 %v19980_v40, %v19979_v12  ;;  %v19982_v45 = vpop.f32.mrb[110].mxu1  ;;  %v21874_v12 = vld [vmem:[#allocation19 + $0x7c8] ss:$164 sps:$4 sm:$0xff]  }
 0x6a3   :  { %v19983_v9 = vpop.f32.mrb[111].mxu1  ;;  %v21879_v40 = vld [vmem:[#allocation19 + $0x90c] ss:$164 sps:$4 sm:$0xff]  }
 0x6a4   :  { %v9977_v18 = vadd.f32 %v19981_v28, %v9937_v14  ;;  %v21867_v14 = vld [vmem:[#allocation19 + $0x67c] ss:$164 sps:$4 sm:$0xff]   ;;  %v21882_v28 = vld [vmem:[#allocation19 + $0x914] ss:$164 sps:$4 sm:$0xff]   ;;  %v21877_v45 = vld [vmem:[#allocation19 + $0x908] ss:$164 sps:$4 sm:$0xff]  }
 0x6a5   :  { %v21880_v9 = vld [vmem:[#allocation19 + $0x910] ss:$164 sps:$4 sm:$0xff]  }
 0x6a6   :  { %v10017_v61 = vadd.f32 %v24160_v5, %v9977_v18  ;;  %v21885_v18 = vld [vmem:[#allocation19 + $0x24] ss:$164 sps:$4 sm:$0xff]  }
 0x6c0   :  { %v20023_v35 = vpop.f32.mrb[112].mxu1 }
 0x6c1   :  { %v20024_v19 = vpop.f32.mrb[113].mxu1 }
 0x6c2   :  { %v20025_v10 = vadd.f32 %v20024_v19, %v20023_v35  ;;  %v20026_v33 = vpop.f32.mrb[114].mxu1  ;;  %v21883_v35 = vld [vmem:[#allocation19 + $0x20] ss:$164 sps:$4 sm:$0xff]   ;;  %v21886_v19 = vld [vmem:[#allocation19 + $0x28] ss:$164 sps:$4 sm:$0xff]  }
 0x6c3   :  { %v20027_v48 = vpop.f32.mrb[115].mxu1  ;;  %v21894_v33 = vld [vmem:[#allocation19 + $0x174] ss:$164 sps:$4 sm:$0xff]  }
 0x6c4   :  { %v10057_v13 = vadd.f32 %v20025_v10, %v10017_v61  ;;  %v21888_v61 = vld [vmem:[#allocation19 + $0x2c] ss:$164 sps:$4 sm:$0xff]  }
 0x6c5   :  { %v21891_v10 = vld [vmem:[#allocation19 + $0x16c] ss:$164 sps:$4 sm:$0xff]  }
 0x6c6   :  { %v10097_v37 = vadd.f32 %v24165_v21, %v10057_v13  ;;  %v21889_v48 = vld [vmem:[#allocation19 + $0x168] ss:$164 sps:$4 sm:$0xff]   ;;  %v21892_v13 = vld [vmem:[#allocation19 + $0x170] ss:$164 sps:$4 sm:$0xff]  }
 0x6e0   :  { %v20067_v31 = vpop.f32.mrb[116].mxu1 }
 0x6e1   :  { %v20068_v54 = vpop.f32.mrb[117].mxu1 }
 0x6e2   :  { %v20069_v46 = vadd.f32 %v20068_v54, %v20067_v31  ;;  %v20070_v24 = vpop.f32.mrb[118].mxu1  ;;  %v21900_v31 = vld [vmem:[#allocation19 + $0x2bc] ss:$164 sps:$4 sm:$0xff]   ;;  %v21895_v54 = vld [vmem:[#allocation19 + $0x2b0] ss:$164 sps:$4 sm:$0xff]  }
 0x6e3   :  { %v20071_v29 = vpop.f32.mrb[119].mxu1  ;;  %v21903_v24 = vld [vmem:[#allocation19 + $0x3fc] ss:$164 sps:$4 sm:$0xff]  }
 0x6e4   :  { %v10137_v1 = vadd.f32 %v20069_v46, %v10097_v37  ;;  %v21897_v37 = vld [vmem:[#allocation19 + $0x2b4] ss:$164 sps:$4 sm:$0xff]   ;;  %v21906_v29 = vld [vmem:[#allocation19 + $0x404] ss:$164 sps:$4 sm:$0xff]  }
 0x6e5   :  { %v21898_v46 = vld [vmem:[#allocation19 + $0x2b8] ss:$164 sps:$4 sm:$0xff]  }
 0x6e6   :  { %v10177_v11 = vadd.f32 %v24170_v50, %v10137_v1  ;;  %v21843_v50 = vld [vmem:[#allocation19 + $0x15c] ss:$164 sps:$4 sm:$0xff]  }
 0x6e7   :  { %v21901_v1 = vld [vmem:[#allocation19 + $0x3f8] ss:$164 sps:$4 sm:$0xff]  }
 0x700   :  { %v20111_v62 = vpop.f32.mrb[120].mxu1 }
 0x701   :  { %v20112_v58 = vpop.f32.mrb[121].mxu1 }
 0x702   :  { %v20113_v34 = vadd.f32 %v20112_v58, %v20111_v62  ;;  %v20114_v5 = vpop.f32.mrb[122].mxu1  ;;  %v21909_v62 = vld [vmem:[#allocation19 + $0x544] ss:$164 sps:$4 sm:$0xff]   ;;  %v21912_v58 = vld [vmem:[#allocation19 + $0x54c] ss:$164 sps:$4 sm:$0xff]  }
 0x703   :  { %v20115_v38 = vpop.f32.mrb[123].mxu1  ;;  %v21910_v5 = vld [vmem:[#allocation19 + $0x548] ss:$164 sps:$4 sm:$0xff]  }
 0x704   :  { %v10217_v15 = vadd.f32 %v20113_v34, %v10177_v11  ;;  %v21904_v11 = vld [vmem:[#allocation19 + $0x400] ss:$164 sps:$4 sm:$0xff]   ;;  %v21918_v38 = vld [vmem:[#allocation19 + $0x694] ss:$164 sps:$4 sm:$0xff]  }
 0x705   :  { %v21907_v34 = vld [vmem:[#allocation19 + $0x540] ss:$164 sps:$4 sm:$0xff]  }
 0x706   :  { %v10229_v21 = vadd.f32 %v18569_v47, %v10217_v15  ;;  %v21915_v47 = vld [vmem:[#allocation19 + $0x68c] ss:$164 sps:$4 sm:$0xff]  }
 0x707   :  { %v21913_v15 = vld [vmem:[#allocation19 + $0x688] ss:$164 sps:$4 sm:$0xff]  }
 0x708   :  { %vm10230_vm3 = vcmp.ge.f32.partialorder %v10229_v21, 0.0  ;;  %v10232_v63 = vmul.f32 %v10231_v4, %v10229_v21  ;;  %v21916_v4 = vld [vmem:[#allocation19 + $0x690] ss:$164 sps:$4 sm:$0xff]  }
 0x70a   :  { %v10233_v22 = vsel %vm10230_vm3, %v10229_v21, %v10232_v63  ;;  %v21921_v21 = vld [vmem:[#allocation19 + $0x7d4] ss:$164 sps:$4 sm:$0xff]   ;;  %v21924_v63 = vld [vmem:[#allocation19 + $0x7dc] ss:$164 sps:$4 sm:$0xff]  }
 0x70b   :  { %v24184_v52 = vpack.c.bf16 %v10233_v22, %v10233_v22  ;;  %v21919_v22 = vld [vmem:[#allocation19 + $0x7d0] ss:$164 sps:$4 sm:$0xff]  }
 0x70d   :  { %12252 = vmatmul.mubr.bf16.vlgmr.msra.gmra.mrb[124].mxu0 %v24184_v52  ;;  %12293 = vmatmul.mubr.bf16.vlgmr.msra.gmra.mrb[124].mxu1 %v24184_v52 }
 0x70e   :  { %12302 = vmatpush1.bf16.msra.mxu0 %v21835_v57  ;;  %12343 = vmatpush1.bf16.msra.mxu1 %v21838_v27  ;;  %v21922_v57 = vld [vmem:[#allocation19 + $0x7d8] ss:$164 sps:$4 sm:$0xff]  }
 0x70f   :  { %12303 = vmatprep.subr.bf16.mxu0 %v21843_v50  ;;  %12344 = vmatprep.subr.bf16.mxu1 %v21846_v25  ;;  %v21927_v27 = vld [vmem:[#allocation19 + $0x91c] ss:$164 sps:$4 sm:$0xff]   ;;  %v21930_v50 = vld [vmem:[#allocation19 + $0x924] ss:$164 sps:$4 sm:$0xff]  }
 0x710   :  { %12333 = vmatprep.mubr.bf16.mxu0 %v25468_v23  ;;  %12374 = vmatprep.mubr.bf16.mxu1 %v25468_v23  ;;  %v21925_v25 = vld [vmem:[#allocation19 + $0x918] ss:$164 sps:$4 sm:$0xff]  }
 0x712   :  { %12304 = vmatpush1.bf16.msra.mxu0 %v21841_v36  ;;  %12345 = vmatpush1.bf16.msra.mxu1 %v21844_v7  ;;  %v21928_v36 = vld [vmem:[#allocation19 + $0x920] ss:$164 sps:$4 sm:$0xff]   ;;  %v21933_v7 = vld [vmem:[#allocation19 + $0x34] ss:$164 sps:$4 sm:$0xff]  }
 0x713   :  { %12305 = vmatprep.subr.bf16.mxu0 %v21849_v8  ;;  %12346 = vmatprep.subr.bf16.mxu1 %v21852_v32  ;;  %v21936_v8 = vld [vmem:[#allocation19 + $0x3c] ss:$164 sps:$4 sm:$0xff]   ;;  %v21931_v32 = vld [vmem:[#allocation19 + $0x30] ss:$164 sps:$4 sm:$0xff]  }
 0x716   :  { %12306 = vmatpush1.bf16.msra.mxu0 %v21847_v30  ;;  %12347 = vmatpush1.bf16.msra.mxu1 %v21850_v42  ;;  %v21934_v30 = vld [vmem:[#allocation19 + $0x38] ss:$164 sps:$4 sm:$0xff]  }
 0x717   :  { %12307 = vmatprep.subr.bf16.mxu0 %v21855_v6  ;;  %12348 = vmatprep.subr.bf16.mxu1 %v21858_v20  ;;  %v21939_v42 = vld [vmem:[#allocation19 + $0x17c] ss:$164 sps:$4 sm:$0xff]   ;;  %v21942_v6 = vld [vmem:[#allocation19 + $0x184] ss:$164 sps:$4 sm:$0xff]  }
 0x718   :  { %v21937_v20 = vld [vmem:[#allocation19 + $0x178] ss:$164 sps:$4 sm:$0xff]  }
 0x71a   :  { %12308 = vmatpush1.bf16.msra.mxu0 %v21853_v53  ;;  %12349 = vmatpush1.bf16.msra.mxu1 %v21856_v17  ;;  %v21940_v53 = vld [vmem:[#allocation19 + $0x180] ss:$164 sps:$4 sm:$0xff]  }
 0x71b   :  { %12309 = vmatprep.subr.bf16.mxu0 %v21861_v0  ;;  %12350 = vmatprep.subr.bf16.mxu1 %v21864_v3  ;;  %v21945_v17 = vld [vmem:[#allocation19 + $0x2c4] ss:$164 sps:$4 sm:$0xff]   ;;  %v21948_v0 = vld [vmem:[#allocation19 + $0x2cc] ss:$164 sps:$4 sm:$0xff]  }
 0x71c   :  { %v21943_v3 = vld [vmem:[#allocation19 + $0x2c0] ss:$164 sps:$4 sm:$0xff]  }
 0x71e   :  { %12310 = vmatpush1.bf16.msra.mxu0 %v21859_v44  ;;  %12351 = vmatpush1.bf16.msra.mxu1 %v21862_v56  ;;  %v21946_v44 = vld [vmem:[#allocation19 + $0x2c8] ss:$164 sps:$4 sm:$0xff]  }
 0x71f   :  { %12311 = vmatprep.subr.bf16.mxu0 %v21867_v14  ;;  %12352 = vmatprep.subr.bf16.mxu1 %v21870_v41  ;;  %v21951_v56 = vld [vmem:[#allocation19 + $0x40c] ss:$164 sps:$4 sm:$0xff]   ;;  %v21954_v14 = vld [vmem:[#allocation19 + $0x414] ss:$164 sps:$4 sm:$0xff]  }
 0x720   :  { %v21949_v41 = vld [vmem:[#allocation19 + $0x408] ss:$164 sps:$4 sm:$0xff]  }
 0x722   :  { %12312 = vmatpush1.bf16.msra.mxu0 %v21865_v55  ;;  %12353 = vmatpush1.bf16.msra.mxu1 %v21868_v39  ;;  %v21952_v55 = vld [vmem:[#allocation19 + $0x410] ss:$164 sps:$4 sm:$0xff]  }
 0x723   :  { %12313 = vmatprep.subr.bf16.mxu0 %v21873_v49  ;;  %12354 = vmatprep.subr.bf16.mxu1 %v21876_v59  ;;  %v21957_v39 = vld [vmem:[#allocation19 + $0x554] ss:$164 sps:$4 sm:$0xff]   ;;  %v21960_v49 = vld [vmem:[#allocation19 + $0x55c] ss:$164 sps:$4 sm:$0xff]  }
 0x724   :  { %v21955_v59 = vld [vmem:[#allocation19 + $0x550] ss:$164 sps:$4 sm:$0xff]  }
 0x726   :  { %12314 = vmatpush1.bf16.msra.mxu0 %v21871_v60  ;;  %12355 = vmatpush1.bf16.msra.mxu1 %v21874_v12  ;;  %v21958_v60 = vld [vmem:[#allocation19 + $0x558] ss:$164 sps:$4 sm:$0xff]  }
 0x727   :  { %12315 = vmatprep.subr.bf16.mxu0 %v21879_v40  ;;  %12356 = vmatprep.subr.bf16.mxu1 %v21882_v28  ;;  %v21963_v12 = vld [vmem:[#allocation19 + $0x69c] ss:$164 sps:$4 sm:$0xff]   ;;  %v21966_v40 = vld [vmem:[#allocation19 + $0x6a4] ss:$164 sps:$4 sm:$0xff]  }
 0x728   :  { %v21961_v28 = vld [vmem:[#allocation19 + $0x698] ss:$164 sps:$4 sm:$0xff]  }
 0x72a   :  { %12316 = vmatpush1.bf16.msra.mxu0 %v21877_v45  ;;  %12357 = vmatpush1.bf16.msra.mxu1 %v21880_v9  ;;  %v21964_v45 = vld [vmem:[#allocation19 + $0x6a0] ss:$164 sps:$4 sm:$0xff]  }
 0x72b   :  { %12383 = vmatprep.subr.bf16.mxu0 %v21885_v18  ;;  %12424 = vmatprep.subr.bf16.mxu1 %v21888_v61  ;;  %v21969_v9 = vld [vmem:[#allocation19 + $0x7e4] ss:$164 sps:$4 sm:$0xff]   ;;  %v21972_v18 = vld [vmem:[#allocation19 + $0x7ec] ss:$164 sps:$4 sm:$0xff]  }
 0x72c   :  { %v21967_v61 = vld [vmem:[#allocation19 + $0x7e0] ss:$164 sps:$4 sm:$0xff]  }
 0x72d   :  { %12334 = vmatmul.mubr.bf16.vlgmr.msra.gmra.mrb[128].mxu0 %v24184_v52  ;;  %12375 = vmatmul.mubr.bf16.vlgmr.msra.gmra.mrb[128].mxu1 %v24184_v52 }
 0x72e   :  { %12384 = vmatpush1.bf16.msra.mxu0 %v21883_v35  ;;  %12425 = vmatpush1.bf16.msra.mxu1 %v21886_v19  ;;  %v21970_v35 = vld [vmem:[#allocation19 + $0x7e8] ss:$164 sps:$4 sm:$0xff]  }
 0x72f   :  { %12385 = vmatprep.subr.bf16.mxu0 %v21891_v10  ;;  %12426 = vmatprep.subr.bf16.mxu1 %v21894_v33  ;;  %v21975_v19 = vld [vmem:[#allocation19 + $0x92c] ss:$164 sps:$4 sm:$0xff]   ;;  %v21978_v10 = vld [vmem:[#allocation19 + $0x934] ss:$164 sps:$4 sm:$0xff]  }
 0x730   :  { %12415 = vmatprep.mubr.bf16.mxu0 %v25468_v23  ;;  %12456 = vmatprep.mubr.bf16.mxu1 %v25468_v23  ;;  %v21973_v33 = vld [vmem:[#allocation19 + $0x928] ss:$164 sps:$4 sm:$0xff]  }
 0x732   :  { %12386 = vmatpush1.bf16.msra.mxu0 %v21889_v48  ;;  %12427 = vmatpush1.bf16.msra.mxu1 %v21892_v13  ;;  %v21976_v48 = vld [vmem:[#allocation19 + $0x930] ss:$164 sps:$4 sm:$0xff]   ;;  %v21981_v13 = vld [vmem:[#allocation19 + $0x44] ss:$164 sps:$4 sm:$0xff]  }
 0x733   :  { %12387 = vmatprep.subr.bf16.mxu0 %v21897_v37  ;;  %12428 = vmatprep.subr.bf16.mxu1 %v21900_v31  ;;  %v21984_v37 = vld [vmem:[#allocation19 + $0x4c] ss:$164 sps:$4 sm:$0xff]   ;;  %v21979_v31 = vld [vmem:[#allocation19 + $0x40] ss:$164 sps:$4 sm:$0xff]  }
 0x736   :  { %12388 = vmatpush1.bf16.msra.mxu0 %v21895_v54  ;;  %12429 = vmatpush1.bf16.msra.mxu1 %v21898_v46  ;;  %v21982_v54 = vld [vmem:[#allocation19 + $0x48] ss:$164 sps:$4 sm:$0xff]  }
 0x737   :  { %12389 = vmatprep.subr.bf16.mxu0 %v21903_v24  ;;  %12430 = vmatprep.subr.bf16.mxu1 %v21906_v29  ;;  %v21987_v46 = vld [vmem:[#allocation19 + $0x18c] ss:$164 sps:$4 sm:$0xff]   ;;  %v21990_v24 = vld [vmem:[#allocation19 + $0x194] ss:$164 sps:$4 sm:$0xff]  }
 0x738   :  { %v21985_v29 = vld [vmem:[#allocation19 + $0x188] ss:$164 sps:$4 sm:$0xff]  }
 0x73a   :  { %12390 = vmatpush1.bf16.msra.mxu0 %v21901_v1  ;;  %12431 = vmatpush1.bf16.msra.mxu1 %v21904_v11  ;;  %v21988_v1 = vld [vmem:[#allocation19 + $0x190] ss:$164 sps:$4 sm:$0xff]  }
 0x73b   :  { %12391 = vmatprep.subr.bf16.mxu0 %v21909_v62  ;;  %12432 = vmatprep.subr.bf16.mxu1 %v21912_v58  ;;  %v21993_v11 = vld [vmem:[#allocation19 + $0x2d4] ss:$164 sps:$4 sm:$0xff]   ;;  %v21996_v62 = vld [vmem:[#allocation19 + $0x2dc] ss:$164 sps:$4 sm:$0xff]  }
 0x73c   :  { %v21991_v58 = vld [vmem:[#allocation19 + $0x2d0] ss:$164 sps:$4 sm:$0xff]  }
 0x73e   :  { %12392 = vmatpush1.bf16.msra.mxu0 %v21907_v34  ;;  %12433 = vmatpush1.bf16.msra.mxu1 %v21910_v5  ;;  %v21994_v34 = vld [vmem:[#allocation19 + $0x2d8] ss:$164 sps:$4 sm:$0xff]  }
 0x73f   :  { %12393 = vmatprep.subr.bf16.mxu0 %v21915_v47  ;;  %12434 = vmatprep.subr.bf16.mxu1 %v21918_v38  ;;  %v21999_v5 = vld [vmem:[#allocation19 + $0x41c] ss:$164 sps:$4 sm:$0xff]   ;;  %v22002_v47 = vld [vmem:[#allocation19 + $0x424] ss:$164 sps:$4 sm:$0xff]  }
 0x740   :  { %v21997_v38 = vld [vmem:[#allocation19 + $0x418] ss:$164 sps:$4 sm:$0xff]  }
 0x742   :  { %12394 = vmatpush1.bf16.msra.mxu0 %v21913_v15  ;;  %12435 = vmatpush1.bf16.msra.mxu1 %v21916_v4  ;;  %v22000_v15 = vld [vmem:[#allocation19 + $0x420] ss:$164 sps:$4 sm:$0xff]  }
 0x743   :  { %12395 = vmatprep.subr.bf16.mxu0 %v21921_v21  ;;  %12436 = vmatprep.subr.bf16.mxu1 %v21924_v63  ;;  %v22005_v4 = vld [vmem:[#allocation19 + $0x564] ss:$164 sps:$4 sm:$0xff]   ;;  %v22008_v21 = vld [vmem:[#allocation19 + $0x56c] ss:$164 sps:$4 sm:$0xff]  }
 0x744   :  { %v22003_v63 = vld [vmem:[#allocation19 + $0x560] ss:$164 sps:$4 sm:$0xff]  }
 0x746   :  { %12396 = vmatpush1.bf16.msra.mxu0 %v21919_v22  ;;  %12437 = vmatpush1.bf16.msra.mxu1 %v21922_v57  ;;  %v22006_v22 = vld [vmem:[#allocation19 + $0x568] ss:$164 sps:$4 sm:$0xff]  }
 0x747   :  { %12397 = vmatprep.subr.bf16.mxu0 %v21927_v27  ;;  %12438 = vmatprep.subr.bf16.mxu1 %v21930_v50  ;;  %v22011_v57 = vld [vmem:[#allocation19 + $0x6ac] ss:$164 sps:$4 sm:$0xff]   ;;  %v22014_v27 = vld [vmem:[#allocation19 + $0x6b4] ss:$164 sps:$4 sm:$0xff]  }
 0x748   :  { %v22009_v50 = vld [vmem:[#allocation19 + $0x6a8] ss:$164 sps:$4 sm:$0xff]  }
 0x74a   :  { %12398 = vmatpush1.bf16.msra.mxu0 %v21925_v25  ;;  %12439 = vmatpush1.bf16.msra.mxu1 %v21928_v36  ;;  %v22012_v25 = vld [vmem:[#allocation19 + $0x6b0] ss:$164 sps:$4 sm:$0xff]  }
 0x74b   :  { %12465 = vmatprep.subr.bf16.mxu0 %v21933_v7  ;;  %12506 = vmatprep.subr.bf16.mxu1 %v21936_v8  ;;  %v22017_v36 = vld [vmem:[#allocation19 + $0x7f4] ss:$164 sps:$4 sm:$0xff]   ;;  %v22020_v7 = vld [vmem:[#allocation19 + $0x7fc] ss:$164 sps:$4 sm:$0xff]  }
 0x74c   :  { %v22015_v8 = vld [vmem:[#allocation19 + $0x7f0] ss:$164 sps:$4 sm:$0xff]  }
 0x74d   :  { %12416 = vmatmul.mubr.bf16.vlgmr.msra.gmra.mrb[132].mxu0 %v24184_v52  ;;  %12457 = vmatmul.mubr.bf16.vlgmr.msra.gmra.mrb[132].mxu1 %v24184_v52 }
 0x74e   :  { %12466 = vmatpush1.bf16.msra.mxu0 %v21931_v32  ;;  %12507 = vmatpush1.bf16.msra.mxu1 %v21934_v30  ;;  %v22018_v32 = vld [vmem:[#allocation19 + $0x7f8] ss:$164 sps:$4 sm:$0xff]  }
 0x74f   :  { %12467 = vmatprep.subr.bf16.mxu0 %v21939_v42  ;;  %12508 = vmatprep.subr.bf16.mxu1 %v21942_v6  ;;  %v22023_v30 = vld [vmem:[#allocation19 + $0x93c] ss:$164 sps:$4 sm:$0xff]   ;;  %v22026_v42 = vld [vmem:[#allocation19 + $0x944] ss:$164 sps:$4 sm:$0xff]  }
 0x750   :  { %12497 = vmatprep.mubr.bf16.mxu0 %v25468_v23  ;;  %12538 = vmatprep.mubr.bf16.mxu1 %v25468_v23  ;;  %v22021_v6 = vld [vmem:[#allocation19 + $0x938] ss:$164 sps:$4 sm:$0xff]  }
 0x752   :  { %12468 = vmatpush1.bf16.msra.mxu0 %v21937_v20  ;;  %12509 = vmatpush1.bf16.msra.mxu1 %v21940_v53  ;;  %v22024_v20 = vld [vmem:[#allocation19 + $0x940] ss:$164 sps:$4 sm:$0xff]   ;;  %v22029_v53 = vld [vmem:[#allocation19 + $0x54] ss:$164 sps:$4 sm:$0xff]  }
 0x753   :  { %12469 = vmatprep.subr.bf16.mxu0 %v21945_v17  ;;  %12510 = vmatprep.subr.bf16.mxu1 %v21948_v0  ;;  %v22032_v17 = vld [vmem:[#allocation19 + $0x5c] ss:$164 sps:$4 sm:$0xff]   ;;  %v22027_v0 = vld [vmem:[#allocation19 + $0x50] ss:$164 sps:$4 sm:$0xff]  }
 0x756   :  { %12470 = vmatpush1.bf16.msra.mxu0 %v21943_v3  ;;  %12511 = vmatpush1.bf16.msra.mxu1 %v21946_v44  ;;  %v22030_v3 = vld [vmem:[#allocation19 + $0x58] ss:$164 sps:$4 sm:$0xff]  }
 0x757   :  { %12471 = vmatprep.subr.bf16.mxu0 %v21951_v56  ;;  %12512 = vmatprep.subr.bf16.mxu1 %v21954_v14  ;;  %v22035_v44 = vld [vmem:[#allocation19 + $0x19c] ss:$164 sps:$4 sm:$0xff]   ;;  %v22038_v56 = vld [vmem:[#allocation19 + $0x1a4] ss:$164 sps:$4 sm:$0xff]  }
 0x758   :  { %v22033_v14 = vld [vmem:[#allocation19 + $0x198] ss:$164 sps:$4 sm:$0xff]  }
 0x75a   :  { %12472 = vmatpush1.bf16.msra.mxu0 %v21949_v41  ;;  %12513 = vmatpush1.bf16.msra.mxu1 %v21952_v55  ;;  %v22036_v41 = vld [vmem:[#allocation19 + $0x1a0] ss:$164 sps:$4 sm:$0xff]  }
 0x75b   :  { %12473 = vmatprep.subr.bf16.mxu0 %v21957_v39  ;;  %12514 = vmatprep.subr.bf16.mxu1 %v21960_v49  ;;  %v22041_v55 = vld [vmem:[#allocation19 + $0x2e4] ss:$164 sps:$4 sm:$0xff]   ;;  %v22044_v39 = vld [vmem:[#allocation19 + $0x2ec] ss:$164 sps:$4 sm:$0xff]  }
 0x75c   :  { %v22039_v49 = vld [vmem:[#allocation19 + $0x2e0] ss:$164 sps:$4 sm:$0xff]  }
 0x75e   :  { %12474 = vmatpush1.bf16.msra.mxu0 %v21955_v59  ;;  %12515 = vmatpush1.bf16.msra.mxu1 %v21958_v60  ;;  %v22042_v59 = vld [vmem:[#allocation19 + $0x2e8] ss:$164 sps:$4 sm:$0xff]  }
 0x75f   :  { %12475 = vmatprep.subr.bf16.mxu0 %v21963_v12  ;;  %12516 = vmatprep.subr.bf16.mxu1 %v21966_v40  ;;  %v22047_v60 = vld [vmem:[#allocation19 + $0x42c] ss:$164 sps:$4 sm:$0xff]   ;;  %v22050_v12 = vld [vmem:[#allocation19 + $0x434] ss:$164 sps:$4 sm:$0xff]  }
 0x760   :  { %v22045_v40 = vld [vmem:[#allocation19 + $0x428] ss:$164 sps:$4 sm:$0xff]  }
 0x762   :  { %12476 = vmatpush1.bf16.msra.mxu0 %v21961_v28  ;;  %12517 = vmatpush1.bf16.msra.mxu1 %v21964_v45  ;;  %v22048_v28 = vld [vmem:[#allocation19 + $0x430] ss:$164 sps:$4 sm:$0xff]  }
 0x763   :  { %12477 = vmatprep.subr.bf16.mxu0 %v21969_v9  ;;  %12518 = vmatprep.subr.bf16.mxu1 %v21972_v18  ;;  %v22053_v45 = vld [vmem:[#allocation19 + $0x574] ss:$164 sps:$4 sm:$0xff]   ;;  %v22056_v9 = vld [vmem:[#allocation19 + $0x57c] ss:$164 sps:$4 sm:$0xff]  }
 0x764   :  { %v22051_v18 = vld [vmem:[#allocation19 + $0x570] ss:$164 sps:$4 sm:$0xff]  }
 0x766   :  { %12478 = vmatpush1.bf16.msra.mxu0 %v21967_v61  ;;  %12519 = vmatpush1.bf16.msra.mxu1 %v21970_v35  ;;  %v22054_v61 = vld [vmem:[#allocation19 + $0x578] ss:$164 sps:$4 sm:$0xff]  }
 0x767   :  { %12479 = vmatprep.subr.bf16.mxu0 %v21975_v19  ;;  %12520 = vmatprep.subr.bf16.mxu1 %v21978_v10  ;;  %v22059_v35 = vld [vmem:[#allocation19 + $0x6bc] ss:$164 sps:$4 sm:$0xff]   ;;  %v22062_v19 = vld [vmem:[#allocation19 + $0x6c4] ss:$164 sps:$4 sm:$0xff]  }
 0x768   :  { %v22057_v10 = vld [vmem:[#allocation19 + $0x6b8] ss:$164 sps:$4 sm:$0xff]  }
 0x76a   :  { %12480 = vmatpush1.bf16.msra.mxu0 %v21973_v33  ;;  %12521 = vmatpush1.bf16.msra.mxu1 %v21976_v48  ;;  %v22060_v33 = vld [vmem:[#allocation19 + $0x6c0] ss:$164 sps:$4 sm:$0xff]  }
 0x76b   :  { %12547 = vmatprep.subr.bf16.mxu0 %v21981_v13  ;;  %12588 = vmatprep.subr.bf16.mxu1 %v21984_v37  ;;  %v22065_v48 = vld [vmem:[#allocation19 + $0x804] ss:$164 sps:$4 sm:$0xff]   ;;  %v22068_v13 = vld [vmem:[#allocation19 + $0x80c] ss:$164 sps:$4 sm:$0xff]  }
 0x76c   :  { %v22063_v37 = vld [vmem:[#allocation19 + $0x800] ss:$164 sps:$4 sm:$0xff]  }
 0x76d   :  { %12498 = vmatmul.mubr.bf16.vlgmr.msra.gmra.mrb[136].mxu0 %v24184_v52  ;;  %12539 = vmatmul.mubr.bf16.vlgmr.msra.gmra.mrb[136].mxu1 %v24184_v52 }
 0x76e   :  { %12548 = vmatpush1.bf16.msra.mxu0 %v21979_v31  ;;  %12589 = vmatpush1.bf16.msra.mxu1 %v21982_v54  ;;  %v22066_v31 = vld [vmem:[#allocation19 + $0x808] ss:$164 sps:$4 sm:$0xff]  }
 0x76f   :  { %12549 = vmatprep.subr.bf16.mxu0 %v21987_v46  ;;  %12590 = vmatprep.subr.bf16.mxu1 %v21990_v24  ;;  %v22071_v54 = vld [vmem:[#allocation19 + $0x94c] ss:$164 sps:$4 sm:$0xff]   ;;  %v22074_v46 = vld [vmem:[#allocation19 + $0x954] ss:$164 sps:$4 sm:$0xff]  }
 0x770   :  { %12579 = vmatprep.mubr.bf16.mxu0 %v25468_v23  ;;  %12620 = vmatprep.mubr.bf16.mxu1 %v25468_v23  ;;  %v22069_v24 = vld [vmem:[#allocation19 + $0x948] ss:$164 sps:$4 sm:$0xff]  }
 0x772   :  { %12550 = vmatpush1.bf16.msra.mxu0 %v21985_v29  ;;  %12591 = vmatpush1.bf16.msra.mxu1 %v21988_v1  ;;  %v22072_v29 = vld [vmem:[#allocation19 + $0x950] ss:$164 sps:$4 sm:$0xff]   ;;  %v22077_v1 = vld [vmem:[#allocation19 + $0x64] ss:$164 sps:$4 sm:$0xff]  }
 0x773   :  { %12551 = vmatprep.subr.bf16.mxu0 %v21993_v11  ;;  %12592 = vmatprep.subr.bf16.mxu1 %v21996_v62  ;;  %v22080_v11 = vld [vmem:[#allocation19 + $0x6c] ss:$164 sps:$4 sm:$0xff]   ;;  %v22075_v62 = vld [vmem:[#allocation19 + $0x60] ss:$164 sps:$4 sm:$0xff]  }
 0x776   :  { %12552 = vmatpush1.bf16.msra.mxu0 %v21991_v58  ;;  %12593 = vmatpush1.bf16.msra.mxu1 %v21994_v34  ;;  %v22078_v58 = vld [vmem:[#allocation19 + $0x68] ss:$164 sps:$4 sm:$0xff]  }
 0x777   :  { %12553 = vmatprep.subr.bf16.mxu0 %v21999_v5  ;;  %12594 = vmatprep.subr.bf16.mxu1 %v22002_v47  ;;  %v22083_v34 = vld [vmem:[#allocation19 + $0x1ac] ss:$164 sps:$4 sm:$0xff]   ;;  %v22086_v5 = vld [vmem:[#allocation19 + $0x1b4] ss:$164 sps:$4 sm:$0xff]  }
 0x778   :  { %v22081_v47 = vld [vmem:[#allocation19 + $0x1a8] ss:$164 sps:$4 sm:$0xff]  }
 0x77a   :  { %12554 = vmatpush1.bf16.msra.mxu0 %v21997_v38  ;;  %12595 = vmatpush1.bf16.msra.mxu1 %v22000_v15  ;;  %v22084_v38 = vld [vmem:[#allocation19 + $0x1b0] ss:$164 sps:$4 sm:$0xff]  }
 0x77b   :  { %12555 = vmatprep.subr.bf16.mxu0 %v22005_v4  ;;  %12596 = vmatprep.subr.bf16.mxu1 %v22008_v21  ;;  %v22089_v15 = vld [vmem:[#allocation19 + $0x2f4] ss:$164 sps:$4 sm:$0xff]   ;;  %v22092_v4 = vld [vmem:[#allocation19 + $0x2fc] ss:$164 sps:$4 sm:$0xff]  }
 0x77c   :  { %v22087_v21 = vld [vmem:[#allocation19 + $0x2f0] ss:$164 sps:$4 sm:$0xff]  }
 0x77e   :  { %12556 = vmatpush1.bf16.msra.mxu0 %v22003_v63  ;;  %12597 = vmatpush1.bf16.msra.mxu1 %v22006_v22  ;;  %v22090_v63 = vld [vmem:[#allocation19 + $0x2f8] ss:$164 sps:$4 sm:$0xff]  }
 0x77f   :  { %12557 = vmatprep.subr.bf16.mxu0 %v22011_v57  ;;  %12598 = vmatprep.subr.bf16.mxu1 %v22014_v27  ;;  %v22095_v22 = vld [vmem:[#allocation19 + $0x43c] ss:$164 sps:$4 sm:$0xff]   ;;  %v22098_v57 = vld [vmem:[#allocation19 + $0x444] ss:$164 sps:$4 sm:$0xff]  }
 0x780   :  { %v22093_v27 = vld [vmem:[#allocation19 + $0x438] ss:$164 sps:$4 sm:$0xff]  }
 0x782   :  { %12558 = vmatpush1.bf16.msra.mxu0 %v22009_v50  ;;  %12599 = vmatpush1.bf16.msra.mxu1 %v22012_v25  ;;  %v22096_v50 = vld [vmem:[#allocation19 + $0x440] ss:$164 sps:$4 sm:$0xff]  }
 0x783   :  { %12559 = vmatprep.subr.bf16.mxu0 %v22017_v36  ;;  %12600 = vmatprep.subr.bf16.mxu1 %v22020_v7  ;;  %v22101_v25 = vld [vmem:[#allocation19 + $0x584] ss:$164 sps:$4 sm:$0xff]   ;;  %v22104_v36 = vld [vmem:[#allocation19 + $0x58c] ss:$164 sps:$4 sm:$0xff]  }
 0x784   :  { %v22099_v7 = vld [vmem:[#allocation19 + $0x580] ss:$164 sps:$4 sm:$0xff]  }
 0x786   :  { %12560 = vmatpush1.bf16.msra.mxu0 %v22015_v8  ;;  %12601 = vmatpush1.bf16.msra.mxu1 %v22018_v32  ;;  %v22102_v8 = vld [vmem:[#allocation19 + $0x588] ss:$164 sps:$4 sm:$0xff]  }
 0x787   :  { %12561 = vmatprep.subr.bf16.mxu0 %v22023_v30  ;;  %12602 = vmatprep.subr.bf16.mxu1 %v22026_v42  ;;  %v22107_v32 = vld [vmem:[#allocation19 + $0x6cc] ss:$164 sps:$4 sm:$0xff]   ;;  %v22110_v30 = vld [vmem:[#allocation19 + $0x6d4] ss:$164 sps:$4 sm:$0xff]  }
 0x788   :  { %v22105_v42 = vld [vmem:[#allocation19 + $0x6c8] ss:$164 sps:$4 sm:$0xff]  }
 0x78a   :  { %12562 = vmatpush1.bf16.msra.mxu0 %v22021_v6  ;;  %12603 = vmatpush1.bf16.msra.mxu1 %v22024_v20  ;;  %v22108_v6 = vld [vmem:[#allocation19 + $0x6d0] ss:$164 sps:$4 sm:$0xff]  }
 0x78b   :  { %12629 = vmatprep.subr.bf16.mxu0 %v22029_v53  ;;  %12670 = vmatprep.subr.bf16.mxu1 %v22032_v17  ;;  %v22113_v20 = vld [vmem:[#allocation19 + $0x814] ss:$164 sps:$4 sm:$0xff]   ;;  %v22116_v53 = vld [vmem:[#allocation19 + $0x81c] ss:$164 sps:$4 sm:$0xff]  }
 0x78c   :  { %v22111_v17 = vld [vmem:[#allocation19 + $0x810] ss:$164 sps:$4 sm:$0xff]  }
 0x78d   :  { %12580 = vmatmul.mubr.bf16.vlgmr.msra.gmra.mrb[140].mxu0 %v24184_v52  ;;  %12621 = vmatmul.mubr.bf16.vlgmr.msra.gmra.mrb[140].mxu1 %v24184_v52 }
 0x78e   :  { %12630 = vmatpush1.bf16.msra.mxu0 %v22027_v0  ;;  %12671 = vmatpush1.bf16.msra.mxu1 %v22030_v3  ;;  %v22114_v0 = vld [vmem:[#allocation19 + $0x818] ss:$164 sps:$4 sm:$0xff]  }
 0x78f   :  { %12631 = vmatprep.subr.bf16.mxu0 %v22035_v44  ;;  %12672 = vmatprep.subr.bf16.mxu1 %v22038_v56  ;;  %v22119_v3 = vld [vmem:[#allocation19 + $0x95c] ss:$164 sps:$4 sm:$0xff]   ;;  %v22122_v44 = vld [vmem:[#allocation19 + $0x964] ss:$164 sps:$4 sm:$0xff]  }
 0x790   :  { %12661 = vmatprep.mubr.bf16.mxu0 %v25468_v23  ;;  %12702 = vmatprep.mubr.bf16.mxu1 %v25468_v23  ;;  %v22117_v56 = vld [vmem:[#allocation19 + $0x958] ss:$164 sps:$4 sm:$0xff]  }
 0x792   :  { %12632 = vmatpush1.bf16.msra.mxu0 %v22033_v14  ;;  %12673 = vmatpush1.bf16.msra.mxu1 %v22036_v41  ;;  %v22120_v14 = vld [vmem:[#allocation19 + $0x960] ss:$164 sps:$4 sm:$0xff]   ;;  %v22125_v41 = vld [vmem:[#allocation19 + $0x74] ss:$164 sps:$4 sm:$0xff]  }
 0x793   :  { %12633 = vmatprep.subr.bf16.mxu0 %v22041_v55  ;;  %12674 = vmatprep.subr.bf16.mxu1 %v22044_v39  ;;  %v22128_v55 = vld [vmem:[#allocation19 + $0x7c] ss:$164 sps:$4 sm:$0xff]   ;;  %v22123_v39 = vld [vmem:[#allocation19 + $0x70] ss:$164 sps:$4 sm:$0xff]  }
 0x796   :  { %12634 = vmatpush1.bf16.msra.mxu0 %v22039_v49  ;;  %12675 = vmatpush1.bf16.msra.mxu1 %v22042_v59  ;;  %v22126_v49 = vld [vmem:[#allocation19 + $0x78] ss:$164 sps:$4 sm:$0xff]  }
 0x797   :  { %12635 = vmatprep.subr.bf16.mxu0 %v22047_v60  ;;  %12676 = vmatprep.subr.bf16.mxu1 %v22050_v12  ;;  %v22131_v59 = vld [vmem:[#allocation19 + $0x1bc] ss:$164 sps:$4 sm:$0xff]   ;;  %v22134_v60 = vld [vmem:[#allocation19 + $0x1c4] ss:$164 sps:$4 sm:$0xff]  }
 0x798   :  { %v22129_v12 = vld [vmem:[#allocation19 + $0x1b8] ss:$164 sps:$4 sm:$0xff]  }
 0x79a   :  { %12636 = vmatpush1.bf16.msra.mxu0 %v22045_v40  ;;  %12677 = vmatpush1.bf16.msra.mxu1 %v22048_v28  ;;  %v22132_v40 = vld [vmem:[#allocation19 + $0x1c0] ss:$164 sps:$4 sm:$0xff]  }
 0x79b   :  { %12637 = vmatprep.subr.bf16.mxu0 %v22053_v45  ;;  %12678 = vmatprep.subr.bf16.mxu1 %v22056_v9  ;;  %v22137_v28 = vld [vmem:[#allocation19 + $0x304] ss:$164 sps:$4 sm:$0xff]   ;;  %v22140_v45 = vld [vmem:[#allocation19 + $0x30c] ss:$164 sps:$4 sm:$0xff]  }
 0x79c   :  { %v22135_v9 = vld [vmem:[#allocation19 + $0x300] ss:$164 sps:$4 sm:$0xff]  }
 0x79e   :  { %12638 = vmatpush1.bf16.msra.mxu0 %v22051_v18  ;;  %12679 = vmatpush1.bf16.msra.mxu1 %v22054_v61  ;;  %v22138_v18 = vld [vmem:[#allocation19 + $0x308] ss:$164 sps:$4 sm:$0xff]  }
 0x79f   :  { %12639 = vmatprep.subr.bf16.mxu0 %v22059_v35  ;;  %12680 = vmatprep.subr.bf16.mxu1 %v22062_v19  ;;  %v22143_v61 = vld [vmem:[#allocation19 + $0x44c] ss:$164 sps:$4 sm:$0xff]   ;;  %v22146_v35 = vld [vmem:[#allocation19 + $0x454] ss:$164 sps:$4 sm:$0xff]  }
 0x7a0   :  { %v22141_v19 = vld [vmem:[#allocation19 + $0x448] ss:$164 sps:$4 sm:$0xff]  }
 0x7a2   :  { %12640 = vmatpush1.bf16.msra.mxu0 %v22057_v10  ;;  %12681 = vmatpush1.bf16.msra.mxu1 %v22060_v33  ;;  %v22144_v10 = vld [vmem:[#allocation19 + $0x450] ss:$164 sps:$4 sm:$0xff]  }
 0x7a3   :  { %12641 = vmatprep.subr.bf16.mxu0 %v22065_v48  ;;  %12682 = vmatprep.subr.bf16.mxu1 %v22068_v13  ;;  %v22149_v33 = vld [vmem:[#allocation19 + $0x594] ss:$164 sps:$4 sm:$0xff]   ;;  %v22152_v48 = vld [vmem:[#allocation19 + $0x59c] ss:$164 sps:$4 sm:$0xff]  }
 0x7a4   :  { %v22147_v13 = vld [vmem:[#allocation19 + $0x590] ss:$164 sps:$4 sm:$0xff]  }
 0x7a6   :  { %12642 = vmatpush1.bf16.msra.mxu0 %v22063_v37  ;;  %12683 = vmatpush1.bf16.msra.mxu1 %v22066_v31  ;;  %v22150_v37 = vld [vmem:[#allocation19 + $0x598] ss:$164 sps:$4 sm:$0xff]  }
 0x7a7   :  { %12643 = vmatprep.subr.bf16.mxu0 %v22071_v54  ;;  %12684 = vmatprep.subr.bf16.mxu1 %v22074_v46  ;;  %v22155_v31 = vld [vmem:[#allocation19 + $0x6dc] ss:$164 sps:$4 sm:$0xff]   ;;  %v22158_v54 = vld [vmem:[#allocation19 + $0x6e4] ss:$164 sps:$4 sm:$0xff]  }
 0x7a8   :  { %v22153_v46 = vld [vmem:[#allocation19 + $0x6d8] ss:$164 sps:$4 sm:$0xff]  }
 0x7aa   :  { %12644 = vmatpush1.bf16.msra.mxu0 %v22069_v24  ;;  %12685 = vmatpush1.bf16.msra.mxu1 %v22072_v29  ;;  %v22156_v24 = vld [vmem:[#allocation19 + $0x6e0] ss:$164 sps:$4 sm:$0xff]  }
 0x7ab   :  { %12711 = vmatprep.subr.bf16.mxu0 %v22077_v1  ;;  %12752 = vmatprep.subr.bf16.mxu1 %v22080_v11  ;;  %v22161_v29 = vld [vmem:[#allocation19 + $0x824] ss:$164 sps:$4 sm:$0xff]   ;;  %v22164_v1 = vld [vmem:[#allocation19 + $0x82c] ss:$164 sps:$4 sm:$0xff]  }
 0x7ad   :  { %12662 = vmatmul.mubr.bf16.vlgmr.msra.gmra.mrb[144].mxu0 %v24184_v52  ;;  %12703 = vmatmul.mubr.bf16.vlgmr.msra.gmra.mrb[144].mxu1 %v24184_v52 }
 0x7ae   :  { %12712 = vmatpush1.bf16.msra.mxu0 %v22075_v62  ;;  %12753 = vmatpush1.bf16.msra.mxu1 %v22078_v58 }
 0x7af   :  { %12713 = vmatprep.subr.bf16.mxu0 %v22083_v34  ;;  %12754 = vmatprep.subr.bf16.mxu1 %v22086_v5 }
 0x7b0   :  { %12743 = vmatprep.mubr.bf16.mxu0 %v25468_v23  ;;  %12784 = vmatprep.mubr.bf16.mxu1 %v25468_v23 }
 0x7b2   :  { %12714 = vmatpush1.bf16.msra.mxu0 %v22081_v47  ;;  %12755 = vmatpush1.bf16.msra.mxu1 %v22084_v38  ;;  %v22159_v38 = vld [vmem:[#allocation19 + $0x820] ss:$164 sps:$4 sm:$0xff]  }
 0x7b3   :  { %12715 = vmatprep.subr.bf16.mxu0 %v22089_v15  ;;  %12756 = vmatprep.subr.bf16.mxu1 %v22092_v4  ;;  %v22162_v15 = vld [vmem:[#allocation19 + $0x828] ss:$164 sps:$4 sm:$0xff]  }
 0x7b6   :  { %12716 = vmatpush1.bf16.msra.mxu0 %v22087_v21  ;;  %12757 = vmatpush1.bf16.msra.mxu1 %v22090_v63  ;;  %v22167_v63 = vld [vmem:[#allocation19 + $0x96c] ss:$164 sps:$4 sm:$0xff]  }
 0x7b7   :  { %12717 = vmatprep.subr.bf16.mxu0 %v22095_v22  ;;  %12758 = vmatprep.subr.bf16.mxu1 %v22098_v57  ;;  %v22170_v22 = vld [vmem:[#allocation19 + $0x974] ss:$164 sps:$4 sm:$0xff]   ;;  %v22165_v57 = vld [vmem:[#allocation19 + $0x968] ss:$164 sps:$4 sm:$0xff]  }
 0x7ba   :  { %12718 = vmatpush1.bf16.msra.mxu0 %v22093_v27  ;;  %12759 = vmatpush1.bf16.msra.mxu1 %v22096_v50  ;;  %v22168_v27 = vld [vmem:[#allocation19 + $0x970] ss:$164 sps:$4 sm:$0xff]   ;;  %v22173_v50 = vld [vmem:[#allocation19 + $0x84] ss:$164 sps:$4 sm:$0xff]  }
 0x7bb   :  { %12719 = vmatprep.subr.bf16.mxu0 %v22101_v25  ;;  %12760 = vmatprep.subr.bf16.mxu1 %v22104_v36  ;;  %v22176_v25 = vld [vmem:[#allocation19 + $0x8c] ss:$164 sps:$4 sm:$0xff]   ;;  %v22171_v36 = vld [vmem:[#allocation19 + $0x80] ss:$164 sps:$4 sm:$0xff]  }
 0x7be   :  { %12720 = vmatpush1.bf16.msra.mxu0 %v22099_v7  ;;  %12761 = vmatpush1.bf16.msra.mxu1 %v22102_v8  ;;  %v22174_v7 = vld [vmem:[#allocation19 + $0x88] ss:$164 sps:$4 sm:$0xff]  }
 0x7bf   :  { %12721 = vmatprep.subr.bf16.mxu0 %v22107_v32  ;;  %12762 = vmatprep.subr.bf16.mxu1 %v22110_v30  ;;  %v22179_v8 = vld [vmem:[#allocation19 + $0x1cc] ss:$164 sps:$4 sm:$0xff]   ;;  %v22182_v32 = vld [vmem:[#allocation19 + $0x1d4] ss:$164 sps:$4 sm:$0xff]  }
 0x7c0   :  { %v22177_v30 = vld [vmem:[#allocation19 + $0x1c8] ss:$164 sps:$4 sm:$0xff]  }
 0x7c2   :  { %12722 = vmatpush1.bf16.msra.mxu0 %v22105_v42  ;;  %12763 = vmatpush1.bf16.msra.mxu1 %v22108_v6  ;;  %v22180_v42 = vld [vmem:[#allocation19 + $0x1d0] ss:$164 sps:$4 sm:$0xff]  }
 0x7c3   :  { %12723 = vmatprep.subr.bf16.mxu0 %v22113_v20  ;;  %12764 = vmatprep.subr.bf16.mxu1 %v22116_v53  ;;  %v22185_v6 = vld [vmem:[#allocation19 + $0x314] ss:$164 sps:$4 sm:$0xff]   ;;  %v22188_v20 = vld [vmem:[#allocation19 + $0x31c] ss:$164 sps:$4 sm:$0xff]  }
 0x7c4   :  { %v22183_v53 = vld [vmem:[#allocation19 + $0x310] ss:$164 sps:$4 sm:$0xff]  }
 0x7c6   :  { %12724 = vmatpush1.bf16.msra.mxu0 %v22111_v17  ;;  %12765 = vmatpush1.bf16.msra.mxu1 %v22114_v0  ;;  %v22186_v17 = vld [vmem:[#allocation19 + $0x318] ss:$164 sps:$4 sm:$0xff]  }
 0x7c7   :  { %12725 = vmatprep.subr.bf16.mxu0 %v22119_v3  ;;  %12766 = vmatprep.subr.bf16.mxu1 %v22122_v44  ;;  %v22191_v0 = vld [vmem:[#allocation19 + $0x45c] ss:$164 sps:$4 sm:$0xff]   ;;  %v22194_v3 = vld [vmem:[#allocation19 + $0x464] ss:$164 sps:$4 sm:$0xff]  }
 0x7c8   :  { %v22189_v44 = vld [vmem:[#allocation19 + $0x458] ss:$164 sps:$4 sm:$0xff]  }
 0x7ca   :  { %12726 = vmatpush1.bf16.msra.mxu0 %v22117_v56  ;;  %12767 = vmatpush1.bf16.msra.mxu1 %v22120_v14  ;;  %v22192_v56 = vld [vmem:[#allocation19 + $0x460] ss:$164 sps:$4 sm:$0xff]  }
 0x7cb   :  { %12793 = vmatprep.subr.bf16.mxu0 %v22125_v41  ;;  %12834 = vmatprep.subr.bf16.mxu1 %v22128_v55  ;;  %v22197_v14 = vld [vmem:[#allocation19 + $0x5a4] ss:$164 sps:$4 sm:$0xff]   ;;  %v22200_v41 = vld [vmem:[#allocation19 + $0x5ac] ss:$164 sps:$4 sm:$0xff]  }
 0x7cc   :  { %v22195_v55 = vld [vmem:[#allocation19 + $0x5a0] ss:$164 sps:$4 sm:$0xff]  }
 0x7cd   :  { %12744 = vmatmul.mubr.bf16.vlgmr.msra.gmra.mrb[148].mxu0 %v24184_v52  ;;  %12785 = vmatmul.mubr.bf16.vlgmr.msra.gmra.mrb[148].mxu1 %v24184_v52 }
 0x7ce   :  { %12794 = vmatpush1.bf16.msra.mxu0 %v22123_v39  ;;  %12835 = vmatpush1.bf16.msra.mxu1 %v22126_v49  ;;  %v22198_v39 = vld [vmem:[#allocation19 + $0x5a8] ss:$164 sps:$4 sm:$0xff]  }
 0x7cf   :  { %12795 = vmatprep.subr.bf16.mxu0 %v22131_v59  ;;  %12836 = vmatprep.subr.bf16.mxu1 %v22134_v60  ;;  %v22203_v49 = vld [vmem:[#allocation19 + $0x6ec] ss:$164 sps:$4 sm:$0xff]   ;;  %v22206_v59 = vld [vmem:[#allocation19 + $0x6f4] ss:$164 sps:$4 sm:$0xff]   ;;  %v24226_v60 = vld [vmem:[#allocation21] sm:$0xff] }
 0x7d0   :  { %12825 = vmatprep.mubr.bf16.mxu0 %v25468_v23  ;;  %12866 = vmatprep.mubr.bf16.mxu1 %v25468_v23 }
 0x7d2   :  { %12796 = vmatpush1.bf16.msra.mxu0 %v22129_v12  ;;  %12837 = vmatpush1.bf16.msra.mxu1 %v22132_v40  ;;  %v25470_v12 = vld [vmem:[#allocation41_spill] sm:$0xff] }
 0x7d3   :  { %12797 = vmatprep.subr.bf16.mxu0 %v22137_v28  ;;  %12838 = vmatprep.subr.bf16.mxu1 %v22140_v45  ;;  %v13116_v40 = vrot.slane %v24226_v60, %v25470_v12  ;;  %v25471_v28 = vld [vmem:[#allocation42_spill] sm:$0xff] }
 0x7d4   :  { %v13120_v45 = vrot.slane %v24226_v60, %v25471_v28 }
 0x7d6   :  { %12798 = vmatpush1.bf16.msra.mxu0 %v22135_v9  ;;  %12839 = vmatpush1.bf16.msra.mxu1 %v22138_v18  ;;  %v22201_v9 = vld [vmem:[#allocation19 + $0x6e8] ss:$164 sps:$4 sm:$0xff]   ;;  %v22204_v18 = vld [vmem:[#allocation19 + $0x6f0] ss:$164 sps:$4 sm:$0xff]  }
 0x7d7   :  { %12799 = vmatprep.subr.bf16.mxu0 %v22143_v61  ;;  %12840 = vmatprep.subr.bf16.mxu1 %v22146_v35  ;;  %v22209_v61 = vld [vmem:[#allocation19 + $0x834] ss:$164 sps:$4 sm:$0xff]   ;;  %v22212_v35 = vld [vmem:[#allocation19 + $0x83c] ss:$164 sps:$4 sm:$0xff]  }
 0x7da   :  { %12800 = vmatpush1.bf16.msra.mxu0 %v22141_v19  ;;  %12841 = vmatpush1.bf16.msra.mxu1 %v22144_v10 }
 0x7db   :  { %12801 = vmatprep.subr.bf16.mxu0 %v22149_v33  ;;  %12842 = vmatprep.subr.bf16.mxu1 %v22152_v48 }
 0x7de   :  { %12802 = vmatpush1.bf16.msra.mxu0 %v22147_v13  ;;  %12843 = vmatpush1.bf16.msra.mxu1 %v22150_v37 }
 0x7df   :  { %12803 = vmatprep.subr.bf16.mxu0 %v22155_v31  ;;  %12844 = vmatprep.subr.bf16.mxu1 %v22158_v54 }
 0x7e0   :  { %v24214_v11 = vpop.f32.mrb[124].mxu0  ;;  %v24216_v62 = vpop.f32.mrb[124].mxu1 }
 0x7e1   :  { %v24218_v58 = vpop.f32.mrb[125].mxu0  ;;  %v24220_v34 = vpop.f32.mrb[125].mxu1 }
 0x7e2   :  { %12804 = vmatpush1.bf16.msra.mxu0 %v22153_v46  ;;  %12845 = vmatpush1.bf16.msra.mxu1 %v22156_v24  ;;  %v12257_v5 = vpop.f32.mrb[126].mxu0  ;;  %v12298_v47 = vpop.f32.mrb[126].mxu1  ;;  %v22207_v46 = vld [vmem:[#allocation19 + $0x830] ss:$164 sps:$4 sm:$0xff]   ;;  %v22210_v24 = vld [vmem:[#allocation19 + $0x838] ss:$164 sps:$4 sm:$0xff]  }
 0x7e3   :  { %v12258_v4 = vpop.f32.mrb[127].mxu0  ;;  %v12299_v21 = vpop.f32.mrb[127].mxu1  ;;  %12805 = vmatprep.subr.bf16.mxu0 %v22161_v29  ;;  %12846 = vmatprep.subr.bf16.mxu1 %v22164_v1  ;;  %v22215_v5 = vld [vmem:[#allocation19 + $0x97c] ss:$164 sps:$4 sm:$0xff]   ;;  %v22218_v47 = vld [vmem:[#allocation19 + $0x984] ss:$164 sps:$4 sm:$0xff]  }
 0x7e4   :  { %v22221_v4 = vld [vmem:[#allocation19 + $0x94] ss:$164 sps:$4 sm:$0xff]   ;;  %v22224_v21 = vld [vmem:[#allocation19 + $0x9c] ss:$164 sps:$4 sm:$0xff]  }
 0x7e6   :  { %12806 = vmatpush1.bf16.msra.mxu0 %v22159_v38  ;;  %12847 = vmatpush1.bf16.msra.mxu1 %v22162_v15  ;;  %v22213_v38 = vld [vmem:[#allocation19 + $0x978] ss:$164 sps:$4 sm:$0xff]   ;;  %v22216_v15 = vld [vmem:[#allocation19 + $0x980] ss:$164 sps:$4 sm:$0xff]  }
 0x7e7   :  { %12807 = vmatprep.subr.bf16.mxu0 %v22167_v63  ;;  %12848 = vmatprep.subr.bf16.mxu1 %v22170_v22  ;;  %v22219_v63 = vld [vmem:[#allocation19 + $0x90] ss:$164 sps:$4 sm:$0xff]   ;;  %v22222_v22 = vld [vmem:[#allocation19 + $0x98] ss:$164 sps:$4 sm:$0xff]  }
 0x7ea   :  { %12808 = vmatpush1.bf16.msra.mxu0 %v22165_v57  ;;  %12849 = vmatpush1.bf16.msra.mxu1 %v22168_v27  ;;  %v22227_v57 = vld [vmem:[#allocation19 + $0x1dc] ss:$164 sps:$4 sm:$0xff]   ;;  %v22230_v27 = vld [vmem:[#allocation19 + $0x1e4] ss:$164 sps:$4 sm:$0xff]  }
 0x7eb   :  { %12875 = vmatprep.subr.bf16.mxu0 %v22173_v50  ;;  %12916 = vmatprep.subr.bf16.mxu1 %v22176_v25  ;;  %v22225_v50 = vld [vmem:[#allocation19 + $0x1d8] ss:$164 sps:$4 sm:$0xff]   ;;  %v22228_v25 = vld [vmem:[#allocation19 + $0x1e0] ss:$164 sps:$4 sm:$0xff]  }
 0x7ed   :  { %12826 = vmatmul.mubr.bf16.vlgmr.msra.gmra.mrb[152].mxu0 %v24184_v52  ;;  %12867 = vmatmul.mubr.bf16.vlgmr.msra.gmra.mrb[152].mxu1 %v24184_v52 }
 0x7ee   :  { %12876 = vmatpush1.bf16.msra.mxu0 %v22171_v36  ;;  %12917 = vmatpush1.bf16.msra.mxu1 %v22174_v7  ;;  %v22233_v36 = vld [vmem:[#allocation19 + $0x324] ss:$164 sps:$4 sm:$0xff]   ;;  %v22236_v7 = vld [vmem:[#allocation19 + $0x32c] ss:$164 sps:$4 sm:$0xff]  }
 0x7ef   :  { %12877 = vmatprep.subr.bf16.mxu0 %v22179_v8  ;;  %12918 = vmatprep.subr.bf16.mxu1 %v22182_v32  ;;  %v22231_v8 = vld [vmem:[#allocation19 + $0x320] ss:$164 sps:$4 sm:$0xff]   ;;  %v22234_v32 = vld [vmem:[#allocation19 + $0x328] ss:$164 sps:$4 sm:$0xff]  }
 0x7f0   :  { %12907 = vmatprep.mubr.bf16.mxu0 %v25468_v23  ;;  %12948 = vmatprep.mubr.bf16.mxu1 %v25468_v23 }
 0x7f2   :  { %12878 = vmatpush1.bf16.msra.mxu0 %v22177_v30  ;;  %12919 = vmatpush1.bf16.msra.mxu1 %v22180_v42  ;;  %v22239_v30 = vld [vmem:[#allocation19 + $0x46c] ss:$164 sps:$4 sm:$0xff]   ;;  %v22242_v42 = vld [vmem:[#allocation19 + $0x474] ss:$164 sps:$4 sm:$0xff]  }
 0x7f3   :  { %12879 = vmatprep.subr.bf16.mxu0 %v22185_v6  ;;  %12920 = vmatprep.subr.bf16.mxu1 %v22188_v20  ;;  %v22237_v6 = vld [vmem:[#allocation19 + $0x468] ss:$164 sps:$4 sm:$0xff]   ;;  %v22240_v20 = vld [vmem:[#allocation19 + $0x470] ss:$164 sps:$4 sm:$0xff]  }
 0x7f6   :  { %12880 = vmatpush1.bf16.msra.mxu0 %v22183_v53  ;;  %12921 = vmatpush1.bf16.msra.mxu1 %v22186_v17  ;;  %v22245_v53 = vld [vmem:[#allocation19 + $0x5b4] ss:$164 sps:$4 sm:$0xff]   ;;  %v22248_v17 = vld [vmem:[#allocation19 + $0x5bc] ss:$164 sps:$4 sm:$0xff]  }
 0x7f7   :  { %12881 = vmatprep.subr.bf16.mxu0 %v22191_v0  ;;  %12922 = vmatprep.subr.bf16.mxu1 %v22194_v3  ;;  %v22243_v0 = vld [vmem:[#allocation19 + $0x5b0] ss:$164 sps:$4 sm:$0xff]   ;;  %v22251_v3 = vld [vmem:[#allocation19 + $0x6fc] ss:$164 sps:$4 sm:$0xff]  }
 0x7fa   :  { %12882 = vmatpush1.bf16.msra.mxu0 %v22189_v44  ;;  %12923 = vmatpush1.bf16.msra.mxu1 %v22192_v56  ;;  %v22254_v44 = vld [vmem:[#allocation19 + $0x704] ss:$164 sps:$4 sm:$0xff]   ;;  %v22249_v56 = vld [vmem:[#allocation19 + $0x6f8] ss:$164 sps:$4 sm:$0xff]  }
 0x7fb   :  { %12883 = vmatprep.subr.bf16.mxu0 %v22197_v14  ;;  %12924 = vmatprep.subr.bf16.mxu1 %v22200_v41  ;;  %v22252_v14 = vld [vmem:[#allocation19 + $0x700] ss:$164 sps:$4 sm:$0xff]  }
 0x7fc   :  { %v22257_v41 = vld [vmem:[#allocation19 + $0x844] ss:$164 sps:$4 sm:$0xff]  }
 0x7fe   :  { %12884 = vmatpush1.bf16.msra.mxu0 %v22195_v55  ;;  %12925 = vmatpush1.bf16.msra.mxu1 %v22198_v39  ;;  %v22260_v55 = vld [vmem:[#allocation19 + $0x84c] ss:$164 sps:$4 sm:$0xff]  }
 0x7ff   :  { %12885 = vmatprep.subr.bf16.mxu0 %v22203_v49  ;;  %12926 = vmatprep.subr.bf16.mxu1 %v22206_v59 }
 0x800   :  { %v24232_v19 = vpop.f32.mrb[128].mxu0  ;;  %v12376_v10 = vpop.f32.mrb[128].mxu1 }
 0x801   :  { %v24234_v33 = vadd.f32 %v13116_v40, %v12376_v10  ;;  %v24236_v48 = vpop.f32.mrb[129].mxu0  ;;  %v12378_v13 = vpop.f32.mrb[129].mxu1 }
 0x802   :  { %v24238_v37 = vadd.f32 %v13120_v45, %v12378_v13  ;;  %v12339_v31 = vpop.f32.mrb[130].mxu0  ;;  %v12380_v54 = vpop.f32.mrb[130].mxu1  ;;  %12886 = vmatpush1.bf16.msra.mxu0 %v22201_v9  ;;  %12927 = vmatpush1.bf16.msra.mxu1 %v22204_v18  ;;  %v22255_v18 = vld [vmem:[#allocation19 + $0x840] ss:$164 sps:$4 sm:$0xff]   ;;  %v22263_v13 = vld [vmem:[#allocation19 + $0x98c] ss:$164 sps:$4 sm:$0xff]  }
 0x803   :  { %v12340_v29 = vpop.f32.mrb[131].mxu0  ;;  %v12381_v1 = vpop.f32.mrb[131].mxu1  ;;  %12887 = vmatprep.subr.bf16.mxu0 %v22209_v61  ;;  %12928 = vmatprep.subr.bf16.mxu1 %v22212_v35  ;;  %v22258_v61 = vld [vmem:[#allocation19 + $0x848] ss:$164 sps:$4 sm:$0xff]   ;;  %v22266_v31 = vld [vmem:[#allocation19 + $0x994] ss:$164 sps:$4 sm:$0xff]  }
 0x804   :  { %v25472_v54 = vld [vmem:[#allocation45_spill] sm:$0xff]  ;;  %v22264_v29 = vld [vmem:[#allocation19 + $0x990] ss:$164 sps:$4 sm:$0xff]   ;;  %v22267_v1 = vld [vmem:[#allocation22 + $0x40] sm:$0xff]  }
 0x806   :  { %12888 = vmatpush1.bf16.msra.mxu0 %v22207_v46  ;;  %12929 = vmatpush1.bf16.msra.mxu1 %v22210_v24  ;;  %v13096_v46 = vrot.slane %v24226_v60, %v25472_v54  ;;  %v22261_v24 = vld [vmem:[#allocation19 + $0x988] ss:$164 sps:$4 sm:$0xff]  }
 0x807   :  { %12889 = vmatprep.subr.bf16.mxu0 %v22215_v5  ;;  %12930 = vmatprep.subr.bf16.mxu1 %v22218_v47  ;;  %v22268_v47 = vld [vmem:[#allocation19 + $0xa0] ss:$164 sps:$4 sm:$0xff]  }
 0x808   :  { %v24255_v5 = vadd.f32 %v13096_v46, %v24218_v58  ;;  %v22272_v58 = vld [vmem:[#allocation22 + $0x8] sm:$0xff]  }
 0x80a   :  { %12890 = vmatpush1.bf16.msra.mxu0 %v22213_v38  ;;  %12931 = vmatpush1.bf16.msra.mxu1 %v22216_v15  ;;  %v22269_v38 = vld [vmem:[#allocation22] sm:$0xff]   ;;  %v22270_v15 = vld [vmem:[#allocation22 + $0x48] sm:$0xff]  }
 0x80b   :  { %12957 = vmatprep.subr.bf16.mxu0 %v22221_v4  ;;  %12998 = vmatprep.subr.bf16.mxu1 %v22224_v21  ;;  %v13330_v4 = vpack.c.bf16 %v24255_v5, %v24255_v5  ;;  %v22271_v21 = vld [vmem:[#allocation19 + $0x1e8] ss:$164 sps:$4 sm:$0xff]  }
 0x80d   :  { %12908 = vmatmul.mubr.bf16.vlgmr.msra.gmra.mrb[156].mxu0 %v24184_v52  ;;  %12949 = vmatmul.mubr.bf16.vlgmr.msra.gmra.mrb[156].mxu1 %v24184_v52 }
 0x80e   :  { %12958 = vmatpush1.bf16.msra.mxu0 %v22219_v63  ;;  %12999 = vmatpush1.bf16.msra.mxu1 %v22222_v22  ;;  %v22273_v63 = vld [vmem:[#allocation22 + $0x50] sm:$0xff]   ;;  %v22274_v22 = vld [vmem:[#allocation19 + $0x330] ss:$164 sps:$4 sm:$0xff]  }
 0x80f   :  { %12959 = vmatprep.subr.bf16.mxu0 %v22227_v57  ;;  %13000 = vmatprep.subr.bf16.mxu1 %v22230_v27  ;;  %v22275_v57 = vld [vmem:[#allocation22 + $0x10] sm:$0xff]   ;;  %v22276_v27 = vld [vmem:[#allocation22 + $0x58] sm:$0xff]  }
 0x810   :  { %12989 = vmatprep.mubr.bf16.mxu0 %v25468_v23  ;;  %13030 = vmatprep.mubr.bf16.mxu1 %v25468_v23  ;;  %v22246_v23 = vld [vmem:[#allocation19 + $0x5b8] ss:$164 sps:$4 sm:$0xff]  }
 0x812   :  { %12960 = vmatpush1.bf16.msra.mxu0 %v22225_v50  ;;  %13001 = vmatpush1.bf16.msra.mxu1 %v22228_v25  ;;  %v22277_v50 = vld [vmem:[#allocation19 + $0x478] ss:$164 sps:$4 sm:$0xff]   ;;  %v22278_v25 = vld [vmem:[#allocation22 + $0x18] sm:$0xff]  }
 0x813   :  { %12961 = vmatprep.subr.bf16.mxu0 %v22233_v36  ;;  %13002 = vmatprep.subr.bf16.mxu1 %v22236_v7  ;;  %v22279_v36 = vld [vmem:[#allocation22 + $0x60] sm:$0xff]   ;;  %v22280_v7 = vld [vmem:[#allocation19 + $0x5c0] ss:$164 sps:$4 sm:$0xff]  }
 0x816   :  { %12962 = vmatpush1.bf16.msra.mxu0 %v22231_v8  ;;  %13003 = vmatpush1.bf16.msra.mxu1 %v22234_v32  ;;  %v22281_v8 = vld [vmem:[#allocation22 + $0x20] sm:$0xff]   ;;  %v22282_v32 = vld [vmem:[#allocation22 + $0x68] sm:$0xff]  }
 0x817   :  { %12963 = vmatprep.subr.bf16.mxu0 %v22239_v30  ;;  %13004 = vmatprep.subr.bf16.mxu1 %v22242_v42  ;;  %v24268_v30 = vld [vmem:[#allocation21 + $0x8] sm:$0xff] }
 0x818   :  { %v13148_v42 = vrot.slane %v24268_v30, %v25470_v12 }
 0x81a   :  { %12964 = vmatpush1.bf16.msra.mxu0 %v22237_v6  ;;  %13005 = vmatpush1.bf16.msra.mxu1 %v22240_v20  ;;  %v22283_v6 = vld [vmem:[#allocation19 + $0x708] ss:$164 sps:$4 sm:$0xff]   ;;  %v22284_v20 = vld [vmem:[#allocation22 + $0x28] sm:$0xff]  }
 0x81b   :  { %12965 = vmatprep.subr.bf16.mxu0 %v22245_v53  ;;  %13006 = vmatprep.subr.bf16.mxu1 %v22248_v17  ;;  %v22285_v53 = vld [vmem:[#allocation22 + $0x70] sm:$0xff]  }
 0x81e   :  { %12966 = vmatpush1.bf16.msra.mxu0 %v22243_v0  ;;  %13007 = vmatpush1.bf16.msra.mxu1 %v22246_v23 }
 0x81f   :  { %12967 = vmatprep.subr.bf16.mxu0 %v22251_v3  ;;  %13008 = vmatprep.subr.bf16.mxu1 %v22254_v44 }
 0x820   :  { %v24244_v39 = vpop.f32.mrb[132].mxu0  ;;  %v24246_v49 = vpop.f32.mrb[132].mxu1 }
 0x821   :  { %v24248_v59 = vpop.f32.mrb[133].mxu0  ;;  %v24250_v40 = vpop.f32.mrb[133].mxu1 }
 0x822   :  { %v12421_v45 = vpop.f32.mrb[134].mxu0  ;;  %v12462_v9 = vpop.f32.mrb[134].mxu1  ;;  %12968 = vmatpush1.bf16.msra.mxu0 %v22249_v56  ;;  %13009 = vmatpush1.bf16.msra.mxu1 %v22252_v14 }
 0x823   :  { %v12422_v35 = vpop.f32.mrb[135].mxu0  ;;  %v12463_v10 = vpop.f32.mrb[135].mxu1  ;;  %12969 = vmatprep.subr.bf16.mxu0 %v22257_v41  ;;  %13010 = vmatprep.subr.bf16.mxu1 %v22260_v55  ;;  %v22286_v41 = vld [vmem:[#allocation19 + $0x850] ss:$164 sps:$4 sm:$0xff]   ;;  %v22287_v55 = vld [vmem:[#allocation22 + $0x30] sm:$0xff]  }
 0x824   :  { %v25473_v45 = vld [vmem:[#allocation47_spill] sm:$0xff]  ;;  %v22288_v35 = vld [vmem:[#allocation22 + $0x78] sm:$0xff]   ;;  %v25474_v10 = vld [vmem:[#allocation48_spill] sm:$0xff] }
 0x825   :  { %v13092_v9 = vrot.slane %v24226_v60, %v25473_v45 }
 0x826   :  { %12970 = vmatpush1.bf16.msra.mxu0 %v22255_v18  ;;  %13011 = vmatpush1.bf16.msra.mxu1 %v22258_v61 }
 0x827   :  { %12971 = vmatprep.subr.bf16.mxu0 %v22263_v13  ;;  %13012 = vmatprep.subr.bf16.mxu1 %v22266_v31  ;;  %v13104_v13 = vrot.slane %v24226_v60, %v25474_v10  ;;  %v25475_v31 = vld [vmem:[#allocation49_spill] sm:$0xff] }
 0x828   :  { %v13112_v46 = vrot.slane %v24226_v60, %v25475_v31 }
 0x82a   :  { %12972 = vmatpush1.bf16.msra.mxu0 %v22261_v24  ;;  %13013 = vmatpush1.bf16.msra.mxu1 %v22264_v29  ;;  %v22289_v24 = vld [vmem:[#allocation19 + $0x998] ss:$164 sps:$4 sm:$0xff]   ;;  %v22290_v29 = vld [vmem:[#allocation22 + $0x38] sm:$0xff]  }
 0x82b   :  { %20606 = vmatprep.subr.bf16.mxu0 %v25467_v26  ;;  %20126 = vmatprep.subr.bf16.mxu1 %v22267_v1  ;;  %v24289_v1 = vadd.f32 %v13092_v9, %v24214_v11  ;;  %v22294_v11 = vld [vmem:[#allocation22 + $0x100] sm:$0xff]  }
 0x82d   :  { %12990 = vmatmul.mubr.bf16.vlgmr.msra.gmra.mrb[160].mxu0 %v24184_v52  ;;  %13031 = vmatmul.mubr.bf16.vlgmr.msra.gmra.mrb[160].mxu1 %v24184_v52 }
 0x82e   :  { %20607 = vmatpush3.bf16.msra.mxu0 %v22268_v47  ;;  %20127 = vmatpush3.bf16.msra.mxu1 %v22269_v38  ;;  %v22291_v47 = vld [vmem:[#allocation22 + $0xc0] sm:$0xff]  }
 0x82f   :  { %15961 = vmatprep.mubr.bf16.mxu1 %v13330_v4  ;;  %20608 = vmatprep.subr.bf16.mxu0 %v25467_v26  ;;  %v22292_v38 = vld [vmem:[#allocation22 + $0x140] sm:$0xff]   ;;  %v24296_v4 = vadd.f32 %v13112_v46, %v24236_v48  ;;  %v22297_v48 = vld [vmem:[#allocation22 + $0x88] sm:$0xff]  }
 0x830   :  { %20128 = vmatprep.subr.bf16.mxu1 %v22270_v15  ;;  %20622 = vmatprep.mubr.msk.bf16.mxu0 %vm23180_vm1, %v25467_v26  ;;  %v24293_v15 = vadd.f32 %v13104_v13, %v24220_v34 }
 0x831   :  { %v13334_v34 = vpack.c.bf16 %v24296_v4, %v24296_v4 }
 0x832   :  { %20609 = vmatpush3.bf16.msra.mxu0 %v22271_v21  ;;  %20129 = vmatpush3.bf16.msra.mxu1 %v22272_v58  ;;  %v22293_v21 = vld [vmem:[#allocation22 + $0x80] sm:$0xff]   ;;  %v13329_v58 = vpack.c.bf16 %v24289_v1, %v24289_v1 }
 0x833   :  { %20610 = vmatprep.subr.bf16.mxu0 %v25467_v26  ;;  %20130 = vmatprep.subr.bf16.mxu1 %v22273_v63  ;;  %v22295_v63 = vld [vmem:[#allocation22 + $0xc8] sm:$0xff]  }
 0x836   :  { %20611 = vmatpush3.bf16.msra.mxu0 %v22274_v22  ;;  %20131 = vmatpush3.bf16.msra.mxu1 %v22275_v57  ;;  %v22296_v22 = vld [vmem:[#allocation22 + $0x148] sm:$0xff]  }
 0x837   :  { %20612 = vmatprep.subr.bf16.mxu0 %v25467_v26  ;;  %20132 = vmatprep.subr.bf16.mxu1 %v22276_v27  ;;  %v22298_v57 = vld [vmem:[#allocation22 + $0x108] sm:$0xff]   ;;  %v22299_v27 = vld [vmem:[#allocation22 + $0xd0] sm:$0xff]  }
 0x83a   :  { %20613 = vmatpush3.bf16.msra.mxu0 %v22277_v50  ;;  %20133 = vmatpush3.bf16.msra.mxu1 %v22278_v25  ;;  %v22300_v50 = vld [vmem:[#allocation22 + $0x150] sm:$0xff]  }
 0x83b   :  { %20614 = vmatprep.subr.bf16.mxu0 %v25467_v26  ;;  %20134 = vmatprep.subr.bf16.mxu1 %v22279_v36  ;;  %v22301_v25 = vld [vmem:[#allocation22 + $0x90] sm:$0xff]  }
 0x83c   :  { %v22302_v36 = vld [vmem:[#allocation22 + $0x110] sm:$0xff]  }
 0x83e   :  { %20615 = vmatpush3.bf16.msra.mxu0 %v22280_v7  ;;  %20135 = vmatpush3.bf16.msra.mxu1 %v22281_v8  ;;  %v22304_v7 = vld [vmem:[#allocation22 + $0x158] sm:$0xff]  }
 0x83f   :  { %20616 = vmatprep.subr.bf16.mxu0 %v25467_v26  ;;  %20136 = vmatprep.subr.bf16.mxu1 %v22282_v32  ;;  %v22305_v8 = vld [vmem:[#allocation22 + $0x98] sm:$0xff]  }
 0x840   :  { %v24273_v17 = vpop.f32.mrb[136].mxu0  ;;  %v12540_v0 = vpop.f32.mrb[136].mxu1  ;;  %v22306_v32 = vld [vmem:[#allocation22 + $0x118] sm:$0xff]  }
 0x841   :  { %v24275_v23 = vadd.f32 %v13148_v42, %v12540_v0  ;;  %v24277_v3 = vpop.f32.mrb[137].mxu0  ;;  %v24279_v44 = vpop.f32.mrb[137].mxu1  ;;  %v22307_v42 = vld [vmem:[#allocation22 + $0xe0] sm:$0xff]   ;;  %v22311_v0 = vld [vmem:[#allocation22 + $0xe8] sm:$0xff]  }
 0x842   :  { %v12503_v56 = vpop.f32.mrb[138].mxu0  ;;  %v12544_v14 = vpop.f32.mrb[138].mxu1  ;;  %20617 = vmatpush3.bf16.msra.mxu0 %v22283_v6  ;;  %20137 = vmatpush3.bf16.msra.mxu1 %v22284_v20  ;;  %v22308_v6 = vld [vmem:[#allocation22 + $0x160] sm:$0xff]  }
 0x843   :  { %v12504_v18 = vpop.f32.mrb[139].mxu0  ;;  %v12545_v61 = vpop.f32.mrb[139].mxu1  ;;  %20618 = vmatprep.subr.bf16.mxu0 %v25467_v26  ;;  %20138 = vmatprep.subr.bf16.mxu1 %v22285_v53  ;;  %v22309_v20 = vld [vmem:[#allocation22 + $0xa0] sm:$0xff]   ;;  %v22312_v56 = vld [vmem:[#allocation22 + $0x168] sm:$0xff]  }
 0x844   :  { %v22310_v53 = vld [vmem:[#allocation22 + $0x120] sm:$0xff]   ;;  %v22313_v14 = vld [vmem:[#allocation22 + $0xa8] sm:$0xff]   ;;  %v22316_v61 = vld [vmem:[#allocation22 + $0x170] sm:$0xff]  }
 0x846   :  { %20619 = vmatpush3.bf16.msra.mxu0 %v22286_v41  ;;  %20139 = vmatpush3.bf16.msra.mxu1 %v22287_v55  ;;  %v22314_v41 = vld [vmem:[#allocation22 + $0x128] sm:$0xff]   ;;  %v22315_v55 = vld [vmem:[#allocation22 + $0xf0] sm:$0xff]  }
 0x847   :  { %20620 = vmatprep.subr.bf16.mxu0 %v25467_v26  ;;  %20140 = vmatprep.subr.bf16.mxu1 %v22288_v35  ;;  %v13332_v26 = vpack.c.bf16 %v24293_v15, %v24293_v15 }
 0x84a   :  { %20621 = vmatpush3.bf16.msra.mxu0 %v22289_v24  ;;  %20141 = vmatpush3.bf16.msra.mxu1 %v22290_v29  ;;  %v22317_v29 = vld [vmem:[#allocation22 + $0xb0] sm:$0xff]  }
 0x84b   :  { %20148 = vmatprep.subr.bf16.mxu0 %v22291_v47  ;;  %20170 = vmatprep.subr.bf16.mxu1 %v22292_v38  ;;  %v25476_v47 = vld [vmem:[#allocation54_spill] sm:$0xff] }
 0x84c   :  { %v13100_v38 = vrot.slane %v24226_v60, %v25476_v47 }
 0x84d   :  { %20623 = vmatmul.mubr.bf16.vlgmr.msra.gmra.mrb[164].mxu0 %v24184_v52  ;;  %15962 = vmatmul.mubr.bf16.vlgmr.msra.gmra.mrb[164].mxu1 %v13329_v58  ;;  %v22303_v52 = vld [vmem:[#allocation22 + $0xd8] sm:$0xff]  }
 0x84e   :  { %20149 = vmatpush3.bf16.msra.mxu0 %v22293_v21  ;;  %16001 = vmatprep.mubr.bf16.mxu0 %v13332_v26  ;;  %v22319_v26 = vld [vmem:[#allocation22 + $0xf8] sm:$0xff]  }
 0x84f   :  { %20171 = vmatpush3.bf16.msra.mxu1 %v22294_v11  ;;  %16041 = vmatprep.mubr.bf16.mxu1 %v13334_v34  ;;  %v22318_v11 = vld [vmem:[#allocation22 + $0x130] sm:$0xff]   ;;  %v22320_v34 = vld [vmem:[#allocation22 + $0x178] sm:$0xff]  }
 0x850   :  { %20150 = vmatprep.subr.bf16.mxu0 %v22295_v63  ;;  %20172 = vmatprep.subr.bf16.mxu1 %v22296_v22  ;;  %v25477_v63 = vld [vmem:[#allocation55_spill] sm:$0xff] }
 0x851   :  { %v13108_v22 = vrot.slane %v24226_v60, %v25477_v63 }
 0x852   :  { %20151 = vmatpush3.bf16.msra.mxu0 %v22297_v48  ;;  %v13128_v48 = vrot.slane %v24268_v30, %v25472_v54 }
 0x853   :  { %20173 = vmatpush3.bf16.msra.mxu1 %v22298_v57  ;;  %20152 = vmatprep.subr.bf16.mxu0 %v22299_v27  ;;  %v22321_v57 = vld [vmem:[#allocation22 + $0xb8] sm:$0xff]   ;;  %v24320_v27 = vadd.f32 %v13100_v38, %v24216_v62  ;;  %v22326_v62 = vld [vmem:[#allocation22 + $0x200] sm:$0xff]  }
 0x854   :  { %20174 = vmatprep.subr.bf16.mxu1 %v22300_v50  ;;  %v22322_v50 = vld [vmem:[#allocation22 + $0x138] sm:$0xff]   ;;  %v24326_v60 = vadd.f32 %v13128_v48, %v24248_v59  ;;  %v22340_v38 = vld [vmem:[#allocation22 + $0x260] sm:$0xff]   ;;  %v22347_v48 = vld [vmem:[#allocation22 + $0x1f0] sm:$0xff]  }
 0x856   :  { %20153 = vmatpush3.bf16.msra.mxu0 %v22301_v25  ;;  %v22323_v25 = vld [vmem:[#allocation22 + $0x1c0] sm:$0xff]   ;;  %v13338_v59 = vpack.c.bf16 %v24326_v60, %v24326_v60 }
 0x857   :  { %20175 = vmatpush3.bf16.msra.mxu1 %v22302_v36  ;;  %20154 = vmatprep.subr.bf16.mxu0 %v22303_v52  ;;  %v24323_v36 = vadd.f32 %v13108_v22, %v24232_v19  ;;  %v22324_v52 = vld [vmem:[#allocation22 + $0x240] sm:$0xff]   ;;  %v13336_v19 = vpack.c.bf16 %v24238_v37, %v24238_v37  ;;  %v22345_v22 = vld [vmem:[#allocation22 + $0x1a8] sm:$0xff]  }
 0x858   :  { %20176 = vmatprep.subr.bf16.mxu1 %v22304_v7  ;;  %v22325_v7 = vld [vmem:[#allocation22 + $0x180] sm:$0xff]  }
 0x85a   :  { %20155 = vmatpush3.bf16.msra.mxu0 %v22305_v8  ;;  %v13331_v8 = vpack.c.bf16 %v24320_v27, %v24320_v27 }
 0x85b   :  { %20177 = vmatpush3.bf16.msra.mxu1 %v22306_v32  ;;  %20156 = vmatprep.subr.bf16.mxu0 %v22307_v42  ;;  %v13333_v32 = vpack.c.bf16 %v24323_v36, %v24323_v36  ;;  %v22327_v42 = vld [vmem:[#allocation22 + $0x1c8] sm:$0xff]  }
 0x85c   :  { %20178 = vmatprep.subr.bf16.mxu1 %v22308_v6  ;;  %v22328_v6 = vld [vmem:[#allocation22 + $0x248] sm:$0xff]  }
 0x85e   :  { %20157 = vmatpush3.bf16.msra.mxu0 %v22309_v20  ;;  %v22329_v20 = vld [vmem:[#allocation22 + $0x188] sm:$0xff]  }
 0x85f   :  { %20179 = vmatpush3.bf16.msra.mxu1 %v22310_v53  ;;  %20158 = vmatprep.subr.bf16.mxu0 %v22311_v0  ;;  %v22330_v53 = vld [vmem:[#allocation22 + $0x208] sm:$0xff]   ;;  %v22331_v0 = vld [vmem:[#allocation22 + $0x1d0] sm:$0xff]  }
 0x860   :  { %v24305_v9 = vpop.f32.mrb[140].mxu0  ;;  %v24307_v18 = vpop.f32.mrb[140].mxu1  ;;  %20180 = vmatprep.subr.bf16.mxu1 %v22312_v56  ;;  %v22332_v56 = vld [vmem:[#allocation22 + $0x250] sm:$0xff]  }
 0x861   :  { %v24309_v35 = vpop.f32.mrb[141].mxu0  ;;  %v24311_v13 = vpop.f32.mrb[141].mxu1 }
 0x862   :  { %v12585_v46 = vpop.f32.mrb[142].mxu0  ;;  %v12626_v24 = vpop.f32.mrb[142].mxu1  ;;  %20159 = vmatpush3.bf16.msra.mxu0 %v22313_v14  ;;  %v22333_v14 = vld [vmem:[#allocation22 + $0x190] sm:$0xff]  }
 0x863   :  { %20181 = vmatpush3.bf16.msra.mxu1 %v22314_v41  ;;  %v12586_v21 = vpop.f32.mrb[143].mxu0  ;;  %v12627_v58 = vpop.f32.mrb[143].mxu1  ;;  %20160 = vmatprep.subr.bf16.mxu0 %v22315_v55  ;;  %v22334_v41 = vld [vmem:[#allocation22 + $0x210] sm:$0xff]   ;;  %v22335_v55 = vld [vmem:[#allocation22 + $0x1d8] sm:$0xff]  }
 0x864   :  { %20182 = vmatprep.subr.bf16.mxu1 %v22316_v61  ;;  %v22336_v61 = vld [vmem:[#allocation22 + $0x258] sm:$0xff]   ;;  %v22341_v21 = vld [vmem:[#allocation22 + $0x1a0] sm:$0xff]  }
 0x865   :  { %v22337_v46 = vld [vmem:[#allocation22 + $0x198] sm:$0xff]   ;;  %v22342_v58 = vld [vmem:[#allocation22 + $0x220] sm:$0xff]  }
 0x866   :  { %20161 = vmatpush3.bf16.msra.mxu0 %v22317_v29  ;;  %v22338_v24 = vld [vmem:[#allocation22 + $0x218] sm:$0xff]   ;;  %v22339_v29 = vld [vmem:[#allocation22 + $0x1e0] sm:$0xff]  }
 0x867   :  { %20183 = vmatpush3.bf16.msra.mxu1 %v22318_v11  ;;  %20162 = vmatprep.subr.bf16.mxu0 %v22319_v26  ;;  %v22343_v11 = vld [vmem:[#allocation22 + $0x1e8] sm:$0xff]  }
 0x868   :  { %20184 = vmatprep.subr.bf16.mxu1 %v22320_v34  ;;  %v22344_v26 = vld [vmem:[#allocation22 + $0x268] sm:$0xff]  }
 0x869   :  { %v22346_v34 = vld [vmem:[#allocation22 + $0x228] sm:$0xff]  }
 0x86a   :  { %20163 = vmatpush3.bf16.msra.mxu0 %v22321_v57 }
 0x86b   :  { %20185 = vmatpush3.bf16.msra.mxu1 %v22322_v50  ;;  %20192 = vmatprep.subr.bf16.mxu0 %v22323_v25  ;;  %v22348_v25 = vld [vmem:[#allocation22 + $0x270] sm:$0xff]  }
 0x86c   :  { %20214 = vmatprep.subr.bf16.mxu1 %v22324_v52 }
 0x86d   :  { %16002 = vmatmul.mubr.bf16.vlgmr.msra.gmra.mrb[168].mxu0 %v13331_v8 }
 0x86e   :  { %16042 = vmatmul.mubr.bf16.vlgmr.msra.gmra.mrb[168].mxu1 %v13333_v32  ;;  %20193 = vmatpush3.bf16.msra.mxu0 %v22325_v7  ;;  %v22349_v32 = vld [vmem:[#allocation22 + $0x1b0] sm:$0xff]  }
 0x86f   :  { %16081 = vmatprep.mubr.bf16.mxu0 %v13336_v19  ;;  %20215 = vmatpush3.bf16.msra.mxu1 %v22326_v62 }
 0x870   :  { %16121 = vmatprep.mubr.bf16.mxu1 %v13338_v59  ;;  %20194 = vmatprep.subr.bf16.mxu0 %v22327_v42  ;;  %v22351_v59 = vld [vmem:[#allocation22 + $0x1f8] sm:$0xff]  }
 0x871   :  { %20216 = vmatprep.subr.bf16.mxu1 %v22328_v6  ;;  %v22350_v6 = vld [vmem:[#allocation22 + $0x230] sm:$0xff]  }
 0x872   :  { %20195 = vmatpush3.bf16.msra.mxu0 %v22329_v20  ;;  %v13124_v20 = vrot.slane %v24268_v30, %v25473_v45 }
 0x873   :  { %20217 = vmatpush3.bf16.msra.mxu1 %v22330_v53  ;;  %20196 = vmatprep.subr.bf16.mxu0 %v22331_v0  ;;  %v22352_v53 = vld [vmem:[#allocation22 + $0x278] sm:$0xff]   ;;  %v13136_v0 = vrot.slane %v24268_v30, %v25474_v10 }
 0x874   :  { %20218 = vmatprep.subr.bf16.mxu1 %v22332_v56  ;;  %v13144_v56 = vrot.slane %v24268_v30, %v25475_v31 }
 0x876   :  { %20197 = vmatpush3.bf16.msra.mxu0 %v22333_v14  ;;  %v22353_v14 = vld [vmem:[#allocation22 + $0x1b8] sm:$0xff]  }
 0x877   :  { %20219 = vmatpush3.bf16.msra.mxu1 %v22334_v41  ;;  %20198 = vmatprep.subr.bf16.mxu0 %v22335_v55  ;;  %v22354_v41 = vld [vmem:[#allocation22 + $0x238] sm:$0xff]   ;;  %v22355_v55 = vld [vmem:[#allocation22 + $0x2c0] sm:$0xff]  }
 0x878   :  { %20220 = vmatprep.subr.bf16.mxu1 %v22336_v61  ;;  %v24351_v61 = vadd.f32 %v13124_v20, %v24244_v39  ;;  %v22358_v39 = vld [vmem:[#allocation22 + $0x300] sm:$0xff]   ;;  %v22368_v20 = vld [vmem:[#allocation22 + $0x358] sm:$0xff]  }
 0x87a   :  { %20199 = vmatpush3.bf16.msra.mxu0 %v22337_v46  ;;  %v22356_v46 = vld [vmem:[#allocation22 + $0x340] sm:$0xff]  }
 0x87b   :  { %20221 = vmatpush3.bf16.msra.mxu1 %v22338_v24  ;;  %20200 = vmatprep.subr.bf16.mxu0 %v22339_v29  ;;  %v17234_v24 = vmax.f32 %v24289_v1, %v24320_v27  ;;  %v24356_v29 = vadd.f32 %v13136_v0, %v24250_v40 }
 0x87c   :  { %20222 = vmatprep.subr.bf16.mxu1 %v22340_v38  ;;  %v24359_v38 = vadd.f32 %v13144_v56, %v24277_v3  ;;  %v22360_v3 = vld [vmem:[#allocation22 + $0x348] sm:$0xff]   ;;  %v22370_v56 = vld [vmem:[#allocation22 + $0x318] sm:$0xff]  }
 0x87d   :  { %v13340_v40 = vpack.c.bf16 %v24356_v29, %v24356_v29 }
 0x87e   :  { %20201 = vmatpush3.bf16.msra.mxu0 %v22341_v21  ;;  %v22357_v21 = vld [vmem:[#allocation22 + $0x280] sm:$0xff]  }
 0x87f   :  { %20223 = vmatpush3.bf16.msra.mxu1 %v22342_v58  ;;  %20202 = vmatprep.subr.bf16.mxu0 %v22343_v11  ;;  %v13335_v58 = vpack.c.bf16 %v24234_v33, %v24234_v33  ;;  %v13337_v11 = vpack.c.bf16 %v24351_v61, %v24351_v61 }
 0x880   :  { %v24336_v57 = vpop.f32.mrb[144].mxu0  ;;  %v24338_v50 = vpop.f32.mrb[144].mxu1  ;;  %20224 = vmatprep.subr.bf16.mxu1 %v22344_v26  ;;  %v22359_v26 = vld [vmem:[#allocation22 + $0x2c8] sm:$0xff]  }
 0x881   :  { %v24340_v52 = vpop.f32.mrb[145].mxu0  ;;  %v24342_v7 = vpop.f32.mrb[145].mxu1 }
 0x882   :  { %v12667_v8 = vpop.f32.mrb[146].mxu0  ;;  %v12708_v62 = vpop.f32.mrb[146].mxu1  ;;  %20203 = vmatpush3.bf16.msra.mxu0 %v22345_v22  ;;  %v17236_v22 = vmax.f32 %v24255_v5, %v17234_v24  ;;  %v22374_v24 = vld [vmem:[#allocation22 + $0x320] sm:$0xff]  }
 0x883   :  { %20225 = vmatpush3.bf16.msra.mxu1 %v22346_v34  ;;  %v12668_v42 = vpop.f32.mrb[147].mxu0  ;;  %v12709_v19 = vpop.f32.mrb[147].mxu1  ;;  %20204 = vmatprep.subr.bf16.mxu0 %v22347_v48  ;;  %v13342_v34 = vpack.c.bf16 %v24359_v38, %v24359_v38  ;;  %v22361_v48 = vld [vmem:[#allocation22 + $0x288] sm:$0xff]   ;;  %v22363_v8 = vld [vmem:[#allocation22 + $0x2d0] sm:$0xff]  }
 0x884   :  { %20226 = vmatprep.subr.bf16.mxu1 %v22348_v25  ;;  %v22362_v25 = vld [vmem:[#allocation22 + $0x308] sm:$0xff]   ;;  %v22364_v62 = vld [vmem:[#allocation22 + $0x350] sm:$0xff]  }
 0x885   :  { %v22365_v42 = vld [vmem:[#allocation22 + $0x290] sm:$0xff]  }
 0x886   :  { %20205 = vmatpush3.bf16.msra.mxu0 %v22349_v32  ;;  %v17235_v32 = vmax.f32 %v24293_v15, %v17236_v22  ;;  %v22378_v22 = vld [vmem:[#allocation22 + $0x328] sm:$0xff]  }
 0x887   :  { %20227 = vmatpush3.bf16.msra.mxu1 %v22350_v6  ;;  %20206 = vmatprep.subr.bf16.mxu0 %v22351_v59  ;;  %v22366_v6 = vld [vmem:[#allocation22 + $0x310] sm:$0xff]   ;;  %v22367_v59 = vld [vmem:[#allocation22 + $0x2d8] sm:$0xff]  }
 0x888   :  { %20228 = vmatprep.subr.bf16.mxu1 %v22352_v53  ;;  %v17237_v19 = vmax.f32 %v24323_v36, %v17235_v32  ;;  %v22369_v53 = vld [vmem:[#allocation22 + $0x298] sm:$0xff]  }
 0x88a   :  { %20207 = vmatpush3.bf16.msra.mxu0 %v22353_v14  ;;  %v17238_v0 = vmax.f32 %v24234_v33, %v17237_v19  ;;  %v22371_v14 = vld [vmem:[#allocation22 + $0x2e0] sm:$0xff]   ;;  %v22381_v19 = vld [vmem:[#allocation22 + $0x2b0] sm:$0xff]  }
 0x88b   :  { %20229 = vmatpush3.bf16.msra.mxu1 %v22354_v41  ;;  %20236 = vmatprep.subr.bf16.mxu0 %v22355_v55  ;;  %v22372_v41 = vld [vmem:[#allocation22 + $0x360] sm:$0xff]  }
 0x88c   :  { %20258 = vmatprep.subr.bf16.mxu1 %v22356_v46  ;;  %v22373_v55 = vld [vmem:[#allocation22 + $0x2a0] sm:$0xff]   ;;  %v17240_v46 = vmax.f32 %v24296_v4, %v17238_v0  ;;  %v22382_v0 = vld [vmem:[#allocation22 + $0x330] sm:$0xff]  }
 0x88d   :  { %16082 = vmatmul.mubr.bf16.vlgmr.msra.gmra.mrb[172].mxu0 %v13335_v58  ;;  %v22376_v58 = vld [vmem:[#allocation22 + $0x368] sm:$0xff]  }
 0x88e   :  { %16122 = vmatmul.mubr.bf16.vlgmr.msra.gmra.mrb[172].mxu1 %v13337_v11  ;;  %20237 = vmatpush3.bf16.msra.mxu0 %v22357_v21  ;;  %v22375_v21 = vld [vmem:[#allocation22 + $0x2e8] sm:$0xff]   ;;  %v17239_v11 = vmax.f32 %v24238_v37, %v17240_v46  ;;  %v13152_v46 = vrot.slane %v24268_v30, %v25471_v28 }
 0x88f   :  { %16161 = vmatprep.mubr.bf16.mxu0 %v13340_v40  ;;  %20259 = vmatpush3.bf16.msra.mxu1 %v22358_v39  ;;  %v22377_v39 = vld [vmem:[#allocation22 + $0x2a8] sm:$0xff]   ;;  %v22379_v40 = vld [vmem:[#allocation22 + $0x2f0] sm:$0xff]  }
 0x890   :  { %16201 = vmatprep.mubr.bf16.mxu1 %v13342_v34  ;;  %20238 = vmatprep.subr.bf16.mxu0 %v22359_v26  ;;  %v13132_v26 = vrot.slane %v24268_v30, %v25476_v47 }
 0x891   :  { %20260 = vmatprep.subr.bf16.mxu1 %v22360_v3 }
 0x892   :  { %20239 = vmatpush3.bf16.msra.mxu0 %v22361_v48  ;;  %v22380_v48 = vld [vmem:[#allocation22 + $0x370] sm:$0xff]  }
 0x893   :  { %20261 = vmatpush3.bf16.msra.mxu1 %v22362_v25  ;;  %20240 = vmatprep.subr.bf16.mxu0 %v22363_v8  ;;  %v17241_v25 = vmax.f32 %v24351_v61, %v17239_v11  ;;  %v22388_v11 = vld [vmem:[#allocation22 + $0x440] sm:$0xff]  }
 0x894   :  { %20262 = vmatprep.subr.bf16.mxu1 %v22364_v62 }
 0x896   :  { %20241 = vmatpush3.bf16.msra.mxu0 %v22365_v42 }
 0x897   :  { %20263 = vmatpush3.bf16.msra.mxu1 %v22366_v6  ;;  %20242 = vmatprep.subr.bf16.mxu0 %v22367_v59  ;;  %v24387_v6 = vadd.f32 %v13132_v26, %v24246_v49  ;;  %v24389_v59 = vld [vmem:[#allocation21 + $0x10] sm:$0xff] }
 0x898   :  { %20264 = vmatprep.subr.bf16.mxu1 %v22368_v20  ;;  %v13160_v49 = vrot.slane %v24389_v59, %v25472_v54 }
 0x89a   :  { %20243 = vmatpush3.bf16.msra.mxu0 %v22369_v53 }
 0x89b   :  { %20265 = vmatpush3.bf16.msra.mxu1 %v22370_v56  ;;  %20244 = vmatprep.subr.bf16.mxu0 %v22371_v14  ;;  %v22383_v56 = vld [vmem:[#allocation22 + $0x2f8] sm:$0xff]   ;;  %v13140_v14 = vrot.slane %v24268_v30, %v25477_v63  ;;  %v24406_v30 = vadd.f32 %v13160_v49, %v24309_v35  ;;  %v22392_v35 = vld [vmem:[#allocation22 + $0x448] sm:$0xff]  }
 0x89c   :  { %20266 = vmatprep.subr.bf16.mxu1 %v22372_v41  ;;  %v22384_v41 = vld [vmem:[#allocation22 + $0x378] sm:$0xff]  }
 0x89d   :  { %v22399_v49 = vld [vmem:[#allocation22 + $0x3d8] sm:$0xff]  }
 0x89e   :  { %20245 = vmatpush3.bf16.msra.mxu0 %v22373_v55  ;;  %v17242_v55 = vmax.f32 %v24387_v6, %v17241_v25  ;;  %v22390_v25 = vld [vmem:[#allocation22 + $0x400] sm:$0xff]  }
 0x89f   :  { %20267 = vmatpush3.bf16.msra.mxu1 %v22374_v24  ;;  %20246 = vmatprep.subr.bf16.mxu0 %v22375_v21  ;;  %v22385_v24 = vld [vmem:[#allocation22 + $0x2b8] sm:$0xff]  }
 0x8a0   :  { %v24377_v3 = vpop.f32.mrb[148].mxu0  ;;  %v24379_v34 = vpop.f32.mrb[148].mxu1  ;;  %20268 = vmatprep.subr.bf16.mxu1 %v22376_v58  ;;  %v22386_v21 = vld [vmem:[#allocation22 + $0x338] sm:$0xff]   ;;  %v22387_v58 = vld [vmem:[#allocation22 + $0x3c0] sm:$0xff]   ;;  %v17244_v26 = vmax.f32 %v24326_v60, %v17242_v55 }
 0x8a1   :  { %v24382_v8 = vpop.f32.mrb[149].mxu0  ;;  %v24384_v62 = vpop.f32.mrb[149].mxu1 }
 0x8a2   :  { %v12749_v32 = vpop.f32.mrb[150].mxu0  ;;  %v12790_v42 = vpop.f32.mrb[150].mxu1  ;;  %20247 = vmatpush3.bf16.msra.mxu0 %v22377_v39  ;;  %v24399_v39 = vadd.f32 %v13140_v14, %v24273_v17  ;;  %v22396_v14 = vld [vmem:[#allocation22 + $0x450] sm:$0xff]  }
 0x8a3   :  { %20269 = vmatpush3.bf16.msra.mxu1 %v22378_v22  ;;  %v12750_v20 = vpop.f32.mrb[151].mxu0  ;;  %v12791_v53 = vpop.f32.mrb[151].mxu1  ;;  %20248 = vmatprep.subr.bf16.mxu0 %v22379_v40  ;;  %v24403_v22 = vadd.f32 %v13152_v46, %v24279_v44  ;;  %v22389_v40 = vld [vmem:[#allocation22 + $0x380] sm:$0xff]   ;;  %v22391_v32 = vld [vmem:[#allocation22 + $0x3c8] sm:$0xff]   ;;  %v17243_v42 = vmax.f32 %v24356_v29, %v17244_v26  ;;  %v22398_v46 = vld [vmem:[#allocation22 + $0x410] sm:$0xff]  }
 0x8a4   :  { %20270 = vmatprep.subr.bf16.mxu1 %v22380_v48  ;;  %v13339_v48 = vpack.c.bf16 %v24387_v6, %v24387_v6  ;;  %v13341_v17 = vpack.c.bf16 %v24399_v39, %v24399_v39  ;;  %v22393_v20 = vld [vmem:[#allocation22 + $0x388] sm:$0xff]   ;;  %v22402_v26 = vld [vmem:[#allocation22 + $0x418] sm:$0xff]  }
 0x8a5   :  { %v13344_v44 = vpack.c.bf16 %v24403_v22, %v24403_v22  ;;  %v17245_v53 = vmax.f32 %v24399_v39, %v17243_v42  ;;  %v13164_v42 = vrot.slane %v24389_v59, %v25476_v47 }
 0x8a6   :  { %20249 = vmatpush3.bf16.msra.mxu0 %v22381_v19  ;;  %v13346_v19 = vpack.c.bf16 %v24406_v30, %v24406_v30 }
 0x8a7   :  { %20271 = vmatpush3.bf16.msra.mxu1 %v22382_v0  ;;  %20250 = vmatprep.subr.bf16.mxu0 %v22383_v56  ;;  %v22394_v0 = vld [vmem:[#allocation22 + $0x408] sm:$0xff]   ;;  %v22395_v56 = vld [vmem:[#allocation22 + $0x3d0] sm:$0xff]   ;;  %v17246_v55 = vmax.f32 %v24275_v23, %v17245_v53 }
 0x8a8   :  { %20272 = vmatprep.subr.bf16.mxu1 %v22384_v41  ;;  %v22397_v41 = vld [vmem:[#allocation22 + $0x390] sm:$0xff]   ;;  %v22409_v53 = vld [vmem:[#allocation22 + $0x3a8] sm:$0xff]  }
 0x8aa   :  { %20251 = vmatpush3.bf16.msra.mxu0 %v22385_v24  ;;  %v22400_v24 = vld [vmem:[#allocation22 + $0x458] sm:$0xff]  }
 0x8ab   :  { %20273 = vmatpush3.bf16.msra.mxu1 %v22386_v21  ;;  %20280 = vmatprep.subr.bf16.mxu0 %v22387_v58  ;;  %v13156_v21 = vrot.slane %v24389_v59, %v25473_v45  ;;  %v22401_v58 = vld [vmem:[#allocation22 + $0x398] sm:$0xff]  }
 0x8ac   :  { %20302 = vmatprep.subr.bf16.mxu1 %v22388_v11  ;;  %v17248_v11 = vmax.f32 %v24359_v38, %v17246_v55  ;;  %v22412_v55 = vld [vmem:[#allocation22 + $0x470] sm:$0xff]  }
 0x8ad   :  { %16162 = vmatmul.mubr.bf16.vlgmr.msra.gmra.mrb[176].mxu0 %v13339_v48  ;;  %v22404_v48 = vld [vmem:[#allocation22 + $0x460] sm:$0xff]  }
 0x8ae   :  { %16202 = vmatmul.mubr.bf16.vlgmr.msra.gmra.mrb[176].mxu1 %v13341_v17  ;;  %20281 = vmatpush3.bf16.msra.mxu0 %v22389_v40  ;;  %v22403_v40 = vld [vmem:[#allocation22 + $0x3e0] sm:$0xff]  }
 0x8af   :  { %16241 = vmatprep.mubr.bf16.mxu0 %v13344_v44  ;;  %20303 = vmatpush3.bf16.msra.mxu1 %v22390_v25  ;;  %v24423_v25 = vadd.f32 %v13156_v21, %v24305_v9  ;;  %v22405_v17 = vld [vmem:[#allocation22 + $0x3a0] sm:$0xff]   ;;  %v24430_v9 = vadd.f32 %v13164_v42, %v24307_v18  ;;  %v22413_v18 = vld [vmem:[#allocation22 + $0x3b0] sm:$0xff]   ;;  %v22416_v42 = vld [vmem:[#allocation22 + $0x478] sm:$0xff]  }
 0x8b0   :  { %16281 = vmatprep.mubr.bf16.mxu1 %v13346_v19  ;;  %20282 = vmatprep.subr.bf16.mxu0 %v22391_v32  ;;  %v17247_v32 = vmax.f32 %v24403_v22, %v17248_v11  ;;  %v22406_v44 = vld [vmem:[#allocation22 + $0x420] sm:$0xff]   ;;  %v22408_v19 = vld [vmem:[#allocation22 + $0x468] sm:$0xff]   ;;  %v13168_v11 = vrot.slane %v24389_v59, %v25474_v10 }
 0x8b1   :  { %20304 = vmatprep.subr.bf16.mxu1 %v22392_v35  ;;  %v22407_v35 = vld [vmem:[#allocation22 + $0x3e8] sm:$0xff]  }
 0x8b2   :  { %20283 = vmatpush3.bf16.msra.mxu0 %v22393_v20  ;;  %v17249_v20 = vmax.f32 %v24423_v25, %v17247_v32  ;;  %v22415_v32 = vld [vmem:[#allocation22 + $0x3f8] sm:$0xff]  }
 0x8b3   :  { %20305 = vmatpush3.bf16.msra.mxu1 %v22394_v0  ;;  %20284 = vmatprep.subr.bf16.mxu0 %v22395_v56  ;;  %v22410_v0 = vld [vmem:[#allocation22 + $0x428] sm:$0xff]   ;;  %v22411_v56 = vld [vmem:[#allocation22 + $0x3f0] sm:$0xff]  }
 0x8b4   :  { %20306 = vmatprep.subr.bf16.mxu1 %v22396_v14 }
 0x8b6   :  { %20285 = vmatpush3.bf16.msra.mxu0 %v22397_v41 }
 0x8b7   :  { %20307 = vmatpush3.bf16.msra.mxu1 %v22398_v46  ;;  %20286 = vmatprep.subr.bf16.mxu0 %v22399_v49  ;;  %v17250_v46 = vmax.f32 %v24430_v9, %v17249_v20  ;;  %v24449_v20 = vadd.f32 %v13168_v11, %v24311_v13  ;;  %v22421_v13 = vld [vmem:[#allocation22 + $0x480] sm:$0xff]  }
 0x8b8   :  { %20308 = vmatprep.subr.bf16.mxu1 %v22400_v24  ;;  %v22422_v11 = vld [vmem:[#allocation22 + $0x500] sm:$0xff]  }
 0x8ba   :  { %20287 = vmatpush3.bf16.msra.mxu0 %v22401_v58 }
 0x8bb   :  { %20309 = vmatpush3.bf16.msra.mxu1 %v22402_v26  ;;  %20288 = vmatprep.subr.bf16.mxu0 %v22403_v40  ;;  %v13172_v26 = vrot.slane %v24389_v59, %v25477_v63 }
 0x8bc   :  { %20310 = vmatprep.subr.bf16.mxu1 %v22404_v48 }
 0x8be   :  { %20289 = vmatpush3.bf16.msra.mxu0 %v22405_v17  ;;  %v22414_v17 = vld [vmem:[#allocation22 + $0x430] sm:$0xff]  }
 0x8bf   :  { %20311 = vmatpush3.bf16.msra.mxu1 %v22406_v44  ;;  %20290 = vmatprep.subr.bf16.mxu0 %v22407_v35  ;;  %v17252_v44 = vmax.f32 %v24406_v30, %v17250_v46  ;;  %v13176_v35 = vrot.slane %v24389_v59, %v25475_v31  ;;  %v13180_v46 = vrot.slane %v24389_v59, %v25470_v12 }
 0x8c0   :  { %v24432_v14 = vpop.f32.mrb[152].mxu0  ;;  %v24434_v41 = vpop.f32.mrb[152].mxu1  ;;  %20312 = vmatprep.subr.bf16.mxu1 %v22408_v19  ;;  %v22417_v19 = vld [vmem:[#allocation22 + $0x3b8] sm:$0xff]  }
 0x8c1   :  { %v24437_v49 = vpop.f32.mrb[153].mxu0  ;;  %v24439_v24 = vpop.f32.mrb[153].mxu1 }
 0x8c2   :  { %v12831_v21 = vpop.f32.mrb[154].mxu0  ;;  %v12872_v58 = vpop.f32.mrb[154].mxu1  ;;  %20291 = vmatpush3.bf16.msra.mxu0 %v22409_v53  ;;  %v24452_v53 = vadd.f32 %v13172_v26, %v24336_v57  ;;  %v13343_v57 = vpack.c.bf16 %v24275_v23, %v24275_v23  ;;  %v13345_v26 = vpack.c.bf16 %v24423_v25, %v24423_v25 }
 0x8c3   :  { %20313 = vmatpush3.bf16.msra.mxu1 %v22410_v0  ;;  %v12832_v40 = vpop.f32.mrb[155].mxu0  ;;  %v12873_v48 = vpop.f32.mrb[155].mxu1  ;;  %20292 = vmatprep.subr.bf16.mxu0 %v22411_v56  ;;  %v22418_v0 = vld [vmem:[#allocation22 + $0x438] sm:$0xff]   ;;  %v22419_v56 = vld [vmem:[#allocation22 + $0x4c0] sm:$0xff]   ;;  %v17251_v21 = vmax.f32 %v24449_v20, %v17252_v44  ;;  %v24458_v58 = vadd.f32 %v13176_v35, %v24340_v52  ;;  %v13348_v52 = vpack.c.bf16 %v24449_v20, %v24449_v20  ;;  %v22425_v44 = vld [vmem:[#allocation22 + $0x488] sm:$0xff]  }
 0x8c4   :  { %20314 = vmatprep.subr.bf16.mxu1 %v22412_v55  ;;  %v22420_v55 = vld [vmem:[#allocation22 + $0x540] sm:$0xff]   ;;  %v22423_v40 = vld [vmem:[#allocation22 + $0x4c8] sm:$0xff]   ;;  %v24466_v48 = vadd.f32 %v13180_v46, %v24338_v50  ;;  %v22427_v50 = vld [vmem:[#allocation22 + $0x4d0] sm:$0xff]  }
 0x8c6   :  { %20293 = vmatpush3.bf16.msra.mxu0 %v22413_v18  ;;  %v17253_v18 = vmax.f32 %v24452_v53, %v17251_v21  ;;  %v22429_v21 = vld [vmem:[#allocation22 + $0x490] sm:$0xff]  }
 0x8c7   :  { %20315 = vmatpush3.bf16.msra.mxu1 %v22414_v17  ;;  %20294 = vmatprep.subr.bf16.mxu0 %v22415_v32  ;;  %v22424_v17 = vld [vmem:[#allocation22 + $0x548] sm:$0xff]   ;;  %v24470_v32 = vld [vmem:[#allocation21 + $0x18] sm:$0xff] }
 0x8c8   :  { %20316 = vmatprep.subr.bf16.mxu1 %v22416_v42  ;;  %v13350_v42 = vpack.c.bf16 %v24458_v58, %v24458_v58  ;;  %v17254_v35 = vmax.f32 %v24466_v48, %v17253_v18  ;;  %v22432_v18 = vld [vmem:[#allocation22 + $0x558] sm:$0xff]  }
 0x8ca   :  { %20295 = vmatpush3.bf16.msra.mxu0 %v22417_v19  ;;  %v22426_v19 = vld [vmem:[#allocation22 + $0x508] sm:$0xff]   ;;  %v17256_v46 = vmax.f32 %v24458_v58, %v17254_v35 }
 0x8cb   :  { %20317 = vmatpush3.bf16.msra.mxu1 %v22418_v0  ;;  %20324 = vmatprep.subr.bf16.mxu0 %v22419_v56  ;;  %v22428_v0 = vld [vmem:[#allocation22 + $0x550] sm:$0xff]   ;;  %v13184_v56 = vrot.slane %v24389_v59, %v25471_v28  ;;  %v22433_v59 = vld [vmem:[#allocation22 + $0x498] sm:$0xff]  }
 0x8cc   :  { %20346 = vmatprep.subr.bf16.mxu1 %v22420_v55  ;;  %v13188_v55 = vrot.slane %v24470_v32, %v25473_v45 }
 0x8cd   :  { %16242 = vmatmul.mubr.bf16.vlgmr.msra.gmra.mrb[180].mxu0 %v13343_v57  ;;  %v22431_v57 = vld [vmem:[#allocation22 + $0x4d8] sm:$0xff]  }
 0x8ce   :  { %16282 = vmatmul.mubr.bf16.vlgmr.msra.gmra.mrb[180].mxu1 %v13345_v26  ;;  %20325 = vmatpush3.bf16.msra.mxu0 %v22421_v13  ;;  %v22430_v13 = vld [vmem:[#allocation22 + $0x510] sm:$0xff]   ;;  %v24484_v26 = vadd.f32 %v13188_v55, %v24377_v3 }
 0x8cf   :  { %16321 = vmatprep.mubr.bf16.mxu0 %v13348_v52  ;;  %20347 = vmatpush3.bf16.msra.mxu1 %v22422_v11  ;;  %v24481_v11 = vadd.f32 %v13184_v56, %v24342_v7  ;;  %v13196_v52 = vrot.slane %v24470_v32, %v25476_v47  ;;  %v22437_v7 = vld [vmem:[#allocation22 + $0x4a0] sm:$0xff]   ;;  %v22440_v56 = vld [vmem:[#allocation22 + $0x568] sm:$0xff]  }
 0x8d0   :  { %16361 = vmatprep.mubr.bf16.mxu1 %v13350_v42  ;;  %20326 = vmatprep.subr.bf16.mxu0 %v22423_v40  ;;  %v22435_v42 = vld [vmem:[#allocation22 + $0x4e0] sm:$0xff]  }
 0x8d1   :  { %20348 = vmatprep.subr.bf16.mxu1 %v22424_v17  ;;  %v17255_v40 = vmax.f32 %v24481_v11, %v17256_v46  ;;  %v22434_v17 = vld [vmem:[#allocation22 + $0x518] sm:$0xff]   ;;  %v24491_v3 = vadd.f32 %v13196_v52, %v24379_v34  ;;  %v13200_v34 = vrot.slane %v24470_v32, %v25474_v10  ;;  %v22444_v52 = vld [vmem:[#allocation22 + $0x570] sm:$0xff]  }
 0x8d2   :  { %20327 = vmatpush3.bf16.msra.mxu0 %v22425_v44  ;;  %v22436_v44 = vld [vmem:[#allocation22 + $0x560] sm:$0xff]  }
 0x8d3   :  { %20349 = vmatpush3.bf16.msra.mxu1 %v22426_v19  ;;  %20328 = vmatprep.subr.bf16.mxu0 %v22427_v50  ;;  %v17257_v35 = vmax.f32 %v24484_v26, %v17255_v40  ;;  %v13192_v19 = vrot.slane %v24470_v32, %v25472_v54  ;;  %v22438_v50 = vld [vmem:[#allocation22 + $0x520] sm:$0xff]  }
 0x8d4   :  { %20350 = vmatprep.subr.bf16.mxu1 %v22428_v0  ;;  %v22439_v0 = vld [vmem:[#allocation22 + $0x4e8] sm:$0xff]  }
 0x8d5   :  { %v17258_v55 = vmax.f32 %v24491_v3, %v17257_v35  ;;  %v24497_v46 = vadd.f32 %v13192_v19, %v24382_v8  ;;  %v24513_v19 = vadd.f32 %v13200_v34, %v24384_v62  ;;  %v22451_v34 = vld [vmem:[#allocation22 + $0x5c0] sm:$0xff]  }
 0x8d6   :  { %20329 = vmatpush3.bf16.msra.mxu0 %v22429_v21  ;;  %v22441_v21 = vld [vmem:[#allocation22 + $0x4a8] sm:$0xff]  }
 0x8d7   :  { %20351 = vmatpush3.bf16.msra.mxu1 %v22430_v13  ;;  %20330 = vmatprep.subr.bf16.mxu0 %v22431_v57  ;;  %v13204_v13 = vrot.slane %v24470_v32, %v25477_v63  ;;  %v22442_v57 = vld [vmem:[#allocation22 + $0x528] sm:$0xff]  }
 0x8d8   :  { %20352 = vmatprep.subr.bf16.mxu1 %v22432_v18  ;;  %v22443_v18 = vld [vmem:[#allocation22 + $0x4f0] sm:$0xff]  }
 0x8da   :  { %20331 = vmatpush3.bf16.msra.mxu0 %v22433_v59 }
 0x8db   :  { %20353 = vmatpush3.bf16.msra.mxu1 %v22434_v17  ;;  %20332 = vmatprep.subr.bf16.mxu0 %v22435_v42  ;;  %v17260_v17 = vmax.f32 %v24497_v46, %v17258_v55  ;;  %v22447_v55 = vld [vmem:[#allocation22 + $0x4f8] sm:$0xff]  }
 0x8dc   :  { %20354 = vmatprep.subr.bf16.mxu1 %v22436_v44 }
 0x8dd   :  { %v17259_v16 = vmax.f32 %v24513_v19, %v17260_v17  ;;  %v22453_v17 = vld [vmem:[#allocation22 + $0x580] sm:$0xff]  }
 0x8de   :  { %20333 = vmatpush3.bf16.msra.mxu0 %v22437_v7  ;;  %v22445_v7 = vld [vmem:[#allocation22 + $0x4b0] sm:$0xff]  }
 0x8df   :  { %20355 = vmatpush3.bf16.msra.mxu1 %v22438_v50  ;;  %20334 = vmatprep.subr.bf16.mxu0 %v22439_v0  ;;  %v24516_v50 = vadd.f32 %v13204_v13, %v24432_v14  ;;  %v22450_v14 = vld [vmem:[#allocation22 + $0x538] sm:$0xff]   ;;  %v22452_v13 = vld [vmem:[#allocation22 + $0x640] sm:$0xff]  }
 0x8e0   :  { %v24503_v59 = vpop.f32.mrb[156].mxu0  ;;  %v24505_v40 = vpop.f32.mrb[156].mxu1  ;;  %20356 = vmatprep.subr.bf16.mxu1 %v22440_v56 }
 0x8e1   :  { %v24508_v8 = vpop.f32.mrb[157].mxu0  ;;  %v24510_v42 = vpop.f32.mrb[157].mxu1  ;;  %v17261_v62 = vmax.f32 %v24516_v50, %v17259_v16  ;;  %v22454_v16 = vld [vmem:[#allocation22 + $0x600] sm:$0xff]  }
 0x8e2   :  { %v12913_v44 = vpop.f32.mrb[158].mxu0  ;;  %v12954_v35 = vpop.f32.mrb[158].mxu1  ;;  %20335 = vmatpush3.bf16.msra.mxu0 %v22441_v21  ;;  %v13212_v21 = vrot.slane %v24470_v32, %v25470_v12 }
 0x8e3   :  { %20357 = vmatpush3.bf16.msra.mxu1 %v22442_v57  ;;  %v12914_v0 = vpop.f32.mrb[159].mxu0  ;;  %v12955_v56 = vpop.f32.mrb[159].mxu1  ;;  %20336 = vmatprep.subr.bf16.mxu0 %v22443_v18  ;;  %v22449_v44 = vld [vmem:[#allocation22 + $0x4b8] sm:$0xff]   ;;  %v13208_v18 = vrot.slane %v24470_v32, %v25475_v31  ;;  %v13347_v35 = vpack.c.bf16 %v24430_v9, %v24430_v9 }
 0x8e4   :  { %20358 = vmatprep.subr.bf16.mxu1 %v22444_v52  ;;  %v24523_v57 = vadd.f32 %v13212_v21, %v24434_v41  ;;  %v24527_v52 = vld [vmem:[#allocation21 + $0x20] sm:$0xff]  ;;  %v22455_v41 = vld [vmem:[#allocation22 + $0x5c8] sm:$0xff]   ;;  %v13216_v0 = vrot.slane %v24470_v32, %v25471_v28  ;;  %v22459_v32 = vld [vmem:[#allocation22 + $0x5d0] sm:$0xff]  }
 0x8e5   :  { %v13220_v56 = vrot.slane %v24527_v52, %v25473_v45  ;;  %v22456_v21 = vld [vmem:[#allocation22 + $0x648] sm:$0xff]   ;;  %v22460_v45 = vld [vmem:[#allocation22 + $0x650] sm:$0xff]  }
 0x8e6   :  { %20337 = vmatpush3.bf16.msra.mxu0 %v22445_v7  ;;  %v24535_v7 = vadd.f32 %v13208_v18, %v24437_v49  ;;  %v22461_v18 = vld [vmem:[#allocation22 + $0x590] sm:$0xff]  }
 0x8e7   :  { %20359 = vmatpush3.bf16.msra.mxu1 %v22446_v51  ;;  %20338 = vmatprep.subr.bf16.mxu0 %v22447_v55  ;;  %v17262_v51 = vmax.f32 %v24523_v57, %v17261_v62  ;;  %v13352_v55 = vpack.c.bf16 %v24481_v11, %v24481_v11  ;;  %v22457_v62 = vld [vmem:[#allocation22 + $0x588] sm:$0xff]  }
 0x8e8   :  { %20360 = vmatprep.subr.bf16.mxu1 %v22448_v43  ;;  %v13349_v43 = vpack.c.bf16 %v24452_v53, %v24452_v53 }
 0x8e9   :  { %v17264_v49 = vmax.f32 %v24535_v7, %v17262_v51  ;;  %v22462_v51 = vld [vmem:[#allocation22 + $0x610] sm:$0xff]  }
 0x8ea   :  { %20339 = vmatpush3.bf16.msra.mxu0 %v22449_v44  ;;  %v13354_v44 = vpack.c.bf16 %v24497_v46, %v24497_v46 }
 0x8eb   :  { %20361 = vmatpush3.bf16.msra.mxu1 %v22450_v14  ;;  %20368 = vmatprep.subr.bf16.mxu0 %v22451_v34  ;;  %v22458_v14 = vld [vmem:[#allocation22 + $0x608] sm:$0xff]   ;;  %v24547_v34 = vadd.f32 %v13216_v0, %v24439_v24  ;;  %v13224_v0 = vrot.slane %v24527_v52, %v25472_v54 }
 0x8ec   :  { %20390 = vmatprep.subr.bf16.mxu1 %v22452_v13  ;;  %v24550_v13 = vadd.f32 %v13220_v56, %v24503_v59  ;;  %v22466_v56 = vld [vmem:[#allocation22 + $0x618] sm:$0xff]   ;;  %v22471_v54 = vld [vmem:[#allocation22 + $0x5e8] sm:$0xff]  }
 0x8ed   :  { %16322 = vmatmul.mubr.bf16.vlgmr.msra.gmra.mrb[184].mxu0 %v13347_v35  ;;  %v13228_v35 = vrot.slane %v24527_v52, %v25476_v47  ;;  %v22467_v47 = vld [vmem:[#allocation22 + $0x5e0] sm:$0xff]  }
 0x8ee   :  { %16362 = vmatmul.mubr.bf16.vlgmr.msra.gmra.mrb[184].mxu1 %v13349_v43  ;;  %20369 = vmatpush3.bf16.msra.mxu0 %v22453_v17  ;;  %v17263_v17 = vmax.f32 %v24547_v34, %v17264_v49  ;;  %v22464_v43 = vld [vmem:[#allocation22 + $0x658] sm:$0xff]   ;;  %v22470_v49 = vld [vmem:[#allocation22 + $0x620] sm:$0xff]  }
 0x8ef   :  { %16401 = vmatprep.mubr.bf16.mxu0 %v13352_v55  ;;  %20391 = vmatpush3.bf16.msra.mxu1 %v22454_v16  ;;  %v22463_v16 = vld [vmem:[#allocation22 + $0x5d8] sm:$0xff]   ;;  %v24557_v59 = vadd.f32 %v13228_v35, %v24505_v40  ;;  %v22468_v55 = vld [vmem:[#allocation22 + $0x660] sm:$0xff]   ;;  %v13232_v40 = vrot.slane %v24527_v52, %v25474_v10  ;;  %v13244_v10 = vrot.slane %v24527_v52, %v25470_v12  ;;  %v22475_v35 = vld [vmem:[#allocation22 + $0x5f0] sm:$0xff]  }
 0x8f0   :  { %16441 = vmatprep.mubr.bf16.mxu1 %v13354_v44  ;;  %20370 = vmatprep.subr.bf16.mxu0 %v22455_v41  ;;  %v17265_v24 = vmax.f32 %v24550_v13, %v17263_v17  ;;  %v22465_v41 = vld [vmem:[#allocation22 + $0x598] sm:$0xff]   ;;  %v22469_v44 = vld [vmem:[#allocation22 + $0x5a0] sm:$0xff]  }
 0x8f1   :  { %20392 = vmatprep.subr.bf16.mxu1 %v22456_v21  ;;  %v24571_v17 = vadd.f32 %v13232_v40, %v24510_v42 }
 0x8f2   :  { %20371 = vmatpush3.bf16.msra.mxu0 %v22457_v62  ;;  %v17269_v21 = vmax.f32 %v17265_v24, %v24557_v59  ;;  %v24563_v62 = vadd.f32 %v13224_v0, %v24508_v8  ;;  %v22474_v8 = vld [vmem:[#allocation22 + $0x628] sm:$0xff]   ;;  %v22476_v24 = vld [vmem:[#allocation22 + $0x670] sm:$0xff]   ;;  %v13240_v0 = vrot.slane %v24527_v52, %v25475_v31 }
 0x8f3   :  { %20393 = vmatpush3.bf16.msra.mxu1 %v22458_v14  ;;  %20372 = vmatprep.subr.bf16.mxu0 %v22459_v32  ;;  %v22472_v14 = vld [vmem:[#allocation22 + $0x668] sm:$0xff]  }
 0x8f4   :  { %20394 = vmatprep.subr.bf16.mxu1 %v22460_v45  ;;  %v17266_v32 = vmax.f32 %v24563_v62, %v17269_v21  ;;  %v13236_v45 = vrot.slane %v24527_v52, %v25477_v63 }
 0x8f6   :  { %20373 = vmatpush3.bf16.msra.mxu0 %v22461_v18  ;;  %v22473_v18 = vld [vmem:[#allocation22 + $0x5a8] sm:$0xff]   ;;  %v17267_v63 = vmax.f32 %v24571_v17, %v17266_v32  ;;  %v22480_v32 = vld [vmem:[#allocation22 + $0x678] sm:$0xff]  }
 0x8f7   :  { %20395 = vmatpush3.bf16.msra.mxu1 %v22462_v51  ;;  %20374 = vmatprep.subr.bf16.mxu0 %v22463_v16 }
 0x8f8   :  { %20396 = vmatprep.subr.bf16.mxu1 %v22464_v43  ;;  %v13248_v43 = vrot.slane %v24527_v52, %v25471_v28 }
 0x8fa   :  { %20375 = vmatpush3.bf16.msra.mxu0 %v22465_v41 }
 0x8fb   :  { %20397 = vmatpush3.bf16.msra.mxu1 %v22466_v56  ;;  %20376 = vmatprep.subr.bf16.mxu0 %v22467_v47 }
 0x8fc   :  { %20398 = vmatprep.subr.bf16.mxu1 %v22468_v55  ;;  %v22477_v55 = vld [vmem:[#allocation22 + $0x5b0] sm:$0xff]  }
 0x8fe   :  { %20377 = vmatpush3.bf16.msra.mxu0 %v22469_v44 }
 0x8ff   :  { %20399 = vmatpush3.bf16.msra.mxu1 %v22470_v49  ;;  %20378 = vmatprep.subr.bf16.mxu0 %v22471_v54  ;;  %v22478_v49 = vld [vmem:[#allocation22 + $0x630] sm:$0xff]   ;;  %v22479_v54 = vld [vmem:[#allocation22 + $0x5f8] sm:$0xff]  }
 0x900   :  { %v12991_v51 = vpop.f32.mrb[160].mxu0  ;;  %v13032_v16 = vpop.f32.mrb[160].mxu1  ;;  %20400 = vmatprep.subr.bf16.mxu1 %v22472_v14 }
 0x901   :  { %v24578_v41 = vadd.f32 %v13236_v45, %v12991_v51  ;;  %v12993_v42 = vpop.f32.mrb[161].mxu0  ;;  %v13034_v56 = vpop.f32.mrb[161].mxu1  ;;  %v24583_v44 = vadd.f32 %v13244_v10, %v13032_v16  ;;  %v25478_v45 = vld [vmem:[#allocation85_spill] sm:$0xff]  ;;  %v22483_v51 = vld [vmem:[#allocation22 + $0x6c0] sm:$0xff]  }
 0x902   :  { %v12995_v12 = vpop.f32.mrb[162].mxu0  ;;  %v13036_v47 = vpop.f32.mrb[162].mxu1  ;;  %20379 = vmatpush3.bf16.msra.mxu0 %v22473_v18  ;;  %v24585_v14 = vadd.f32 %v13248_v43, %v13034_v56  ;;  %v24588_v52 = vadd.f32 %v13240_v0, %v12993_v42  ;;  %vm17193_vm4 = vcmp.lt.s32.totalorder %v25478_v45, 5005  ;;  %v22481_v18 = vld [vmem:[#allocation22 + $0x5b8] sm:$0xff]   ;;  %v22484_v16 = vld [vmem:[#allocation22 + $0x740] sm:$0xff]   ;;  %v13353_v0 = vpack.c.bf16 %v24484_v26, %v24484_v26  ;;  %v22494_v45 = vld [vmem:[#allocation22 + $0x710] sm:$0xff]  }
 0x903   :  { %v17268_v21 = vmax.f32 %v24578_v41, %v17267_v63  ;;  %20401 = vmatpush3.bf16.msra.mxu1 %v22474_v8  ;;  %v12996_v28 = vpop.f32.mrb[163].mxu0  ;;  %v13037_v40 = vpop.f32.mrb[163].mxu1  ;;  %20380 = vmatprep.subr.bf16.mxu0 %v22475_v35  ;;  %v22482_v8 = vld [vmem:[#allocation22 + $0x638] sm:$0xff]   ;;  %v13351_v63 = vpack.c.bf16 %v24466_v48, %v24466_v48  ;;  %v22486_v42 = vld [vmem:[#allocation22 + $0x700] sm:$0xff]   ;;  %v13356_v12 = vpack.c.bf16 %v24513_v19, %v24513_v19  ;;  %v22487_v47 = vld [vmem:[#allocation22 + $0x6c8] sm:$0xff]  }
 0x904   :  { %20402 = vmatprep.subr.bf16.mxu1 %v22476_v24  ;;  %v24593_v35 = vsel %vm17193_vm4, %v24585_v14, -1e+30  ;;  %v22485_v24 = vld [vmem:[#allocation22 + $0x680] sm:$0xff]   ;;  %v22489_v28 = vld [vmem:[#allocation22 + $0x688] sm:$0xff]  }
 0x905   :  { %v17270_v31 = vmax.f32 %v24583_v44, %v17268_v21  ;;  %v25479_v56 = vld [vmem:[#allocation83_spill] sm:$0xff]  ;;  %v13358_v21 = vpack.c.bf16 %v24535_v7, %v24535_v7 }
 0x906   :  { %20381 = vmatpush3.bf16.msra.mxu0 %v22477_v55  ;;  %vm17142_vm5 = vcmp.lt.s32.totalorder %v25479_v56, 100  ;;  %v22488_v55 = vld [vmem:[#allocation22 + $0x748] sm:$0xff]  }
 0x907   :  { %v17271_v10 = vmax.f32 %v24588_v52, %v17270_v31  ;;  %20403 = vmatpush3.bf16.msra.mxu1 %v22478_v49  ;;  %20382 = vmatprep.subr.bf16.mxu0 %v22479_v54  ;;  %v24608_v40 = vsel %vm17142_vm5, %v24118_v2, -1e+30  ;;  %v22490_v49 = vld [vmem:[#allocation22 + $0x708] sm:$0xff]   ;;  %v22491_v54 = vld [vmem:[#allocation22 + $0x6d0] sm:$0xff]   ;;  %v22498_v2 = vld [vmem:[#allocation22 + $0x718] sm:$0xff]  }
 0x908   :  { %20404 = vmatprep.subr.bf16.mxu1 %v22480_v32  ;;  %v22492_v32 = vld [vmem:[#allocation22 + $0x750] sm:$0xff]  }
 0x909   :  { %v17272_v43 = vmax.f32 %v24593_v35, %v17271_v10  ;;  %v22493_v31 = vld [vmem:[#allocation22 + $0x690] sm:$0xff]   ;;  %v22496_v10 = vld [vmem:[#allocation22 + $0x758] sm:$0xff]  }
 0x90a   :  { %20383 = vmatpush3.bf16.msra.mxu0 %v22481_v18  ;;  %v22495_v18 = vld [vmem:[#allocation22 + $0x6d8] sm:$0xff]  }
 0x90b   :  { %20405 = vmatpush3.bf16.msra.mxu1 %v22482_v8  ;;  %17273 = vmax.xlane.f32.xlu1 %v17272_v43  ;;  %v22497_v8 = vld [vmem:[#allocation22 + $0x698] sm:$0xff]   ;;  %v22501_v43 = vld [vmem:[#allocation22 + $0x6a0] sm:$0xff]  }
 0x90c   :  { %20412 = vmatprep.subr.bf16.mxu0 %v22483_v51  ;;  %20434 = vmatprep.subr.bf16.mxu1 %v22484_v16  ;;  %v22499_v51 = vld [vmem:[#allocation22 + $0x6e0] sm:$0xff]  }
 0x90d   :  { %16402 = vmatmul.mubr.bf16.vlgmr.msra.gmra.mrb[188].mxu0 %v13351_v63  ;;  %v22500_v16 = vld [vmem:[#allocation22 + $0x760] sm:$0xff]   ;;  %v22503_v63 = vld [vmem:[#allocation22 + $0x6e8] sm:$0xff]  }
 0x90e   :  { %16442 = vmatmul.mubr.bf16.vlgmr.msra.gmra.mrb[188].mxu1 %v13353_v0  ;;  %20413 = vmatpush3.bf16.msra.mxu0 %v22485_v24  ;;  %v22502_v24 = vld [vmem:[#allocation22 + $0x720] sm:$0xff]   ;;  %v22505_v0 = vld [vmem:[#allocation22 + $0x6a8] sm:$0xff]  }
 0x90f   :  { %16481 = vmatprep.mubr.bf16.mxu0 %v13356_v12  ;;  %20435 = vmatpush3.bf16.msra.mxu1 %v22486_v42  ;;  %v22504_v42 = vld [vmem:[#allocation22 + $0x768] sm:$0xff]  }
 0x910   :  { %16521 = vmatprep.mubr.bf16.mxu1 %v13358_v21  ;;  %17144 = vmax.xlane.f32.xlu1 %v24608_v40  ;;  %v22506_v12 = vld [vmem:[#allocation22 + $0x728] sm:$0xff]  }
 0x911   :  { %20414 = vmatprep.subr.bf16.mxu0 %v22487_v47  ;;  %20436 = vmatprep.subr.bf16.mxu1 %v22488_v55  ;;  %v22507_v47 = vld [vmem:[#allocation22 + $0x6f0] sm:$0xff]  }
 0x912   :  { %20415 = vmatpush3.bf16.msra.mxu0 %v22489_v28  ;;  %v22508_v28 = vld [vmem:[#allocation22 + $0x770] sm:$0xff]  }
 0x913   :  { %20437 = vmatpush3.bf16.msra.mxu1 %v22490_v49  ;;  %20416 = vmatprep.subr.bf16.mxu0 %v22491_v54 }
 0x914   :  { %20438 = vmatprep.subr.bf16.mxu1 %v22492_v32 }
 0x916   :  { %20417 = vmatpush3.bf16.msra.mxu0 %v22493_v31 }
 0x917   :  { %20439 = vmatpush3.bf16.msra.mxu1 %v22494_v45  ;;  %20418 = vmatprep.subr.bf16.mxu0 %v22495_v18  ;;  %v22509_v18 = vld [vmem:[#allocation22 + $0x6b0] sm:$0xff]  }
 0x918   :  { %20440 = vmatprep.subr.bf16.mxu1 %v22496_v10 }
 0x91a   :  { %20419 = vmatpush3.bf16.msra.mxu0 %v22497_v8 }
 0x91b   :  { %20441 = vmatpush3.bf16.msra.mxu1 %v22498_v2  ;;  %20420 = vmatprep.subr.bf16.mxu0 %v22499_v51  ;;  %v22510_v2 = vld [vmem:[#allocation22 + $0x730] sm:$0xff]   ;;  %v22511_v51 = vld [vmem:[#allocation22 + $0x6f8] sm:$0xff]  }
 0x91c   :  { %20442 = vmatprep.subr.bf16.mxu1 %v22500_v16  ;;  %v22512_v16 = vld [vmem:[#allocation22 + $0x778] sm:$0xff]  }
 0x91e   :  { %20421 = vmatpush3.bf16.msra.mxu0 %v22501_v43  ;;  %v22513_v43 = vld [vmem:[#allocation22 + $0x6b8] sm:$0xff]  }
 0x91f   :  { %20443 = vmatpush3.bf16.msra.mxu1 %v22502_v24  ;;  %20422 = vmatprep.subr.bf16.mxu0 %v22503_v63  ;;  %v22514_v24 = vld [vmem:[#allocation22 + $0x738] sm:$0xff]   ;;  %v22515_v63 = vld [vmem:[#allocation22 + $0x7c0] sm:$0xff]  }
 0x920   :  { %v24611_v55 = vpop.f32.mrb[164].mxu0  ;;  %v20142_v21 = vpop.f32.mrb[164].mxu1  ;;  %20444 = vmatprep.subr.bf16.mxu1 %v22504_v42  ;;  %v22516_v42 = vld [vmem:[#allocation22 + $0x840] sm:$0xff]  }
 0x921   :  { %25480 = vst [vmem:[#allocation91_spill] sm:$0xff] %v24611_v55  ;;  %v20624_v49 = vpop.f32.mrb[165].mxu0  ;;  %v20143_v54 = vpop.f32.mrb[165].mxu1  ;;  %v22577_v55 = vld [vmem:[#allocation22 + $0x8b8] sm:$0xff]  }
 0x922   :  { %v24613_v32 = vadd.f32 %v20143_v54, %v20142_v21  ;;  %v13076_v31 = vpop.f32.mrb[166].mxu0  ;;  %v20145_v45 = vpop.f32.mrb[166].mxu1  ;;  %20423 = vmatpush3.bf16.msra.mxu0 %v22505_v0  ;;  %v22517_v21 = vld [vmem:[#allocation22 + $0x780] sm:$0xff]   ;;  %v13355_v0 = vpack.c.bf16 %v24491_v3, %v24491_v3  ;;  %v13360_v49 = vpack.c.bf16 %v24547_v34, %v24547_v34  ;;  %v22520_v54 = vld [vmem:[#allocation22 + $0x848] sm:$0xff]  }
 0x923   :  { %20445 = vmatpush3.bf16.msra.mxu1 %v22506_v12  ;;  %v20625_v10 = vpop.f32.mrb[167].mxu0  ;;  %v20146_v8 = vpop.f32.mrb[167].mxu1  ;;  %20424 = vmatprep.subr.bf16.mxu0 %v22507_v47  ;;  %v22518_v12 = vld [vmem:[#allocation22 + $0x800] sm:$0xff]   ;;  %v13357_v47 = vpack.c.bf16 %v24516_v50, %v24516_v50  ;;  %v13362_v31 = vpack.c.bf16 %v24563_v62, %v24563_v62  ;;  %v22521_v45 = vld [vmem:[#allocation22 + $0x788] sm:$0xff]  }
 0x924   :  { %20446 = vmatprep.subr.bf16.mxu1 %v22508_v28  ;;  %v22519_v28 = vld [vmem:[#allocation22 + $0x7c8] sm:$0xff]   ;;  %v22523_v10 = vld [vmem:[#allocation22 + $0x7d0] sm:$0xff]  }
 0x925   :  { %v22524_v8 = vld [vmem:[#allocation22 + $0x850] sm:$0xff]  }
 0x926   :  { %20425 = vmatpush3.bf16.msra.mxu0 %v22509_v18  ;;  %v22522_v18 = vld [vmem:[#allocation22 + $0x808] sm:$0xff]  }
 0x927   :  { %20447 = vmatpush3.bf16.msra.mxu1 %v22510_v2  ;;  %20426 = vmatprep.subr.bf16.mxu0 %v22511_v51  ;;  %v22525_v2 = vld [vmem:[#allocation22 + $0x790] sm:$0xff]  }
 0x928   :  { %20448 = vmatprep.subr.bf16.mxu1 %v22512_v16  ;;  %v22526_v51 = vld [vmem:[#allocation22 + $0x810] sm:$0xff]   ;;  %v22527_v16 = vld [vmem:[#allocation22 + $0x7d8] sm:$0xff]  }
 0x92a   :  { %20427 = vmatpush3.bf16.msra.mxu0 %v22513_v43  ;;  %v22528_v43 = vld [vmem:[#allocation22 + $0x858] sm:$0xff]  }
 0x92b   :  { %20449 = vmatpush3.bf16.msra.mxu1 %v22514_v24  ;;  %20456 = vmatprep.subr.bf16.mxu0 %v22515_v63  ;;  %v22529_v24 = vld [vmem:[#allocation22 + $0x798] sm:$0xff]  }
 0x92c   :  { %20478 = vmatprep.subr.bf16.mxu1 %v22516_v42  ;;  %v22530_v63 = vld [vmem:[#allocation22 + $0x818] sm:$0xff]   ;;  %v22531_v42 = vld [vmem:[#allocation22 + $0x7e0] sm:$0xff]  }
 0x92d   :  { %16482 = vmatmul.mubr.bf16.vlgmr.msra.gmra.mrb[192].mxu0 %v13355_v0  ;;  %v22533_v0 = vld [vmem:[#allocation22 + $0x7a0] sm:$0xff]  }
 0x92e   :  { %16522 = vmatmul.mubr.bf16.vlgmr.msra.gmra.mrb[192].mxu1 %v13357_v47  ;;  %20457 = vmatpush3.bf16.msra.mxu0 %v22517_v21  ;;  %v22532_v21 = vld [vmem:[#allocation22 + $0x860] sm:$0xff]   ;;  %v22535_v47 = vld [vmem:[#allocation22 + $0x7e8] sm:$0xff]  }
 0x92f   :  { %16561 = vmatprep.mubr.bf16.mxu0 %v13360_v49  ;;  %20479 = vmatpush3.bf16.msra.mxu1 %v22518_v12  ;;  %v22534_v12 = vld [vmem:[#allocation22 + $0x820] sm:$0xff]   ;;  %v22537_v49 = vld [vmem:[#allocation22 + $0x7a8] sm:$0xff]  }
 0x930   :  { %16601 = vmatprep.mubr.bf16.mxu1 %v13362_v31  ;;  %20458 = vmatprep.subr.bf16.mxu0 %v22519_v28  ;;  %v22536_v28 = vld [vmem:[#allocation22 + $0x868] sm:$0xff]   ;;  %v22539_v31 = vld [vmem:[#allocation22 + $0x7f0] sm:$0xff]  }
 0x931   :  { %20480 = vmatprep.subr.bf16.mxu1 %v22520_v54  ;;  %v22538_v54 = vld [vmem:[#allocation22 + $0x828] sm:$0xff]  }
 0x932   :  { %20459 = vmatpush3.bf16.msra.mxu0 %v22521_v45 }
 0x933   :  { %20481 = vmatpush3.bf16.msra.mxu1 %v22522_v18  ;;  %20460 = vmatprep.subr.bf16.mxu0 %v22523_v10  ;;  %v22540_v18 = vld [vmem:[#allocation22 + $0x870] sm:$0xff]  }
 0x934   :  { %20482 = vmatprep.subr.bf16.mxu1 %v22524_v8 }
 0x936   :  { %20461 = vmatpush3.bf16.msra.mxu0 %v22525_v2 }
 0x937   :  { %20483 = vmatpush3.bf16.msra.mxu1 %v22526_v51  ;;  %20462 = vmatprep.subr.bf16.mxu0 %v22527_v16 }
 0x938   :  { %20484 = vmatprep.subr.bf16.mxu1 %v22528_v43  ;;  %v22541_v43 = vld [vmem:[#allocation22 + $0x7b0] sm:$0xff]  }
 0x93a   :  { %20463 = vmatpush3.bf16.msra.mxu0 %v22529_v24 }
 0x93b   :  { %20485 = vmatpush3.bf16.msra.mxu1 %v22530_v63  ;;  %20464 = vmatprep.subr.bf16.mxu0 %v22531_v42 }
 0x93c   :  { %20486 = vmatprep.subr.bf16.mxu1 %v22532_v21  ;;  %v22542_v21 = vld [vmem:[#allocation22 + $0x830] sm:$0xff]  }
 0x93e   :  { %20465 = vmatpush3.bf16.msra.mxu0 %v22533_v0  ;;  %v22543_v0 = vld [vmem:[#allocation22 + $0x7f8] sm:$0xff]  }
 0x93f   :  { %20487 = vmatpush3.bf16.msra.mxu1 %v22534_v12  ;;  %20466 = vmatprep.subr.bf16.mxu0 %v22535_v47 }
 0x940   :  { %v20164_v45 = vpop.f32.mrb[168].mxu0  ;;  %20488 = vmatprep.subr.bf16.mxu1 %v22536_v28  ;;  %v22544_v28 = vld [vmem:[#allocation22 + $0x878] sm:$0xff]  }
 0x941   :  { %v20186_v10 = vpop.f32.mrb[168].mxu1  ;;  %v20165_v8 = vpop.f32.mrb[169].mxu0 }
 0x942   :  { %v20166_v2 = vadd.f32 %v20165_v8, %v20164_v45  ;;  %v20187_v51 = vpop.f32.mrb[169].mxu1  ;;  %v20167_v16 = vpop.f32.mrb[170].mxu0  ;;  %20467 = vmatpush3.bf16.msra.mxu0 %v22537_v49  ;;  %v22545_v45 = vld [vmem:[#allocation22 + $0x7b8] sm:$0xff]   ;;  %v22547_v8 = vld [vmem:[#allocation22 + $0x8c0] sm:$0xff]  }
 0x943   :  { %v20188_v24 = vadd.f32 %v20187_v51, %v20186_v10  ;;  %v20189_v63 = vpop.f32.mrb[170].mxu1  ;;  %20489 = vmatpush3.bf16.msra.mxu1 %v22538_v54  ;;  %v20168_v42 = vpop.f32.mrb[171].mxu0  ;;  %20468 = vmatprep.subr.bf16.mxu0 %v22539_v31  ;;  %v22546_v49 = vld [vmem:[#allocation22 + $0x838] sm:$0xff]   ;;  %v22548_v10 = vld [vmem:[#allocation22 + $0x940] sm:$0xff]   ;;  %v13359_v31 = vpack.c.bf16 %v24523_v57, %v24523_v57  ;;  %v13364_v51 = vpack.c.bf16 %v24571_v17, %v24571_v17  ;;  %v22552_v16 = vld [vmem:[#allocation22 + $0x948] sm:$0xff]  }
 0x944   :  { %v16004_v12 = vadd.f32 %v20166_v2, %v24613_v32  ;;  %v20190_v47 = vpop.f32.mrb[171].mxu1  ;;  %20490 = vmatprep.subr.bf16.mxu1 %v22540_v18  ;;  %v22549_v54 = vld [vmem:[#allocation22 + $0x880] sm:$0xff]   ;;  %v13361_v18 = vpack.c.bf16 %v24550_v13, %v24550_v13  ;;  %v22551_v2 = vld [vmem:[#allocation22 + $0x8c8] sm:$0xff]   ;;  %v22555_v42 = vld [vmem:[#allocation22 + $0x8d0] sm:$0xff]  }
 0x945   :  { %v22550_v32 = vld [vmem:[#allocation22 + $0x900] sm:$0xff]   ;;  %v22554_v63 = vld [vmem:[#allocation22 + $0x908] sm:$0xff]   ;;  %v22559_v47 = vld [vmem:[#allocation22 + $0x8d8] sm:$0xff]  }
 0x946   :  { %v24624_v56 = vadd.f32 %v20188_v24, %v16004_v12  ;;  %20469 = vmatpush3.bf16.msra.mxu0 %v22541_v43  ;;  %v13366_v43 = vpack.c.bf16 %v24588_v52, %v24588_v52  ;;  %v22553_v24 = vld [vmem:[#allocation22 + $0x888] sm:$0xff]   ;;  %v22558_v12 = vld [vmem:[#allocation22 + $0x910] sm:$0xff]  }
 0x947   :  { %20491 = vmatpush3.bf16.msra.mxu1 %v22542_v21  ;;  %20470 = vmatprep.subr.bf16.mxu0 %v22543_v0  ;;  %v22556_v21 = vld [vmem:[#allocation22 + $0x950] sm:$0xff]  }
 0x948   :  { %20492 = vmatprep.subr.bf16.mxu1 %v22544_v28  ;;  %v22557_v0 = vld [vmem:[#allocation22 + $0x890] sm:$0xff]   ;;  %v22560_v28 = vld [vmem:[#allocation22 + $0x958] sm:$0xff]  }
 0x94a   :  { %20471 = vmatpush3.bf16.msra.mxu0 %v22545_v45  ;;  %v22561_v45 = vld [vmem:[#allocation22 + $0x898] sm:$0xff]  }
 0x94b   :  { %20493 = vmatpush3.bf16.msra.mxu1 %v22546_v49  ;;  %20500 = vmatprep.subr.bf16.mxu0 %v22547_v8  ;;  %v22562_v49 = vld [vmem:[#allocation22 + $0x918] sm:$0xff]   ;;  %v22563_v8 = vld [vmem:[#allocation22 + $0x8e0] sm:$0xff]  }
 0x94c   :  { %20522 = vmatprep.subr.bf16.mxu1 %v22548_v10  ;;  %v22564_v10 = vld [vmem:[#allocation22 + $0x960] sm:$0xff]  }
 0x94d   :  { %16562 = vmatmul.mubr.bf16.vlgmr.msra.gmra.mrb[196].mxu0 %v13359_v31  ;;  %v22566_v31 = vld [vmem:[#allocation22 + $0x920] sm:$0xff]  }
 0x94e   :  { %16602 = vmatmul.mubr.bf16.vlgmr.msra.gmra.mrb[196].mxu1 %v13361_v18  ;;  %20501 = vmatpush3.bf16.msra.mxu0 %v22549_v54  ;;  %v22565_v54 = vld [vmem:[#allocation22 + $0x8a0] sm:$0xff]   ;;  %v22568_v18 = vld [vmem:[#allocation22 + $0x968] sm:$0xff]  }
 0x94f   :  { %16641 = vmatprep.mubr.bf16.mxu0 %v13364_v51  ;;  %20523 = vmatpush3.bf16.msra.mxu1 %v22550_v32  ;;  %v22567_v32 = vld [vmem:[#allocation22 + $0x8e8] sm:$0xff]  }
 0x950   :  { %16681 = vmatprep.mubr.bf16.mxu1 %v13366_v43  ;;  %20502 = vmatprep.subr.bf16.mxu0 %v22551_v2  ;;  %v22569_v2 = vld [vmem:[#allocation22 + $0x8a8] sm:$0xff]  }
 0x951   :  { %20524 = vmatprep.subr.bf16.mxu1 %v22552_v16  ;;  %v22570_v51 = vld [vmem:[#allocation22 + $0x928] sm:$0xff]   ;;  %v22571_v16 = vld [vmem:[#allocation22 + $0x8f0] sm:$0xff]  }
 0x952   :  { %20503 = vmatpush3.bf16.msra.mxu0 %v22553_v24  ;;  %v22572_v24 = vld [vmem:[#allocation22 + $0x970] sm:$0xff]  }
 0x953   :  { %20525 = vmatpush3.bf16.msra.mxu1 %v22554_v63  ;;  %20504 = vmatprep.subr.bf16.mxu0 %v22555_v42 }
 0x954   :  { %20526 = vmatprep.subr.bf16.mxu1 %v22556_v21 }
 0x956   :  { %20505 = vmatpush3.bf16.msra.mxu0 %v22557_v0 }
 0x957   :  { %20527 = vmatpush3.bf16.msra.mxu1 %v22558_v12  ;;  %20506 = vmatprep.subr.bf16.mxu0 %v22559_v47  ;;  %v22573_v47 = vld [vmem:[#allocation22 + $0x8b0] sm:$0xff]  }
 0x958   :  { %20528 = vmatprep.subr.bf16.mxu1 %v22560_v28 }
 0x95a   :  { %20507 = vmatpush3.bf16.msra.mxu0 %v22561_v45 }
 0x95b   :  { %20529 = vmatpush3.bf16.msra.mxu1 %v22562_v49  ;;  %20508 = vmatprep.subr.bf16.mxu0 %v22563_v8  ;;  %v22574_v8 = vld [vmem:[#allocation22 + $0x930] sm:$0xff]  }
 0x95c   :  { %20530 = vmatprep.subr.bf16.mxu1 %v22564_v10  ;;  %v22575_v10 = vld [vmem:[#allocation22 + $0x8f8] sm:$0xff]  }
 0x95e   :  { %20509 = vmatpush3.bf16.msra.mxu0 %v22565_v54 }
 0x95f   :  { %20531 = vmatpush3.bf16.msra.mxu1 %v22566_v31  ;;  %20510 = vmatprep.subr.bf16.mxu0 %v22567_v32  ;;  %v22576_v32 = vld [vmem:[#allocation22 + $0x978] sm:$0xff]  }
 0x960   :  { %v20208_v43 = vpop.f32.mrb[172].mxu0  ;;  %20532 = vmatprep.subr.bf16.mxu1 %v22568_v18 }
 0x961   :  { %v20230_v63 = vpop.f32.mrb[172].mxu1  ;;  %v20209_v42 = vpop.f32.mrb[173].mxu0 }
 0x962   :  { %v20210_v21 = vadd.f32 %v20209_v42, %v20208_v43  ;;  %v20231_v0 = vpop.f32.mrb[173].mxu1  ;;  %v20211_v12 = vpop.f32.mrb[174].mxu0  ;;  %20511 = vmatpush3.bf16.msra.mxu0 %v22569_v2  ;;  %v22578_v43 = vld [vmem:[#allocation22 + $0x938] sm:$0xff]   ;;  %v22579_v2 = vld [vmem:[#allocation22 + $0x9c0] sm:$0xff]   ;;  %v22582_v42 = vld [vmem:[#allocation22 + $0x988] sm:$0xff]  }
 0x963   :  { %v20232_v28 = vadd.f32 %v20231_v0, %v20230_v63  ;;  %v20233_v45 = vpop.f32.mrb[174].mxu1  ;;  %20533 = vmatpush3.bf16.msra.mxu1 %v22570_v51  ;;  %v20212_v49 = vpop.f32.mrb[175].mxu0  ;;  %20512 = vmatprep.subr.bf16.mxu0 %v22571_v16  ;;  %v22580_v63 = vld [vmem:[#allocation22 + $0x980] sm:$0xff]   ;;  %v13363_v51 = vpack.c.bf16 %v24557_v59, %v24557_v59  ;;  %v22581_v16 = vld [vmem:[#allocation22 + $0x9c8] sm:$0xff]   ;;  %v22585_v0 = vld [vmem:[#allocation22 + $0x9d8] sm:$0xff]  }
 0x964   :  { %v16084_v54 = vadd.f32 %v20210_v21, %v24624_v56  ;;  %v20234_v31 = vpop.f32.mrb[175].mxu1  ;;  %20534 = vmatprep.subr.bf16.mxu1 %v22572_v24  ;;  %v13365_v56 = vpack.c.bf16 %v24578_v41, %v24578_v41  ;;  %v13368_v24 = vpack.c.bf16 %v24585_v14, %v24585_v14  ;;  %v22584_v21 = vld [vmem:[#allocation22 + $0x990] sm:$0xff]   ;;  %v22586_v12 = vld [vmem:[#allocation22 + $0x998] sm:$0xff]   ;;  %v22589_v45 = vld [vmem:[#allocation22 + $0x9e8] sm:$0xff]  }
 0x965   :  { %v22590_v14 = vld [vmem:[#allocation22 + $0x9a8] sm:$0xff]   ;;  %v22591_v49 = vld [vmem:[#allocation22 + $0x9f0] sm:$0xff]  }
 0x966   :  { %v16124_v18 = vadd.f32 %v20232_v28, %v16084_v54  ;;  %20513 = vmatpush3.bf16.msra.mxu0 %v22573_v47  ;;  %v22587_v47 = vld [vmem:[#allocation22 + $0x9e0] sm:$0xff]  }
 0x967   :  { %20535 = vmatpush3.bf16.msra.mxu1 %v22574_v8  ;;  %20514 = vmatprep.subr.bf16.mxu0 %v22575_v10  ;;  %v22588_v28 = vld [vmem:[#allocation22 + $0x9a0] sm:$0xff]  }
 0x968   :  { %20536 = vmatprep.subr.bf16.mxu1 %v22576_v32 }
 0x96a   :  { %20515 = vmatpush3.bf16.msra.mxu0 %v22577_v55  ;;  %v22583_v55 = vld [vmem:[#allocation22 + $0x9d0] sm:$0xff]  }
 0x96b   :  { %20537 = vmatpush3.bf16.msra.mxu1 %v22578_v43  ;;  %20544 = vmatprep.subr.bf16.mxu0 %v22579_v2  ;;  %v22592_v2 = vld [vmem:[#allocation22 + $0x9b0] sm:$0xff]  }
 0x96d   :  { %16642 = vmatmul.mubr.bf16.vlgmr.msra.gmra.mrb[200].mxu0 %v13363_v51 }
 0x96e   :  { %16682 = vmatmul.mubr.bf16.vlgmr.msra.gmra.mrb[200].mxu1 %v13365_v56  ;;  %20545 = vmatpush3.bf16.msra.mxu0 %v22580_v63  ;;  %v22593_v56 = vld [vmem:[#allocation22 + $0x9f8] sm:$0xff]  }
 0x96f   :  { %16721 = vmatprep.mubr.bf16.mxu0 %v13368_v24  ;;  %20546 = vmatprep.subr.bf16.mxu0 %v22581_v16 }
 0x972   :  { %20547 = vmatpush3.bf16.msra.mxu0 %v22582_v42 }
 0x973   :  { %20548 = vmatprep.subr.bf16.mxu0 %v22583_v55 }
 0x976   :  { %20549 = vmatpush3.bf16.msra.mxu0 %v22584_v21  ;;  %v22594_v21 = vld [vmem:[#allocation22 + $0x9b8] sm:$0xff]  }
 0x977   :  { %20550 = vmatprep.subr.bf16.mxu0 %v22585_v0  ;;  %v13367_v0 = vpack.c.bf16 %v24583_v44, %v24583_v44 }
 0x97a   :  { %20551 = vmatpush3.bf16.msra.mxu0 %v22586_v12 }
 0x97b   :  { %20552 = vmatprep.subr.bf16.mxu0 %v22587_v47 }
 0x97e   :  { %20553 = vmatpush3.bf16.msra.mxu0 %v22588_v28 }
 0x97f   :  { %20554 = vmatprep.subr.bf16.mxu0 %v22589_v45 }
 0x980   :  { %v20252_v8 = vpop.f32.mrb[176].mxu0 }
 0x981   :  { %v20274_v10 = vpop.f32.mrb[176].mxu1  ;;  %v20253_v54 = vpop.f32.mrb[177].mxu0 }
 0x982   :  { %v20254_v31 = vadd.f32 %v20253_v54, %v20252_v8  ;;  %v20275_v32 = vpop.f32.mrb[177].mxu1  ;;  %v20255_v43 = vpop.f32.mrb[178].mxu0  ;;  %20555 = vmatpush3.bf16.msra.mxu0 %v22590_v14 }
 0x983   :  { %v20276_v63 = vadd.f32 %v20275_v32, %v20274_v10  ;;  %v20277_v51 = vpop.f32.mrb[178].mxu1  ;;  %v20256_v16 = vpop.f32.mrb[179].mxu0  ;;  %20556 = vmatprep.subr.bf16.mxu0 %v22591_v49 }
 0x984   :  { %v16164_v24 = vadd.f32 %v20254_v31, %v16124_v18  ;;  %v20278_v42 = vpop.f32.mrb[179].mxu1  ;;  %v24643_v43 = vpop.xlane.xlu0 %16898 }
 0x986   :  { %v16204_v55 = vadd.f32 %v20276_v63, %v16164_v24  ;;  %20557 = vmatpush3.bf16.msra.mxu0 %v22592_v2 }
 0x987   :  { %20558 = vmatprep.subr.bf16.mxu0 %v22593_v56 }
 0x98a   :  { %20559 = vmatpush3.bf16.msra.mxu0 %v22594_v21 }
 0x98d   :  { %16722 = vmatmul.mubr.bf16.vlgmr.msra.gmra.mrb[204].mxu0 %v13367_v0 }
 0x9a0   :  { %v20296_v12 = vpop.f32.mrb[180].mxu0 }
 0x9a1   :  { %v20318_v47 = vpop.f32.mrb[180].mxu1  ;;  %v20297_v28 = vpop.f32.mrb[181].mxu0 }
 0x9a2   :  { %v20298_v45 = vadd.f32 %v20297_v28, %v20296_v12  ;;  %v20319_v14 = vpop.f32.mrb[181].mxu1  ;;  %v20299_v8 = vpop.f32.mrb[182].mxu0  ;;  %v25481_v12 = vld [vmem:[#allocation51_spill] sm:$0xff] }
 0x9a3   :  { %v20320_v10 = vadd.f32 %v20319_v14, %v20318_v47  ;;  %v20321_v49 = vpop.f32.mrb[182].mxu1  ;;  %v20300_v54 = vpop.f32.mrb[183].mxu0  ;;  %v16900_v28 = vsub.f32 %v25481_v12, %v24643_v43 }
 0x9a4   :  { %v16244_v18 = vadd.f32 %v20298_v45, %v16204_v55  ;;  %v20322_v31 = vpop.f32.mrb[183].mxu1  ;;  %v24647_v47 = vpop.xlane.xlu1 %17273  ;;  %v25482_v45 = vld [vmem:[#allocation46_spill] sm:$0xff] }
 0x9a5   :  { %v16901_v8 = vsub.f32 %v25482_v45, %v24643_v43  ;;  %v16940_v49 = vmul.f32 1.442695, %v16900_v28  ;;  %v17275_v54 = vsub.f32 %v24289_v1, %v24647_v47  ;;  %v17276_v31 = vsub.f32 %v24255_v5, %v24647_v47  ;;  %v25485_v1 = vld [vmem:[#allocation57_spill] sm:$0xff] }
 0x9a6   :  { %v16284_v32 = vadd.f32 %v20320_v10, %v16244_v18 }
 0x9a7   :  { %v16942_v18 = vmul.f32 1.442695, %v16901_v8  ;;  %22595 = vpow2.f32 %v16940_v49 }
 0x9a9   :  { %22597 = vpow2.f32 %v16942_v18  ;;  %v25488_v18 = vld [vmem:[#allocation43_spill] sm:$0xff] }
 0x9b1   :  { %v24667_v28 = vpop.eup %22595 }
 0x9b3   :  { %v24671_v8 = vpop.eup %22597 }
 0x9c0   :  { %v20340_v2 = vpop.f32.mrb[184].mxu0 }
 0x9c1   :  { %v20362_v63 = vpop.f32.mrb[184].mxu1  ;;  %v20341_v51 = vpop.f32.mrb[185].mxu0 }
 0x9c2   :  { %v20342_v16 = vadd.f32 %v20341_v51, %v20340_v2  ;;  %v20363_v56 = vpop.f32.mrb[185].mxu1  ;;  %v20343_v24 = vpop.f32.mrb[186].mxu0  ;;  %v25483_v2 = vld [vmem:[#allocation56_spill] sm:$0xff]  ;;  %v17315_v51 = vmul.f32 1.442695, %v17275_v54 }
 0x9c3   :  { %v20364_v42 = vadd.f32 %v20363_v56, %v20362_v63  ;;  %v20365_v21 = vpop.f32.mrb[186].mxu1  ;;  %v20344_v0 = vpop.f32.mrb[187].mxu0  ;;  %v16902_v63 = vsub.f32 %v25483_v2, %v24643_v43  ;;  %v17020_v2 = vadd.f32 %v24671_v8, %v24667_v28 }
 0x9c4   :  { %v16324_v14 = vadd.f32 %v20342_v16, %v16284_v32  ;;  %v20366_v55 = vpop.f32.mrb[187].mxu1  ;;  %v17317_v32 = vmul.f32 1.442695, %v17276_v31  ;;  %v25484_v16 = vld [vmem:[#allocation52_spill] sm:$0xff]  ;;  %22599 = vpow2.f32 %v17315_v51  ;;  %v16904_v21 = vsub.f32 %v25485_v1, %v24643_v43 }
 0x9c5   :  { %v16903_v56 = vsub.f32 %v25484_v16, %v24643_v43  ;;  %v16944_v24 = vmul.f32 1.442695, %v16902_v63  ;;  %v17278_v0 = vsub.f32 %v24293_v15, %v24647_v47  ;;  %v16906_v15 = vsub.f32 %v25488_v18, %v24643_v43  ;;  %v25491_v16 = vld [vmem:[#allocation44_spill] sm:$0xff] }
 0x9c6   :  { %v24651_v10 = vadd.f32 %v20364_v42, %v16324_v14  ;;  %v17277_v42 = vsub.f32 %v24320_v27, %v24647_v47  ;;  %22601 = vpow2.f32 %v17317_v32  ;;  %v25486_v14 = vld [vmem:[#allocation53_spill] sm:$0xff]  ;;  %v16948_v45 = vmul.f32 1.442695, %v16904_v21 }
 0x9c7   :  { %v16946_v5 = vmul.f32 1.442695, %v16903_v56  ;;  %22603 = vpow2.f32 %v16944_v24  ;;  %v16905_v55 = vsub.f32 %v25486_v14, %v24643_v43  ;;  %v17279_v27 = vsub.f32 %v24323_v36, %v24647_v47  ;;  %v25493_v14 = vld [vmem:[#allocation59_spill] sm:$0xff] }
 0x9c8   :  { %v17319_v12 = vmul.f32 1.442695, %v17277_v42  ;;  %v17321_v49 = vmul.f32 1.442695, %v17278_v0  ;;  %v17280_v51 = vsub.f32 %v24296_v4, %v24647_v47  ;;  %v16907_v56 = vsub.f32 %v25491_v16, %v24643_v43 }
 0x9c9   :  { %22605 = vpow2.f32 %v16946_v5  ;;  %v16950_v31 = vmul.f32 1.442695, %v16905_v55  ;;  %v17323_v32 = vmul.f32 1.442695, %v17279_v27  ;;  %v16952_v24 = vmul.f32 1.442695, %v16906_v15 }
 0x9ca   :  { %22607 = vpow2.f32 %v17319_v12  ;;  %v17281_v21 = vsub.f32 %v24234_v33, %v24647_v47  ;;  %v17325_v5 = vmul.f32 1.442695, %v17280_v51  ;;  %v16908_v55 = vsub.f32 %v25493_v14, %v24643_v43 }
 0x9cb   :  { %22609 = vpow2.f32 %v16948_v45  ;;  %v17282_v51 = vsub.f32 %v24238_v37, %v24647_v47 }
 0x9cc   :  { %22611 = vpow2.f32 %v17321_v49  ;;  %v16954_v49 = vmul.f32 1.442695, %v16907_v56 }
 0x9cd   :  { %22613 = vpow2.f32 %v16950_v31 }
 0x9ce   :  { %v24675_v54 = vpop.eup %22599  ;;  %22615 = vpow2.f32 %v17323_v32  ;;  %v17327_v32 = vmul.f32 1.442695, %v17281_v21 }
 0x9cf   :  { %25487 = vst [vmem:[#allocation41_spill] sm:$0xff] %v24675_v54  ;;  %22617 = vpow2.f32 %v16952_v24 }
 0x9d0   :  { %v24681_v63 = vpop.eup %22601  ;;  %22619 = vpow2.f32 %v17325_v5  ;;  %v17283_v5 = vsub.f32 %v24351_v61, %v24647_v47 }
 0x9d1   :  { %25489 = vst [vmem:[#allocation42_spill] sm:$0xff] %v24681_v63  ;;  %v24685_v36 = vpop.eup %22603  ;;  %v17395_v1 = vadd.f32 %v24681_v63, %v24675_v54  ;;  %22621 = vpow2.f32 %v16954_v49 }
 0x9d2   :  { %25490 = vst [vmem:[#allocation45_spill] sm:$0xff] %v24685_v36  ;;  %v17021_v42 = vadd.f32 %v24685_v36, %v17020_v2  ;;  %22623 = vpow2.f32 %v17327_v32  ;;  %v17331_v61 = vmul.f32 1.442695, %v17283_v5 }
 0x9d3   :  { %v24694_v4 = vpop.eup %22605 }
 0x9d4   :  { %v24696_v0 = vpop.eup %22607  ;;  %v17022_v18 = vadd.f32 %v24694_v4, %v17021_v42  ;;  %v25495_v42 = vld [vmem:[#allocation58_spill] sm:$0xff] }
 0x9d5   :  { %25492 = vst [vmem:[#allocation47_spill] sm:$0xff] %v24696_v0  ;;  %v17396_v15 = vadd.f32 %v24696_v0, %v17395_v1  ;;  %v24704_v16 = vpop.eup %22609  ;;  %v16909_v1 = vsub.f32 %v25495_v42, %v24643_v43  ;;  %v17285_v42 = vsub.f32 %v24387_v6, %v24647_v47 }
 0x9d6   :  { %v24706_v36 = vpop.eup %22611 }
 0x9d7   :  { %25494 = vst [vmem:[#allocation48_spill] sm:$0xff] %v24706_v36  ;;  %v17397_v37 = vadd.f32 %v24706_v36, %v17396_v15  ;;  %v17335_v6 = vmul.f32 1.442695, %v17285_v42  ;;  %v25505_v42 = vld [vmem:[#allocation50_spill] sm:$0xff] }
 0x9e0   :  { %v20384_v12 = vpop.f32.mrb[188].mxu0 }
 0x9e1   :  { %v20406_v45 = vpop.f32.mrb[188].mxu1  ;;  %v20385_v27 = vpop.f32.mrb[189].mxu0 }
 0x9e2   :  { %v20386_v31 = vadd.f32 %v20385_v27, %v20384_v12  ;;  %v20407_v33 = vpop.f32.mrb[189].mxu1  ;;  %v20387_v2 = vpop.f32.mrb[190].mxu0  ;;  %v16956_v12 = vmul.f32 1.442695, %v16908_v55  ;;  %v17023_v27 = vadd.f32 %v24704_v16, %v17022_v18  ;;  %v16958_v55 = vmul.f32 1.442695, %v16909_v1 }
 0x9e3   :  { %v20408_v63 = vadd.f32 %v20407_v33, %v20406_v45  ;;  %v20409_v14 = vpop.f32.mrb[190].mxu1  ;;  %v20388_v54 = vpop.f32.mrb[191].mxu0 }
 0x9e4   :  { %v16404_v56 = vadd.f32 %v20386_v31, %v24651_v10  ;;  %v20410_v24 = vpop.f32.mrb[191].mxu1  ;;  %v17329_v54 = vmul.f32 1.442695, %v17282_v51  ;;  %v24717_v45 = vpop.eup %22613  ;;  %v25497_v31 = vld [vmem:[#allocation62_spill] sm:$0xff]  ;;  %22625 = vpow2.f32 %v16956_v12  ;;  %v25499_v51 = vld [vmem:[#allocation60_spill] sm:$0xff] }
 0x9e5   :  { %v24719_v10 = vpop.eup %22615  ;;  %v16910_v33 = vsub.f32 %v25497_v31, %v24643_v43  ;;  %v17024_v49 = vadd.f32 %v24717_v45, %v17023_v27  ;;  %v16911_v32 = vsub.f32 %v25499_v51, %v24643_v43  ;;  %v25501_v27 = vld [vmem:[#allocation63_spill] sm:$0xff] }
 0x9e6   :  { %v24713_v21 = vadd.f32 %v20408_v63, %v16404_v56  ;;  %25496 = vst [vmem:[#allocation49_spill] sm:$0xff] %v24719_v10  ;;  %v17398_v18 = vadd.f32 %v24719_v10, %v17397_v37  ;;  %v17284_v63 = vsub.f32 %v24326_v60, %v24647_v47  ;;  %22627 = vpow2.f32 %v17329_v54  ;;  %v24727_v15 = vpop.eup %22617 }
 0x9e7   :  { %v24729_v2 = vpop.eup %22619  ;;  %22629 = vpow2.f32 %v16958_v55  ;;  %v16960_v14 = vmul.f32 1.442695, %v16910_v33  ;;  %v17025_v56 = vadd.f32 %v24727_v15, %v17024_v49  ;;  %v16912_v37 = vsub.f32 %v25501_v27, %v24643_v43 }
 0x9e8   :  { %25498 = vst [vmem:[#allocation54_spill] sm:$0xff] %v24729_v2  ;;  %v17399_v24 = vadd.f32 %v24729_v2, %v17398_v18  ;;  %22631 = vpow2.f32 %v17331_v61  ;;  %v17333_v60 = vmul.f32 1.442695, %v17284_v63  ;;  %v24737_v1 = vpop.eup %22621  ;;  %v16962_v5 = vmul.f32 1.442695, %v16911_v32  ;;  %v25503_v18 = vld [vmem:[#allocation61_spill] sm:$0xff] }
 0x9e9   :  { %v24739_v12 = vpop.eup %22623  ;;  %22633 = vpow2.f32 %v16960_v14  ;;  %v17026_v54 = vadd.f32 %v24737_v1, %v17025_v56  ;;  %v17286_v33 = vsub.f32 %v24356_v29, %v24647_v47  ;;  %v16913_v63 = vsub.f32 %v25503_v18, %v24643_v43 }
 0x9ea   :  { %25500 = vst [vmem:[#allocation55_spill] sm:$0xff] %v24739_v12  ;;  %v17400_v31 = vadd.f32 %v24739_v12, %v17399_v24  ;;  %22635 = vpow2.f32 %v17333_v60  ;;  %v16964_v61 = vmul.f32 1.442695, %v16912_v37  ;;  %v17287_v14 = vsub.f32 %v24399_v39, %v24647_v47 }
 0x9eb   :  { %22637 = vpow2.f32 %v16962_v5  ;;  %v17337_v29 = vmul.f32 1.442695, %v17286_v33  ;;  %v16914_v60 = vsub.f32 %v25505_v42, %v24643_v43  ;;  %v16966_v27 = vmul.f32 1.442695, %v16913_v63 }
 0x9ec   :  { %22639 = vpow2.f32 %v17335_v6  ;;  %v17339_v39 = vmul.f32 1.442695, %v17287_v14  ;;  %v25507_v6 = vld [vmem:[#allocation64_spill] sm:$0xff] }
 0x9ed   :  { %22641 = vpow2.f32 %v16964_v61  ;;  %v16915_v18 = vsub.f32 %v25507_v6, %v24643_v43  ;;  %v16968_v42 = vmul.f32 1.442695, %v16914_v60 }
 0x9ee   :  { %v24747_v55 = vpop.eup %22625  ;;  %22643 = vpow2.f32 %v17337_v29 }
 0x9ef   :  { %v17027_v51 = vadd.f32 %v24747_v55, %v17026_v54  ;;  %v17288_v54 = vsub.f32 %v24359_v38, %v24647_v47  ;;  %22645 = vpow2.f32 %v16966_v27  ;;  %v16970_v60 = vmul.f32 1.442695, %v16915_v18 }
 0x9f0   :  { %v24749_v49 = vpop.eup %22627  ;;  %22647 = vpow2.f32 %v17339_v39 }
 0x9f1   :  { %25502 = vst [vmem:[#allocation85_spill] sm:$0xff] %v24749_v49  ;;  %v17401_v32 = vadd.f32 %v24749_v49, %v17400_v31  ;;  %v24757_v56 = vpop.eup %22629  ;;  %v17341_v38 = vmul.f32 1.442695, %v17288_v54  ;;  %22649 = vpow2.f32 %v16968_v42  ;;  %v17290_v54 = vsub.f32 %v24403_v22, %v24647_v47 }
 0x9f2   :  { %v24759_v24 = vpop.eup %22631  ;;  %v17028_v37 = vadd.f32 %v24757_v56, %v17027_v51  ;;  %v17289_v51 = vsub.f32 %v24275_v23, %v24647_v47 }
 0x9f3   :  { %25504 = vst [vmem:[#allocation51_spill] sm:$0xff] %v24759_v24  ;;  %v17402_v5 = vadd.f32 %v24759_v24, %v17401_v32  ;;  %v24767_v31 = vpop.eup %22633  ;;  %v25509_v24 = vld [vmem:[#allocation66_spill] sm:$0xff]  ;;  %22651 = vpow2.f32 %v17341_v38  ;;  %v17291_v38 = vsub.f32 %v24423_v25, %v24647_v47 }
 0x9f4   :  { %v24769_v33 = vpop.eup %22635  ;;  %v17029_v63 = vadd.f32 %v24767_v31, %v17028_v37  ;;  %v16916_v49 = vsub.f32 %v25509_v24, %v24643_v43  ;;  %v17343_v12 = vmul.f32 1.442695, %v17289_v51  ;;  %22653 = vpow2.f32 %v16970_v60 }
 0x9f5   :  { %25506 = vst [vmem:[#allocation46_spill] sm:$0xff] %v24769_v33  ;;  %v17403_v61 = vadd.f32 %v24769_v33, %v17402_v5  ;;  %v24777_v32 = vpop.eup %22637  ;;  %v17347_v25 = vmul.f32 1.442695, %v17291_v38 }
 0x9f6   :  { %v24779_v14 = vpop.eup %22639  ;;  %v17030_v37 = vadd.f32 %v24777_v32, %v17029_v63  ;;  %v25511_v63 = vld [vmem:[#allocation65_spill] sm:$0xff]  ;;  %22655 = vpow2.f32 %v17343_v12 }
 0x9f7   :  { %25508 = vst [vmem:[#allocation56_spill] sm:$0xff] %v24779_v14  ;;  %v17404_v5 = vadd.f32 %v24779_v14, %v17403_v61  ;;  %v24787_v2 = vpop.eup %22641  ;;  %v16917_v61 = vsub.f32 %v25511_v63, %v24643_v43  ;;  %v17293_v63 = vsub.f32 %v24430_v9, %v24647_v47 }
 0x9f8   :  { %v24789_v0 = vpop.eup %22643 }
 0x9f9   :  { %25510 = vst [vmem:[#allocation52_spill] sm:$0xff] %v24789_v0  ;;  %v17405_v22 = vadd.f32 %v24789_v0, %v17404_v5  ;;  %v17351_v9 = vmul.f32 1.442695, %v17293_v63  ;;  %v25521_v63 = vld [vmem:[#allocation71_spill] sm:$0xff] }
 0xa00   :  { %v20428_v29 = vpop.f32.mrb[192].mxu0 }
 0xa01   :  { %v20450_v6 = vpop.f32.mrb[192].mxu1  ;;  %v20429_v27 = vpop.f32.mrb[193].mxu0 }
 0xa02   :  { %v20430_v33 = vadd.f32 %v20429_v27, %v20428_v29  ;;  %v20451_v23 = vpop.f32.mrb[193].mxu1  ;;  %v20431_v39 = vpop.f32.mrb[194].mxu0  ;;  %v16972_v29 = vmul.f32 1.442695, %v16916_v49  ;;  %v17031_v27 = vadd.f32 %v24787_v2, %v17030_v37  ;;  %v16974_v49 = vmul.f32 1.442695, %v16917_v61 }
 0xa03   :  { %v20452_v10 = vadd.f32 %v20451_v23, %v20450_v6  ;;  %v20453_v24 = vpop.f32.mrb[194].mxu1  ;;  %v20432_v36 = vpop.f32.mrb[195].mxu0  ;;  %v25515_v39 = vld [vmem:[#allocation68_spill] sm:$0xff] }
 0xa04   :  { %v16484_v18 = vadd.f32 %v20430_v33, %v24713_v21  ;;  %v20454_v42 = vpop.f32.mrb[195].mxu1  ;;  %v17345_v36 = vmul.f32 1.442695, %v17290_v54  ;;  %v24800_v6 = vpop.eup %22645  ;;  %v25513_v33 = vld [vmem:[#allocation67_spill] sm:$0xff]  ;;  %22657 = vpow2.f32 %v16972_v29  ;;  %v16919_v54 = vsub.f32 %v25515_v39, %v24643_v43 }
 0xa05   :  { %v24802_v21 = vpop.eup %22647  ;;  %v16918_v23 = vsub.f32 %v25513_v33, %v24643_v43  ;;  %v17032_v60 = vadd.f32 %v24800_v6, %v17031_v27  ;;  %v25517_v27 = vld [vmem:[#allocation69_spill] sm:$0xff] }
 0xa06   :  { %v24796_v51 = vadd.f32 %v20452_v10, %v16484_v18  ;;  %25512 = vst [vmem:[#allocation57_spill] sm:$0xff] %v24802_v21  ;;  %v17406_v37 = vadd.f32 %v24802_v21, %v17405_v22  ;;  %v17292_v10 = vsub.f32 %v24406_v30, %v24647_v47  ;;  %22659 = vpow2.f32 %v17345_v36  ;;  %v24810_v12 = vpop.eup %22649 }
 0xa07   :  { %v24812_v5 = vpop.eup %22651  ;;  %22661 = vpow2.f32 %v16974_v49  ;;  %v16976_v24 = vmul.f32 1.442695, %v16918_v23  ;;  %v17033_v18 = vadd.f32 %v24810_v12, %v17032_v60  ;;  %v16920_v22 = vsub.f32 %v25517_v27, %v24643_v43 }
 0xa08   :  { %25514 = vst [vmem:[#allocation53_spill] sm:$0xff] %v24812_v5  ;;  %v17407_v42 = vadd.f32 %v24812_v5, %v17406_v37  ;;  %22663 = vpow2.f32 %v17347_v25  ;;  %v17349_v30 = vmul.f32 1.442695, %v17292_v10  ;;  %v24820_v61 = vpop.eup %22653  ;;  %v16978_v38 = vmul.f32 1.442695, %v16919_v54  ;;  %v25519_v37 = vld [vmem:[#allocation70_spill] sm:$0xff] }
 0xa09   :  { %v24822_v29 = vpop.eup %22655  ;;  %22665 = vpow2.f32 %v16976_v24  ;;  %v17034_v36 = vadd.f32 %v24820_v61, %v17033_v18  ;;  %v17294_v23 = vsub.f32 %v24449_v20, %v24647_v47  ;;  %v16921_v10 = vsub.f32 %v25519_v37, %v24643_v43 }
 0xa0a   :  { %25516 = vst [vmem:[#allocation43_spill] sm:$0xff] %v24822_v29  ;;  %v17408_v33 = vadd.f32 %v24822_v29, %v17407_v42  ;;  %22667 = vpow2.f32 %v17349_v30  ;;  %v16980_v25 = vmul.f32 1.442695, %v16920_v22  ;;  %v17295_v24 = vsub.f32 %v24452_v53, %v24647_v47 }
 0xa0b   :  { %22669 = vpow2.f32 %v16978_v38  ;;  %v17353_v20 = vmul.f32 1.442695, %v17294_v23  ;;  %v16922_v30 = vsub.f32 %v25521_v63, %v24643_v43  ;;  %v16982_v27 = vmul.f32 1.442695, %v16921_v10 }
 0xa0c   :  { %22671 = vpow2.f32 %v17351_v9  ;;  %v17355_v53 = vmul.f32 1.442695, %v17295_v24  ;;  %v25523_v9 = vld [vmem:[#allocation72_spill] sm:$0xff] }
 0xa0d   :  { %22673 = vpow2.f32 %v16980_v25  ;;  %v16923_v37 = vsub.f32 %v25523_v9, %v24643_v43  ;;  %v16984_v63 = vmul.f32 1.442695, %v16922_v30 }
 0xa0e   :  { %v24830_v49 = vpop.eup %22657  ;;  %22675 = vpow2.f32 %v17353_v20 }
 0xa0f   :  { %v17035_v39 = vadd.f32 %v24830_v49, %v17034_v36  ;;  %v17296_v36 = vsub.f32 %v24458_v58, %v24647_v47  ;;  %22677 = vpow2.f32 %v16982_v27  ;;  %v16986_v30 = vmul.f32 1.442695, %v16923_v37 }
 0xa10   :  { %v24832_v60 = vpop.eup %22659  ;;  %22679 = vpow2.f32 %v17355_v53 }
 0xa11   :  { %25518 = vst [vmem:[#allocation44_spill] sm:$0xff] %v24832_v60  ;;  %v17409_v54 = vadd.f32 %v24832_v60, %v17408_v33  ;;  %v24840_v18 = vpop.eup %22661  ;;  %v17357_v58 = vmul.f32 1.442695, %v17296_v36  ;;  %22681 = vpow2.f32 %v16984_v63  ;;  %v17298_v36 = vsub.f32 %v24481_v11, %v24647_v47 }
 0xa12   :  { %v24842_v42 = vpop.eup %22663  ;;  %v17036_v22 = vadd.f32 %v24840_v18, %v17035_v39  ;;  %v17297_v39 = vsub.f32 %v24466_v48, %v24647_v47 }
 0xa13   :  { %25520 = vst [vmem:[#allocation59_spill] sm:$0xff] %v24842_v42  ;;  %v17410_v38 = vadd.f32 %v24842_v42, %v17409_v54  ;;  %v24850_v33 = vpop.eup %22665  ;;  %v25525_v42 = vld [vmem:[#allocation73_spill] sm:$0xff]  ;;  %22683 = vpow2.f32 %v17357_v58  ;;  %v17299_v58 = vsub.f32 %v24484_v26, %v24647_v47 }
 0xa14   :  { %v24852_v23 = vpop.eup %22667  ;;  %v17037_v10 = vadd.f32 %v24850_v33, %v17036_v22  ;;  %v16924_v60 = vsub.f32 %v25525_v42, %v24643_v43  ;;  %v17359_v29 = vmul.f32 1.442695, %v17297_v39  ;;  %22685 = vpow2.f32 %v16986_v30 }
 0xa15   :  { %25522 = vst [vmem:[#allocation58_spill] sm:$0xff] %v24852_v23  ;;  %v17411_v25 = vadd.f32 %v24852_v23, %v17410_v38  ;;  %v24860_v54 = vpop.eup %22669  ;;  %v17363_v26 = vmul.f32 1.442695, %v17299_v58 }
 0xa16   :  { %v24862_v24 = vpop.eup %22671  ;;  %v17038_v22 = vadd.f32 %v24860_v54, %v17037_v10  ;;  %v25527_v10 = vld [vmem:[#allocation75_spill] sm:$0xff]  ;;  %22687 = vpow2.f32 %v17359_v29 }
 0xa17   :  { %25524 = vst [vmem:[#allocation62_spill] sm:$0xff] %v24862_v24  ;;  %v17412_v38 = vadd.f32 %v24862_v24, %v17411_v25  ;;  %v24870_v5 = vpop.eup %22673  ;;  %v16925_v25 = vsub.f32 %v25527_v10, %v24643_v43  ;;  %v17301_v10 = vsub.f32 %v24491_v3, %v24647_v47 }
 0xa18   :  { %v24872_v14 = vpop.eup %22675 }
 0xa19   :  { %25526 = vst [vmem:[#allocation60_spill] sm:$0xff] %v24872_v14  ;;  %v17413_v11 = vadd.f32 %v24872_v14, %v17412_v38  ;;  %v17367_v3 = vmul.f32 1.442695, %v17301_v10  ;;  %v25537_v10 = vld [vmem:[#allocation78_spill] sm:$0xff] }
 0xa20   :  { %v20472_v20 = vpop.f32.mrb[196].mxu0 }
 0xa21   :  { %v20494_v9 = vpop.f32.mrb[196].mxu1  ;;  %v20473_v27 = vpop.f32.mrb[197].mxu0 }
 0xa22   :  { %v20474_v23 = vadd.f32 %v20473_v27, %v20472_v20  ;;  %v20495_v48 = vpop.f32.mrb[197].mxu1  ;;  %v20475_v53 = vpop.f32.mrb[198].mxu0  ;;  %v16988_v20 = vmul.f32 1.442695, %v16924_v60  ;;  %v17039_v27 = vadd.f32 %v24870_v5, %v17038_v22  ;;  %v16990_v60 = vmul.f32 1.442695, %v16925_v25 }
 0xa23   :  { %v20496_v21 = vadd.f32 %v20495_v48, %v20494_v9  ;;  %v20497_v42 = vpop.f32.mrb[198].mxu1  ;;  %v20476_v0 = vpop.f32.mrb[199].mxu0  ;;  %v25531_v53 = vld [vmem:[#allocation76_spill] sm:$0xff] }
 0xa24   :  { %v16564_v37 = vadd.f32 %v20474_v23, %v24796_v51  ;;  %v20498_v63 = vpop.f32.mrb[199].mxu1  ;;  %v17361_v0 = vmul.f32 1.442695, %v17298_v36  ;;  %v24883_v9 = vpop.eup %22677  ;;  %v25529_v23 = vld [vmem:[#allocation74_spill] sm:$0xff]  ;;  %22689 = vpow2.f32 %v16988_v20  ;;  %v16927_v36 = vsub.f32 %v25531_v53, %v24643_v43 }
 0xa25   :  { %v24885_v51 = vpop.eup %22679  ;;  %v16926_v48 = vsub.f32 %v25529_v23, %v24643_v43  ;;  %v17040_v30 = vadd.f32 %v24883_v9, %v17039_v27  ;;  %v25533_v27 = vld [vmem:[#allocation77_spill] sm:$0xff] }
 0xa26   :  { %v24879_v39 = vadd.f32 %v20496_v21, %v16564_v37  ;;  %25528 = vst [vmem:[#allocation63_spill] sm:$0xff] %v24885_v51  ;;  %v17414_v22 = vadd.f32 %v24885_v51, %v17413_v11  ;;  %v17300_v21 = vsub.f32 %v24497_v46, %v24647_v47  ;;  %22691 = vpow2.f32 %v17361_v0  ;;  %v24893_v29 = vpop.eup %22681 }
 0xa27   :  { %v24895_v38 = vpop.eup %22683  ;;  %22693 = vpow2.f32 %v16990_v60  ;;  %v16992_v42 = vmul.f32 1.442695, %v16926_v48  ;;  %v17041_v37 = vadd.f32 %v24893_v29, %v17040_v30  ;;  %v16928_v11 = vsub.f32 %v25533_v27, %v24643_v43 }
 0xa28   :  { %25530 = vst [vmem:[#allocation61_spill] sm:$0xff] %v24895_v38  ;;  %v17415_v63 = vadd.f32 %v24895_v38, %v17414_v22  ;;  %22695 = vpow2.f32 %v17363_v26  ;;  %v17365_v46 = vmul.f32 1.442695, %v17300_v21  ;;  %v24903_v25 = vpop.eup %22685  ;;  %v16994_v58 = vmul.f32 1.442695, %v16927_v36  ;;  %v25535_v22 = vld [vmem:[#allocation79_spill] sm:$0xff] }
 0xa29   :  { %v24905_v20 = vpop.eup %22687  ;;  %22697 = vpow2.f32 %v16992_v42  ;;  %v17042_v0 = vadd.f32 %v24903_v25, %v17041_v37  ;;  %v17302_v48 = vsub.f32 %v24513_v19, %v24647_v47  ;;  %v16929_v21 = vsub.f32 %v25535_v22, %v24643_v43 }
 0xa2a   :  { %25532 = vst [vmem:[#allocation50_spill] sm:$0xff] %v24905_v20  ;;  %v17416_v23 = vadd.f32 %v24905_v20, %v17415_v63  ;;  %22699 = vpow2.f32 %v17365_v46  ;;  %v16996_v26 = vmul.f32 1.442695, %v16928_v11  ;;  %v17303_v42 = vsub.f32 %v24516_v50, %v24647_v47 }
 0xa2b   :  { %22701 = vpow2.f32 %v16994_v58  ;;  %v17369_v19 = vmul.f32 1.442695, %v17302_v48  ;;  %v16930_v46 = vsub.f32 %v25537_v10, %v24643_v43  ;;  %v16998_v27 = vmul.f32 1.442695, %v16929_v21 }
 0xa2c   :  { %22703 = vpow2.f32 %v17367_v3  ;;  %v17371_v50 = vmul.f32 1.442695, %v17303_v42  ;;  %v25539_v3 = vld [vmem:[#allocation80_spill] sm:$0xff] }
 0xa2d   :  { %22705 = vpow2.f32 %v16996_v26  ;;  %v16931_v22 = vsub.f32 %v25539_v3, %v24643_v43  ;;  %v17000_v10 = vmul.f32 1.442695, %v16930_v46 }
 0xa2e   :  { %v24913_v60 = vpop.eup %22689  ;;  %22707 = vpow2.f32 %v17369_v19 }
 0xa2f   :  { %v17043_v53 = vadd.f32 %v24913_v60, %v17042_v0  ;;  %v17304_v0 = vsub.f32 %v24535_v7, %v24647_v47  ;;  %22709 = vpow2.f32 %v16998_v27  ;;  %v17002_v46 = vmul.f32 1.442695, %v16931_v22 }
 0xa30   :  { %v24915_v30 = vpop.eup %22691  ;;  %22711 = vpow2.f32 %v17371_v50 }
 0xa31   :  { %25534 = vst [vmem:[#allocation64_spill] sm:$0xff] %v24915_v30  ;;  %v17417_v36 = vadd.f32 %v24915_v30, %v17416_v23  ;;  %v24923_v37 = vpop.eup %22693  ;;  %v17373_v7 = vmul.f32 1.442695, %v17304_v0  ;;  %22713 = vpow2.f32 %v17000_v10  ;;  %v17306_v0 = vsub.f32 %v24547_v34, %v24647_v47 }
 0xa32   :  { %v24925_v63 = vpop.eup %22695  ;;  %v17044_v11 = vadd.f32 %v24923_v37, %v17043_v53  ;;  %v17305_v53 = vsub.f32 %v24523_v57, %v24647_v47 }
 0xa33   :  { %25536 = vst [vmem:[#allocation66_spill] sm:$0xff] %v24925_v63  ;;  %v17418_v58 = vadd.f32 %v24925_v63, %v17417_v36  ;;  %v24933_v23 = vpop.eup %22697  ;;  %v25540_v63 = vld [vmem:[#allocation81_spill] sm:$0xff]  ;;  %22715 = vpow2.f32 %v17373_v7  ;;  %v17307_v7 = vsub.f32 %v24550_v13, %v24647_v47 }
 0xa34   :  { %v24935_v48 = vpop.eup %22699  ;;  %v17045_v21 = vadd.f32 %v24933_v23, %v17044_v11  ;;  %v16932_v30 = vsub.f32 %v25540_v63, %v24643_v43  ;;  %v17375_v20 = vmul.f32 1.442695, %v17305_v53  ;;  %22717 = vpow2.f32 %v17002_v46 }
 0xa35   :  { %25538 = vst [vmem:[#allocation65_spill] sm:$0xff] %v24935_v48  ;;  %v17419_v26 = vadd.f32 %v24935_v48, %v17418_v58  ;;  %v24943_v36 = vpop.eup %22701  ;;  %v17379_v13 = vmul.f32 1.442695, %v17307_v7 }
 0xa36   :  { %v24945_v42 = vpop.eup %22703  ;;  %v17046_v11 = vadd.f32 %v24943_v36, %v17045_v21  ;;  %v25541_v21 = vld [vmem:[#allocation84_spill] sm:$0xff]  ;;  %22719 = vpow2.f32 %v17375_v20 }
 0xa37   :  { %v17420_v58 = vadd.f32 %v24945_v42, %v17419_v26  ;;  %v24953_v38 = vpop.eup %22705  ;;  %v16933_v26 = vsub.f32 %v25541_v21, %v24643_v43  ;;  %v17309_v21 = vsub.f32 %v24557_v59, %v24647_v47 }
 0xa38   :  { %v24955_v24 = vpop.eup %22707 }
 0xa39   :  { %v17421_v34 = vadd.f32 %v24955_v24, %v17420_v58  ;;  %v17383_v59 = vmul.f32 1.442695, %v17309_v21  ;;  %v25548_v21 = vld [vmem:[#allocation88_spill] sm:$0xff] }
 0xa40   :  { %v20516_v19 = vpop.f32.mrb[200].mxu0 }
 0xa41   :  { %v20538_v3 = vpop.f32.mrb[200].mxu1  ;;  %v20517_v27 = vpop.f32.mrb[201].mxu0 }
 0xa42   :  { %v20518_v48 = vadd.f32 %v20517_v27, %v20516_v19  ;;  %v20539_v57 = vpop.f32.mrb[201].mxu1  ;;  %v20519_v50 = vpop.f32.mrb[202].mxu0  ;;  %v17004_v19 = vmul.f32 1.442695, %v16932_v30  ;;  %v17047_v27 = vadd.f32 %v24953_v38, %v17046_v11  ;;  %v17006_v30 = vmul.f32 1.442695, %v16933_v26 }
 0xa43   :  { %v20540_v51 = vadd.f32 %v20539_v57, %v20538_v3  ;;  %v20541_v63 = vpop.f32.mrb[202].mxu1  ;;  %v20520_v14 = vpop.f32.mrb[203].mxu0  ;;  %v25543_v50 = vld [vmem:[#allocation86_spill] sm:$0xff] }
 0xa44   :  { %v16644_v22 = vadd.f32 %v20518_v48, %v24879_v39  ;;  %v20542_v10 = vpop.f32.mrb[203].mxu1  ;;  %v17377_v14 = vmul.f32 1.442695, %v17306_v0  ;;  %v24966_v3 = vpop.eup %22709  ;;  %v25542_v48 = vld [vmem:[#allocation82_spill] sm:$0xff]  ;;  %22721 = vpow2.f32 %v17004_v19  ;;  %v16935_v0 = vsub.f32 %v25543_v50, %v24643_v43 }
 0xa45   :  { %v24968_v39 = vpop.eup %22711  ;;  %v16934_v57 = vsub.f32 %v25542_v48, %v24643_v43  ;;  %v17048_v46 = vadd.f32 %v24966_v3, %v17047_v27  ;;  %v25544_v27 = vld [vmem:[#allocation87_spill] sm:$0xff] }
 0xa46   :  { %v24962_v53 = vadd.f32 %v20540_v51, %v16644_v22  ;;  %v17422_v11 = vadd.f32 %v24968_v39, %v17421_v34  ;;  %v17308_v51 = vsub.f32 %v24563_v62, %v24647_v47  ;;  %22723 = vpow2.f32 %v17377_v14  ;;  %v24976_v20 = vpop.eup %22713 }
 0xa47   :  { %v24978_v58 = vpop.eup %22715  ;;  %22725 = vpow2.f32 %v17006_v30  ;;  %v17008_v63 = vmul.f32 1.442695, %v16934_v57  ;;  %v17049_v22 = vadd.f32 %v24976_v20, %v17048_v46  ;;  %v16936_v34 = vsub.f32 %v25544_v27, %v24643_v43  ;;  %v17145_v27 = vpop.xlane.xlu1 %17144 }
 0xa48   :  { %v17423_v10 = vadd.f32 %v24978_v58, %v17422_v11  ;;  %22727 = vpow2.f32 %v17379_v13  ;;  %v17381_v62 = vmul.f32 1.442695, %v17308_v51  ;;  %v24986_v26 = vpop.eup %22717  ;;  %v17010_v7 = vmul.f32 1.442695, %v16935_v0  ;;  %v25546_v11 = vld [vmem:[#allocation89_spill] sm:$0xff] }
 0xa49   :  { %v24988_v19 = vpop.eup %22719  ;;  %22729 = vpow2.f32 %v17008_v63  ;;  %v17050_v14 = vadd.f32 %v24986_v26, %v17049_v22  ;;  %v17310_v57 = vsub.f32 %v24571_v17, %v24647_v47  ;;  %v16937_v51 = vsub.f32 %v25546_v11, %v24643_v43 }
 0xa4a   :  { %v17424_v48 = vadd.f32 %v24988_v19, %v17423_v10  ;;  %22731 = vpow2.f32 %v17381_v62  ;;  %v17012_v13 = vmul.f32 1.442695, %v16936_v34  ;;  %v17311_v63 = vsub.f32 %v24578_v41, %v24647_v47 }
 0xa4b   :  { %22733 = vpow2.f32 %v17010_v7  ;;  %v17385_v17 = vmul.f32 1.442695, %v17310_v57  ;;  %v16938_v62 = vsub.f32 %v25548_v21, %v24643_v43  ;;  %v17014_v7 = vmul.f32 1.442695, %v16937_v51  ;;  %v25550_v21 = vld [vmem:[#allocation90_spill] sm:$0xff] }
 0xa4c   :  { %22735 = vpow2.f32 %v17383_v59  ;;  %v17387_v41 = vmul.f32 1.442695, %v17311_v63  ;;  %v17146_v11 = vsub.f32 %v24608_v40, %v17145_v27 }
 0xa4d   :  { %22737 = vpow2.f32 %v17012_v13  ;;  %v17016_v51 = vmul.f32 1.442695, %v16938_v62 }
 0xa4e   :  { %v24996_v30 = vpop.eup %22721  ;;  %22739 = vpow2.f32 %v17385_v17 }
 0xa4f   :  { %v17051_v50 = vadd.f32 %v24996_v30, %v17050_v14  ;;  %22741 = vpow2.f32 %v17014_v7 }
 0xa50   :  { %v24998_v46 = vpop.eup %22723  ;;  %22743 = vpow2.f32 %v17387_v41 }
 0xa51   :  { %25545 = vst [vmem:[#allocation67_spill] sm:$0xff] %v24998_v46  ;;  %v17425_v0 = vadd.f32 %v24998_v46, %v17424_v48  ;;  %v25006_v22 = vpop.eup %22725  ;;  %v17312_v48 = vsub.f32 %v24588_v52, %v24647_v47  ;;  %v16939_v46 = vsub.f32 %v25550_v21, %v24643_v43  ;;  %v17313_v52 = vsub.f32 %v24583_v44, %v24647_v47 }
 0xa52   :  { %v25008_v10 = vpop.eup %22727  ;;  %v17052_v34 = vadd.f32 %v25006_v22, %v17051_v50  ;;  %22745 = vpow2.f32 %v17016_v51  ;;  %v17314_v44 = vsub.f32 %v24593_v35, %v24647_v47 }
 0xa53   :  { %25547 = vst [vmem:[#allocation68_spill] sm:$0xff] %v25008_v10  ;;  %v17426_v14 = vadd.f32 %v25008_v10, %v17425_v0  ;;  %v25016_v57 = vpop.eup %22729  ;;  %v17389_v0 = vmul.f32 1.442695, %v17312_v48  ;;  %v17147_v10 = vmul.f32 1.442695, %v17146_v11 }
 0xa54   :  { %v25018_v59 = vpop.eup %22731  ;;  %v17053_v13 = vadd.f32 %v25016_v57, %v17052_v34  ;;  %v17018_v43 = vmul.f32 1.442695, %v16939_v46  ;;  %v17391_v48 = vmul.f32 1.442695, %v17313_v52  ;;  %v19218_v46 = vld [vmem:[#allocation24] ss:$0 sm:$0xff] }
 0xa55   :  { %25549 = vst [vmem:[#allocation69_spill] sm:$0xff] %v25018_v59  ;;  %v17427_v50 = vadd.f32 %v25018_v59, %v17426_v14  ;;  %v25027_v63 = vpop.eup %22733  ;;  %22747 = vpow2.f32 %v17389_v0  ;;  %v17393_v35 = vmul.f32 1.442695, %v17314_v44 }
 0xa56   :  { %v25029_v17 = vpop.eup %22735  ;;  %v17054_v62 = vadd.f32 %v25027_v63, %v17053_v13  ;;  %22749 = vpow2.f32 %v17147_v10 }
 0xa57   :  { %v17428_v7 = vadd.f32 %v25029_v17, %v17427_v50  ;;  %v25035_v41 = vpop.eup %22737  ;;  %22751 = vpow2.f32 %v17018_v43  ;;  %v25551_v50 = vld [vmem:[#allocation91_spill] sm:$0xff] }
 0xa58   :  { %v25037_v59 = vpop.eup %22739  ;;  %v17055_v51 = vadd.f32 %v25035_v41, %v17054_v62  ;;  %22753 = vpow2.f32 %v17391_v48 }
 0xa59   :  { %v17429_v13 = vadd.f32 %v25037_v59, %v17428_v7  ;;  %v25043_v47 = vpop.eup %22741  ;;  %22755 = vpow2.f32 %v17393_v35 }
 0xa5a   :  { %v25045_v52 = vpop.eup %22743 }
 0xa5b   :  { %v17430_v10 = vadd.f32 %v25045_v52, %v17429_v13 }
 0xa5c   :  { %v25051_v62 = vpop.eup %22745 }
 0xa5f   :  { %v25053_v7 = vpop.eup %22747 }
 0xa60   :  { %v20560_v40 = vpop.f32.mrb[204].mxu0  ;;  %v22750_v44 = vpop.eup %22749 }
 0xa61   :  { %v20561_v27 = vpop.f32.mrb[205].mxu0  ;;  %v25057_v48 = vpop.eup %22751 }
 0xa62   :  { %v20562_v34 = vadd.f32 %v20561_v27, %v20560_v40  ;;  %v20563_v14 = vpop.f32.mrb[206].mxu0  ;;  %v17056_v27 = vadd.f32 %v25043_v47, %v17055_v51 }
 0xa63   :  { %v20564_v21 = vpop.f32.mrb[207].mxu0  ;;  %v17431_v14 = vadd.f32 %v25053_v7, %v17430_v10 }
 0xa64   :  { %v16724_v11 = vadd.f32 %v20562_v34, %v24962_v53  ;;  %v17057_v34 = vadd.f32 %v25051_v62, %v17056_v27  ;;  %v25059_v21 = vpop.eup %22753 }
 0xa65   :  { %v25063_v51 = vpop.eup %22755 }
 0xa66   :  { %v16729_v40 = vadd.f32 %v16724_v11, %v25551_v50  ;;  %v17058_v11 = vadd.f32 %v25057_v48, %v17057_v34 }
 0xa68   :  { %v16737_v0 = vadd.f32 %v19218_v46, %v16729_v40  ;;  %v17432_v46 = vadd.f32 %v25059_v21, %v17431_v14 }
 0xa6a   :  { %v17517_v43 = vsel %vm17142_vm5, %v16737_v0, -1e+30  ;;  %v17433_v13 = vadd.f32 %v25063_v51, %v17432_v46 }
 0xa6b   :  { %17518 = vmax.xlane.f32.xlu1 %v17517_v43 }
 0xa6f   :  { %17149 = vadd.xlane.f32.xlu1 %v22750_v44 }
 0xa73   :  { %17059 = vadd.xlane.f32.xlu1 %v17058_v11 }
 0xa77   :  { %17434 = vadd.xlane.f32.xlu1 %v17433_v13  ;;  %v25553_v13 = vld [vmem:[#allocation45_spill] sm:$0xff] }
 0xaf8   :  { %v17519_v50 = vpop.xlane.xlu1 %17518 }
 0xaf9   :  { %v17520_v40 = vsub.f32 %v17517_v43, %v17519_v50 }
 0xafb   :  { %v17521_v35 = vmul.f32 1.442695, %v17520_v40 }
 0xafc   :  { %v17150_v0 = vpop.xlane.xlu1 %17149 }
 0xafd   :  { %22757 = vpow2.f32 %v17521_v35 }
 0xafe   :  { %22759 = vrcp.f32 %v17150_v0 }
 0xb00   :  { %v17060_v27 = vpop.xlane.xlu1 %17059 }
 0xb01   :  { %22761 = vrcp.f32 %v17060_v27 }
 0xb04   :  { %v17435_v10 = vpop.xlane.xlu1 %17434 }
 0xb05   :  { %22763 = vrcp.f32 %v17435_v10  ;;  %v25556_v10 = vld [vmem:[#allocation47_spill] sm:$0xff] }
 0xb07   :  { %v25066_v53 = vpop.eup %22757 }
 0xb08   :  { %v22760_v34 = vpop.eup %22759  ;;  %17523 = vadd.xlane.f32.xlu1 %v25066_v53 }
 0xb09   :  { %v17152_v14 = vmul.f32 %v22760_v34, %v22750_v44  ;;  %v25557_v34 = vld [vmem:[#allocation48_spill] sm:$0xff] }
 0xb0b   :  { %v25069_v11 = vpop.eup %22761  ;;  %17153 = vst [vmem:[#allocation26] sm:$0xff] %v17152_v14  ;;  %v25558_v14 = vld [vmem:[#allocation49_spill] sm:$0xff] }
 0xb0c   :  { %v17062_v43 = vmul.f32 %v25069_v11, %v24667_v28  ;;  %v17063_v46 = vmul.f32 %v25069_v11, %v24671_v8  ;;  %v17064_v50 = vmul.f32 %v25069_v11, %v25553_v13  ;;  %v17065_v40 = vmul.f32 %v25069_v11, %v24694_v4  ;;  %v25560_v13 = vld [vmem:[#allocation55_spill] sm:$0xff] }
 0xb0d   :  { %v17066_v35 = vmul.f32 %v25069_v11, %v24704_v16  ;;  %v17067_v44 = vmul.f32 %v25069_v11, %v24717_v45  ;;  %v17068_v0 = vmul.f32 %v25069_v11, %v24727_v15  ;;  %v17069_v28 = vmul.f32 %v25069_v11, %v24737_v1 }
 0xb0e   :  { %v17070_v8 = vmul.f32 %v25069_v11, %v24747_v55  ;;  %v17071_v27 = vmul.f32 %v25069_v11, %v24757_v56  ;;  %v17072_v4 = vmul.f32 %v25069_v11, %v24767_v31  ;;  %v17073_v16 = vmul.f32 %v25069_v11, %v24777_v32  ;;  %17102 = vst [vmem:[#allocation25] sm:$0xff] %v17062_v43  ;;  %v25559_v43 = vld [vmem:[#allocation54_spill] sm:$0xff] }
 0xb0f   :  { %17103 = vst [vmem:[#allocation25 + $0x8] sm:$0xff] %v17063_v46  ;;  %17104 = vst [vmem:[#allocation25 + $0x10] sm:$0xff] %v17064_v50  ;;  %v17074_v45 = vmul.f32 %v25069_v11, %v24787_v2  ;;  %v17075_v15 = vmul.f32 %v25069_v11, %v24800_v6  ;;  %v17076_v1 = vmul.f32 %v25069_v11, %v24810_v12 }
 0xb10   :  { %17105 = vst [vmem:[#allocation25 + $0x18] sm:$0xff] %v17065_v40  ;;  %v17077_v55 = vmul.f32 %v25069_v11, %v24820_v61  ;;  %17106 = vst [vmem:[#allocation25 + $0x20] sm:$0xff] %v17066_v35  ;;  %v17078_v56 = vmul.f32 %v25069_v11, %v24830_v49  ;;  %v17079_v31 = vmul.f32 %v25069_v11, %v24840_v18  ;;  %v25561_v40 = vld [vmem:[#allocation85_spill] sm:$0xff] }
 0xb11   :  { %17107 = vst [vmem:[#allocation25 + $0x28] sm:$0xff] %v17067_v44  ;;  %17108 = vst [vmem:[#allocation25 + $0x30] sm:$0xff] %v17068_v0  ;;  %v17080_v2 = vmul.f32 %v25069_v11, %v24850_v33  ;;  %v17081_v32 = vmul.f32 %v25069_v11, %v24860_v54  ;;  %v17082_v6 = vmul.f32 %v25069_v11, %v24870_v5  ;;  %v25562_v44 = vld [vmem:[#allocation51_spill] sm:$0xff] }
 0xb12   :  { %17109 = vst [vmem:[#allocation25 + $0x38] sm:$0xff] %v17069_v28  ;;  %17110 = vst [vmem:[#allocation25 + $0x40] sm:$0xff] %v17070_v8  ;;  %v17083_v12 = vmul.f32 %v25069_v11, %v24883_v9  ;;  %v17084_v61 = vmul.f32 %v25069_v11, %v24893_v29  ;;  %v17085_v49 = vmul.f32 %v25069_v11, %v24903_v25  ;;  %v25127_v9 = vpop.eup %22763  ;;  %v25563_v28 = vld [vmem:[#allocation46_spill] sm:$0xff] }
 0xb13   :  { %17111 = vst [vmem:[#allocation25 + $0x48] sm:$0xff] %v17071_v27  ;;  %17112 = vst [vmem:[#allocation25 + $0x50] sm:$0xff] %v17072_v4  ;;  %v17086_v18 = vmul.f32 %v25069_v11, %v24913_v60  ;;  %v17087_v33 = vmul.f32 %v25069_v11, %v24923_v37  ;;  %v17088_v5 = vmul.f32 %v25069_v11, %v24933_v23  ;;  %v25564_v27 = vld [vmem:[#allocation56_spill] sm:$0xff] }
 0xb14   :  { %17113 = vst [vmem:[#allocation25 + $0x58] sm:$0xff] %v17073_v16  ;;  %17114 = vst [vmem:[#allocation25 + $0x60] sm:$0xff] %v17074_v45  ;;  %v17089_v54 = vmul.f32 %v25069_v11, %v24943_v36  ;;  %v17090_v29 = vmul.f32 %v25069_v11, %v24953_v38  ;;  %v17091_v25 = vmul.f32 %v25069_v11, %v24966_v3  ;;  %v25565_v16 = vld [vmem:[#allocation52_spill] sm:$0xff] }
 0xb15   :  { %17115 = vst [vmem:[#allocation25 + $0x68] sm:$0xff] %v17075_v15  ;;  %17116 = vst [vmem:[#allocation25 + $0x70] sm:$0xff] %v17076_v1  ;;  %v17092_v60 = vmul.f32 %v25069_v11, %v24976_v20  ;;  %v17093_v37 = vmul.f32 %v25069_v11, %v24986_v26  ;;  %v17094_v23 = vmul.f32 %v25069_v11, %v24996_v30  ;;  %v25566_v15 = vld [vmem:[#allocation57_spill] sm:$0xff] }
 0xb16   :  { %17117 = vst [vmem:[#allocation25 + $0x78] sm:$0xff] %v17077_v55  ;;  %17118 = vst [vmem:[#allocation25 + $0x80] sm:$0xff] %v17078_v56  ;;  %v17095_v36 = vmul.f32 %v25069_v11, %v25006_v22  ;;  %v17096_v38 = vmul.f32 %v25069_v11, %v25016_v57  ;;  %v17097_v3 = vmul.f32 %v25069_v11, %v25027_v63  ;;  %v25554_v57 = vld [vmem:[#allocation41_spill] sm:$0xff] }
 0xb17   :  { %17119 = vst [vmem:[#allocation25 + $0x88] sm:$0xff] %v17079_v31  ;;  %17120 = vst [vmem:[#allocation25 + $0x90] sm:$0xff] %v17080_v2  ;;  %v17098_v20 = vmul.f32 %v25069_v11, %v25035_v41  ;;  %v17099_v26 = vmul.f32 %v25069_v11, %v25043_v47  ;;  %v17100_v30 = vmul.f32 %v25069_v11, %v25051_v62  ;;  %v25555_v41 = vld [vmem:[#allocation42_spill] sm:$0xff]  ;;  %v25567_v55 = vld [vmem:[#allocation53_spill] sm:$0xff] }
 0xb18   :  { %17121 = vst [vmem:[#allocation25 + $0x98] sm:$0xff] %v17081_v32  ;;  %17122 = vst [vmem:[#allocation25 + $0xa0] sm:$0xff] %v17082_v6  ;;  %v17101_v22 = vmul.f32 %v25069_v11, %v25057_v48  ;;  %v17437_v63 = vmul.f32 %v25127_v9, %v25554_v57  ;;  %v17438_v47 = vmul.f32 %v25127_v9, %v25555_v41  ;;  %v25568_v31 = vld [vmem:[#allocation43_spill] sm:$0xff]  ;;  %v25569_v32 = vld [vmem:[#allocation44_spill] sm:$0xff] }
 0xb19   :  { %17123 = vst [vmem:[#allocation25 + $0xa8] sm:$0xff] %v17083_v12  ;;  %17124 = vst [vmem:[#allocation25 + $0xb0] sm:$0xff] %v17084_v61  ;;  %v17439_v62 = vmul.f32 %v25127_v9, %v25556_v10  ;;  %v17440_v48 = vmul.f32 %v25127_v9, %v25557_v34  ;;  %v17441_v11 = vmul.f32 %v25127_v9, %v25558_v14 }
 0xb1a   :  { %17125 = vst [vmem:[#allocation25 + $0xb8] sm:$0xff] %v17085_v49  ;;  %17126 = vst [vmem:[#allocation25 + $0xc0] sm:$0xff] %v17086_v18  ;;  %v17442_v46 = vmul.f32 %v25127_v9, %v25559_v43  ;;  %v17443_v50 = vmul.f32 %v25127_v9, %v25560_v13  ;;  %v17444_v35 = vmul.f32 %v25127_v9, %v25561_v40 }
 0xb1b   :  { %17127 = vst [vmem:[#allocation25 + $0xc8] sm:$0xff] %v17087_v33  ;;  %17128 = vst [vmem:[#allocation25 + $0xd0] sm:$0xff] %v17088_v5  ;;  %v17445_v0 = vmul.f32 %v25127_v9, %v25562_v44  ;;  %v17446_v8 = vmul.f32 %v25127_v9, %v25563_v28  ;;  %v17447_v4 = vmul.f32 %v25127_v9, %v25564_v27 }
 0xb1c   :  { %17129 = vst [vmem:[#allocation25 + $0xd8] sm:$0xff] %v17089_v54  ;;  %17130 = vst [vmem:[#allocation25 + $0xe0] sm:$0xff] %v17090_v29  ;;  %v17448_v45 = vmul.f32 %v25127_v9, %v25565_v16  ;;  %v17449_v1 = vmul.f32 %v25127_v9, %v25566_v15  ;;  %v17450_v56 = vmul.f32 %v25127_v9, %v25567_v55 }
 0xb1d   :  { %17131 = vst [vmem:[#allocation25 + $0xe8] sm:$0xff] %v17091_v25  ;;  %17132 = vst [vmem:[#allocation25 + $0xf0] sm:$0xff] %v17092_v60  ;;  %v17451_v2 = vmul.f32 %v25127_v9, %v25568_v31  ;;  %v17452_v6 = vmul.f32 %v25127_v9, %v25569_v32 }
 0xb1e   :  { %17133 = vst [vmem:[#allocation25 + $0xf8] sm:$0xff] %v17093_v37  ;;  %17134 = vst [vmem:[#allocation25 + $0x100] sm:$0xff] %v17094_v23 }
 0xb1f   :  { %17135 = vst [vmem:[#allocation25 + $0x108] sm:$0xff] %v17095_v36  ;;  %17136 = vst [vmem:[#allocation25 + $0x110] sm:$0xff] %v17096_v38 }
 0xb20   :  { %17137 = vst [vmem:[#allocation25 + $0x118] sm:$0xff] %v17097_v3  ;;  %17138 = vst [vmem:[#allocation25 + $0x120] sm:$0xff] %v17098_v20 }
 0xb21   :  { %17139 = vst [vmem:[#allocation25 + $0x128] sm:$0xff] %v17099_v26  ;;  %17140 = vst [vmem:[#allocation25 + $0x130] sm:$0xff] %v17100_v30 }
 0xb22   :  { %17141 = vst [vmem:[#allocation25 + $0x138] sm:$0xff] %v17101_v22  ;;  %17477 = vst [vmem:[#allocation28] sm:$0xff] %v17437_v63 }
 0xb23   :  { %17478 = vst [vmem:[#allocation28 + $0x8] sm:$0xff] %v17438_v47  ;;  %17479 = vst [vmem:[#allocation28 + $0x10] sm:$0xff] %v17439_v62 }
 0xb24   :  { %17480 = vst [vmem:[#allocation28 + $0x18] sm:$0xff] %v17440_v48  ;;  %17481 = vst [vmem:[#allocation28 + $0x20] sm:$0xff] %v17441_v11 }
 0xb25   :  { %17482 = vst [vmem:[#allocation28 + $0x28] sm:$0xff] %v17442_v46  ;;  %17483 = vst [vmem:[#allocation28 + $0x30] sm:$0xff] %v17443_v50 }
 0xb26   :  { %17484 = vst [vmem:[#allocation28 + $0x38] sm:$0xff] %v17444_v35 }
 0xb27   :  { %23064 = shalt.err (!%p23061_p10)
}
 0xb28   :  { %s23065_s5 = scalar_lea.hbm %s25306_s17, 128 }
 0xb29   :  { %p23066_p11 = scmp.ne.s32.totalorder %s25306_s17, %s23065_s5  ;;  %p23069_p12 = scmp.lt.u32.totalorder %s23065_s5, %s25306_s17 }
 0xb2b   :  { %p23071_p13 = pnand %p23069_p12, %p23066_p11 }
 0xb2d   :  { %23074 = shalt.err (!%p23071_p13)
}
 0xb2e   :  { %17547 = dma.vmem_to_hbm [thread:$0]  %s17545_s21, 128, %s25306_s17, [#allocation27]   ;;  %v25570_v12 = vld [vmem:[#allocation59_spill] sm:$0xff]  ;;  %v25571_v49 = vld [vmem:[#allocation58_spill] sm:$0xff]  ;;  %v25573_v54 = vld [vmem:[#allocation60_spill] sm:$0xff]  ;;  %17485 = vst [vmem:[#allocation28 + $0x40] sm:$0xff] %v17445_v0 }
 0xb2f   :  { %v17453_v61 = vmul.f32 %v25127_v9, %v25570_v12  ;;  %v17454_v18 = vmul.f32 %v25127_v9, %v25571_v49  ;;  %v25572_v33 = vld [vmem:[#allocation62_spill] sm:$0xff]  ;;  %v17456_v29 = vmul.f32 %v25127_v9, %v25573_v54  ;;  %17486 = vst [vmem:[#allocation28 + $0x48] sm:$0xff] %v17446_v8  ;;  %17487 = vst [vmem:[#allocation28 + $0x50] sm:$0xff] %v17447_v4  ;;  %s23075_s0 = scalar_lea.vmem %s25177_s14, 5120  ;;  %p23080_p1 = scmp.lt.s32.totalorder %s25177_s14, %s25177_s14 }
 0xb30   :  { %v17455_v5 = vmul.f32 %v25127_v9, %v25572_v33  ;;  %17488 = vst [vmem:[#allocation28 + $0x58] sm:$0xff] %v17448_v45  ;;  %p23076_p0 = scmp.ne.s32.totalorder %s25177_s14, %s23075_s0  ;;  %p23081_p2 = scmp.lt.s32.totalorder %s23075_s0, %s23075_s0 }
 0xb32   :  { %p23082_p3 = por %p23081_p2, %p23080_p1 }
 0xb34   :  { %p23083_p4 = pnand %p23082_p3, %p23076_p0 }
 0xb36   :  { %23086 = shalt.err (!%p23083_p4)
}
 0xb37   :  { %s23087_s13 = scalar_lea.hbm %s25305_s16, 5120 }
 0xb38   :  { %p23088_p5 = scmp.ne.s32.totalorder %s25305_s16, %s23087_s13  ;;  %p23091_p6 = scmp.lt.u32.totalorder %s23087_s13, %s25305_s16 }
 0xb3a   :  { %p23093_p7 = pnand %p23091_p6, %p23088_p5 }
 0xb3c   :  { %23096 = shalt.err (!%p23093_p7)
}
 0xb3d   :  { %17537 = dma.vmem_to_hbm [thread:$0]  %s25177_s14, 5120, %s25305_s16, [#allocation6]   ;;  %v25574_v25 = vld [vmem:[#allocation63_spill] sm:$0xff]  ;;  %v25575_v37 = vld [vmem:[#allocation61_spill] sm:$0xff]  ;;  %v25576_v36 = vld [vmem:[#allocation50_spill] sm:$0xff]  ;;  %17489 = vst [vmem:[#allocation28 + $0x60] sm:$0xff] %v17449_v1  ;;  %v17463_v63 = vmul.f32 %v25127_v9, %v24945_v42  ;;  %v17464_v41 = vmul.f32 %v25127_v9, %v24955_v24  ;;  %v17465_v47 = vmul.f32 %v25127_v9, %v24968_v39  ;;  %v17466_v10 = vmul.f32 %v25127_v9, %v24978_v58 }
 0xb3e   :  { %v17457_v60 = vmul.f32 %v25127_v9, %v25574_v25  ;;  %v17458_v23 = vmul.f32 %v25127_v9, %v25575_v37  ;;  %v17459_v38 = vmul.f32 %v25127_v9, %v25576_v36  ;;  %v25577_v3 = vld [vmem:[#allocation64_spill] sm:$0xff]  ;;  %17490 = vst [vmem:[#allocation28 + $0x68] sm:$0xff] %v17450_v56  ;;  %17491 = vst [vmem:[#allocation28 + $0x70] sm:$0xff] %v17451_v2  ;;  %v25578_v26 = vld [vmem:[#allocation66_spill] sm:$0xff]  ;;  %s23183_s16 = smov [#allocation28]  }
 0xb3f   :  { %v17460_v20 = vmul.f32 %v25127_v9, %v25577_v3  ;;  %17492 = vst [vmem:[#allocation28 + $0x78] sm:$0xff] %v17452_v6  ;;  %v17461_v30 = vmul.f32 %v25127_v9, %v25578_v26  ;;  %v25579_v22 = vld [vmem:[#allocation65_spill] sm:$0xff]  ;;  %17493 = vst [vmem:[#allocation28 + $0x80] sm:$0xff] %v17453_v61  ;;  %s17554_s9 = sshll.u32 %s23183_s16, 4  ;;  %v17467_v62 = vmul.f32 %v25127_v9, %v24988_v19  ;;  %v25580_v34 = vld [vmem:[#allocation67_spill] sm:$0xff]  ;;  %s17555_s9 = int_to_ptr.vmem [resolvable:$true] %s17554_s9 }
 0xb40   :  { %v17462_v57 = vmul.f32 %v25127_v9, %v25579_v22  ;;  %17494 = vst [vmem:[#allocation28 + $0x88] sm:$0xff] %v17454_v18  ;;  %17495 = vst [vmem:[#allocation28 + $0x90] sm:$0xff] %v17455_v5  ;;  %v17468_v42 = vmul.f32 %v25127_v9, %v25580_v34  ;;  %v25581_v24 = vld [vmem:[#allocation68_spill] sm:$0xff]  ;;  %v25582_v14 = vld [vmem:[#allocation69_spill] sm:$0xff]  ;;  %v17471_v39 = vmul.f32 %v25127_v9, %v25029_v17  ;;  %s23097_s2 = scalar_lea.vmem %s17555_s9, 5120  ;;  %p23102_p9 = scmp.lt.s32.totalorder %s17555_s9, %s17555_s9 }
 0xb41   :  { %17496 = vst [vmem:[#allocation28 + $0x98] sm:$0xff] %v17456_v29  ;;  %17497 = vst [vmem:[#allocation28 + $0xa0] sm:$0xff] %v17457_v60  ;;  %v17469_v48 = vmul.f32 %v25127_v9, %v25581_v24  ;;  %v17470_v11 = vmul.f32 %v25127_v9, %v25582_v14  ;;  %v17472_v58 = vmul.f32 %v25127_v9, %v25037_v59  ;;  %p23098_p8 = scmp.ne.s32.totalorder %s17555_s9, %s23097_s2  ;;  %p23103_p10 = scmp.lt.s32.totalorder %s23097_s2, %s23097_s2 }
 0xb42   :  { %17498 = vst [vmem:[#allocation28 + $0xa8] sm:$0xff] %v17458_v23  ;;  %17499 = vst [vmem:[#allocation28 + $0xb0] sm:$0xff] %v17459_v38  ;;  %v17473_v19 = vmul.f32 %v25127_v9, %v25045_v52  ;;  %v17474_v43 = vmul.f32 %v25127_v9, %v25053_v7  ;;  %v17475_v46 = vmul.f32 %v25127_v9, %v25059_v21 }
 0xb43   :  { %17500 = vst [vmem:[#allocation28 + $0xb8] sm:$0xff] %v17460_v20  ;;  %17501 = vst [vmem:[#allocation28 + $0xc0] sm:$0xff] %v17461_v30  ;;  %v17476_v13 = vmul.f32 %v25127_v9, %v25063_v51  ;;  %p23104_p11 = por %p23103_p10, %p23102_p9 }
 0xb44   :  { %17502 = vst [vmem:[#allocation28 + $0xc8] sm:$0xff] %v17462_v57  ;;  %17503 = vst [vmem:[#allocation28 + $0xd0] sm:$0xff] %v17463_v63 }
 0xb45   :  { %17504 = vst [vmem:[#allocation28 + $0xd8] sm:$0xff] %v17464_v41  ;;  %17505 = vst [vmem:[#allocation28 + $0xe0] sm:$0xff] %v17465_v47  ;;  %p23105_p12 = pnand %p23104_p11, %p23098_p8 }
 0xb46   :  { %17506 = vst [vmem:[#allocation28 + $0xe8] sm:$0xff] %v17466_v10  ;;  %17507 = vst [vmem:[#allocation28 + $0xf0] sm:$0xff] %v17467_v62 }
 0xb47   :  { %17508 = vst [vmem:[#allocation28 + $0xf8] sm:$0xff] %v17468_v42  ;;  %17509 = vst [vmem:[#allocation28 + $0x100] sm:$0xff] %v17469_v48 }
 0xb48   :  { %17510 = vst [vmem:[#allocation28 + $0x108] sm:$0xff] %v17470_v11  ;;  %17511 = vst [vmem:[#allocation28 + $0x110] sm:$0xff] %v17471_v39 }
 0xb49   :  { %17512 = vst [vmem:[#allocation28 + $0x118] sm:$0xff] %v17472_v58  ;;  %17513 = vst [vmem:[#allocation28 + $0x120] sm:$0xff] %v17473_v19 }
 0xb4a   :  { %17514 = vst [vmem:[#allocation28 + $0x128] sm:$0xff] %v17474_v43  ;;  %17515 = vst [vmem:[#allocation28 + $0x130] sm:$0xff] %v17475_v46 }
 0xb4b   :  { %17516 = vst [vmem:[#allocation28 + $0x138] sm:$0xff] %v17476_v13 }
 0xb4c   :  { %23108 = shalt.err (!%p23105_p12)
}
 0xb4d   :  { %s23109_s11 = scalar_lea.hbm %s25307_s18, 5120 }
 0xb4e   :  { %p23110_p13 = scmp.ne.s32.totalorder %s25307_s18, %s23109_s11  ;;  %p23113_p0 = scmp.lt.u32.totalorder %s23109_s11, %s25307_s18 }
 0xb50   :  { %p23115_p1 = pnand %p23113_p0, %p23110_p13 }
 0xb52   :  { %23118 = shalt.err (!%p23115_p1)
}
 0xb53   :  { %17557 = dma.vmem_to_hbm [thread:$0]  %s17555_s9, 5120, %s25307_s18, [#allocation27]  }
 0xb54   :  { %s23184_s5 = smov [#allocation29]  }
 0xb55   :  { %s17564_s27 = sshll.u32 %s23184_s5, 4  ;;  %s17565_s27 = int_to_ptr.vmem [resolvable:$true] %s17564_s27 }
 0xb56   :  { %s23119_s29 = scalar_lea.vmem %s17565_s27, 128  ;;  %p23124_p3 = scmp.lt.s32.totalorder %s17565_s27, %s17565_s27 }
 0xb57   :  { %p23120_p2 = scmp.ne.s32.totalorder %s17565_s27, %s23119_s29  ;;  %p23125_p4 = scmp.lt.s32.totalorder %s23119_s29, %s23119_s29 }
 0xb59   :  { %p23126_p5 = por %p23125_p4, %p23124_p3 }
 0xb5b   :  { %p23127_p6 = pnand %p23126_p5, %p23120_p2 }
 0xb95   :  { %v17524_v59 = vpop.xlane.xlu1 %17523 }
 0xb96   :  { %22765 = vrcp.f32 %v17524_v59 }
 0xba0   :  { %v22766_v17 = vpop.eup %22765 }
 0xba1   :  { %v17526_v52 = vmul.f32 %v22766_v17, %v25066_v53 }
 0xba3   :  { %17527 = vst [vmem:[#allocation29] sm:$0xff] %v17526_v52 }
 0xba4   :  { %23130 = shalt.err (!%p23127_p6)
}
 0xba5   :  { %s23131_s18 = scalar_lea.hbm %s25308_s19, 128 }
 0xba6   :  { %p23132_p7 = scmp.ne.s32.totalorder %s25308_s19, %s23131_s18  ;;  %p23135_p8 = scmp.lt.u32.totalorder %s23131_s18, %s25308_s19 }
 0xba8   :  { %p23137_p9 = pnand %p23135_p8, %p23132_p7 }
 0xbaa   :  { %23140 = shalt.err (!%p23137_p9)
}
 0xbab   :  { %17567 = dma.vmem_to_hbm [thread:$0]  %s17565_s27, 128, %s25308_s19, [#allocation30]  }
 0xbac   :  { %23155 = dma.done.wait [#allocation6], 5120  }
 0xbad   :  { %23156 = vsyncadd [#allocation6], 4294962176 }
 0xbae   :  { %23157 = dma.done.wait [#allocation27], 5248  }
 0xbaf   :  { %23158 = vsyncadd [#allocation27], 4294962048 }
 0xbb0   :  { %23159 = dma.done.wait [#allocation30], 128  }
 0xbb1   :  { %23160 = vsyncadd [#allocation30], 4294967168 }
 0xbb2   :  { %17580 = vsyncpa [#allocation5], 1 }
 0xbb3   :  { %17581 = vsyncpa [#allocation8], 1 }
 0xbb4   :  { %17582 = vsyncpa [#allocation11], 1 }
 0xbb5   :  { %17583 = vsyncpa [#allocation14], 1 }
 0xbb6   :  { %17584 = vsyncpa [#allocation17], 1 }
 0xbb7   :  { %17585 = vsyncpa [#allocation20], 1 }
 0xbb8   :  { %17586 = vsyncpa [#allocation23], 1 }
 0xbb9   :  { %17587 = vsyncpa [#allocation6], 1 }
 0xbba   :  { %17588 = vsyncpa [#allocation27], 1 }
 0xbbb   :  { %17589 = vsyncpa [#allocation30], 1 }

</bundles_post_ra>
